<compile_context>
chip_gen: v7x
topology: tpu7x:2x2x1
jax: 0.10.0
libtpu: 0.0.40
codegen_flags: <defaults>
</compile_context>

<pallas_src>
import functools

import jax
import jax.numpy as jnp
import numpy as np
from jax.experimental import pallas as pl
from jax.experimental.pallas import tpu as pltpu

LANE = 128

# Flip to True on v6e/v7x for ~2-4x MXU throughput (expect ~1e-2 rel. error,
# which exceeds the 1e-4 check below).  Default False keeps full f32.
USE_BF16_MATMUL = False


def _round_up(x, m):
    return (x + m - 1) // m * m


def _mm(a, b):
    """MXU matmul; optionally bf16 inputs with f32 accumulation."""
    if USE_BF16_MATMUL:
        a = a.astype(jnp.bfloat16)
        b = b.astype(jnp.bfloat16)
    return jnp.dot(a, b, preferred_element_type=jnp.float32)


def _cparams():
    return pltpu.CompilerParams(
        dimension_semantics=("parallel",),
        vmem_limit_bytes=64 * 1024 * 1024,
    )


def _pick_batch_tile(n, hw):
    """Largest divisor of n such that bt*hw targets >= 256 matmul rows."""
    target = max(1, -(-256 // hw))
    bt = 1
    for d in range(1, n + 1):
        if n % d == 0 and d <= target:
            bt = d
    return bt


# ----------------------------------------------------------------------------
# Pallas kernels
# ----------------------------------------------------------------------------
def _down_first_kernel(p_ref, w_ref, b_ref, o_ref):
    """First down-conv as one lane-dense matmul over pre-packed patches.

    p_ref: (1, M, Kp) im2col patches (K = 16*Cin zero-padded to Kp=128)
    w_ref: (Kp, Coutp), b_ref: (1, Coutp), o_ref: (1, M, Coutp)
    """
    o_ref[0] = jnp.maximum(
        _mm(p_ref[0], w_ref[...]) + b_ref[...], 0.0).astype(o_ref.dtype)


def _down_parity_kernel(xp_ref, w_ref, b_ref, o_ref, *, hout, wout):
    """Conv(k=4, s=2, p=1) + ReLU on one parity-packed image (middle layers).

    xp_ref: (1, 4, Hh, Wh, Cinp) with xp[0, 2p+q, i, j] = x_pad[2i+p, 2j+q]
    w_ref : (16, Cinp, Coutp)    tap-major (di*4+dj), zero-padded channels
    """
    coutp = o_ref.shape[-1]
    cinp = xp_ref.shape[-1]
    acc = jnp.zeros((hout * wout, coutp), jnp.float32)
    for di in range(4):
        for dj in range(4):
            p, u = di % 2, di // 2
            q, v = dj % 2, dj // 2
            xt = xp_ref[0, 2 * p + q, u:u + hout, v:v + wout, :]
            acc += _mm(xt.reshape(hout * wout, cinp), w_ref[di * 4 + dj])
    o_ref[0] = jnp.maximum(acc + b_ref[...], 0.0).astype(o_ref.dtype)


def _tail_kernel(*refs, bt, h, w, n_res, has_down):
    """Fused tail: [stride-2 down-conv] -> 3x3 conv+ReLU -> n_res ResBlocks.

    All intermediates stay in VMEM/vregs; pad_ref is a (bt, h+2, w+2, Cp)
    zero-bordered scratch reused as the spatially padded input of every 3x3
    conv in the chain.
    """
    if has_down:
        x_ref, wd_ref, bd_ref, wb_ref, bb_ref = refs[:5]
        rest = refs[5:]
    else:
        x_ref, wb_ref, bb_ref = refs[:3]
        rest = refs[3:]
    if n_res:
        w1_ref, b1_ref, w2_ref, b2_ref = rest[:4]
        rest = rest[4:]
    o_ref, pad_ref = rest

    cp = o_ref.shape[-1]
    m = bt * h * w

    if has_down:
        # in-tail stride-2 conv (k=4, p=1) from the parity-packed input
        cinp = x_ref.shape[-1]
        acc = jnp.zeros((m, cp), jnp.float32)
        for di in range(4):
            for dj in range(4):
                p, u = di % 2, di // 2
                q, v = dj % 2, dj // 2
                xt = x_ref[:, 2 * p + q, u:u + h, v:v + w, :]
                acc += _mm(xt.reshape(m, cinp), wd_ref[di * 4 + dj])
        y = jnp.maximum(acc + bd_ref[...], 0.0)
    else:
        y = x_ref[...].reshape(m, cp)

    # zero-bordered spatial pad scratch; only the interior is written below
    pad_ref[...] = jnp.zeros_like(pad_ref)

    def conv3x3(get_tap_w, n_out):
        # TODO(synk): the strided window + reshape per tap materializes an
        # (m, Cp) VMEM copy; feed 3-D slices to dot_general (or K-stack the
        # 9 taps in a VMEM staging buffer) to cut redundant ld/st traffic.
        acc = jnp.zeros((m, n_out), jnp.float32)
        for di in range(3):
            for dj in range(3):
                xt = pad_ref[:, di:di + h, dj:dj + w, :]
                acc += _mm(xt.reshape(m, cp), get_tap_w(di * 3 + dj))
        return acc

    # 'before bottleneck' 3x3 conv + ReLU
    pad_ref[:, 1:1 + h, 1:1 + w, :] = y.reshape(bt, h, w, cp)
    y = jnp.maximum(conv3x3(lambda t: wb_ref[t], cp) + bb_ref[...], 0.0)

    # ResBlocks: relu(conv1x1(relu(conv3x3(y))) + y); narrow mid never hits HBM
    for r in range(n_res):
        cmidp = w1_ref.shape[-1]
        pad_ref[:, 1:1 + h, 1:1 + w, :] = y.reshape(bt, h, w, cp)
        # TODO(synk): cmid (= in_c // 4) is lane-padded to 128 here (FLOP
        # waste on conv1); pack the 9 taps * cmid into the lane dim instead.
        h1 = jnp.maximum(
            conv3x3(lambda t, r=r: w1_ref[r, t], cmidp) + b1_ref[r], 0.0)
        y = jnp.maximum(_mm(h1, w2_ref[r]) + b2_ref[r] + y, 0.0)

    o_ref[...] = y.reshape(bt, h, w, cp).astype(o_ref.dtype)


# ----------------------------------------------------------------------------
# Layer wrappers (NHWC, channel dim kept 128-padded between layers)
# ----------------------------------------------------------------------------
def down_conv_first(x, w_k, b):
    """First Conv2d(k=4, s=2, p=1) + ReLU via host-side im2col of the tiny Cin."""
    n, hgt, wid, cin = x.shape
    assert hgt % 2 == 0 and wid % 2 == 0, "stride-2 conv needs even H, W"
    kp, coutp = w_k.shape
    hout, wout = hgt // 2, wid // 2
    xpad = jnp.pad(x, ((0, 0), (1, 1), (1, 1), (0, 0)))
    taps = []
    for di in range(4):
        for dj in range(4):
            taps.append(xpad[:, di:di + 2 * hout:2, dj:dj + 2 * wout:2, :])
    patches = jnp.concatenate(taps, axis=-1)            # (n, hout, wout, 16*cin)
    k = 16 * cin
    if kp > k:
        patches = jnp.pad(patches, ((0, 0), (0, 0), (0, 0), (0, kp - k)))
    patches = patches.reshape(n, hout * wout, kp)
    out = pl.pallas_call(
        _down_first_kernel,
        grid=(n,),
        in_specs=[
            pl.BlockSpec((1, hout * wout, kp), lambda i: (i, 0, 0)),
            pl.BlockSpec(w_k.shape, lambda i: (0, 0)),
            pl.BlockSpec(b.shape, lambda i: (0, 0)),
        ],
        out_specs=pl.BlockSpec((1, hout * wout, coutp), lambda i: (i, 0, 0)),
        out_shape=jax.ShapeDtypeStruct((n, hout * wout, coutp), jnp.float32),
        compiler_params=_cparams(),
    )(patches, w_k, b)
    return out.reshape(n, hout, wout, coutp)


def down_conv_parity(x, w_prep, b_prep):
    """Middle Conv2d(k=4, s=2, p=1) + ReLU, parity-packed input, 16 in-kernel taps."""
    n, hgt, wid, c_in = x.shape
    assert hgt % 2 == 0 and wid % 2 == 0, "stride-2 conv needs even H, W"
    cinp = w_prep.shape[1]
    coutp = w_prep.shape[-1]
    hout, wout = hgt // 2, wid // 2
    hh, wh = hout + 1, wout + 1
    if c_in < cinp:
        x = jnp.pad(x, ((0, 0), (0, 0), (0, 0), (0, cinp - c_in)))
    # TODO(synk): do the parity repack in-kernel (strided pl.ds loads) to avoid
    # an extra HBM pass over the activation.
    xpad = jnp.pad(x, ((0, 0), (1, 1), (1, 1), (0, 0)))
    xpar = xpad.reshape(n, hh, 2, wh, 2, cinp).transpose(0, 2, 4, 1, 3, 5)
    xpar = xpar.reshape(n, 4, hh, wh, cinp)
    out = pl.pallas_call(
        functools.partial(_down_parity_kernel, hout=hout, wout=wout),
        grid=(n,),
        in_specs=[
            pl.BlockSpec((1, 4, hh, wh, cinp), lambda i: (i, 0, 0, 0, 0)),
            pl.BlockSpec(w_prep.shape, lambda i: (0, 0, 0)),
            pl.BlockSpec(b_prep.shape, lambda i: (0, 0)),
        ],
        out_specs=pl.BlockSpec((1, hout * wout, coutp), lambda i: (i, 0, 0)),
        out_shape=jax.ShapeDtypeStruct((n, hout * wout, coutp), jnp.float32),
        compiler_params=_cparams(),
    )(xpar, w_prep, b_prep)
    return out.reshape(n, hout, wout, coutp)


def fused_tail(x, prep):
    """Last stride-2 conv (optional) + 'before' 3x3 conv + all ResBlocks, fused."""
    wb, bb = prep["before"]
    cp = wb.shape[-1]
    res = prep["res"]
    n_res = 0 if res is None else int(res[0].shape[0])
    has_down = prep["last_down"] is not None

    n, h_in, w_in, c_in = x.shape
    if has_down:
        assert h_in % 2 == 0 and w_in % 2 == 0, "stride-2 conv needs even H, W"
        wd, bd = prep["last_down"]
        cinp = wd.shape[1]
        h, w = h_in // 2, w_in // 2
        hh, wh = h + 1, w + 1
        if c_in < cinp:
            x = jnp.pad(x, ((0, 0), (0, 0), (0, 0), (0, cinp - c_in)))
        # parity (space-to-depth) repack: every in-kernel tap slice is contiguous
        xpad = jnp.pad(x, ((0, 0), (1, 1), (1, 1), (0, 0)))
        xk = xpad.reshape(n, hh, 2, wh, 2, cinp).transpose(0, 2, 4, 1, 3, 5)
        xk = xk.reshape(n, 4, hh, wh, cinp)
    else:
        h, w = h_in, w_in
        cin_b = wb.shape[1]
        xk = x if c_in >= cin_b else jnp.pad(
            x, ((0, 0), (0, 0), (0, 0), (0, cin_b - c_in)))

    bt = _pick_batch_tile(n, h * w)   # fold batch into M so matmuls are fed
    grid = (n // bt,)

    # TODO(synk): for large spatial extents add a second (parallel) grid axis
    # tiling output rows (+halo) so whole-image blocks fit v7x's 64 MiB VMEM.
    if has_down:
        arrays = [xk, wd, bd, wb, bb]
        in_specs = [
            pl.BlockSpec((bt, 4, hh, wh, cinp), lambda i: (i, 0, 0, 0, 0)),
            pl.BlockSpec(wd.shape, lambda i: (0, 0, 0)),
            pl.BlockSpec(bd.shape, lambda i: (0, 0)),
            pl.BlockSpec(wb.shape, lambda i: (0, 0, 0)),
            pl.BlockSpec(bb.shape, lambda i: (0, 0)),
        ]
    else:
        arrays = [xk, wb, bb]
        in_specs = [
            pl.BlockSpec((bt, h, w, xk.shape[-1]), lambda i: (i, 0, 0, 0)),
            pl.BlockSpec(wb.shape, lambda i: (0, 0, 0)),
            pl.BlockSpec(bb.shape, lambda i: (0, 0)),
        ]
    if n_res:
        w1, b1, w2, b2 = res
        arrays += [w1, b1, w2, b2]
        # TODO(synk): constant-index weight blocks could use
        # pipeline_mode=pl.Buffered(1) to halve their VMEM footprint on v7x.
        in_specs += [
            pl.BlockSpec(w1.shape, lambda i: (0, 0, 0, 0)),
            pl.BlockSpec(b1.shape, lambda i: (0, 0, 0)),
            pl.BlockSpec(w2.shape, lambda i: (0, 0, 0)),
            pl.BlockSpec(b2.shape, lambda i: (0, 0, 0)),
        ]

    out = pl.pallas_call(
        functools.partial(_tail_kernel, bt=bt, h=h, w=w,
                          n_res=n_res, has_down=has_down),
        grid=grid,
        in_specs=in_specs,
        out_specs=pl.BlockSpec((bt, h, w, cp), lambda i: (i, 0, 0, 0)),
        out_shape=jax.ShapeDtypeStruct((n, h, w, cp), jnp.float32),
        scratch_shapes=[pltpu.VMEM((bt, h + 2, w + 2, cp), jnp.float32)],
        compiler_params=_cparams(),
    )(*arrays)
    return out


# ----------------------------------------------------------------------------
# Parameters: init (PyTorch-like), one-time repack, forward
# ----------------------------------------------------------------------------
def init_encoder_params(key, input_channels=4, n_hid=16,
                        n_downsamples=2, n_bottlenecks=2):
    def conv_param(key, cout, cin, kh, kw):
        k1, k2 = jax.random.split(key)
        fan_in = cin * kh * kw
        scale = 1.0 / np.sqrt(fan_in)
        w = jax.random.uniform(k1, (cout, cin, kh, kw), jnp.float32, -scale, scale)
        b = jax.random.uniform(k2, (cout,), jnp.float32, -scale, scale)
        return w, b

    params = {"down": [], "res": []}
    in_c, out_c = input_channels, n_hid
    for _ in range(n_downsamples):
        key, sub = jax.random.split(key)
        params["down"].append(conv_param(sub, out_c, in_c, 4, 4))
        in_c, out_c = out_c, 2 * out_c
    key, sub = jax.random.split(key)
    params["before"] = conv_param(sub, in_c, in_c, 3, 3)
    for _ in range(n_bottlenecks):
        key, s1 = jax.random.split(key)
        key, s2 = jax.random.split(key)
        params["res"].append(
            (conv_param(s1, in_c // 4, in_c, 3, 3),
             conv_param(s2, in_c, in_c // 4, 1, 1))
        )
    params["output_channels"] = in_c
    return params


def _prep_conv(w, b, cin_eff, coutp):
    """OIHW weight -> tap-major (kh*kw, cin_eff, coutp), zero-padded channels."""
    cout, cin, kh, kw = w.shape
    wt = jnp.transpose(w, (2, 3, 1, 0)).reshape(kh * kw, cin, cout)
    wt = jnp.pad(wt, ((0, 0), (0, cin_eff - cin), (0, coutp - cout)))
    bp = jnp.pad(b, (0, coutp - cout)).reshape(1, coutp)
    return wt, bp


def _prep_first_down(w, b):
    """OIHW 4x4 weight -> K-packed (Kp, Coutp) for the single-matmul first layer."""
    cout, cin, kh, kw = w.shape
    k = kh * kw * cin
    kp = _round_up(k, LANE)
    coutp = _round_up(cout, LANE)
    wk = jnp.transpose(w, (2, 3, 1, 0)).reshape(k, cout)  # (di,dj,cin)-major rows
    wk = jnp.pad(wk, ((0, kp - k), (0, coutp - cout)))
    bp = jnp.pad(b, (0, coutp - cout)).reshape(1, coutp)
    return wk, bp


def prepare_params(params):
    """One-time repack: tap/K-major weights, channels padded to lane width."""
    downs = params["down"]
    prep = {"first_patches": None, "mid": [], "last_down": None}
    rest = downs
    if downs:
        w0, b0 = downs[0]
        if w0.shape[1] * 16 <= 2 * LANE:   # tiny Cin: K-pack the whole window
            prep["first_patches"] = _prep_first_down(w0, b0)
            rest = downs[1:]
    if rest:
        for (w, b) in rest[:-1]:
            prep["mid"].append(_prep_conv(w, b, _round_up(w.shape[1], LANE),
                                          _round_up(w.shape[0], LANE)))
        w, b = rest[-1]
        prep["last_down"] = _prep_conv(w, b, _round_up(w.shape[1], LANE),
                                       _round_up(w.shape[0], LANE))
    w, b = params["before"]
    prep["before"] = _prep_conv(w, b, _round_up(w.shape[1], LANE),
                                _round_up(w.shape[0], LANE))
    if params["res"]:
        w1s, b1s, w2s, b2s = [], [], [], []
        for (w1, b1), (w2, b2) in params["res"]:
            w1p, b1p = _prep_conv(w1, b1, _round_up(w1.shape[1], LANE),
                                  _round_up(w1.shape[0], LANE))
            w2p, b2p = _prep_conv(w2, b2, _round_up(w2.shape[1], LANE),
                                  _round_up(w2.shape[0], LANE))
            w1s.append(w1p); b1s.append(b1p)
            w2s.append(w2p[0]); b2s.append(b2p)          # 1x1 weight -> 2D
        prep["res"] = (jnp.stack(w1s), jnp.stack(b1s),
                       jnp.stack(w2s), jnp.stack(b2s))
    else:
        prep["res"] = None
    prep["output_channels"] = params["output_channels"]
    return prep


def deepmind_encoder_forward(x_nchw, prep):
    # NCHW -> NHWC once at the boundary; stay channels-last (128-padded) inside.
    x = jnp.transpose(x_nchw, (0, 2, 3, 1))
    if prep["first_patches"] is not None:
        x = down_conv_first(x, *prep["first_patches"])
    for (w, b) in prep["mid"]:
        x = down_conv_parity(x, w, b)
    x = fused_tail(x, prep)
    out_c = prep["output_channels"]
    return jnp.transpose(x[..., :out_c], (0, 3, 1, 2))


# ----------------------------------------------------------------------------
# Pure-JAX reference (correctness checking only)
# ----------------------------------------------------------------------------
def _conv_ref(x, w, b, stride, pad):
    y = jax.lax.conv_general_dilated(
        x, w, (stride, stride), ((pad, pad), (pad, pad)),
        dimension_numbers=("NCHW", "OIHW", "NCHW"))
    return y + b.reshape(1, -1, 1, 1)


def _encoder_ref(x, params):
    for (w, b) in params["down"]:
        x = jnp.maximum(_conv_ref(x, w, b, 2, 1), 0.0)
    w, b = params["before"]
    x = jnp.maximum(_conv_ref(x, w, b, 1, 1), 0.0)
    for (w1, b1), (w2, b2) in params["res"]:
        h = jnp.maximum(_conv_ref(x, w1, b1, 1, 1), 0.0)
        x = jnp.maximum(_conv_ref(h, w2, b2, 1, 0) + x, 0.0)
    return x


# ----------------------------------------------------------------------------
if __name__ == "__main__":
    key = jax.random.PRNGKey(0)
    k_x, k_p = jax.random.split(key)

    # Small but structure-preserving config: 4->16->32 channels, 32x32 -> 8x8.
    N, C, H, W = 2, 4, 32, 32
    x = jax.random.normal(k_x, (N, C, H, W), jnp.float32)
    params = init_encoder_params(k_p, input_channels=C, n_hid=16,
                                 n_downsamples=2, n_bottlenecks=2)
    prep = prepare_params(params)

    fwd = jax.jit(lambda inp: deepmind_encoder_forward(inp, prep))
    out = jax.block_until_ready(fwd(x))

    ref = jax.block_until_ready(_encoder_ref(x, params))
    assert out.shape == (N, params["output_channels"], H // 4, W // 4), out.shape
    np.testing.assert_allclose(np.asarray(out), np.asarray(ref),
                               rtol=1e-4, atol=1e-4)
    print("KERNEL_OK")
</pallas_src>

<mosaic_0001>
module attributes {stable_mosaic.version = 11 : i64} {
  func.func @_down_first_kernel(%arg0: i32, %arg1: memref<1x256x128xf32, #tpu.memory_space<vmem>>, %arg2: memref<128x128xf32, #tpu.memory_space<vmem>>, %arg3: memref<1x128xf32, #tpu.memory_space<vmem>>, %arg4: memref<1x256x128xf32, #tpu.memory_space<vmem>>) attributes {dimension_semantics = [#tpu.dimension_semantics<parallel>], iteration_bounds = array<i64: 2>, scalar_prefetch = 0 : i64, scratch_operands = 0 : i64, tpu.core_type = #tpu.core_type<tc>, window_params = [{transform_indices = @transform_0, window_bounds = array<i64: 1, 256, 128>}, {pipeline_mode = #tpu.pipeline_mode<synchronous>, transform_indices = @transform_1, window_bounds = array<i64: 128, 128>}, {pipeline_mode = #tpu.pipeline_mode<synchronous>, transform_indices = @transform_2, window_bounds = array<i64: 1, 128>}, {transform_indices = @transform_3, window_bounds = array<i64: 1, 256, 128>}]} {
    %c0 = arith.constant 0 : index
    %c0_0 = arith.constant 0 : index
    %c0_1 = arith.constant 0 : index
    %0 = vector.load %arg1[%c0, %c0_0, %c0_1] : memref<1x256x128xf32, #tpu.memory_space<vmem>>, vector<1x256x128xf32>
    %1 = vector.shape_cast %0 : vector<1x256x128xf32> to vector<256x128xf32>
    %c0_2 = arith.constant 0 : index
    %c0_3 = arith.constant 0 : index
    %2 = vector.load %arg2[%c0_2, %c0_3] : memref<128x128xf32, #tpu.memory_space<vmem>>, vector<128x128xf32>
    %cst = arith.constant dense<0.000000e+00> : vector<256x128xf32>
    %3 = tpu.matmul %1, %2, %cst {dimension_numbers = #tpu.dot_dimension_numbers<[1], [0], [0], [1], [0, 0, 1, 1], [], []>} : vector<256x128xf32>, vector<128x128xf32>, vector<256x128xf32> -> vector<256x128xf32>
    %c0_4 = arith.constant 0 : index
    %c0_5 = arith.constant 0 : index
    %4 = vector.load %arg3[%c0_4, %c0_5] : memref<1x128xf32, #tpu.memory_space<vmem>>, vector<1x128xf32>
    %5 = vector.broadcast %4 : vector<1x128xf32> to vector<256x128xf32>
    %6 = arith.addf %3, %5 : vector<256x128xf32>
    %cst_6 = arith.constant 0.000000e+00 : f32
    %7 = vector.broadcast %cst_6 : f32 to vector<256x128xf32>
    %8 = arith.maximumf %6, %7 : vector<256x128xf32>
    %c0_7 = arith.constant 0 : index
    %c0_8 = arith.constant 0 : index
    %c0_9 = arith.constant 0 : index
    %9 = vector.load %arg4[%c0_7, %c0_8, %c0_9] : memref<1x256x128xf32, #tpu.memory_space<vmem>>, vector<1x256x128xf32>
    %10 = vector.shape_cast %9 : vector<1x256x128xf32> to vector<256x128xf32>
    %11 = vector.shape_cast %8 : vector<256x128xf32> to vector<1x256x128xf32>
    tpu.vector_store %arg4[%c0_7, %c0_8, %c0_9], %11 {strides = array<i32>} : memref<1x256x128xf32, #tpu.memory_space<vmem>>, vector<1x256x128xf32>,
    return
  }
  func.func @transform_0(%arg0: i32) -> (i32, i32, i32) {
    %c0_i32 = arith.constant 0 : i32
    %c0_i32_0 = arith.constant 0 : i32
    %c0_i32_1 = arith.constant 0 : i32
    return %arg0, %c0_i32, %c0_i32_0 : i32, i32, i32
  }
  func.func @transform_1(%arg0: i32) -> (i32, i32) {
    %c0_i32 = arith.constant 0 : i32
    %c0_i32_0 = arith.constant 0 : i32
    %c0_i32_1 = arith.constant 0 : i32
    return %c0_i32, %c0_i32_0 : i32, i32
  }
  func.func @transform_2(%arg0: i32) -> (i32, i32) {
    %c0_i32 = arith.constant 0 : i32
    %c0_i32_0 = arith.constant 0 : i32
    %c0_i32_1 = arith.constant 0 : i32
    return %c0_i32, %c0_i32_0 : i32, i32
  }
  func.func @transform_3(%arg0: i32) -> (i32, i32, i32) {
    %c0_i32 = arith.constant 0 : i32
    %c0_i32_0 = arith.constant 0 : i32
    %c0_i32_1 = arith.constant 0 : i32
    return %arg0, %c0_i32, %c0_i32_0 : i32, i32, i32
  }
}

module attributes {stable_mosaic.version = 11 : i64} {
  func.func @_tail_kernel(%arg0: i32, %arg1: memref<2x4x9x9x128xf32, #tpu.memory_space<vmem>>, %arg2: memref<16x128x128xf32, #tpu.memory_space<vmem>>, %arg3: memref<1x128xf32, #tpu.memory_space<vmem>>, %arg4: memref<9x128x128xf32, #tpu.memory_space<vmem>>, %arg5: memref<1x128xf32, #tpu.memory_space<vmem>>, %arg6: memref<2x9x128x128xf32, #tpu.memory_space<vmem>>, %arg7: memref<2x1x128xf32, #tpu.memory_space<vmem>>, %arg8: memref<2x128x128xf32, #tpu.memory_space<vmem>>, %arg9: memref<2x1x128xf32, #tpu.memory_space<vmem>>, %arg10: memref<2x8x8x128xf32, #tpu.memory_space<vmem>>, %arg11: memref<2x10x10x128xf32, #tpu.memory_space<vmem>>) attributes {dimension_semantics = [#tpu.dimension_semantics<parallel>], iteration_bounds = array<i64: 1>, scalar_prefetch = 0 : i64, scratch_operands = 1 : i64, tpu.core_type = #tpu.core_type<tc>, window_params = [{transform_indices = @transform_0, window_bounds = array<i64: 2, 4, 9, 9, 128>}, {pipeline_mode = #tpu.pipeline_mode<synchronous>, transform_indices = @transform_1, window_bounds = array<i64: 16, 128, 128>}, {pipeline_mode = #tpu.pipeline_mode<synchronous>, transform_indices = @transform_2, window_bounds = array<i64: 1, 128>}, {pipeline_mode = #tpu.pipeline_mode<synchronous>, transform_indices = @transform_3, window_bounds = array<i64: 9, 128, 128>}, {pipeline_mode = #tpu.pipeline_mode<synchronous>, transform_indices = @transform_4, window_bounds = array<i64: 1, 128>}, {pipeline_mode = #tpu.pipeline_mode<synchronous>, transform_indices = @transform_5, window_bounds = array<i64: 2, 9, 128, 128>}, {pipeline_mode = #tpu.pipeline_mode<synchronous>, transform_indices = @transform_6, window_bounds = array<i64: 2, 1, 128>}, {pipeline_mode = #tpu.pipeline_mode<synchronous>, transform_indices = @transform_7, window_bounds = array<i64: 2, 128, 128>}, {pipeline_mode = #tpu.pipeline_mode<synchronous>, transform_indices = @transform_8, window_bounds = array<i64: 2, 1, 128>}, {transform_indices = @transform_9, window_bounds = array<i64: 2, 8, 8, 128>}]} {
    %cst = arith.constant 0.000000e+00 : f32
    %0 = vector.broadcast %cst : f32 to vector<128x128xf32>
    %c0 = arith.constant 0 : index
    %c0_0 = arith.constant 0 : index
    %c0_1 = arith.constant 0 : index
    %c0_2 = arith.constant 0 : index
    %c0_3 = arith.constant 0 : index
    %1 = vector.load %arg1[%c0, %c0_0, %c0_1, %c0_2, %c0_3] : memref<2x4x9x9x128xf32, #tpu.memory_space<vmem>>, vector<2x1x8x8x128xf32>
    %2 = vector.shape_cast %1 : vector<2x1x8x8x128xf32> to vector<2x8x8x128xf32>
    %3 = vector.shape_cast %2 : vector<2x8x8x128xf32> to vector<128x128xf32>
    %c0_4 = arith.constant 0 : index
    %c0_5 = arith.constant 0 : index
    %c0_6 = arith.constant 0 : index
    %4 = vector.load %arg2[%c0_4, %c0_5, %c0_6] : memref<16x128x128xf32, #tpu.memory_space<vmem>>, vector<1x128x128xf32>
    %5 = vector.shape_cast %4 : vector<1x128x128xf32> to vector<128x128xf32>
    %cst_7 = arith.constant dense<0.000000e+00> : vector<128x128xf32>
    %6 = tpu.matmul %3, %5, %cst_7 {dimension_numbers = #tpu.dot_dimension_numbers<[1], [0], [0], [1], [0, 0, 1, 1], [], []>} : vector<128x128xf32>, vector<128x128xf32>, vector<128x128xf32> -> vector<128x128xf32>
    %7 = arith.addf %0, %6 : vector<128x128xf32>
    %c0_8 = arith.constant 0 : index
    %c1 = arith.constant 1 : index
    %c0_9 = arith.constant 0 : index
    %c0_10 = arith.constant 0 : index
    %c0_11 = arith.constant 0 : index
    %8 = vector.load %arg1[%c0_8, %c1, %c0_9, %c0_10, %c0_11] : memref<2x4x9x9x128xf32, #tpu.memory_space<vmem>>, vector<2x1x8x8x128xf32>
    %9 = vector.shape_cast %8 : vector<2x1x8x8x128xf32> to vector<2x8x8x128xf32>
    %10 = vector.shape_cast %9 : vector<2x8x8x128xf32> to vector<128x128xf32>
    %c1_12 = arith.constant 1 : index
    %c0_13 = arith.constant 0 : index
    %c0_14 = arith.constant 0 : index
    %11 = vector.load %arg2[%c1_12, %c0_13, %c0_14] : memref<16x128x128xf32, #tpu.memory_space<vmem>>, vector<1x128x128xf32>
    %12 = vector.shape_cast %11 : vector<1x128x128xf32> to vector<128x128xf32>
    %cst_15 = arith.constant dense<0.000000e+00> : vector<128x128xf32>
    %13 = tpu.matmul %10, %12, %cst_15 {dimension_numbers = #tpu.dot_dimension_numbers<[1], [0], [0], [1], [0, 0, 1, 1], [], []>} : vector<128x128xf32>, vector<128x128xf32>, vector<128x128xf32> -> vector<128x128xf32>
    %14 = arith.addf %7, %13 : vector<128x128xf32>
    %c0_16 = arith.constant 0 : index
    %c0_17 = arith.constant 0 : index
    %c0_18 = arith.constant 0 : index
    %c1_19 = arith.constant 1 : index
    %c0_20 = arith.constant 0 : index
    %15 = vector.load %arg1[%c0_16, %c0_17, %c0_18, %c1_19, %c0_20] : memref<2x4x9x9x128xf32, #tpu.memory_space<vmem>>, vector<2x1x8x8x128xf32>
    %16 = vector.shape_cast %15 : vector<2x1x8x8x128xf32> to vector<2x8x8x128xf32>
    %17 = vector.shape_cast %16 : vector<2x8x8x128xf32> to vector<128x128xf32>
    %c2 = arith.constant 2 : index
    %c0_21 = arith.constant 0 : index
    %c0_22 = arith.constant 0 : index
    %18 = vector.load %arg2[%c2, %c0_21, %c0_22] : memref<16x128x128xf32, #tpu.memory_space<vmem>>, vector<1x128x128xf32>
    %19 = vector.shape_cast %18 : vector<1x128x128xf32> to vector<128x128xf32>
    %cst_23 = arith.constant dense<0.000000e+00> : vector<128x128xf32>
    %20 = tpu.matmul %17, %19, %cst_23 {dimension_numbers = #tpu.dot_dimension_numbers<[1], [0], [0], [1], [0, 0, 1, 1], [], []>} : vector<128x128xf32>, vector<128x128xf32>, vector<128x128xf32> -> vector<128x128xf32>
    %21 = arith.addf %14, %20 : vector<128x128xf32>
    %c0_24 = arith.constant 0 : index
    %c1_25 = arith.constant 1 : index
    %c0_26 = arith.constant 0 : index
    %c1_27 = arith.constant 1 : index
    %c0_28 = arith.constant 0 : index
    %22 = vector.load %arg1[%c0_24, %c1_25, %c0_26, %c1_27, %c0_28] : memref<2x4x9x9x128xf32, #tpu.memory_space<vmem>>, vector<2x1x8x8x128xf32>
    %23 = vector.shape_cast %22 : vector<2x1x8x8x128xf32> to vector<2x8x8x128xf32>
    %24 = vector.shape_cast %23 : vector<2x8x8x128xf32> to vector<128x128xf32>
    %c3 = arith.constant 3 : index
    %c0_29 = arith.constant 0 : index
    %c0_30 = arith.constant 0 : index
    %25 = vector.load %arg2[%c3, %c0_29, %c0_30] : memref<16x128x128xf32, #tpu.memory_space<vmem>>, vector<1x128x128xf32>
    %26 = vector.shape_cast %25 : vector<1x128x128xf32> to vector<128x128xf32>
    %cst_31 = arith.constant dense<0.000000e+00> : vector<128x128xf32>
    %27 = tpu.matmul %24, %26, %cst_31 {dimension_numbers = #tpu.dot_dimension_numbers<[1], [0], [0], [1], [0, 0, 1, 1], [], []>} : vector<128x128xf32>, vector<128x128xf32>, vector<128x128xf32> -> vector<128x128xf32>
    %28 = arith.addf %21, %27 : vector<128x128xf32>
    %c0_32 = arith.constant 0 : index
    %c2_33 = arith.constant 2 : index
    %c0_34 = arith.constant 0 : index
    %c0_35 = arith.constant 0 : index
    %c0_36 = arith.constant 0 : index
    %29 = vector.load %arg1[%c0_32, %c2_33, %c0_34, %c0_35, %c0_36] : memref<2x4x9x9x128xf32, #tpu.memory_space<vmem>>, vector<2x1x8x8x128xf32>
    %30 = vector.shape_cast %29 : vector<2x1x8x8x128xf32> to vector<2x8x8x128xf32>
    %31 = vector.shape_cast %30 : vector<2x8x8x128xf32> to vector<128x128xf32>
    %c4 = arith.constant 4 : index
    %c0_37 = arith.constant 0 : index
    %c0_38 = arith.constant 0 : index
    %32 = vector.load %arg2[%c4, %c0_37, %c0_38] : memref<16x128x128xf32, #tpu.memory_space<vmem>>, vector<1x128x128xf32>
    %33 = vector.shape_cast %32 : vector<1x128x128xf32> to vector<128x128xf32>
    %cst_39 = arith.constant dense<0.000000e+00> : vector<128x128xf32>
    %34 = tpu.matmul %31, %33, %cst_39 {dimension_numbers = #tpu.dot_dimension_numbers<[1], [0], [0], [1], [0, 0, 1, 1], [], []>} : vector<128x128xf32>, vector<128x128xf32>, vector<128x128xf32> -> vector<128x128xf32>
    %35 = arith.addf %28, %34 : vector<128x128xf32>
    %c0_40 = arith.constant 0 : index
    %c3_41 = arith.constant 3 : index
    %c0_42 = arith.constant 0 : index
    %c0_43 = arith.constant 0 : index
    %c0_44 = arith.constant 0 : index
    %36 = vector.load %arg1[%c0_40, %c3_41, %c0_42, %c0_43, %c0_44] : memref<2x4x9x9x128xf32, #tpu.memory_space<vmem>>, vector<2x1x8x8x128xf32>
    %37 = vector.shape_cast %36 : vector<2x1x8x8x128xf32> to vector<2x8x8x128xf32>
    %38 = vector.shape_cast %37 : vector<2x8x8x128xf32> to vector<128x128xf32>
    %c5 = arith.constant 5 : index
    %c0_45 = arith.constant 0 : index
    %c0_46 = arith.constant 0 : index
    %39 = vector.load %arg2[%c5, %c0_45, %c0_46] : memref<16x128x128xf32, #tpu.memory_space<vmem>>, vector<1x128x128xf32>
    %40 = vector.shape_cast %39 : vector<1x128x128xf32> to vector<128x128xf32>
    %cst_47 = arith.constant dense<0.000000e+00> : vector<128x128xf32>
    %41 = tpu.matmul %38, %40, %cst_47 {dimension_numbers = #tpu.dot_dimension_numbers<[1], [0], [0], [1], [0, 0, 1, 1], [], []>} : vector<128x128xf32>, vector<128x128xf32>, vector<128x128xf32> -> vector<128x128xf32>
    %42 = arith.addf %35, %41 : vector<128x128xf32>
    %c0_48 = arith.constant 0 : index
    %c2_49 = arith.constant 2 : index
    %c0_50 = arith.constant 0 : index
    %c1_51 = arith.constant 1 : index
    %c0_52 = arith.constant 0 : index
    %43 = vector.load %arg1[%c0_48, %c2_49, %c0_50, %c1_51, %c0_52] : memref<2x4x9x9x128xf32, #tpu.memory_space<vmem>>, vector<2x1x8x8x128xf32>
    %44 = vector.shape_cast %43 : vector<2x1x8x8x128xf32> to vector<2x8x8x128xf32>
    %45 = vector.shape_cast %44 : vector<2x8x8x128xf32> to vector<128x128xf32>
    %c6 = arith.constant 6 : index
    %c0_53 = arith.constant 0 : index
    %c0_54 = arith.constant 0 : index
    %46 = vector.load %arg2[%c6, %c0_53, %c0_54] : memref<16x128x128xf32, #tpu.memory_space<vmem>>, vector<1x128x128xf32>
    %47 = vector.shape_cast %46 : vector<1x128x128xf32> to vector<128x128xf32>
    %cst_55 = arith.constant dense<0.000000e+00> : vector<128x128xf32>
    %48 = tpu.matmul %45, %47, %cst_55 {dimension_numbers = #tpu.dot_dimension_numbers<[1], [0], [0], [1], [0, 0, 1, 1], [], []>} : vector<128x128xf32>, vector<128x128xf32>, vector<128x128xf32> -> vector<128x128xf32>
    %49 = arith.addf %42, %48 : vector<128x128xf32>
    %c0_56 = arith.constant 0 : index
    %c3_57 = arith.constant 3 : index
    %c0_58 = arith.constant 0 : index
    %c1_59 = arith.constant 1 : index
    %c0_60 = arith.constant 0 : index
    %50 = vector.load %arg1[%c0_56, %c3_57, %c0_58, %c1_59, %c0_60] : memref<2x4x9x9x128xf32, #tpu.memory_space<vmem>>, vector<2x1x8x8x128xf32>
    %51 = vector.shape_cast %50 : vector<2x1x8x8x128xf32> to vector<2x8x8x128xf32>
    %52 = vector.shape_cast %51 : vector<2x8x8x128xf32> to vector<128x128xf32>
    %c7 = arith.constant 7 : index
    %c0_61 = arith.constant 0 : index
    %c0_62 = arith.constant 0 : index
    %53 = vector.load %arg2[%c7, %c0_61, %c0_62] : memref<16x128x128xf32, #tpu.memory_space<vmem>>, vector<1x128x128xf32>
    %54 = vector.shape_cast %53 : vector<1x128x128xf32> to vector<128x128xf32>
    %cst_63 = arith.constant dense<0.000000e+00> : vector<128x128xf32>
    %55 = tpu.matmul %52, %54, %cst_63 {dimension_numbers = #tpu.dot_dimension_numbers<[1], [0], [0], [1], [0, 0, 1, 1], [], []>} : vector<128x128xf32>, vector<128x128xf32>, vector<128x128xf32> -> vector<128x128xf32>
    %56 = arith.addf %49, %55 : vector<128x128xf32>
    %c0_64 = arith.constant 0 : index
    %c0_65 = arith.constant 0 : index
    %c1_66 = arith.constant 1 : index
    %c0_67 = arith.constant 0 : index
    %c0_68 = arith.constant 0 : index
    %57 = vector.load %arg1[%c0_64, %c0_65, %c1_66, %c0_67, %c0_68] : memref<2x4x9x9x128xf32, #tpu.memory_space<vmem>>, vector<2x1x8x8x128xf32>
    %58 = vector.shape_cast %57 : vector<2x1x8x8x128xf32> to vector<2x8x8x128xf32>
    %59 = vector.shape_cast %58 : vector<2x8x8x128xf32> to vector<128x128xf32>
    %c8 = arith.constant 8 : index
    %c0_69 = arith.constant 0 : index
    %c0_70 = arith.constant 0 : index
    %60 = vector.load %arg2[%c8, %c0_69, %c0_70] : memref<16x128x128xf32, #tpu.memory_space<vmem>>, vector<1x128x128xf32>
    %61 = vector.shape_cast %60 : vector<1x128x128xf32> to vector<128x128xf32>
    %cst_71 = arith.constant dense<0.000000e+00> : vector<128x128xf32>
    %62 = tpu.matmul %59, %61, %cst_71 {dimension_numbers = #tpu.dot_dimension_numbers<[1], [0], [0], [1], [0, 0, 1, 1], [], []>} : vector<128x128xf32>, vector<128x128xf32>, vector<128x128xf32> -> vector<128x128xf32>
    %63 = arith.addf %56, %62 : vector<128x128xf32>
    %c0_72 = arith.constant 0 : index
    %c1_73 = arith.constant 1 : index
    %c1_74 = arith.constant 1 : index
    %c0_75 = arith.constant 0 : index
    %c0_76 = arith.constant 0 : index
    %64 = vector.load %arg1[%c0_72, %c1_73, %c1_74, %c0_75, %c0_76] : memref<2x4x9x9x128xf32, #tpu.memory_space<vmem>>, vector<2x1x8x8x128xf32>
    %65 = vector.shape_cast %64 : vector<2x1x8x8x128xf32> to vector<2x8x8x128xf32>
    %66 = vector.shape_cast %65 : vector<2x8x8x128xf32> to vector<128x128xf32>
    %c9 = arith.constant 9 : index
    %c0_77 = arith.constant 0 : index
    %c0_78 = arith.constant 0 : index
    %67 = vector.load %arg2[%c9, %c0_77, %c0_78] : memref<16x128x128xf32, #tpu.memory_space<vmem>>, vector<1x128x128xf32>
    %68 = vector.shape_cast %67 : vector<1x128x128xf32> to vector<128x128xf32>
    %cst_79 = arith.constant dense<0.000000e+00> : vector<128x128xf32>
    %69 = tpu.matmul %66, %68, %cst_79 {dimension_numbers = #tpu.dot_dimension_numbers<[1], [0], [0], [1], [0, 0, 1, 1], [], []>} : vector<128x128xf32>, vector<128x128xf32>, vector<128x128xf32> -> vector<128x128xf32>
    %70 = arith.addf %63, %69 : vector<128x128xf32>
    %c0_80 = arith.constant 0 : index
    %c0_81 = arith.constant 0 : index
    %c1_82 = arith.constant 1 : index
    %c1_83 = arith.constant 1 : index
    %c0_84 = arith.constant 0 : index
    %71 = vector.load %arg1[%c0_80, %c0_81, %c1_82, %c1_83, %c0_84] : memref<2x4x9x9x128xf32, #tpu.memory_space<vmem>>, vector<2x1x8x8x128xf32>
    %72 = vector.shape_cast %71 : vector<2x1x8x8x128xf32> to vector<2x8x8x128xf32>
    %73 = vector.shape_cast %72 : vector<2x8x8x128xf32> to vector<128x128xf32>
    %c10 = arith.constant 10 : index
    %c0_85 = arith.constant 0 : index
    %c0_86 = arith.constant 0 : index
    %74 = vector.load %arg2[%c10, %c0_85, %c0_86] : memref<16x128x128xf32, #tpu.memory_space<vmem>>, vector<1x128x128xf32>
    %75 = vector.shape_cast %74 : vector<1x128x128xf32> to vector<128x128xf32>
    %cst_87 = arith.constant dense<0.000000e+00> : vector<128x128xf32>
    %76 = tpu.matmul %73, %75, %cst_87 {dimension_numbers = #tpu.dot_dimension_numbers<[1], [0], [0], [1], [0, 0, 1, 1], [], []>} : vector<128x128xf32>, vector<128x128xf32>, vector<128x128xf32> -> vector<128x128xf32>
    %77 = arith.addf %70, %76 : vector<128x128xf32>
    %c0_88 = arith.constant 0 : index
    %c1_89 = arith.constant 1 : index
    %c1_90 = arith.constant 1 : index
    %c1_91 = arith.constant 1 : index
    %c0_92 = arith.constant 0 : index
    %78 = vector.load %arg1[%c0_88, %c1_89, %c1_90, %c1_91, %c0_92] : memref<2x4x9x9x128xf32, #tpu.memory_space<vmem>>, vector<2x1x8x8x128xf32>
    %79 = vector.shape_cast %78 : vector<2x1x8x8x128xf32> to vector<2x8x8x128xf32>
    %80 = vector.shape_cast %79 : vector<2x8x8x128xf32> to vector<128x128xf32>
    %c11 = arith.constant 11 : index
    %c0_93 = arith.constant 0 : index
    %c0_94 = arith.constant 0 : index
    %81 = vector.load %arg2[%c11, %c0_93, %c0_94] : memref<16x128x128xf32, #tpu.memory_space<vmem>>, vector<1x128x128xf32>
    %82 = vector.shape_cast %81 : vector<1x128x128xf32> to vector<128x128xf32>
    %cst_95 = arith.constant dense<0.000000e+00> : vector<128x128xf32>
    %83 = tpu.matmul %80, %82, %cst_95 {dimension_numbers = #tpu.dot_dimension_numbers<[1], [0], [0], [1], [0, 0, 1, 1], [], []>} : vector<128x128xf32>, vector<128x128xf32>, vector<128x128xf32> -> vector<128x128xf32>
    %84 = arith.addf %77, %83 : vector<128x128xf32>
    %c0_96 = arith.constant 0 : index
    %c2_97 = arith.constant 2 : index
    %c1_98 = arith.constant 1 : index
    %c0_99 = arith.constant 0 : index
    %c0_100 = arith.constant 0 : index
    %85 = vector.load %arg1[%c0_96, %c2_97, %c1_98, %c0_99, %c0_100] : memref<2x4x9x9x128xf32, #tpu.memory_space<vmem>>, vector<2x1x8x8x128xf32>
    %86 = vector.shape_cast %85 : vector<2x1x8x8x128xf32> to vector<2x8x8x128xf32>
    %87 = vector.shape_cast %86 : vector<2x8x8x128xf32> to vector<128x128xf32>
    %c12 = arith.constant 12 : index
    %c0_101 = arith.constant 0 : index
    %c0_102 = arith.constant 0 : index
    %88 = vector.load %arg2[%c12, %c0_101, %c0_102] : memref<16x128x128xf32, #tpu.memory_space<vmem>>, vector<1x128x128xf32>
    %89 = vector.shape_cast %88 : vector<1x128x128xf32> to vector<128x128xf32>
    %cst_103 = arith.constant dense<0.000000e+00> : vector<128x128xf32>
    %90 = tpu.matmul %87, %89, %cst_103 {dimension_numbers = #tpu.dot_dimension_numbers<[1], [0], [0], [1], [0, 0, 1, 1], [], []>} : vector<128x128xf32>, vector<128x128xf32>, vector<128x128xf32> -> vector<128x128xf32>
    %91 = arith.addf %84, %90 : vector<128x128xf32>
    %c0_104 = arith.constant 0 : index
    %c3_105 = arith.constant 3 : index
    %c1_106 = arith.constant 1 : index
    %c0_107 = arith.constant 0 : index
    %c0_108 = arith.constant 0 : index
    %92 = vector.load %arg1[%c0_104, %c3_105, %c1_106, %c0_107, %c0_108] : memref<2x4x9x9x128xf32, #tpu.memory_space<vmem>>, vector<2x1x8x8x128xf32>
    %93 = vector.shape_cast %92 : vector<2x1x8x8x128xf32> to vector<2x8x8x128xf32>
    %94 = vector.shape_cast %93 : vector<2x8x8x128xf32> to vector<128x128xf32>
    %c13 = arith.constant 13 : index
    %c0_109 = arith.constant 0 : index
    %c0_110 = arith.constant 0 : index
    %95 = vector.load %arg2[%c13, %c0_109, %c0_110] : memref<16x128x128xf32, #tpu.memory_space<vmem>>, vector<1x128x128xf32>
    %96 = vector.shape_cast %95 : vector<1x128x128xf32> to vector<128x128xf32>
    %cst_111 = arith.constant dense<0.000000e+00> : vector<128x128xf32>
    %97 = tpu.matmul %94, %96, %cst_111 {dimension_numbers = #tpu.dot_dimension_numbers<[1], [0], [0], [1], [0, 0, 1, 1], [], []>} : vector<128x128xf32>, vector<128x128xf32>, vector<128x128xf32> -> vector<128x128xf32>
    %98 = arith.addf %91, %97 : vector<128x128xf32>
    %c0_112 = arith.constant 0 : index
    %c2_113 = arith.constant 2 : index
    %c1_114 = arith.constant 1 : index
    %c1_115 = arith.constant 1 : index
    %c0_116 = arith.constant 0 : index
    %99 = vector.load %arg1[%c0_112, %c2_113, %c1_114, %c1_115, %c0_116] : memref<2x4x9x9x128xf32, #tpu.memory_space<vmem>>, vector<2x1x8x8x128xf32>
    %100 = vector.shape_cast %99 : vector<2x1x8x8x128xf32> to vector<2x8x8x128xf32>
    %101 = vector.shape_cast %100 : vector<2x8x8x128xf32> to vector<128x128xf32>
    %c14 = arith.constant 14 : index
    %c0_117 = arith.constant 0 : index
    %c0_118 = arith.constant 0 : index
    %102 = vector.load %arg2[%c14, %c0_117, %c0_118] : memref<16x128x128xf32, #tpu.memory_space<vmem>>, vector<1x128x128xf32>
    %103 = vector.shape_cast %102 : vector<1x128x128xf32> to vector<128x128xf32>
    %cst_119 = arith.constant dense<0.000000e+00> : vector<128x128xf32>
    %104 = tpu.matmul %101, %103, %cst_119 {dimension_numbers = #tpu.dot_dimension_numbers<[1], [0], [0], [1], [0, 0, 1, 1], [], []>} : vector<128x128xf32>, vector<128x128xf32>, vector<128x128xf32> -> vector<128x128xf32>
    %105 = arith.addf %98, %104 : vector<128x128xf32>
    %c0_120 = arith.constant 0 : index
    %c3_121 = arith.constant 3 : index
    %c1_122 = arith.constant 1 : index
    %c1_123 = arith.constant 1 : index
    %c0_124 = arith.constant 0 : index
    %106 = vector.load %arg1[%c0_120, %c3_121, %c1_122, %c1_123, %c0_124] : memref<2x4x9x9x128xf32, #tpu.memory_space<vmem>>, vector<2x1x8x8x128xf32>
    %107 = vector.shape_cast %106 : vector<2x1x8x8x128xf32> to vector<2x8x8x128xf32>
    %108 = vector.shape_cast %107 : vector<2x8x8x128xf32> to vector<128x128xf32>
    %c15 = arith.constant 15 : index
    %c0_125 = arith.constant 0 : index
    %c0_126 = arith.constant 0 : index
    %109 = vector.load %arg2[%c15, %c0_125, %c0_126] : memref<16x128x128xf32, #tpu.memory_space<vmem>>, vector<1x128x128xf32>
    %110 = vector.shape_cast %109 : vector<1x128x128xf32> to vector<128x128xf32>
    %cst_127 = arith.constant dense<0.000000e+00> : vector<128x128xf32>
    %111 = tpu.matmul %108, %110, %cst_127 {dimension_numbers = #tpu.dot_dimension_numbers<[1], [0], [0], [1], [0, 0, 1, 1], [], []>} : vector<128x128xf32>, vector<128x128xf32>, vector<128x128xf32> -> vector<128x128xf32>
    %112 = arith.addf %105, %111 : vector<128x128xf32>
    %c0_128 = arith.constant 0 : index
    %c0_129 = arith.constant 0 : index
    %113 = vector.load %arg3[%c0_128, %c0_129] : memref<1x128xf32, #tpu.memory_space<vmem>>, vector<1x128xf32>
    %114 = vector.broadcast %113 : vector<1x128xf32> to vector<128x128xf32>
    %115 = arith.addf %112, %114 : vector<128x128xf32>
    %cst_130 = arith.constant 0.000000e+00 : f32
    %116 = vector.broadcast %cst_130 : f32 to vector<128x128xf32>
    %117 = arith.maximumf %115, %116 : vector<128x128xf32>
    %cst_131 = arith.constant 0.000000e+00 : f32
    %118 = vector.broadcast %cst_131 : f32 to vector<2x10x10x128xf32>
    %c0_132 = arith.constant 0 : index
    %c0_133 = arith.constant 0 : index
    %c0_134 = arith.constant 0 : index
    %c0_135 = arith.constant 0 : index
    %119 = vector.load %arg11[%c0_132, %c0_133, %c0_134, %c0_135] : memref<2x10x10x128xf32, #tpu.memory_space<vmem>>, vector<2x10x10x128xf32>
    tpu.vector_store %arg11[%c0_132, %c0_133, %c0_134, %c0_135], %118 {strides = array<i32>} : memref<2x10x10x128xf32, #tpu.memory_space<vmem>>, vector<2x10x10x128xf32>,
    %120 = vector.shape_cast %117 : vector<128x128xf32> to vector<2x8x8x128xf32>
    %c0_136 = arith.constant 0 : index
    %c1_137 = arith.constant 1 : index
    %c1_138 = arith.constant 1 : index
    %c0_139 = arith.constant 0 : index
    %121 = vector.load %arg11[%c0_136, %c1_137, %c1_138, %c0_139] : memref<2x10x10x128xf32, #tpu.memory_space<vmem>>, vector<2x8x8x128xf32>
    tpu.vector_store %arg11[%c0_136, %c1_137, %c1_138, %c0_139], %120 {strides = array<i32>} : memref<2x10x10x128xf32, #tpu.memory_space<vmem>>, vector<2x8x8x128xf32>,
    %cst_140 = arith.constant 0.000000e+00 : f32
    %122 = vector.broadcast %cst_140 : f32 to vector<128x128xf32>
    %c0_141 = arith.constant 0 : index
    %c0_142 = arith.constant 0 : index
    %c0_143 = arith.constant 0 : index
    %c0_144 = arith.constant 0 : index
    %123 = vector.load %arg11[%c0_141, %c0_142, %c0_143, %c0_144] : memref<2x10x10x128xf32, #tpu.memory_space<vmem>>, vector<2x8x8x128xf32>
    %124 = vector.shape_cast %123 : vector<2x8x8x128xf32> to vector<128x128xf32>
    %c0_145 = arith.constant 0 : index
    %c0_146 = arith.constant 0 : index
    %c0_147 = arith.constant 0 : index
    %125 = vector.load %arg4[%c0_145, %c0_146, %c0_147] : memref<9x128x128xf32, #tpu.memory_space<vmem>>, vector<1x128x128xf32>
    %126 = vector.shape_cast %125 : vector<1x128x128xf32> to vector<128x128xf32>
    %cst_148 = arith.constant dense<0.000000e+00> : vector<128x128xf32>
    %127 = tpu.matmul %124, %126, %cst_148 {dimension_numbers = #tpu.dot_dimension_numbers<[1], [0], [0], [1], [0, 0, 1, 1], [], []>} : vector<128x128xf32>, vector<128x128xf32>, vector<128x128xf32> -> vector<128x128xf32>
    %128 = arith.addf %122, %127 : vector<128x128xf32>
    %c0_149 = arith.constant 0 : index
    %c0_150 = arith.constant 0 : index
    %c1_151 = arith.constant 1 : index
    %c0_152 = arith.constant 0 : index
    %129 = vector.load %arg11[%c0_149, %c0_150, %c1_151, %c0_152] : memref<2x10x10x128xf32, #tpu.memory_space<vmem>>, vector<2x8x8x128xf32>
    %130 = vector.shape_cast %129 : vector<2x8x8x128xf32> to vector<128x128xf32>
    %c1_153 = arith.constant 1 : index
    %c0_154 = arith.constant 0 : index
    %c0_155 = arith.constant 0 : index
    %131 = vector.load %arg4[%c1_153, %c0_154, %c0_155] : memref<9x128x128xf32, #tpu.memory_space<vmem>>, vector<1x128x128xf32>
    %132 = vector.shape_cast %131 : vector<1x128x128xf32> to vector<128x128xf32>
    %cst_156 = arith.constant dense<0.000000e+00> : vector<128x128xf32>
    %133 = tpu.matmul %130, %132, %cst_156 {dimension_numbers = #tpu.dot_dimension_numbers<[1], [0], [0], [1], [0, 0, 1, 1], [], []>} : vector<128x128xf32>, vector<128x128xf32>, vector<128x128xf32> -> vector<128x128xf32>
    %134 = arith.addf %128, %133 : vector<128x128xf32>
    %c0_157 = arith.constant 0 : index
    %c0_158 = arith.constant 0 : index
    %c2_159 = arith.constant 2 : index
    %c0_160 = arith.constant 0 : index
    %135 = vector.load %arg11[%c0_157, %c0_158, %c2_159, %c0_160] : memref<2x10x10x128xf32, #tpu.memory_space<vmem>>, vector<2x8x8x128xf32>
    %136 = vector.shape_cast %135 : vector<2x8x8x128xf32> to vector<128x128xf32>
    %c2_161 = arith.constant 2 : index
    %c0_162 = arith.constant 0 : index
    %c0_163 = arith.constant 0 : index
    %137 = vector.load %arg4[%c2_161, %c0_162, %c0_163] : memref<9x128x128xf32, #tpu.memory_space<vmem>>, vector<1x128x128xf32>
    %138 = vector.shape_cast %137 : vector<1x128x128xf32> to vector<128x128xf32>
    %cst_164 = arith.constant dense<0.000000e+00> : vector<128x128xf32>
    %139 = tpu.matmul %136, %138, %cst_164 {dimension_numbers = #tpu.dot_dimension_numbers<[1], [0], [0], [1], [0, 0, 1, 1], [], []>} : vector<128x128xf32>, vector<128x128xf32>, vector<128x128xf32> -> vector<128x128xf32>
    %140 = arith.addf %134, %139 : vector<128x128xf32>
    %c0_165 = arith.constant 0 : index
    %c1_166 = arith.constant 1 : index
    %c0_167 = arith.constant 0 : index
    %c0_168 = arith.constant 0 : index
    %141 = vector.load %arg11[%c0_165, %c1_166, %c0_167, %c0_168] : memref<2x10x10x128xf32, #tpu.memory_space<vmem>>, vector<2x8x8x128xf32>
    %142 = vector.shape_cast %141 : vector<2x8x8x128xf32> to vector<128x128xf32>
    %c3_169 = arith.constant 3 : index
    %c0_170 = arith.constant 0 : index
    %c0_171 = arith.constant 0 : index
    %143 = vector.load %arg4[%c3_169, %c0_170, %c0_171] : memref<9x128x128xf32, #tpu.memory_space<vmem>>, vector<1x128x128xf32>
    %144 = vector.shape_cast %143 : vector<1x128x128xf32> to vector<128x128xf32>
    %cst_172 = arith.constant dense<0.000000e+00> : vector<128x128xf32>
    %145 = tpu.matmul %142, %144, %cst_172 {dimension_numbers = #tpu.dot_dimension_numbers<[1], [0], [0], [1], [0, 0, 1, 1], [], []>} : vector<128x128xf32>, vector<128x128xf32>, vector<128x128xf32> -> vector<128x128xf32>
    %146 = arith.addf %140, %145 : vector<128x128xf32>
    %c0_173 = arith.constant 0 : index
    %c1_174 = arith.constant 1 : index
    %c1_175 = arith.constant 1 : index
    %c0_176 = arith.constant 0 : index
    %147 = vector.load %arg11[%c0_173, %c1_174, %c1_175, %c0_176] : memref<2x10x10x128xf32, #tpu.memory_space<vmem>>, vector<2x8x8x128xf32>
    %148 = vector.shape_cast %147 : vector<2x8x8x128xf32> to vector<128x128xf32>
    %c4_177 = arith.constant 4 : index
    %c0_178 = arith.constant 0 : index
    %c0_179 = arith.constant 0 : index
    %149 = vector.load %arg4[%c4_177, %c0_178, %c0_179] : memref<9x128x128xf32, #tpu.memory_space<vmem>>, vector<1x128x128xf32>
    %150 = vector.shape_cast %149 : vector<1x128x128xf32> to vector<128x128xf32>
    %cst_180 = arith.constant dense<0.000000e+00> : vector<128x128xf32>
    %151 = tpu.matmul %148, %150, %cst_180 {dimension_numbers = #tpu.dot_dimension_numbers<[1], [0], [0], [1], [0, 0, 1, 1], [], []>} : vector<128x128xf32>, vector<128x128xf32>, vector<128x128xf32> -> vector<128x128xf32>
    %152 = arith.addf %146, %151 : vector<128x128xf32>
    %c0_181 = arith.constant 0 : index
    %c1_182 = arith.constant 1 : index
    %c2_183 = arith.constant 2 : index
    %c0_184 = arith.constant 0 : index
    %153 = vector.load %arg11[%c0_181, %c1_182, %c2_183, %c0_184] : memref<2x10x10x128xf32, #tpu.memory_space<vmem>>, vector<2x8x8x128xf32>
    %154 = vector.shape_cast %153 : vector<2x8x8x128xf32> to vector<128x128xf32>
    %c5_185 = arith.constant 5 : index
    %c0_186 = arith.constant 0 : index
    %c0_187 = arith.constant 0 : index
    %155 = vector.load %arg4[%c5_185, %c0_186, %c0_187] : memref<9x128x128xf32, #tpu.memory_space<vmem>>, vector<1x128x128xf32>
    %156 = vector.shape_cast %155 : vector<1x128x128xf32> to vector<128x128xf32>
    %cst_188 = arith.constant dense<0.000000e+00> : vector<128x128xf32>
    %157 = tpu.matmul %154, %156, %cst_188 {dimension_numbers = #tpu.dot_dimension_numbers<[1], [0], [0], [1], [0, 0, 1, 1], [], []>} : vector<128x128xf32>, vector<128x128xf32>, vector<128x128xf32> -> vector<128x128xf32>
    %158 = arith.addf %152, %157 : vector<128x128xf32>
    %c0_189 = arith.constant 0 : index
    %c2_190 = arith.constant 2 : index
    %c0_191 = arith.constant 0 : index
    %c0_192 = arith.constant 0 : index
    %159 = vector.load %arg11[%c0_189, %c2_190, %c0_191, %c0_192] : memref<2x10x10x128xf32, #tpu.memory_space<vmem>>, vector<2x8x8x128xf32>
    %160 = vector.shape_cast %159 : vector<2x8x8x128xf32> to vector<128x128xf32>
    %c6_193 = arith.constant 6 : index
    %c0_194 = arith.constant 0 : index
    %c0_195 = arith.constant 0 : index
    %161 = vector.load %arg4[%c6_193, %c0_194, %c0_195] : memref<9x128x128xf32, #tpu.memory_space<vmem>>, vector<1x128x128xf32>
    %162 = vector.shape_cast %161 : vector<1x128x128xf32> to vector<128x128xf32>
    %cst_196 = arith.constant dense<0.000000e+00> : vector<128x128xf32>
    %163 = tpu.matmul %160, %162, %cst_196 {dimension_numbers = #tpu.dot_dimension_numbers<[1], [0], [0], [1], [0, 0, 1, 1], [], []>} : vector<128x128xf32>, vector<128x128xf32>, vector<128x128xf32> -> vector<128x128xf32>
    %164 = arith.addf %158, %163 : vector<128x128xf32>
    %c0_197 = arith.constant 0 : index
    %c2_198 = arith.constant 2 : index
    %c1_199 = arith.constant 1 : index
    %c0_200 = arith.constant 0 : index
    %165 = vector.load %arg11[%c0_197, %c2_198, %c1_199, %c0_200] : memref<2x10x10x128xf32, #tpu.memory_space<vmem>>, vector<2x8x8x128xf32>
    %166 = vector.shape_cast %165 : vector<2x8x8x128xf32> to vector<128x128xf32>
    %c7_201 = arith.constant 7 : index
    %c0_202 = arith.constant 0 : index
    %c0_203 = arith.constant 0 : index
    %167 = vector.load %arg4[%c7_201, %c0_202, %c0_203] : memref<9x128x128xf32, #tpu.memory_space<vmem>>, vector<1x128x128xf32>
    %168 = vector.shape_cast %167 : vector<1x128x128xf32> to vector<128x128xf32>
    %cst_204 = arith.constant dense<0.000000e+00> : vector<128x128xf32>
    %169 = tpu.matmul %166, %168, %cst_204 {dimension_numbers = #tpu.dot_dimension_numbers<[1], [0], [0], [1], [0, 0, 1, 1], [], []>} : vector<128x128xf32>, vector<128x128xf32>, vector<128x128xf32> -> vector<128x128xf32>
    %170 = arith.addf %164, %169 : vector<128x128xf32>
    %c0_205 = arith.constant 0 : index
    %c2_206 = arith.constant 2 : index
    %c2_207 = arith.constant 2 : index
    %c0_208 = arith.constant 0 : index
    %171 = vector.load %arg11[%c0_205, %c2_206, %c2_207, %c0_208] : memref<2x10x10x128xf32, #tpu.memory_space<vmem>>, vector<2x8x8x128xf32>
    %172 = vector.shape_cast %171 : vector<2x8x8x128xf32> to vector<128x128xf32>
    %c8_209 = arith.constant 8 : index
    %c0_210 = arith.constant 0 : index
    %c0_211 = arith.constant 0 : index
    %173 = vector.load %arg4[%c8_209, %c0_210, %c0_211] : memref<9x128x128xf32, #tpu.memory_space<vmem>>, vector<1x128x128xf32>
    %174 = vector.shape_cast %173 : vector<1x128x128xf32> to vector<128x128xf32>
    %cst_212 = arith.constant dense<0.000000e+00> : vector<128x128xf32>
    %175 = tpu.matmul %172, %174, %cst_212 {dimension_numbers = #tpu.dot_dimension_numbers<[1], [0], [0], [1], [0, 0, 1, 1], [], []>} : vector<128x128xf32>, vector<128x128xf32>, vector<128x128xf32> -> vector<128x128xf32>
    %176 = arith.addf %170, %175 : vector<128x128xf32>
    %c0_213 = arith.constant 0 : index
    %c0_214 = arith.constant 0 : index
    %177 = vector.load %arg5[%c0_213, %c0_214] : memref<1x128xf32, #tpu.memory_space<vmem>>, vector<1x128xf32>
    %178 = vector.broadcast %177 : vector<1x128xf32> to vector<128x128xf32>
    %179 = arith.addf %176, %178 : vector<128x128xf32>
    %cst_215 = arith.constant 0.000000e+00 : f32
    %180 = vector.broadcast %cst_215 : f32 to vector<128x128xf32>
    %181 = arith.maximumf %179, %180 : vector<128x128xf32>
    %182 = vector.shape_cast %181 : vector<128x128xf32> to vector<2x8x8x128xf32>
    %c0_216 = arith.constant 0 : index
    %c1_217 = arith.constant 1 : index
    %c1_218 = arith.constant 1 : index
    %c0_219 = arith.constant 0 : index
    %183 = vector.load %arg11[%c0_216, %c1_217, %c1_218, %c0_219] : memref<2x10x10x128xf32, #tpu.memory_space<vmem>>, vector<2x8x8x128xf32>
    tpu.vector_store %arg11[%c0_216, %c1_217, %c1_218, %c0_219], %182 {strides = array<i32>} : memref<2x10x10x128xf32, #tpu.memory_space<vmem>>, vector<2x8x8x128xf32>,
    %cst_220 = arith.constant 0.000000e+00 : f32
    %184 = vector.broadcast %cst_220 : f32 to vector<128x128xf32>
    %c0_221 = arith.constant 0 : index
    %c0_222 = arith.constant 0 : index
    %c0_223 = arith.constant 0 : index
    %c0_224 = arith.constant 0 : index
    %185 = vector.load %arg11[%c0_221, %c0_222, %c0_223, %c0_224] : memref<2x10x10x128xf32, #tpu.memory_space<vmem>>, vector<2x8x8x128xf32>
    %186 = vector.shape_cast %185 : vector<2x8x8x128xf32> to vector<128x128xf32>
    %c0_225 = arith.constant 0 : index
    %c0_226 = arith.constant 0 : index
    %c0_227 = arith.constant 0 : index
    %c0_228 = arith.constant 0 : index
    %187 = vector.load %arg6[%c0_225, %c0_226, %c0_227, %c0_228] : memref<2x9x128x128xf32, #tpu.memory_space<vmem>>, vector<1x1x128x128xf32>
    %188 = vector.shape_cast %187 : vector<1x1x128x128xf32> to vector<128x128xf32>
    %cst_229 = arith.constant dense<0.000000e+00> : vector<128x128xf32>
    %189 = tpu.matmul %186, %188, %cst_229 {dimension_numbers = #tpu.dot_dimension_numbers<[1], [0], [0], [1], [0, 0, 1, 1], [], []>} : vector<128x128xf32>, vector<128x128xf32>, vector<128x128xf32> -> vector<128x128xf32>
    %190 = arith.addf %184, %189 : vector<128x128xf32>
    %c0_230 = arith.constant 0 : index
    %c0_231 = arith.constant 0 : index
    %c1_232 = arith.constant 1 : index
    %c0_233 = arith.constant 0 : index
    %191 = vector.load %arg11[%c0_230, %c0_231, %c1_232, %c0_233] : memref<2x10x10x128xf32, #tpu.memory_space<vmem>>, vector<2x8x8x128xf32>
    %192 = vector.shape_cast %191 : vector<2x8x8x128xf32> to vector<128x128xf32>
    %c0_234 = arith.constant 0 : index
    %c1_235 = arith.constant 1 : index
    %c0_236 = arith.constant 0 : index
    %c0_237 = arith.constant 0 : index
    %193 = vector.load %arg6[%c0_234, %c1_235, %c0_236, %c0_237] : memref<2x9x128x128xf32, #tpu.memory_space<vmem>>, vector<1x1x128x128xf32>
    %194 = vector.shape_cast %193 : vector<1x1x128x128xf32> to vector<128x128xf32>
    %cst_238 = arith.constant dense<0.000000e+00> : vector<128x128xf32>
    %195 = tpu.matmul %192, %194, %cst_238 {dimension_numbers = #tpu.dot_dimension_numbers<[1], [0], [0], [1], [0, 0, 1, 1], [], []>} : vector<128x128xf32>, vector<128x128xf32>, vector<128x128xf32> -> vector<128x128xf32>
    %196 = arith.addf %190, %195 : vector<128x128xf32>
    %c0_239 = arith.constant 0 : index
    %c0_240 = arith.constant 0 : index
    %c2_241 = arith.constant 2 : index
    %c0_242 = arith.constant 0 : index
    %197 = vector.load %arg11[%c0_239, %c0_240, %c2_241, %c0_242] : memref<2x10x10x128xf32, #tpu.memory_space<vmem>>, vector<2x8x8x128xf32>
    %198 = vector.shape_cast %197 : vector<2x8x8x128xf32> to vector<128x128xf32>
    %c0_243 = arith.constant 0 : index
    %c2_244 = arith.constant 2 : index
    %c0_245 = arith.constant 0 : index
    %c0_246 = arith.constant 0 : index
    %199 = vector.load %arg6[%c0_243, %c2_244, %c0_245, %c0_246] : memref<2x9x128x128xf32, #tpu.memory_space<vmem>>, vector<1x1x128x128xf32>
    %200 = vector.shape_cast %199 : vector<1x1x128x128xf32> to vector<128x128xf32>
    %cst_247 = arith.constant dense<0.000000e+00> : vector<128x128xf32>
    %201 = tpu.matmul %198, %200, %cst_247 {dimension_numbers = #tpu.dot_dimension_numbers<[1], [0], [0], [1], [0, 0, 1, 1], [], []>} : vector<128x128xf32>, vector<128x128xf32>, vector<128x128xf32> -> vector<128x128xf32>
    %202 = arith.addf %196, %201 : vector<128x128xf32>
    %c0_248 = arith.constant 0 : index
    %c1_249 = arith.constant 1 : index
    %c0_250 = arith.constant 0 : index
    %c0_251 = arith.constant 0 : index
    %203 = vector.load %arg11[%c0_248, %c1_249, %c0_250, %c0_251] : memref<2x10x10x128xf32, #tpu.memory_space<vmem>>, vector<2x8x8x128xf32>
    %204 = vector.shape_cast %203 : vector<2x8x8x128xf32> to vector<128x128xf32>
    %c0_252 = arith.constant 0 : index
    %c3_253 = arith.constant 3 : index
    %c0_254 = arith.constant 0 : index
    %c0_255 = arith.constant 0 : index
    %205 = vector.load %arg6[%c0_252, %c3_253, %c0_254, %c0_255] : memref<2x9x128x128xf32, #tpu.memory_space<vmem>>, vector<1x1x128x128xf32>
    %206 = vector.shape_cast %205 : vector<1x1x128x128xf32> to vector<128x128xf32>
    %cst_256 = arith.constant dense<0.000000e+00> : vector<128x128xf32>
    %207 = tpu.matmul %204, %206, %cst_256 {dimension_numbers = #tpu.dot_dimension_numbers<[1], [0], [0], [1], [0, 0, 1, 1], [], []>} : vector<128x128xf32>, vector<128x128xf32>, vector<128x128xf32> -> vector<128x128xf32>
    %208 = arith.addf %202, %207 : vector<128x128xf32>
    %c0_257 = arith.constant 0 : index
    %c1_258 = arith.constant 1 : index
    %c1_259 = arith.constant 1 : index
    %c0_260 = arith.constant 0 : index
    %209 = vector.load %arg11[%c0_257, %c1_258, %c1_259, %c0_260] : memref<2x10x10x128xf32, #tpu.memory_space<vmem>>, vector<2x8x8x128xf32>
    %210 = vector.shape_cast %209 : vector<2x8x8x128xf32> to vector<128x128xf32>
    %c0_261 = arith.constant 0 : index
    %c4_262 = arith.constant 4 : index
    %c0_263 = arith.constant 0 : index
    %c0_264 = arith.constant 0 : index
    %211 = vector.load %arg6[%c0_261, %c4_262, %c0_263, %c0_264] : memref<2x9x128x128xf32, #tpu.memory_space<vmem>>, vector<1x1x128x128xf32>
    %212 = vector.shape_cast %211 : vector<1x1x128x128xf32> to vector<128x128xf32>
    %cst_265 = arith.constant dense<0.000000e+00> : vector<128x128xf32>
    %213 = tpu.matmul %210, %212, %cst_265 {dimension_numbers = #tpu.dot_dimension_numbers<[1], [0], [0], [1], [0, 0, 1, 1], [], []>} : vector<128x128xf32>, vector<128x128xf32>, vector<128x128xf32> -> vector<128x128xf32>
    %214 = arith.addf %208, %213 : vector<128x128xf32>
    %c0_266 = arith.constant 0 : index
    %c1_267 = arith.constant 1 : index
    %c2_268 = arith.constant 2 : index
    %c0_269 = arith.constant 0 : index
    %215 = vector.load %arg11[%c0_266, %c1_267, %c2_268, %c0_269] : memref<2x10x10x128xf32, #tpu.memory_space<vmem>>, vector<2x8x8x128xf32>
    %216 = vector.shape_cast %215 : vector<2x8x8x128xf32> to vector<128x128xf32>
    %c0_270 = arith.constant 0 : index
    %c5_271 = arith.constant 5 : index
    %c0_272 = arith.constant 0 : index
    %c0_273 = arith.constant 0 : index
    %217 = vector.load %arg6[%c0_270, %c5_271, %c0_272, %c0_273] : memref<2x9x128x128xf32, #tpu.memory_space<vmem>>, vector<1x1x128x128xf32>
    %218 = vector.shape_cast %217 : vector<1x1x128x128xf32> to vector<128x128xf32>
    %cst_274 = arith.constant dense<0.000000e+00> : vector<128x128xf32>
    %219 = tpu.matmul %216, %218, %cst_274 {dimension_numbers = #tpu.dot_dimension_numbers<[1], [0], [0], [1], [0, 0, 1, 1], [], []>} : vector<128x128xf32>, vector<128x128xf32>, vector<128x128xf32> -> vector<128x128xf32>
    %220 = arith.addf %214, %219 : vector<128x128xf32>
    %c0_275 = arith.constant 0 : index
    %c2_276 = arith.constant 2 : index
    %c0_277 = arith.constant 0 : index
    %c0_278 = arith.constant 0 : index
    %221 = vector.load %arg11[%c0_275, %c2_276, %c0_277, %c0_278] : memref<2x10x10x128xf32, #tpu.memory_space<vmem>>, vector<2x8x8x128xf32>
    %222 = vector.shape_cast %221 : vector<2x8x8x128xf32> to vector<128x128xf32>
    %c0_279 = arith.constant 0 : index
    %c6_280 = arith.constant 6 : index
    %c0_281 = arith.constant 0 : index
    %c0_282 = arith.constant 0 : index
    %223 = vector.load %arg6[%c0_279, %c6_280, %c0_281, %c0_282] : memref<2x9x128x128xf32, #tpu.memory_space<vmem>>, vector<1x1x128x128xf32>
    %224 = vector.shape_cast %223 : vector<1x1x128x128xf32> to vector<128x128xf32>
    %cst_283 = arith.constant dense<0.000000e+00> : vector<128x128xf32>
    %225 = tpu.matmul %222, %224, %cst_283 {dimension_numbers = #tpu.dot_dimension_numbers<[1], [0], [0], [1], [0, 0, 1, 1], [], []>} : vector<128x128xf32>, vector<128x128xf32>, vector<128x128xf32> -> vector<128x128xf32>
    %226 = arith.addf %220, %225 : vector<128x128xf32>
    %c0_284 = arith.constant 0 : index
    %c2_285 = arith.constant 2 : index
    %c1_286 = arith.constant 1 : index
    %c0_287 = arith.constant 0 : index
    %227 = vector.load %arg11[%c0_284, %c2_285, %c1_286, %c0_287] : memref<2x10x10x128xf32, #tpu.memory_space<vmem>>, vector<2x8x8x128xf32>
    %228 = vector.shape_cast %227 : vector<2x8x8x128xf32> to vector<128x128xf32>
    %c0_288 = arith.constant 0 : index
    %c7_289 = arith.constant 7 : index
    %c0_290 = arith.constant 0 : index
    %c0_291 = arith.constant 0 : index
    %229 = vector.load %arg6[%c0_288, %c7_289, %c0_290, %c0_291] : memref<2x9x128x128xf32, #tpu.memory_space<vmem>>, vector<1x1x128x128xf32>
    %230 = vector.shape_cast %229 : vector<1x1x128x128xf32> to vector<128x128xf32>
    %cst_292 = arith.constant dense<0.000000e+00> : vector<128x128xf32>
    %231 = tpu.matmul %228, %230, %cst_292 {dimension_numbers = #tpu.dot_dimension_numbers<[1], [0], [0], [1], [0, 0, 1, 1], [], []>} : vector<128x128xf32>, vector<128x128xf32>, vector<128x128xf32> -> vector<128x128xf32>
    %232 = arith.addf %226, %231 : vector<128x128xf32>
    %c0_293 = arith.constant 0 : index
    %c2_294 = arith.constant 2 : index
    %c2_295 = arith.constant 2 : index
    %c0_296 = arith.constant 0 : index
    %233 = vector.load %arg11[%c0_293, %c2_294, %c2_295, %c0_296] : memref<2x10x10x128xf32, #tpu.memory_space<vmem>>, vector<2x8x8x128xf32>
    %234 = vector.shape_cast %233 : vector<2x8x8x128xf32> to vector<128x128xf32>
    %c0_297 = arith.constant 0 : index
    %c8_298 = arith.constant 8 : index
    %c0_299 = arith.constant 0 : index
    %c0_300 = arith.constant 0 : index
    %235 = vector.load %arg6[%c0_297, %c8_298, %c0_299, %c0_300] : memref<2x9x128x128xf32, #tpu.memory_space<vmem>>, vector<1x1x128x128xf32>
    %236 = vector.shape_cast %235 : vector<1x1x128x128xf32> to vector<128x128xf32>
    %cst_301 = arith.constant dense<0.000000e+00> : vector<128x128xf32>
    %237 = tpu.matmul %234, %236, %cst_301 {dimension_numbers = #tpu.dot_dimension_numbers<[1], [0], [0], [1], [0, 0, 1, 1], [], []>} : vector<128x128xf32>, vector<128x128xf32>, vector<128x128xf32> -> vector<128x128xf32>
    %238 = arith.addf %232, %237 : vector<128x128xf32>
    %c0_302 = arith.constant 0 : index
    %c0_303 = arith.constant 0 : index
    %c0_304 = arith.constant 0 : index
    %239 = vector.load %arg7[%c0_302, %c0_303, %c0_304] : memref<2x1x128xf32, #tpu.memory_space<vmem>>, vector<1x1x128xf32>
    %240 = vector.shape_cast %239 : vector<1x1x128xf32> to vector<1x128xf32>
    %241 = vector.broadcast %240 : vector<1x128xf32> to vector<128x128xf32>
    %242 = arith.addf %238, %241 : vector<128x128xf32>
    %cst_305 = arith.constant 0.000000e+00 : f32
    %243 = vector.broadcast %cst_305 : f32 to vector<128x128xf32>
    %244 = arith.maximumf %242, %243 : vector<128x128xf32>
    %c0_306 = arith.constant 0 : index
    %c0_307 = arith.constant 0 : index
    %c0_308 = arith.constant 0 : index
    %245 = vector.load %arg8[%c0_306, %c0_307, %c0_308] : memref<2x128x128xf32, #tpu.memory_space<vmem>>, vector<1x128x128xf32>
    %246 = vector.shape_cast %245 : vector<1x128x128xf32> to vector<128x128xf32>
    %cst_309 = arith.constant dense<0.000000e+00> : vector<128x128xf32>
    %247 = tpu.matmul %244, %246, %cst_309 {dimension_numbers = #tpu.dot_dimension_numbers<[1], [0], [0], [1], [0, 0, 1, 1], [], []>} : vector<128x128xf32>, vector<128x128xf32>, vector<128x128xf32> -> vector<128x128xf32>
    %c0_310 = arith.constant 0 : index
    %c0_311 = arith.constant 0 : index
    %c0_312 = arith.constant 0 : index
    %248 = vector.load %arg9[%c0_310, %c0_311, %c0_312] : memref<2x1x128xf32, #tpu.memory_space<vmem>>, vector<1x1x128xf32>
    %249 = vector.shape_cast %248 : vector<1x1x128xf32> to vector<1x128xf32>
    %250 = vector.broadcast %249 : vector<1x128xf32> to vector<128x128xf32>
    %251 = arith.addf %247, %250 : vector<128x128xf32>
    %252 = arith.addf %251, %181 : vector<128x128xf32>
    %cst_313 = arith.constant 0.000000e+00 : f32
    %253 = vector.broadcast %cst_313 : f32 to vector<128x128xf32>
    %254 = arith.maximumf %252, %253 : vector<128x128xf32>
    %255 = vector.shape_cast %254 : vector<128x128xf32> to vector<2x8x8x128xf32>
    %c0_314 = arith.constant 0 : index
    %c1_315 = arith.constant 1 : index
    %c1_316 = arith.constant 1 : index
    %c0_317 = arith.constant 0 : index
    %256 = vector.load %arg11[%c0_314, %c1_315, %c1_316, %c0_317] : memref<2x10x10x128xf32, #tpu.memory_space<vmem>>, vector<2x8x8x128xf32>
    tpu.vector_store %arg11[%c0_314, %c1_315, %c1_316, %c0_317], %255 {strides = array<i32>} : memref<2x10x10x128xf32, #tpu.memory_space<vmem>>, vector<2x8x8x128xf32>,
    %cst_318 = arith.constant 0.000000e+00 : f32
    %257 = vector.broadcast %cst_318 : f32 to vector<128x128xf32>
    %c0_319 = arith.constant 0 : index
    %c0_320 = arith.constant 0 : index
    %c0_321 = arith.constant 0 : index
    %c0_322 = arith.constant 0 : index
    %258 = vector.load %arg11[%c0_319, %c0_320, %c0_321, %c0_322] : memref<2x10x10x128xf32, #tpu.memory_space<vmem>>, vector<2x8x8x128xf32>
    %259 = vector.shape_cast %258 : vector<2x8x8x128xf32> to vector<128x128xf32>
    %c1_323 = arith.constant 1 : index
    %c0_324 = arith.constant 0 : index
    %c0_325 = arith.constant 0 : index
    %c0_326 = arith.constant 0 : index
    %260 = vector.load %arg6[%c1_323, %c0_324, %c0_325, %c0_326] : memref<2x9x128x128xf32, #tpu.memory_space<vmem>>, vector<1x1x128x128xf32>
    %261 = vector.shape_cast %260 : vector<1x1x128x128xf32> to vector<128x128xf32>
    %cst_327 = arith.constant dense<0.000000e+00> : vector<128x128xf32>
    %262 = tpu.matmul %259, %261, %cst_327 {dimension_numbers = #tpu.dot_dimension_numbers<[1], [0], [0], [1], [0, 0, 1, 1], [], []>} : vector<128x128xf32>, vector<128x128xf32>, vector<128x128xf32> -> vector<128x128xf32>
    %263 = arith.addf %257, %262 : vector<128x128xf32>
    %c0_328 = arith.constant 0 : index
    %c0_329 = arith.constant 0 : index
    %c1_330 = arith.constant 1 : index
    %c0_331 = arith.constant 0 : index
    %264 = vector.load %arg11[%c0_328, %c0_329, %c1_330, %c0_331] : memref<2x10x10x128xf32, #tpu.memory_space<vmem>>, vector<2x8x8x128xf32>
    %265 = vector.shape_cast %264 : vector<2x8x8x128xf32> to vector<128x128xf32>
    %c1_332 = arith.constant 1 : index
    %c1_333 = arith.constant 1 : index
    %c0_334 = arith.constant 0 : index
    %c0_335 = arith.constant 0 : index
    %266 = vector.load %arg6[%c1_332, %c1_333, %c0_334, %c0_335] : memref<2x9x128x128xf32, #tpu.memory_space<vmem>>, vector<1x1x128x128xf32>
    %267 = vector.shape_cast %266 : vector<1x1x128x128xf32> to vector<128x128xf32>
    %cst_336 = arith.constant dense<0.000000e+00> : vector<128x128xf32>
    %268 = tpu.matmul %265, %267, %cst_336 {dimension_numbers = #tpu.dot_dimension_numbers<[1], [0], [0], [1], [0, 0, 1, 1], [], []>} : vector<128x128xf32>, vector<128x128xf32>, vector<128x128xf32> -> vector<128x128xf32>
    %269 = arith.addf %263, %268 : vector<128x128xf32>
    %c0_337 = arith.constant 0 : index
    %c0_338 = arith.constant 0 : index
    %c2_339 = arith.constant 2 : index
    %c0_340 = arith.constant 0 : index
    %270 = vector.load %arg11[%c0_337, %c0_338, %c2_339, %c0_340] : memref<2x10x10x128xf32, #tpu.memory_space<vmem>>, vector<2x8x8x128xf32>
    %271 = vector.shape_cast %270 : vector<2x8x8x128xf32> to vector<128x128xf32>
    %c1_341 = arith.constant 1 : index
    %c2_342 = arith.constant 2 : index
    %c0_343 = arith.constant 0 : index
    %c0_344 = arith.constant 0 : index
    %272 = vector.load %arg6[%c1_341, %c2_342, %c0_343, %c0_344] : memref<2x9x128x128xf32, #tpu.memory_space<vmem>>, vector<1x1x128x128xf32>
    %273 = vector.shape_cast %272 : vector<1x1x128x128xf32> to vector<128x128xf32>
    %cst_345 = arith.constant dense<0.000000e+00> : vector<128x128xf32>
    %274 = tpu.matmul %271, %273, %cst_345 {dimension_numbers = #tpu.dot_dimension_numbers<[1], [0], [0], [1], [0, 0, 1, 1], [], []>} : vector<128x128xf32>, vector<128x128xf32>, vector<128x128xf32> -> vector<128x128xf32>
    %275 = arith.addf %269, %274 : vector<128x128xf32>
    %c0_346 = arith.constant 0 : index
    %c1_347 = arith.constant 1 : index
    %c0_348 = arith.constant 0 : index
    %c0_349 = arith.constant 0 : index
    %276 = vector.load %arg11[%c0_346, %c1_347, %c0_348, %c0_349] : memref<2x10x10x128xf32, #tpu.memory_space<vmem>>, vector<2x8x8x128xf32>
    %277 = vector.shape_cast %276 : vector<2x8x8x128xf32> to vector<128x128xf32>
    %c1_350 = arith.constant 1 : index
    %c3_351 = arith.constant 3 : index
    %c0_352 = arith.constant 0 : index
    %c0_353 = arith.constant 0 : index
    %278 = vector.load %arg6[%c1_350, %c3_351, %c0_352, %c0_353] : memref<2x9x128x128xf32, #tpu.memory_space<vmem>>, vector<1x1x128x128xf32>
    %279 = vector.shape_cast %278 : vector<1x1x128x128xf32> to vector<128x128xf32>
    %cst_354 = arith.constant dense<0.000000e+00> : vector<128x128xf32>
    %280 = tpu.matmul %277, %279, %cst_354 {dimension_numbers = #tpu.dot_dimension_numbers<[1], [0], [0], [1], [0, 0, 1, 1], [], []>} : vector<128x128xf32>, vector<128x128xf32>, vector<128x128xf32> -> vector<128x128xf32>
    %281 = arith.addf %275, %280 : vector<128x128xf32>
    %c0_355 = arith.constant 0 : index
    %c1_356 = arith.constant 1 : index
    %c1_357 = arith.constant 1 : index
    %c0_358 = arith.constant 0 : index
    %282 = vector.load %arg11[%c0_355, %c1_356, %c1_357, %c0_358] : memref<2x10x10x128xf32, #tpu.memory_space<vmem>>, vector<2x8x8x128xf32>
    %283 = vector.shape_cast %282 : vector<2x8x8x128xf32> to vector<128x128xf32>
    %c1_359 = arith.constant 1 : index
    %c4_360 = arith.constant 4 : index
    %c0_361 = arith.constant 0 : index
    %c0_362 = arith.constant 0 : index
    %284 = vector.load %arg6[%c1_359, %c4_360, %c0_361, %c0_362] : memref<2x9x128x128xf32, #tpu.memory_space<vmem>>, vector<1x1x128x128xf32>
    %285 = vector.shape_cast %284 : vector<1x1x128x128xf32> to vector<128x128xf32>
    %cst_363 = arith.constant dense<0.000000e+00> : vector<128x128xf32>
    %286 = tpu.matmul %283, %285, %cst_363 {dimension_numbers = #tpu.dot_dimension_numbers<[1], [0], [0], [1], [0, 0, 1, 1], [], []>} : vector<128x128xf32>, vector<128x128xf32>, vector<128x128xf32> -> vector<128x128xf32>
    %287 = arith.addf %281, %286 : vector<128x128xf32>
    %c0_364 = arith.constant 0 : index
    %c1_365 = arith.constant 1 : index
    %c2_366 = arith.constant 2 : index
    %c0_367 = arith.constant 0 : index
    %288 = vector.load %arg11[%c0_364, %c1_365, %c2_366, %c0_367] : memref<2x10x10x128xf32, #tpu.memory_space<vmem>>, vector<2x8x8x128xf32>
    %289 = vector.shape_cast %288 : vector<2x8x8x128xf32> to vector<128x128xf32>
    %c1_368 = arith.constant 1 : index
    %c5_369 = arith.constant 5 : index
    %c0_370 = arith.constant 0 : index
    %c0_371 = arith.constant 0 : index
    %290 = vector.load %arg6[%c1_368, %c5_369, %c0_370, %c0_371] : memref<2x9x128x128xf32, #tpu.memory_space<vmem>>, vector<1x1x128x128xf32>
    %291 = vector.shape_cast %290 : vector<1x1x128x128xf32> to vector<128x128xf32>
    %cst_372 = arith.constant dense<0.000000e+00> : vector<128x128xf32>
    %292 = tpu.matmul %289, %291, %cst_372 {dimension_numbers = #tpu.dot_dimension_numbers<[1], [0], [0], [1], [0, 0, 1, 1], [], []>} : vector<128x128xf32>, vector<128x128xf32>, vector<128x128xf32> -> vector<128x128xf32>
    %293 = arith.addf %287, %292 : vector<128x128xf32>
    %c0_373 = arith.constant 0 : index
    %c2_374 = arith.constant 2 : index
    %c0_375 = arith.constant 0 : index
    %c0_376 = arith.constant 0 : index
    %294 = vector.load %arg11[%c0_373, %c2_374, %c0_375, %c0_376] : memref<2x10x10x128xf32, #tpu.memory_space<vmem>>, vector<2x8x8x128xf32>
    %295 = vector.shape_cast %294 : vector<2x8x8x128xf32> to vector<128x128xf32>
    %c1_377 = arith.constant 1 : index
    %c6_378 = arith.constant 6 : index
    %c0_379 = arith.constant 0 : index
    %c0_380 = arith.constant 0 : index
    %296 = vector.load %arg6[%c1_377, %c6_378, %c0_379, %c0_380] : memref<2x9x128x128xf32, #tpu.memory_space<vmem>>, vector<1x1x128x128xf32>
    %297 = vector.shape_cast %296 : vector<1x1x128x128xf32> to vector<128x128xf32>
    %cst_381 = arith.constant dense<0.000000e+00> : vector<128x128xf32>
    %298 = tpu.matmul %295, %297, %cst_381 {dimension_numbers = #tpu.dot_dimension_numbers<[1], [0], [0], [1], [0, 0, 1, 1], [], []>} : vector<128x128xf32>, vector<128x128xf32>, vector<128x128xf32> -> vector<128x128xf32>
    %299 = arith.addf %293, %298 : vector<128x128xf32>
    %c0_382 = arith.constant 0 : index
    %c2_383 = arith.constant 2 : index
    %c1_384 = arith.constant 1 : index
    %c0_385 = arith.constant 0 : index
    %300 = vector.load %arg11[%c0_382, %c2_383, %c1_384, %c0_385] : memref<2x10x10x128xf32, #tpu.memory_space<vmem>>, vector<2x8x8x128xf32>
    %301 = vector.shape_cast %300 : vector<2x8x8x128xf32> to vector<128x128xf32>
    %c1_386 = arith.constant 1 : index
    %c7_387 = arith.constant 7 : index
    %c0_388 = arith.constant 0 : index
    %c0_389 = arith.constant 0 : index
    %302 = vector.load %arg6[%c1_386, %c7_387, %c0_388, %c0_389] : memref<2x9x128x128xf32, #tpu.memory_space<vmem>>, vector<1x1x128x128xf32>
    %303 = vector.shape_cast %302 : vector<1x1x128x128xf32> to vector<128x128xf32>
    %cst_390 = arith.constant dense<0.000000e+00> : vector<128x128xf32>
    %304 = tpu.matmul %301, %303, %cst_390 {dimension_numbers = #tpu.dot_dimension_numbers<[1], [0], [0], [1], [0, 0, 1, 1], [], []>} : vector<128x128xf32>, vector<128x128xf32>, vector<128x128xf32> -> vector<128x128xf32>
    %305 = arith.addf %299, %304 : vector<128x128xf32>
    %c0_391 = arith.constant 0 : index
    %c2_392 = arith.constant 2 : index
    %c2_393 = arith.constant 2 : index
    %c0_394 = arith.constant 0 : index
    %306 = vector.load %arg11[%c0_391, %c2_392, %c2_393, %c0_394] : memref<2x10x10x128xf32, #tpu.memory_space<vmem>>, vector<2x8x8x128xf32>
    %307 = vector.shape_cast %306 : vector<2x8x8x128xf32> to vector<128x128xf32>
    %c1_395 = arith.constant 1 : index
    %c8_396 = arith.constant 8 : index
    %c0_397 = arith.constant 0 : index
    %c0_398 = arith.constant 0 : index
    %308 = vector.load %arg6[%c1_395, %c8_396, %c0_397, %c0_398] : memref<2x9x128x128xf32, #tpu.memory_space<vmem>>, vector<1x1x128x128xf32>
    %309 = vector.shape_cast %308 : vector<1x1x128x128xf32> to vector<128x128xf32>
    %cst_399 = arith.constant dense<0.000000e+00> : vector<128x128xf32>
    %310 = tpu.matmul %307, %309, %cst_399 {dimension_numbers = #tpu.dot_dimension_numbers<[1], [0], [0], [1], [0, 0, 1, 1], [], []>} : vector<128x128xf32>, vector<128x128xf32>, vector<128x128xf32> -> vector<128x128xf32>
    %311 = arith.addf %305, %310 : vector<128x128xf32>
    %c1_400 = arith.constant 1 : index
    %c0_401 = arith.constant 0 : index
    %c0_402 = arith.constant 0 : index
    %312 = vector.load %arg7[%c1_400, %c0_401, %c0_402] : memref<2x1x128xf32, #tpu.memory_space<vmem>>, vector<1x1x128xf32>
    %313 = vector.shape_cast %312 : vector<1x1x128xf32> to vector<1x128xf32>
    %314 = vector.broadcast %313 : vector<1x128xf32> to vector<128x128xf32>
    %315 = arith.addf %311, %314 : vector<128x128xf32>
    %cst_403 = arith.constant 0.000000e+00 : f32
    %316 = vector.broadcast %cst_403 : f32 to vector<128x128xf32>
    %317 = arith.maximumf %315, %316 : vector<128x128xf32>
    %c1_404 = arith.constant 1 : index
    %c0_405 = arith.constant 0 : index
    %c0_406 = arith.constant 0 : index
    %318 = vector.load %arg8[%c1_404, %c0_405, %c0_406] : memref<2x128x128xf32, #tpu.memory_space<vmem>>, vector<1x128x128xf32>
    %319 = vector.shape_cast %318 : vector<1x128x128xf32> to vector<128x128xf32>
    %cst_407 = arith.constant dense<0.000000e+00> : vector<128x128xf32>
    %320 = tpu.matmul %317, %319, %cst_407 {dimension_numbers = #tpu.dot_dimension_numbers<[1], [0], [0], [1], [0, 0, 1, 1], [], []>} : vector<128x128xf32>, vector<128x128xf32>, vector<128x128xf32> -> vector<128x128xf32>
    %c1_408 = arith.constant 1 : index
    %c0_409 = arith.constant 0 : index
    %c0_410 = arith.constant 0 : index
    %321 = vector.load %arg9[%c1_408, %c0_409, %c0_410] : memref<2x1x128xf32, #tpu.memory_space<vmem>>, vector<1x1x128xf32>
    %322 = vector.shape_cast %321 : vector<1x1x128xf32> to vector<1x128xf32>
    %323 = vector.broadcast %322 : vector<1x128xf32> to vector<128x128xf32>
    %324 = arith.addf %320, %323 : vector<128x128xf32>
    %325 = arith.addf %324, %254 : vector<128x128xf32>
    %cst_411 = arith.constant 0.000000e+00 : f32
    %326 = vector.broadcast %cst_411 : f32 to vector<128x128xf32>
    %327 = arith.maximumf %325, %326 : vector<128x128xf32>
    %328 = vector.shape_cast %327 : vector<128x128xf32> to vector<2x8x8x128xf32>
    %c0_412 = arith.constant 0 : index
    %c0_413 = arith.constant 0 : index
    %c0_414 = arith.constant 0 : index
    %c0_415 = arith.constant 0 : index
    %329 = vector.load %arg10[%c0_412, %c0_413, %c0_414, %c0_415] : memref<2x8x8x128xf32, #tpu.memory_space<vmem>>, vector<2x8x8x128xf32>
    tpu.vector_store %arg10[%c0_412, %c0_413, %c0_414, %c0_415], %328 {strides = array<i32>} : memref<2x8x8x128xf32, #tpu.memory_space<vmem>>, vector<2x8x8x128xf32>,
    return
  }
  func.func @transform_0(%arg0: i32) -> (i32, i32, i32, i32, i32) {
    %c0_i32 = arith.constant 0 : i32
    %c0_i32_0 = arith.constant 0 : i32
    %c0_i32_1 = arith.constant 0 : i32
    %c0_i32_2 = arith.constant 0 : i32
    %c0_i32_3 = arith.constant 0 : i32
    return %arg0, %c0_i32, %c0_i32_0, %c0_i32_1, %c0_i32_2 : i32, i32, i32, i32, i32
  }
  func.func @transform_1(%arg0: i32) -> (i32, i32, i32) {
    %c0_i32 = arith.constant 0 : i32
    %c0_i32_0 = arith.constant 0 : i32
    %c0_i32_1 = arith.constant 0 : i32
    %c0_i32_2 = arith.constant 0 : i32
    return %c0_i32, %c0_i32_0, %c0_i32_1 : i32, i32, i32
  }
  func.func @transform_2(%arg0: i32) -> (i32, i32) {
    %c0_i32 = arith.constant 0 : i32
    %c0_i32_0 = arith.constant 0 : i32
    %c0_i32_1 = arith.constant 0 : i32
    return %c0_i32, %c0_i32_0 : i32, i32
  }
  func.func @transform_3(%arg0: i32) -> (i32, i32, i32) {
    %c0_i32 = arith.constant 0 : i32
    %c0_i32_0 = arith.constant 0 : i32
    %c0_i32_1 = arith.constant 0 : i32
    %c0_i32_2 = arith.constant 0 : i32
    return %c0_i32, %c0_i32_0, %c0_i32_1 : i32, i32, i32
  }
  func.func @transform_4(%arg0: i32) -> (i32, i32) {
    %c0_i32 = arith.constant 0 : i32
    %c0_i32_0 = arith.constant 0 : i32
    %c0_i32_1 = arith.constant 0 : i32
    return %c0_i32, %c0_i32_0 : i32, i32
  }
  func.func @transform_5(%arg0: i32) -> (i32, i32, i32, i32) {
    %c0_i32 = arith.constant 0 : i32
    %c0_i32_0 = arith.constant 0 : i32
    %c0_i32_1 = arith.constant 0 : i32
    %c0_i32_2 = arith.constant 0 : i32
    %c0_i32_3 = arith.constant 0 : i32
    return %c0_i32, %c0_i32_0, %c0_i32_1, %c0_i32_2 : i32, i32, i32, i32
  }
  func.func @transform_6(%arg0: i32) -> (i32, i32, i32) {
    %c0_i32 = arith.constant 0 : i32
    %c0_i32_0 = arith.constant 0 : i32
    %c0_i32_1 = arith.constant 0 : i32
    %c0_i32_2 = arith.constant 0 : i32
    return %c0_i32, %c0_i32_0, %c0_i32_1 : i32, i32, i32
  }
  func.func @transform_7(%arg0: i32) -> (i32, i32, i32) {
    %c0_i32 = arith.constant 0 : i32
    %c0_i32_0 = arith.constant 0 : i32
    %c0_i32_1 = arith.constant 0 : i32
    %c0_i32_2 = arith.constant 0 : i32
    return %c0_i32, %c0_i32_0, %c0_i32_1 : i32, i32, i32
  }
  func.func @transform_8(%arg0: i32) -> (i32, i32, i32) {
    %c0_i32 = arith.constant 0 : i32
    %c0_i32_0 = arith.constant 0 : i32
    %c0_i32_1 = arith.constant 0 : i32
    %c0_i32_2 = arith.constant 0 : i32
    return %c0_i32, %c0_i32_0, %c0_i32_1 : i32, i32, i32
  }
  func.func @transform_9(%arg0: i32) -> (i32, i32, i32, i32) {
    %c0_i32 = arith.constant 0 : i32
    %c0_i32_0 = arith.constant 0 : i32
    %c0_i32_1 = arith.constant 0 : i32
    %c0_i32_2 = arith.constant 0 : i32
    return %arg0, %c0_i32, %c0_i32_0, %c0_i32_1 : i32, i32, i32, i32
  }
}

</mosaic_0001>

<bundles_post_ra>
// kernel: _lambda_.2
= control target key start
LH: loop header
LB: loop body
LE: loop exit
PB: predicated region body
PF: predicated region fallthrough
CT: control target
= control target key end

     0   :  { %8 = vsyncpa [#allocation3], 0  ;;  %s1468_s0 = inlined_call_operand.hbm [shape: f32[2,256,128], index: 0, kind: input, shape index: {}]   ;;  %s1469_s1 = inlined_call_operand.hbm [shape: f32[128,128], index: 1, kind: input, shape index: {}]   ;;  %s1470_s2 = inlined_call_operand.hbm [shape: f32[1,128], index: 2, kind: input, shape index: {}]   ;;  %s1471_s3 = inlined_call_operand.hbm [shape: f32[2,256,128], index: 3, kind: output, shape index: {}]  }
   0x1   :  { %10 = vsyncpa [#allocation3 + $0x1], 0 }
   0x2   :  { %11 = vsyncpa [#allocation6], 0 }
   0x3   :  { %12 = vsyncpa [#allocation4], 0 }
   0x4   :  { %14 = vsyncpa [#allocation4 + $0x1], 0  ;;  %s1120_s12 = smov 0   ;;  %s1122_s13 = smov 0  }
   0x5   :  { %s1124_s14 = smov 0   ;;  %s1126_s15 = smov 0  }
   0x6 LB: > { %s1141_s16 = sadd.s32 4294967295, %s1090_s15   ;;  %s666_s17 = sadd.s32 4294967294, %s1090_s15   ;;  %s1090_s15 = sphi %s1126_s15, %s1491_s15   ;;  %s1086_s14 = sphi %s1124_s14, %s1490_s14   ;;  %s1082_s13 = sphi %s1122_s13, %s1489_s13   ;;  %s1078_s12 = sphi %s1120_s12, %s1488_s12  }
   0x7   : > { %p40_p0 = scmp.ne.s32.totalorder %s1082_s13, %s1078_s12  ;;  %p1472_p1 = scmp.eq.s32.totalorder %s1141_s16, 0 }
   0x8   : > { %p112_p3 = scmp.eq.s32.totalorder %s666_s17, 1  ;;  %p667_p5 = scmp.ge.s32.totalorder %s1090_s15, 1 }
   0x9   : > { %p1150_p4 = por %p1472_p1, %p40_p0  ;;  %p119_p7 = scmp.lt.s32.totalorder %s1090_s15, 3 }
   0xa   : > { %p1155_p6 = por %p112_p3, %p40_p0  ;;  %s1092_s21 = smov [#allocation5]  }
   0xb   : > { %s1475_s18 = scalar_select %p1150_p4, 1, 0 }
   0xc   : > { %s1476_s19 = scalar_select %p1155_p6, 1, 0 }
   0xd   : > { %p1160_p8 = pnand %p667_p5, %p119_p7  ;;  %s131_s22 = sshll.u32 %s1092_s21, 4  ;;  %s1164_s22 = int_to_ptr.vmem [resolvable:$true] %s131_s22 }
   0xe   : > { %s1093_s24 = smov [#allocation7]   ;;  %s934_s28 = scalar_lea.hbm %s1469_s1, 2048 }
   0xf   : > { %p875_p9 = pneg %p1160_p8  ;;  %s145_s25 = sshll.u32 %s1093_s24, 4  ;;  %s1175_s25 = int_to_ptr.vmem [resolvable:$true] %s145_s25 }
  0x10   : > { %p935_p12 = scmp.ne.s32.totalorder %s1469_s1, %s934_s28  ;;  %p941_p5 = scmp.lt.u32.totalorder %s934_s28, %s1469_s1 }
  0x11   : > { %p1171_p11 = pnand %p875_p9, %p1472_p1 }
  0x13   : > { %p936_p13 = pneg %p1171_p11 }
  0x15   : > { %p937_p0 = pnand %p936_p13, %p935_p12 }
  0x17   : > { %p938_p3 = pneg %p937_p0 }
  0x19   : > { %p943_p7 = pnand %p941_p5, %p938_p3 }
  0x1b   : > { %946 = shalt.err (!%p943_p7)
}
  0x1c   : > { %s947_s6 = scalar_lea.vmem %s1164_s22, 2048  ;;  %p955_p2 = scmp.lt.s32.totalorder %s1164_s22, %s1164_s22 }
  0x1d   : > { %p948_p9 = scmp.ne.s32.totalorder %s1164_s22, %s947_s6  ;;  %p956_p12 = scmp.lt.s32.totalorder %s947_s6, %s947_s6 }
  0x1f   : > { %p950_p10 = pnand %p948_p9, %p936_p13  ;;  %p957_p0 = por %p956_p12, %p955_p2 }
  0x21   : > { %p951_p1 = pneg %p950_p10 }
  0x23   : > { %p958_p6 = pnand %p957_p0, %p951_p1 }
  0x25   : > { %961 = shalt.err (!%p958_p6)
}
  0x26   : > { %s1094_s7 = smov 128   ;;  %s1095_s8 = smov 8  }
  0x27   : > { %878 = dma.hbm_to_vmem [thread:$0]  (!%p1171_p11), %s1469_s1, 2048, %s1164_s22, [#allocation6], %s1094_s7, %s1094_s7, %s1095_s8  }
  0x28   : > { %s962_s21 = scalar_lea.hbm %s1470_s2, 16 }
  0x29   : > { %p963_p1 = scmp.ne.s32.totalorder %s1470_s2, %s962_s21  ;;  %p969_p10 = scmp.lt.u32.totalorder %s962_s21, %s1470_s2 }
  0x2b   : > { %p965_p2 = pnand %p963_p1, %p936_p13 }
  0x2d   : > { %p966_p6 = pneg %p965_p2 }
  0x2f   : > { %p971_p3 = pnand %p969_p10, %p966_p6 }
  0x31   : > { %974 = shalt.err (!%p971_p3)
}
  0x32   : > { %s975_s22 = scalar_lea.vmem %s1175_s25, 16  ;;  %s982_s29 = scalar_lea.vmem %s1175_s25, 32 }
  0x33   : > { %p976_p5 = scmp.ne.s32.totalorder %s1175_s25, %s975_s22  ;;  %p983_p12 = scmp.lt.s32.totalorder %s1175_s25, %s1175_s25 }
  0x34   : > { %p984_p0 = scmp.lt.s32.totalorder %s982_s29, %s975_s22 }
  0x35   : > { %p978_p7 = pnand %p976_p5, %p936_p13 }
  0x36   : > { %p985_p1 = por %p984_p0, %p983_p12 }
  0x37   : > { %p979_p9 = pneg %p978_p7 }
  0x39   : > { %p986_p2 = pnand %p985_p1, %p979_p9 }
  0x3b   : > { %989 = shalt.err (!%p986_p2)
}
  0x3c   : > { %881 = dma.hbm_to_vmem [thread:$0]  (!%p1171_p11), %s1470_s2, 16, %s1175_s25, [#allocation6]  }
  0x3d   : > { %s1234_s5 = sadd.s32 1, %s1090_s15   ;;  %s27_s23 = sadd.s32 1, %s1086_s14 }
  0x3e   : > { %s24_s6 = ssub.s32 %s1090_s15, %s1234_s5  ;;  %p34_p13 = scmp.ne.s32.totalorder %s1086_s14, %s1082_s13 }
  0x3f   : > { %p25_p6 = scmp.eq.s32.totalorder %s24_s6, 0  ;;  %p35_p10 = scmp.eq.s32.totalorder %s1090_s15, 0 }
  0x40   : > { %p1479_p3 = scmp.eq.s32.totalorder %s1141_s16, 1  ;;  %p892_p7 = scmp.lt.s32.totalorder %s1090_s15, 2 }
  0x41   : > { %s1250_s10 = scalar_select %p25_p6, %s1086_s14, %s27_s23  }
  0x42   : > { %p1244_p5 = por %p1479_p3, %p34_p13  ;;  %p36_p9 = por %p35_p10, %p34_p13 }
  0x43   : > { %s156_s11 = sand.u32 1, %s1086_s14   ;;  %s685_s25 = sshll.u32 %s1090_s15, 12 }
  0x44   : > { %s1480_s9 = scalar_select %p1244_p5, 1, 0 }
  0x45   : > { %s671_s17 = sshll.u32 %s156_s11, 8  ;;  %s1257_s26 = scalar_lea.hbm %s1468_s0, %s685_s25 }
  0x46   : > { %s160_s27 = scalar_lea.vmem [#allocation2], %s671_s17  ;;  %p1261_p11 = pnand %p892_p7, %p36_p9 }
  0x47   : > { %s167_s28 = sshll.u32 %s160_s27, 4  ;;  %s1265_s29 = scalar_lea.sflag [#allocation3], %s156_s11  ;;  %s1259_s28 = int_to_ptr.vmem [resolvable:$true] %s167_s28 }
  0x48   : > { %s990_s30 = scalar_lea.hbm %s1257_s26, 4096  ;;  %p992_p0 = pneg %p1261_p11 }
  0x49   : > { %p991_p12 = scmp.ne.s32.totalorder %s1257_s26, %s990_s30  ;;  %s995_s6 = scalar_lea.hbm %s1468_s0, 8192 }
  0x4a   : > { %p996_p13 = scmp.lt.u32.totalorder %s1257_s26, %s1468_s0  ;;  %p997_p6 = scmp.lt.u32.totalorder %s995_s6, %s990_s30 }
  0x4b   : > { %p993_p1 = pnand %p992_p0, %p991_p12  ;;  %p999_p3 = scmp.lt.u32.totalorder %s990_s30, %s1257_s26 }
  0x4c   : > { %p998_p10 = por %p997_p6, %p996_p13 }
  0x4d   : > { %p994_p2 = pneg %p993_p1 }
  0x4e   : > { %p1000_p7 = por %p999_p3, %p998_p10 }
  0x50   : > { %p1001_p9 = pnand %p1000_p7, %p994_p2 }
  0x52   : > { %1004 = shalt.err (!%p1001_p9)
}
  0x53   : > { %s1005_s11 = scalar_lea.vmem %s1259_s28, 4096  ;;  %s1096_s21 = smov [#allocation2]  }
  0x54   : > { %p1006_p12 = scmp.ne.s32.totalorder %s1259_s28, %s1005_s11  ;;  %s1010_s24 = sshll.u32 %s1096_s21, 4  ;;  %s1011_s24 = int_to_ptr.vmem [resolvable:$false] %s1010_s24 }
  0x55   : > { %s1012_s27 = scalar_lea.vmem %s1011_s24, 8192  ;;  %p1013_p4 = scmp.lt.s32.totalorder %s1259_s28, %s1011_s24 }
  0x56   : > { %p1008_p1 = pnand %p1006_p12, %p992_p0  ;;  %p1014_p13 = scmp.lt.s32.totalorder %s1012_s27, %s1005_s11 }
  0x58   : > { %p1009_p5 = pneg %p1008_p1  ;;  %p1015_p6 = por %p1014_p13, %p1013_p4 }
  0x5a   : > { %p1016_p10 = pnand %p1015_p6, %p1009_p5 }
  0x5c   : > { %1019 = shalt.err (!%p1016_p10)
}
  0x5d   : > { %885 = dma.hbm_to_vmem [thread:$0]  (!%p1261_p11), %s1257_s26, 4096, %s1259_s28, %s1265_s29, %s1094_s7, %s1094_s7, %s1095_s8  }
  0x5e   : > { %179 = sbr.rel (%p1160_p8) target bundleno = 400 (0x190), region = 32  ;;  %s1299_s30 = sand.u32 (!%p1160_p8), 1, %s1082_s13  }
  0x5f   : > { %s675_s4 = sshll.u32 (!%p1160_p8), %s1299_s30, 8  ;;  %s182_s23 = scalar_lea.sflag (!%p1160_p8), [#allocation3], %s1299_s30 }
  0x60   : > { %s1305_s22 = scalar_lea.vmem (!%p1160_p8), [#allocation2], %s675_s4  ;;  %p1482_p4 = scmp.ne.s32.totalorder (!%p1160_p8), %s1475_s18, 0 }
  0x65   : > { %1065 = dma.done.wait (%p1482_p4), %s182_s23, 4096  }
  0x66   : > { %1067 = vsyncadd (%p1482_p4), %s182_s23, 4294963200  ;;  %p1483_p5 = scmp.eq.s32.totalorder %s1141_s16, 0 }
  0x68   : > { %1069 = dma.done.wait (%p1483_p5), [#allocation6], 2064   ;;  %p1484_p8 = pmov %p1483_p5 }
  0x69   : > { %v248_v0 = vld [vmem:[#allocation5] sm:$0xff]  ;;  %v249_v1 = vld [vmem:[#allocation5 + $0x8] sm:$0xff]  ;;  %v250_v2 = vld [vmem:[#allocation5 + $0x10] sm:$0xff]  ;;  %s1355_s18 = scalar_lea.vmem [#allocation8], %s675_s4  ;;  %s686_s20 = sshll.u32 %s1141_s16, 12 }
  0x6a   : > { %1071 = vsyncadd (%p1484_p8), [#allocation6], 4294965232  ;;  %v815_v3 = vpack.c.bf16 %v249_v1, %v248_v0  ;;  %v251_v4 = vld [vmem:[#allocation5 + $0x18] sm:$0xff]  ;;  %v252_v6 = vld [vmem:[#allocation5 + $0x20] sm:$0xff]  ;;  %s574_s7 = sshll.u32 %s1355_s18, 4  ;;  %s1418_s26 = scalar_lea.hbm %s1471_s3, %s686_s20  ;;  %s1420_s7 = int_to_ptr.vmem [resolvable:$true] %s574_s7 }
  0x6b   : > { %v819_v5 = vpack.c.bf16 %v251_v4, %v250_v2  ;;  %v253_v7 = vld [vmem:[#allocation5 + $0x28] sm:$0xff]  ;;  %v216_v9 = vld [vmem:[%s1305_s22] sm:$0xff]  ;;  %v254_v11 = vld [vmem:[#allocation5 + $0x30] sm:$0xff]  ;;  %s561_s28 = scalar_lea.sflag [#allocation4], %s1299_s30  ;;  %s1020_s29 = scalar_lea.vmem %s1420_s7, 4096 }
  0x6c   : > { %816 = vmatprep.subr.bf16.mxu0 %v815_v3  ;;  %847 = vmatprep.subr.bf16.mxu1 %v815_v3  ;;  %v823_v8 = vpack.c.bf16 %v253_v7, %v252_v6  ;;  %v232_v10 = vld [vmem:[%s1305_s22 + $0x80] sm:$0xff]  ;;  %v255_v12 = vld [vmem:[#allocation5 + $0x38] sm:$0xff]  ;;  %v257_v15 = vld [vmem:[#allocation5 + $0x48] sm:$0xff]  ;;  %p1021_p11 = scmp.ne.s32.totalorder %s1420_s7, %s1020_s29  ;;  %p1485_p0 = scmp.ne.s32.totalorder %s1480_s9, 0 }
  0x6d   : > { %818 = vmatpush3.bf16.msra.mxu0 %v815_v3  ;;  %855 = vmatpush3.bf16.msra.mxu1 %v815_v3  ;;  %v827_v13 = vpack.c.bf16 %v255_v12, %v254_v11  ;;  %v256_v14 = vld [vmem:[#allocation5 + $0x40] sm:$0xff]  ;;  %v258_v17 = vld [vmem:[#allocation5 + $0x50] sm:$0xff]  ;;  %v259_v18 = vld [vmem:[#allocation5 + $0x58] sm:$0xff]  ;;  %s1097_s6 = smov [#allocation8]  }
  0x6e   : > { %820 = vmatprep.subr.bf16.mxu0 %v819_v5  ;;  %848 = vmatprep.subr.bf16.mxu1 %v819_v5  ;;  %v831_v16 = vpack.c.bf16 %v257_v15, %v256_v14  ;;  %v835_v19 = vpack.c.bf16 %v259_v18, %v258_v17  ;;  %v260_v20 = vld [vmem:[#allocation5 + $0x60] sm:$0xff]  ;;  %v261_v21 = vld [vmem:[#allocation5 + $0x68] sm:$0xff]  ;;  %v262_v23 = vld [vmem:[#allocation5 + $0x70] sm:$0xff]  ;;  %p1022_p2 = pnand %p1021_p11, %p1485_p0  ;;  %s1024_s17 = sshll.u32 %s1097_s6, 4  ;;  %s1025_s17 = int_to_ptr.vmem [resolvable:$false] %s1024_s17 }
  0x6f   : > { %767 = vmatprep.mubr.f32.mxu0 %v216_v9  ;;  %791 = vmatprep.mubr.f32.mxu1 %v232_v10  ;;  %v839_v22 = vpack.c.bf16 %v261_v21, %v260_v20  ;;  %v263_v24 = vld [vmem:[#allocation5 + $0x78] sm:$0xff]  ;;  %v217_v26 = vld [vmem:[%s1305_s22 + $0x8] sm:$0xff]  ;;  %v218_v28 = vld [vmem:[%s1305_s22 + $0x10] sm:$0xff]  ;;  %s1026_s25 = scalar_lea.vmem %s1025_s17, 8192  ;;  %p1027_p7 = scmp.lt.s32.totalorder %s1420_s7, %s1025_s17 }
  0x70   : > { %v843_v25 = vpack.c.bf16 %v263_v24, %v262_v23  ;;  %v233_v27 = vld [vmem:[%s1305_s22 + $0x88] sm:$0xff]  ;;  %v234_v29 = vld [vmem:[%s1305_s22 + $0x90] sm:$0xff]  ;;  %v219_v30 = vld [vmem:[%s1305_s22 + $0x18] sm:$0xff]  ;;  %p1023_p3 = pneg %p1022_p2  ;;  %p1028_p9 = scmp.lt.s32.totalorder %s1026_s25, %s1020_s29 }
  0x71   : > { %822 = vmatpush3.bf16.msra.mxu0 %v819_v5  ;;  %856 = vmatpush3.bf16.msra.mxu1 %v819_v5  ;;  %v235_v31 = vld [vmem:[%s1305_s22 + $0x98] sm:$0xff]  ;;  %v220_v32 = vld [vmem:[%s1305_s22 + $0x20] sm:$0xff]  ;;  %v221_v34 = vld [vmem:[%s1305_s22 + $0x28] sm:$0xff] }
  0x72   : > { %824 = vmatprep.subr.bf16.mxu0 %v823_v8  ;;  %849 = vmatprep.subr.bf16.mxu1 %v823_v8  ;;  %v236_v33 = vld [vmem:[%s1305_s22 + $0xa0] sm:$0xff]  ;;  %v237_v35 = vld [vmem:[%s1305_s22 + $0xa8] sm:$0xff]  ;;  %v222_v36 = vld [vmem:[%s1305_s22 + $0x30] sm:$0xff]  ;;  %p1029_p12 = por %p1028_p9, %p1027_p7 }
  0x73   : > { %v238_v37 = vld [vmem:[%s1305_s22 + $0xb0] sm:$0xff]  ;;  %v223_v38 = vld [vmem:[%s1305_s22 + $0x38] sm:$0xff]  ;;  %v224_v40 = vld [vmem:[%s1305_s22 + $0x40] sm:$0xff] }
  0x74   : > { %v239_v39 = vld [vmem:[%s1305_s22 + $0xb8] sm:$0xff]  ;;  %v240_v41 = vld [vmem:[%s1305_s22 + $0xc0] sm:$0xff]  ;;  %v225_v42 = vld [vmem:[%s1305_s22 + $0x48] sm:$0xff]  ;;  %p1030_p1 = pnand %p1029_p12, %p1023_p3 }
  0x75   : > { %826 = vmatpush3.bf16.msra.mxu0 %v823_v8  ;;  %857 = vmatpush3.bf16.msra.mxu1 %v823_v8  ;;  %v241_v43 = vld [vmem:[%s1305_s22 + $0xc8] sm:$0xff]  ;;  %v226_v44 = vld [vmem:[%s1305_s22 + $0x50] sm:$0xff]  ;;  %v227_v46 = vld [vmem:[%s1305_s22 + $0x58] sm:$0xff] }
  0x76   : > { %828 = vmatprep.subr.bf16.mxu0 %v827_v13  ;;  %850 = vmatprep.subr.bf16.mxu1 %v827_v13  ;;  %v242_v45 = vld [vmem:[%s1305_s22 + $0xd0] sm:$0xff]  ;;  %v243_v47 = vld [vmem:[%s1305_s22 + $0xd8] sm:$0xff]  ;;  %v228_v48 = vld [vmem:[%s1305_s22 + $0x60] sm:$0xff] }
  0x77   : > { %v244_v49 = vld [vmem:[%s1305_s22 + $0xe0] sm:$0xff]  ;;  %v229_v50 = vld [vmem:[%s1305_s22 + $0x68] sm:$0xff]  ;;  %v230_v52 = vld [vmem:[%s1305_s22 + $0x70] sm:$0xff] }
  0x78   : > { %v245_v51 = vld [vmem:[%s1305_s22 + $0xe8] sm:$0xff]  ;;  %v246_v53 = vld [vmem:[%s1305_s22 + $0xf0] sm:$0xff]  ;;  %v231_v54 = vld [vmem:[%s1305_s22 + $0x78] sm:$0xff] }
  0x79   : > { %830 = vmatpush3.bf16.msra.mxu0 %v827_v13  ;;  %858 = vmatpush3.bf16.msra.mxu1 %v827_v13  ;;  %v247_v55 = vld [vmem:[%s1305_s22 + $0xf8] sm:$0xff]  ;;  %v1347_v56 = vld [vmem:[#allocation7] ss:$0 sm:$0xff] }
  0x7a   : > { %832 = vmatprep.subr.bf16.mxu0 %v831_v16  ;;  %851 = vmatprep.subr.bf16.mxu1 %v831_v16 }
  0x7d   : > { %834 = vmatpush3.bf16.msra.mxu0 %v831_v16  ;;  %859 = vmatpush3.bf16.msra.mxu1 %v831_v16 }
  0x7e   : > { %836 = vmatprep.subr.bf16.mxu0 %v835_v19  ;;  %852 = vmatprep.subr.bf16.mxu1 %v835_v19 }
  0x81   : > { %838 = vmatpush3.bf16.msra.mxu0 %v835_v19  ;;  %860 = vmatpush3.bf16.msra.mxu1 %v835_v19 }
  0x82   : > { %840 = vmatprep.subr.bf16.mxu0 %v839_v22  ;;  %853 = vmatprep.subr.bf16.mxu1 %v839_v22 }
  0x85   : > { %842 = vmatpush3.bf16.msra.mxu0 %v839_v22  ;;  %861 = vmatpush3.bf16.msra.mxu1 %v839_v22 }
  0x86   : > { %844 = vmatprep.subr.bf16.mxu0 %v843_v25  ;;  %854 = vmatprep.subr.bf16.mxu1 %v843_v25 }
  0x89   : > { %846 = vmatpush3.bf16.msra.mxu0 %v843_v25  ;;  %862 = vmatpush3.bf16.msra.mxu1 %v843_v25 }
  0x8c   : > { %768 = vmatmul.mubr.f32.vlgmr.msra.gmra.mrb[0].mxu0 %v217_v26  ;;  %792 = vmatmul.mubr.f32.vlgmr.msra.gmra.mrb[0].mxu1 %v233_v27 }
  0x8d   : > { %770 = vmatprep.mubr.f32.mxu0 %v218_v28  ;;  %794 = vmatprep.mubr.f32.mxu1 %v234_v29 }
  0x90   : > { %771 = vmatmul.mubr.f32.gmra.mrb[2].mxu0 %v219_v30  ;;  %795 = vmatmul.mubr.f32.gmra.mrb[2].mxu1 %v235_v31 }
  0x91   : > { %773 = vmatprep.mubr.f32.mxu0 %v220_v32  ;;  %797 = vmatprep.mubr.f32.mxu1 %v236_v33 }
  0x94   : > { %774 = vmatmul.mubr.f32.gmra.mrb[4].mxu0 %v221_v34  ;;  %798 = vmatmul.mubr.f32.gmra.mrb[4].mxu1 %v237_v35 }
  0x95   : > { %776 = vmatprep.mubr.f32.mxu0 %v222_v36  ;;  %800 = vmatprep.mubr.f32.mxu1 %v238_v37 }
  0x98   : > { %777 = vmatmul.mubr.f32.gmra.mrb[6].mxu0 %v223_v38  ;;  %801 = vmatmul.mubr.f32.gmra.mrb[6].mxu1 %v239_v39 }
  0x99   : > { %779 = vmatprep.mubr.f32.mxu0 %v224_v40  ;;  %803 = vmatprep.mubr.f32.mxu1 %v240_v41 }
  0x9c   : > { %780 = vmatmul.mubr.f32.gmra.mrb[8].mxu0 %v225_v42  ;;  %804 = vmatmul.mubr.f32.gmra.mrb[8].mxu1 %v241_v43 }
  0x9d   : > { %782 = vmatprep.mubr.f32.mxu0 %v226_v44  ;;  %806 = vmatprep.mubr.f32.mxu1 %v242_v45 }
  0xa0   : > { %783 = vmatmul.mubr.f32.gmra.mrb[10].mxu0 %v227_v46  ;;  %807 = vmatmul.mubr.f32.gmra.mrb[10].mxu1 %v243_v47 }
  0xa1   : > { %785 = vmatprep.mubr.f32.mxu0 %v228_v48  ;;  %809 = vmatprep.mubr.f32.mxu1 %v244_v49 }
  0xa4   : > { %786 = vmatmul.mubr.f32.gmra.mrb[12].mxu0 %v229_v50  ;;  %810 = vmatmul.mubr.f32.gmra.mrb[12].mxu1 %v245_v51 }
  0xa5   : > { %788 = vmatprep.mubr.f32.mxu0 %v230_v52  ;;  %812 = vmatprep.mubr.f32.mxu1 %v246_v53 }
  0xa8   : > { %789 = vmatmul.mubr.f32.gmra.mrb[14].mxu0 %v231_v54  ;;  %813 = vmatmul.mubr.f32.gmra.mrb[14].mxu1 %v247_v55 }
 0x15f   : > { %v769_v57 = vpop.f32.mrb[0].mxu0  ;;  %v793_v58 = vpop.f32.mrb[0].mxu1 }
 0x160   : > { %v343_v59 = vadd.f32 %v769_v57, %v1347_v56  ;;  %v423_v60 = vadd.f32 %v793_v58, %v1347_v56  ;;  %v337_v61 = vpop.f32.mrb[1].mxu0  ;;  %v417_v62 = vpop.f32.mrb[1].mxu1 }
 0x161   : > { %v338_v63 = vadd.f32 %v1347_v56, %v337_v61  ;;  %v418_v0 = vadd.f32 %v1347_v56, %v417_v62 }
 0x162   : > { %v497_v1 = vmax.f32 %v343_v59, 0.0  ;;  %v513_v2 = vmax.f32 %v423_v60, 0.0 }
 0x163   : > { %v496_v3 = vmax.f32 %v338_v63, 0.0  ;;  %v512_v4 = vmax.f32 %v418_v0, 0.0  ;;  %v772_v5 = vpop.f32.mrb[2].mxu0  ;;  %v796_v6 = vpop.f32.mrb[2].mxu1 }
 0x164   : > { %529 = vst [vmem:[%s1355_s18 + $0x8] sm:$0xff] %v497_v1  ;;  %545 = vst [vmem:[%s1355_s18 + $0x88] sm:$0xff] %v513_v2  ;;  %v353_v7 = vadd.f32 %v772_v5, %v1347_v56  ;;  %v433_v8 = vadd.f32 %v796_v6, %v1347_v56  ;;  %v347_v9 = vpop.f32.mrb[3].mxu0  ;;  %v427_v10 = vpop.f32.mrb[3].mxu1 }
 0x165   : > { %528 = vst [vmem:[%s1355_s18] sm:$0xff] %v496_v3  ;;  %544 = vst [vmem:[%s1355_s18 + $0x80] sm:$0xff] %v512_v4  ;;  %v348_v11 = vadd.f32 %v1347_v56, %v347_v9  ;;  %v428_v12 = vadd.f32 %v1347_v56, %v427_v10 }
 0x166   : > { %v499_v13 = vmax.f32 %v353_v7, 0.0  ;;  %v515_v14 = vmax.f32 %v433_v8, 0.0 }
 0x167   : > { %v498_v15 = vmax.f32 %v348_v11, 0.0  ;;  %v514_v16 = vmax.f32 %v428_v12, 0.0  ;;  %v775_v17 = vpop.f32.mrb[4].mxu0  ;;  %v799_v18 = vpop.f32.mrb[4].mxu1 }
 0x168   : > { %531 = vst [vmem:[%s1355_s18 + $0x18] sm:$0xff] %v499_v13  ;;  %547 = vst [vmem:[%s1355_s18 + $0x98] sm:$0xff] %v515_v14  ;;  %v363_v19 = vadd.f32 %v775_v17, %v1347_v56  ;;  %v443_v20 = vadd.f32 %v799_v18, %v1347_v56  ;;  %v357_v21 = vpop.f32.mrb[5].mxu0  ;;  %v437_v22 = vpop.f32.mrb[5].mxu1 }
 0x169   : > { %530 = vst [vmem:[%s1355_s18 + $0x10] sm:$0xff] %v498_v15  ;;  %546 = vst [vmem:[%s1355_s18 + $0x90] sm:$0xff] %v514_v16  ;;  %v358_v23 = vadd.f32 %v1347_v56, %v357_v21  ;;  %v438_v24 = vadd.f32 %v1347_v56, %v437_v22 }
 0x16a   : > { %v501_v25 = vmax.f32 %v363_v19, 0.0  ;;  %v517_v26 = vmax.f32 %v443_v20, 0.0 }
 0x16b   : > { %v500_v27 = vmax.f32 %v358_v23, 0.0  ;;  %v516_v28 = vmax.f32 %v438_v24, 0.0  ;;  %v778_v29 = vpop.f32.mrb[6].mxu0  ;;  %v802_v30 = vpop.f32.mrb[6].mxu1 }
 0x16c   : > { %533 = vst [vmem:[%s1355_s18 + $0x28] sm:$0xff] %v501_v25  ;;  %549 = vst [vmem:[%s1355_s18 + $0xa8] sm:$0xff] %v517_v26  ;;  %v373_v31 = vadd.f32 %v778_v29, %v1347_v56  ;;  %v453_v32 = vadd.f32 %v802_v30, %v1347_v56  ;;  %v367_v33 = vpop.f32.mrb[7].mxu0  ;;  %v447_v34 = vpop.f32.mrb[7].mxu1 }
 0x16d   : > { %532 = vst [vmem:[%s1355_s18 + $0x20] sm:$0xff] %v500_v27  ;;  %548 = vst [vmem:[%s1355_s18 + $0xa0] sm:$0xff] %v516_v28  ;;  %v368_v35 = vadd.f32 %v1347_v56, %v367_v33  ;;  %v448_v36 = vadd.f32 %v1347_v56, %v447_v34 }
 0x16e   : > { %v503_v37 = vmax.f32 %v373_v31, 0.0  ;;  %v519_v38 = vmax.f32 %v453_v32, 0.0 }
 0x16f   : > { %v502_v39 = vmax.f32 %v368_v35, 0.0  ;;  %v518_v40 = vmax.f32 %v448_v36, 0.0  ;;  %v781_v41 = vpop.f32.mrb[8].mxu0  ;;  %v805_v42 = vpop.f32.mrb[8].mxu1 }
 0x170   : > { %535 = vst [vmem:[%s1355_s18 + $0x38] sm:$0xff] %v503_v37  ;;  %551 = vst [vmem:[%s1355_s18 + $0xb8] sm:$0xff] %v519_v38  ;;  %v383_v43 = vadd.f32 %v781_v41, %v1347_v56  ;;  %v463_v44 = vadd.f32 %v805_v42, %v1347_v56  ;;  %v377_v45 = vpop.f32.mrb[9].mxu0  ;;  %v457_v46 = vpop.f32.mrb[9].mxu1 }
 0x171   : > { %534 = vst [vmem:[%s1355_s18 + $0x30] sm:$0xff] %v502_v39  ;;  %550 = vst [vmem:[%s1355_s18 + $0xb0] sm:$0xff] %v518_v40  ;;  %v378_v47 = vadd.f32 %v1347_v56, %v377_v45  ;;  %v458_v48 = vadd.f32 %v1347_v56, %v457_v46 }
 0x172   : > { %v505_v49 = vmax.f32 %v383_v43, 0.0  ;;  %v521_v50 = vmax.f32 %v463_v44, 0.0 }
 0x173   : > { %v504_v51 = vmax.f32 %v378_v47, 0.0  ;;  %v520_v52 = vmax.f32 %v458_v48, 0.0  ;;  %v784_v53 = vpop.f32.mrb[10].mxu0  ;;  %v808_v54 = vpop.f32.mrb[10].mxu1 }
 0x174   : > { %537 = vst [vmem:[%s1355_s18 + $0x48] sm:$0xff] %v505_v49  ;;  %553 = vst [vmem:[%s1355_s18 + $0xc8] sm:$0xff] %v521_v50  ;;  %v393_v55 = vadd.f32 %v784_v53, %v1347_v56  ;;  %v473_v57 = vadd.f32 %v808_v54, %v1347_v56  ;;  %v387_v58 = vpop.f32.mrb[11].mxu0  ;;  %v467_v59 = vpop.f32.mrb[11].mxu1 }
 0x175   : > { %536 = vst [vmem:[%s1355_s18 + $0x40] sm:$0xff] %v504_v51  ;;  %552 = vst [vmem:[%s1355_s18 + $0xc0] sm:$0xff] %v520_v52  ;;  %v388_v60 = vadd.f32 %v1347_v56, %v387_v58  ;;  %v468_v61 = vadd.f32 %v1347_v56, %v467_v59 }
 0x176   : > { %v507_v62 = vmax.f32 %v393_v55, 0.0  ;;  %v523_v63 = vmax.f32 %v473_v57, 0.0 }
 0x177   : > { %v506_v0 = vmax.f32 %v388_v60, 0.0  ;;  %v522_v1 = vmax.f32 %v468_v61, 0.0  ;;  %v787_v2 = vpop.f32.mrb[12].mxu0  ;;  %v811_v3 = vpop.f32.mrb[12].mxu1 }
 0x178   : > { %539 = vst [vmem:[%s1355_s18 + $0x58] sm:$0xff] %v507_v62  ;;  %555 = vst [vmem:[%s1355_s18 + $0xd8] sm:$0xff] %v523_v63  ;;  %v403_v4 = vadd.f32 %v787_v2, %v1347_v56  ;;  %v483_v5 = vadd.f32 %v811_v3, %v1347_v56  ;;  %v397_v6 = vpop.f32.mrb[13].mxu0  ;;  %v477_v7 = vpop.f32.mrb[13].mxu1 }
 0x179   : > { %538 = vst [vmem:[%s1355_s18 + $0x50] sm:$0xff] %v506_v0  ;;  %554 = vst [vmem:[%s1355_s18 + $0xd0] sm:$0xff] %v522_v1  ;;  %v398_v8 = vadd.f32 %v1347_v56, %v397_v6  ;;  %v478_v9 = vadd.f32 %v1347_v56, %v477_v7 }
 0x17a   : > { %v509_v10 = vmax.f32 %v403_v4, 0.0  ;;  %v525_v11 = vmax.f32 %v483_v5, 0.0 }
 0x17b   : > { %v508_v12 = vmax.f32 %v398_v8, 0.0  ;;  %v524_v13 = vmax.f32 %v478_v9, 0.0  ;;  %v790_v14 = vpop.f32.mrb[14].mxu0  ;;  %v814_v15 = vpop.f32.mrb[14].mxu1 }
 0x17c   : > { %541 = vst [vmem:[%s1355_s18 + $0x68] sm:$0xff] %v509_v10  ;;  %557 = vst [vmem:[%s1355_s18 + $0xe8] sm:$0xff] %v525_v11  ;;  %v413_v16 = vadd.f32 %v790_v14, %v1347_v56  ;;  %v493_v17 = vadd.f32 %v814_v15, %v1347_v56  ;;  %v407_v18 = vpop.f32.mrb[15].mxu0  ;;  %v487_v19 = vpop.f32.mrb[15].mxu1 }
 0x17d   : > { %540 = vst [vmem:[%s1355_s18 + $0x60] sm:$0xff] %v508_v12  ;;  %556 = vst [vmem:[%s1355_s18 + $0xe0] sm:$0xff] %v524_v13  ;;  %v408_v20 = vadd.f32 %v1347_v56, %v407_v18  ;;  %v488_v21 = vadd.f32 %v1347_v56, %v487_v19 }
 0x17e   : > { %v511_v22 = vmax.f32 %v413_v16, 0.0  ;;  %v527_v23 = vmax.f32 %v493_v17, 0.0 }
 0x17f   : > { %v510_v24 = vmax.f32 %v408_v20, 0.0  ;;  %v526_v25 = vmax.f32 %v488_v21, 0.0 }
 0x180   : > { %543 = vst [vmem:[%s1355_s18 + $0x78] sm:$0xff] %v511_v22  ;;  %559 = vst [vmem:[%s1355_s18 + $0xf8] sm:$0xff] %v527_v23 }
 0x181   : > { %542 = vst [vmem:[%s1355_s18 + $0x70] sm:$0xff] %v510_v24  ;;  %558 = vst [vmem:[%s1355_s18 + $0xf0] sm:$0xff] %v526_v25 }
 0x182   : > { %1033 = shalt.err (!%p1030_p1)
}
 0x183   : > { %s1034_s11 = scalar_lea.hbm %s1418_s26, 4096  ;;  %s1038_s27 = scalar_lea.hbm %s1471_s3, 8192 }
 0x184   : > { %p1035_p13 = scmp.ne.s32.totalorder %s1418_s26, %s1034_s11  ;;  %p1039_p4 = scmp.lt.u32.totalorder %s1418_s26, %s1471_s3 }
 0x185   : > { %p1040_p5 = scmp.lt.u32.totalorder %s1038_s27, %s1034_s11  ;;  %p1042_p11 = scmp.lt.u32.totalorder %s1034_s11, %s1418_s26 }
 0x186   : > { %p1036_p6 = pnand %p1035_p13, %p1485_p0 }
 0x187   : > { %p1041_p8 = por %p1040_p5, %p1039_p4 }
 0x188   : > { %p1037_p10 = pneg %p1036_p6 }
 0x189   : > { %p1043_p2 = por %p1042_p11, %p1041_p8 }
 0x18b   : > { %p1044_p3 = pnand %p1043_p2, %p1037_p10 }
 0x18d   : > { %1047 = shalt.err (!%p1044_p3)
}
 0x18e   : > { %s1098_s22 = smov 128   ;;  %s1099_s18 = smov 8  }
 0x18f   : > { %873 = dma.vmem_to_hbm [thread:$0]  (%p1485_p0), %s1420_s7, 4096, %s1418_s26, %s561_s28, %s1098_s22, %s1098_s22, %s1099_s18  }
 0x190 PF: > { %s589_s20 = sand.u32 1, %s1078_s12   ;;  %p1486_p7 = scmp.ne.s32.totalorder %s1476_s19, 0 }
 0x191   : > { %p1487_p9 = scmp.ge.s32.totalorder %s1090_s15, 2  ;;  %s590_s16 = scalar_lea.sflag [#allocation4], %s589_s20 }
 0x193   : > { %p887_p12 = pnand %p1487_p9, %p1486_p7 }
 0x195   : > { %1073 = dma.done.wait (!%p887_p12), %s590_s16, 4096  }
 0x196   : > { %1075 = vsyncadd (!%p887_p12), %s590_s16, 4294963200  ;;  %p17_p1 = scmp.ge.s32.totalorder %s1234_s5, 4   ;;  %s1488_s12 = smov %s1082_s13 }
 0x197   : > { %s1489_s13 = smov %s1086_s14  ;;  %s1490_s14 = smov %s1250_s10 }
 0x198   : > { %s1491_s15 = smov %s1234_s5  ;;  %19 = sbr.rel (!%p17_p1) target bundleno = 6 (0x6), region = 85 }
 0x19f   :  { %595 = vsyncpa [#allocation3], 1 }
 0x1a0   :  { %597 = vsyncpa [#allocation3 + $0x1], 1 }
 0x1a1   :  { %598 = vsyncpa [#allocation6], 1 }
 0x1a2   :  { %599 = vsyncpa [#allocation4], 1 }
 0x1a3   :  { %601 = vsyncpa [#allocation4 + $0x1], 1 }

// kernel: _lambda_.3
= control target key start
LH: loop header
LB: loop body
LE: loop exit
PB: predicated region body
PF: predicated region fallthrough
CT: control target
= control target key end

     0   :  { %14 = vsyncpa [#allocation4], 0  ;;  %s16591_s0 = inlined_call_operand.hbm [shape: f32[2,4,9,9,128], index: 0, kind: input, shape index: {}]   ;;  %s16592_s1 = inlined_call_operand.hbm [shape: f32[16,128,128], index: 1, kind: input, shape index: {}]   ;;  %s16593_s2 = inlined_call_operand.hbm [shape: f32[1,128], index: 2, kind: input, shape index: {}]   ;;  %s16594_s3 = inlined_call_operand.hbm [shape: f32[9,128,128], index: 3, kind: input, shape index: {}]   ;;  %s16595_s4 = inlined_call_operand.hbm [shape: f32[1,128], index: 4, kind: input, shape index: {}]   ;;  %s16596_s5 = inlined_call_operand.hbm [shape: f32[2,9,128,128], index: 5, kind: input, shape index: {}]   ;;  %s16597_s6 = inlined_call_operand.hbm [shape: f32[2,1,128], index: 6, kind: input, shape index: {}]   ;;  %s16598_s7 = inlined_call_operand.hbm [shape: f32[2,128,128], index: 7, kind: input, shape index: {}]   ;;  %s16599_s8 = inlined_call_operand.hbm [shape: f32[2,1,128], index: 8, kind: input, shape index: {}]   ;;  %s16600_s9 = inlined_call_operand.hbm [shape: f32[2,8,8,128], index: 9, kind: output, shape index: {}]  }
   0x1   :  { %15 = vsyncpa [#allocation7], 0 }
   0x2   :  { %16 = vsyncpa [#allocation10], 0 }
   0x3   :  { %17 = vsyncpa [#allocation13], 0 }
   0x4   :  { %18 = vsyncpa [#allocation16], 0 }
   0x5   :  { %19 = vsyncpa [#allocation5], 0  ;;  %s15367_s30 = smov [#allocation6]   ;;  %s15368_s11 = smov [#allocation9]  }
   0x6   :  { %s37_s10 = sshll.u32 %s15367_s30, 4  ;;  %s59_s12 = sshll.u32 %s15368_s11, 4  ;;  %s38_s10 = int_to_ptr.vmem [resolvable:$true] %s37_s10  ;;  %s15432_s12 = int_to_ptr.vmem [resolvable:$true] %s59_s12 }
   0x7   :  { %s15135_s15 = scalar_lea.hbm %s16592_s1, 32768 }
   0x8   :  { %p15136_p0 = scmp.ne.s32.totalorder %s16592_s1, %s15135_s15  ;;  %p15139_p1 = scmp.lt.u32.totalorder %s15135_s15, %s16592_s1 }
   0xa   :  { %p15141_p2 = pnand %p15139_p1, %p15136_p0 }
   0xc   :  { %15144 = shalt.err (!%p15141_p2)
}
   0xd   :  { %s15145_s20 = scalar_lea.vmem %s38_s10, 32768  ;;  %p15150_p4 = scmp.lt.s32.totalorder %s38_s10, %s38_s10 }
   0xe   :  { %p15146_p3 = scmp.ne.s32.totalorder %s38_s10, %s15145_s20  ;;  %p15151_p5 = scmp.lt.s32.totalorder %s15145_s20, %s15145_s20 }
  0x10   :  { %p15152_p6 = por %p15151_p5, %p15150_p4 }
  0x12   :  { %p15153_p7 = pnand %p15152_p6, %p15146_p3 }
  0x14   :  { %15156 = shalt.err (!%p15153_p7)
}
  0x15   :  { %s15369_s21 = smov 128   ;;  %s15370_s22 = smov 8  }
  0x16   :  { %43 = dma.hbm_to_vmem [thread:$0]  %s16592_s1, 32768, %s38_s10, [#allocation7], %s15369_s21, %s15369_s21, %s15370_s22  }
  0x17   :  { %s15157_s27 = scalar_lea.hbm %s16594_s3, 18432 }
  0x18   :  { %p15158_p8 = scmp.ne.s32.totalorder %s16594_s3, %s15157_s27  ;;  %p15161_p9 = scmp.lt.u32.totalorder %s15157_s27, %s16594_s3 }
  0x1a   :  { %p15163_p10 = pnand %p15161_p9, %p15158_p8 }
  0x1c   :  { %15166 = shalt.err (!%p15163_p10)
}
  0x1d   :  { %s15167_s13 = scalar_lea.vmem %s15432_s12, 18432  ;;  %p15172_p12 = scmp.lt.s32.totalorder %s15432_s12, %s15432_s12 }
  0x1e   :  { %p15168_p11 = scmp.ne.s32.totalorder %s15432_s12, %s15167_s13  ;;  %p15173_p13 = scmp.lt.s32.totalorder %s15167_s13, %s15167_s13 }
  0x20   :  { %p15174_p0 = por %p15173_p13, %p15172_p12 }
  0x22   :  { %p15175_p1 = pnand %p15174_p0, %p15168_p11 }
  0x24   :  { %15178 = shalt.err (!%p15175_p1)
}
  0x25   :  { %65 = dma.hbm_to_vmem [thread:$0]  %s16594_s3, 18432, %s15432_s12, [#allocation10], %s15369_s21, %s15369_s21, %s15370_s22  }
  0x26   :  { %s15371_s14 = smov [#allocation12]   ;;  %s15372_s16 = smov [#allocation15]  }
  0x27   :  { %s81_s15 = sshll.u32 %s15371_s14, 4  ;;  %s105_s17 = sshll.u32 %s15372_s16, 4  ;;  %s82_s15 = int_to_ptr.vmem [resolvable:$true] %s81_s15  ;;  %s15469_s17 = int_to_ptr.vmem [resolvable:$true] %s105_s17 }
  0x28   :  { %s15179_s20 = scalar_lea.hbm %s16596_s5, 36864 }
  0x29   :  { %p15180_p2 = scmp.ne.s32.totalorder %s16596_s5, %s15179_s20  ;;  %p15183_p3 = scmp.lt.u32.totalorder %s15179_s20, %s16596_s5 }
  0x2b   :  { %p15185_p4 = pnand %p15183_p3, %p15180_p2 }
  0x2d   :  { %15188 = shalt.err (!%p15185_p4)
}
  0x2e   :  { %s15189_s3 = scalar_lea.vmem %s82_s15, 36864  ;;  %p15194_p6 = scmp.lt.s32.totalorder %s82_s15, %s82_s15 }
  0x2f   :  { %p15190_p5 = scmp.ne.s32.totalorder %s82_s15, %s15189_s3  ;;  %p15195_p7 = scmp.lt.s32.totalorder %s15189_s3, %s15189_s3 }
  0x31   :  { %p15196_p8 = por %p15195_p7, %p15194_p6 }
  0x33   :  { %p15197_p9 = pnand %p15196_p8, %p15190_p5 }
  0x35   :  { %15200 = shalt.err (!%p15197_p9)
}
  0x36   :  { %87 = dma.hbm_to_vmem [thread:$0]  %s16596_s5, 36864, %s82_s15, [#allocation13], %s15369_s21, %s15369_s21, %s15370_s22  }
  0x37   :  { %s15201_s30 = scalar_lea.hbm %s16598_s7, 4096 }
  0x38   :  { %p15202_p10 = scmp.ne.s32.totalorder %s16598_s7, %s15201_s30  ;;  %p15205_p11 = scmp.lt.u32.totalorder %s15201_s30, %s16598_s7 }
  0x3a   :  { %p15207_p12 = pnand %p15205_p11, %p15202_p10 }
  0x3c   :  { %15210 = shalt.err (!%p15207_p12)
}
  0x3d   :  { %s15211_s14 = scalar_lea.vmem %s15469_s17, 4096  ;;  %p15216_p0 = scmp.lt.s32.totalorder %s15469_s17, %s15469_s17 }
  0x3e   :  { %p15212_p13 = scmp.ne.s32.totalorder %s15469_s17, %s15211_s14  ;;  %p15217_p1 = scmp.lt.s32.totalorder %s15211_s14, %s15211_s14 }
  0x40   :  { %p15218_p2 = por %p15217_p1, %p15216_p0 }
  0x42   :  { %p15219_p3 = pnand %p15218_p2, %p15212_p13 }
  0x44   :  { %15222 = shalt.err (!%p15219_p3)
}
  0x45   :  { %111 = dma.hbm_to_vmem [thread:$0]  %s16598_s7, 4096, %s15469_s17, [#allocation16], %s15369_s21, %s15369_s21, %s15370_s22  }
  0x46   :  { %s15373_s16 = smov [#allocation3]   ;;  %s15374_s19 = smov [#allocation8]  }
  0x47   :  { %s25_s18 = sshll.u32 %s15373_s16, 4  ;;  %s50_s20 = sshll.u32 %s15374_s19, 4  ;;  %s26_s18 = int_to_ptr.vmem [resolvable:$true] %s25_s18  ;;  %s51_s20 = int_to_ptr.vmem [resolvable:$true] %s50_s20 }
  0x48   :  { %s15223_s25 = scalar_lea.hbm %s16591_s0, 18432 }
  0x49   :  { %p15224_p4 = scmp.ne.s32.totalorder %s16591_s0, %s15223_s25  ;;  %p15227_p5 = scmp.lt.u32.totalorder %s15223_s25, %s16591_s0 }
  0x4b   :  { %p15229_p6 = pnand %p15227_p5, %p15224_p4 }
  0x4d   :  { %15232 = shalt.err (!%p15229_p6)
}
  0x4e   :  { %s15233_s7 = scalar_lea.vmem %s26_s18, 18432  ;;  %p15238_p8 = scmp.lt.s32.totalorder %s26_s18, %s26_s18 }
  0x4f   :  { %p15234_p7 = scmp.ne.s32.totalorder %s26_s18, %s15233_s7  ;;  %p15239_p9 = scmp.lt.s32.totalorder %s15233_s7, %s15233_s7 }
  0x51   :  { %p15240_p10 = por %p15239_p9, %p15238_p8 }
  0x53   :  { %p15241_p11 = pnand %p15240_p10, %p15234_p7 }
  0x55   :  { %15244 = shalt.err (!%p15241_p11)
}
  0x56   :  { %31 = dma.hbm_to_vmem [thread:$0]  %s16591_s0, 18432, %s26_s18, [#allocation4], %s15369_s21, %s15369_s21, %s15370_s22  }
  0x57   :  { %s15245_s11 = scalar_lea.hbm %s16593_s2, 16 }
  0x58   :  { %p15246_p12 = scmp.ne.s32.totalorder %s16593_s2, %s15245_s11  ;;  %p15249_p13 = scmp.lt.u32.totalorder %s15245_s11, %s16593_s2 }
  0x5a   :  { %p15251_p0 = pnand %p15249_p13, %p15246_p12 }
  0x5c   :  { %15254 = shalt.err (!%p15251_p0)
}
  0x5d   :  { %s15255_s5 = scalar_lea.vmem %s51_s20, 16  ;;  %s15259_s15 = scalar_lea.vmem %s51_s20, 32 }
  0x5e   :  { %p15256_p1 = scmp.ne.s32.totalorder %s51_s20, %s15255_s5  ;;  %p15260_p2 = scmp.lt.s32.totalorder %s51_s20, %s51_s20 }
  0x5f   :  { %p15261_p3 = scmp.lt.s32.totalorder %s15259_s15, %s15255_s5 }
  0x61   :  { %p15262_p4 = por %p15261_p3, %p15260_p2 }
  0x63   :  { %p15263_p5 = pnand %p15262_p4, %p15256_p1 }
  0x65   :  { %15266 = shalt.err (!%p15263_p5)
}
  0x66   :  { %53 = dma.hbm_to_vmem [thread:$0]  %s16593_s2, 16, %s51_s20, [#allocation7]  }
  0x67   :  { %s15375_s18 = smov [#allocation11]   ;;  %s15376_s23 = smov [#allocation14]  }
  0x68   :  { %s72_s19 = sshll.u32 %s15375_s18, 4  ;;  %s93_s24 = sshll.u32 %s15376_s23, 4  ;;  %s73_s19 = int_to_ptr.vmem [resolvable:$true] %s72_s19  ;;  %s15533_s24 = int_to_ptr.vmem [resolvable:$true] %s93_s24 }
  0x69   :  { %s15267_s3 = scalar_lea.hbm %s16595_s4, 16 }
  0x6a   :  { %p15268_p6 = scmp.ne.s32.totalorder %s16595_s4, %s15267_s3  ;;  %p15271_p7 = scmp.lt.u32.totalorder %s15267_s3, %s16595_s4 }
  0x6c   :  { %p15273_p8 = pnand %p15271_p7, %p15268_p6 }
  0x6e   :  { %15276 = shalt.err (!%p15273_p8)
}
  0x6f   :  { %s15277_s2 = scalar_lea.vmem %s73_s19, 16  ;;  %s15281_s20 = scalar_lea.vmem %s73_s19, 32 }
  0x70   :  { %p15278_p9 = scmp.ne.s32.totalorder %s73_s19, %s15277_s2  ;;  %p15282_p10 = scmp.lt.s32.totalorder %s73_s19, %s73_s19 }
  0x71   :  { %p15283_p11 = scmp.lt.s32.totalorder %s15281_s20, %s15277_s2 }
  0x73   :  { %p15284_p12 = por %p15283_p11, %p15282_p10 }
  0x75   :  { %p15285_p13 = pnand %p15284_p12, %p15278_p9 }
  0x77   :  { %15288 = shalt.err (!%p15285_p13)
}
  0x78   :  { %75 = dma.hbm_to_vmem [thread:$0]  %s16595_s4, 16, %s73_s19, [#allocation10]  }
  0x79   :  { %s15289_s13 = scalar_lea.hbm %s16597_s6, 32 }
  0x7a   :  { %p15290_p0 = scmp.ne.s32.totalorder %s16597_s6, %s15289_s13  ;;  %p15293_p1 = scmp.lt.u32.totalorder %s15289_s13, %s16597_s6 }
  0x7c   :  { %p15295_p2 = pnand %p15293_p1, %p15290_p0 }
  0x7e   :  { %15298 = shalt.err (!%p15295_p2)
}
  0x7f   :  { %s15299_s15 = scalar_lea.vmem %s15533_s24, 32  ;;  %p15304_p4 = scmp.lt.s32.totalorder %s15533_s24, %s15533_s24 }
  0x80   :  { %p15300_p3 = scmp.ne.s32.totalorder %s15533_s24, %s15299_s15  ;;  %p15305_p5 = scmp.lt.s32.totalorder %s15299_s15, %s15299_s15 }
  0x82   :  { %p15306_p6 = por %p15305_p5, %p15304_p4 }
  0x84   :  { %p15307_p7 = pnand %p15306_p6, %p15300_p3 }
  0x86   :  { %15310 = shalt.err (!%p15307_p7)
}
  0x87   :  { %s15377_s4 = smov 16   ;;  %s15378_s0 = smov 1  }
  0x88   :  { %99 = dma.hbm_to_vmem [thread:$0]  %s16597_s6, 32, %s15533_s24, [#allocation13], %s15377_s4, %s15377_s4, %s15378_s0  }
  0x89   :  { %s15379_s19 = smov [#allocation17]   ;;  %s15311_s3 = scalar_lea.hbm %s16599_s8, 32 }
  0x8a   :  { %s117_s23 = sshll.u32 %s15379_s19, 4  ;;  %p15312_p8 = scmp.ne.s32.totalorder %s16599_s8, %s15311_s3  ;;  %s118_s23 = int_to_ptr.vmem [resolvable:$true] %s117_s23 }
  0x8b   :  { %p15315_p9 = scmp.lt.u32.totalorder %s15311_s3, %s16599_s8 }
  0x8d   :  { %p15317_p10 = pnand %p15315_p9, %p15312_p8 }
  0x8f   :  { %15320 = shalt.err (!%p15317_p10)
}
  0x90   :  { %s15321_s2 = scalar_lea.vmem %s118_s23, 32  ;;  %p15326_p12 = scmp.lt.s32.totalorder %s118_s23, %s118_s23 }
  0x91   :  { %p15322_p11 = scmp.ne.s32.totalorder %s118_s23, %s15321_s2  ;;  %p15327_p13 = scmp.lt.s32.totalorder %s15321_s2, %s15321_s2 }
  0x93   :  { %p15328_p0 = por %p15327_p13, %p15326_p12 }
  0x95   :  { %p15329_p1 = pnand %p15328_p0, %p15322_p11 }
  0x97   :  { %15332 = shalt.err (!%p15329_p1)
}
  0x98   :  { %123 = dma.hbm_to_vmem [thread:$0]  %s16599_s8, 32, %s118_s23, [#allocation16], %s15377_s4, %s15377_s4, %s15378_s0  }
  0x99   :  { %15355 = dma.done.wait [#allocation4], 18432  }
  0x9a   :  { %15356 = vsyncadd [#allocation4], 4294948864 }
  0x9b   :  { %15357 = dma.done.wait [#allocation7], 32784  }
  0x9c   :  { %15358 = vsyncadd [#allocation7], 4294934512 }
  0x9d   :  { %15359 = dma.done.wait [#allocation10], 18448  }
  0x9e   :  { %15360 = vsyncadd [#allocation10], 4294948848 }
  0x9f   :  { %15361 = dma.done.wait [#allocation13], 36896  }
  0xa0   :  { %15362 = vsyncadd [#allocation13], 4294930400 }
  0xa1   :  { %15363 = dma.done.wait [#allocation16], 4128  }
  0xa2   :  { %15364 = vsyncadd [#allocation16], 4294963168  ;;  %v718_v0 = vld [vmem:[#allocation6 + $0x180] sm:$0xff]  ;;  %v719_v1 = vld [vmem:[#allocation6 + $0x188] sm:$0xff]  ;;  %s15381_s8 = smov [#allocation18]  }
  0xa3   :  { %v720_v2 = vld [vmem:[#allocation6 + $0x190] sm:$0xff]  ;;  %v13117_v3 = vpack.c.bf16 %v719_v1, %v718_v0  ;;  %v721_v4 = vld [vmem:[#allocation6 + $0x198] sm:$0xff]  ;;  %v722_v6 = vld [vmem:[#allocation6 + $0x1a0] sm:$0xff]  ;;  %s9039_s20 = sshll.u32 %s15381_s8, 4  ;;  %s9040_s20 = int_to_ptr.vmem [resolvable:$true] %s9039_s20 }
  0xa4   :  { %v13121_v5 = vpack.c.bf16 %v721_v4, %v720_v2  ;;  %v723_v7 = vld [vmem:[#allocation6 + $0x1a8] sm:$0xff]  ;;  %v701_v9 = vld [vmem:[#allocation3 + $0x91] sm:$0xff]  ;;  %v726_v13 = vld [vmem:[#allocation6 + $0x1c0] sm:$0xff]  ;;  %s15333_s28 = scalar_lea.vmem %s9040_s20, 2048  ;;  %p15338_p3 = scmp.lt.s32.totalorder %s9040_s20, %s9040_s20 }
  0xa5   :  { %13118 = vmatprep.subr.bf16.mxu0 %v13117_v3  ;;  %v13125_v8 = vpack.c.bf16 %v723_v7, %v722_v6  ;;  %v724_v10 = vld [vmem:[#allocation6 + $0x1b0] sm:$0xff]  ;;  %v725_v11 = vld [vmem:[#allocation6 + $0x1b8] sm:$0xff]  ;;  %10701 = vmatprep.mubr.f32.mxu0 %v701_v9  ;;  %v727_v14 = vld [vmem:[#allocation6 + $0x1c8] sm:$0xff]  ;;  %p15334_p2 = scmp.ne.s32.totalorder %s9040_s20, %s15333_s28  ;;  %p15339_p4 = scmp.lt.s32.totalorder %s15333_s28, %s15333_s28 }
  0xa6   :  { %13120 = vmatpush3.bf16.msra.mxu0 %v13117_v3  ;;  %v13129_v12 = vpack.c.bf16 %v725_v11, %v724_v10  ;;  %v13133_v15 = vpack.c.bf16 %v727_v14, %v726_v13  ;;  %v728_v16 = vld [vmem:[#allocation6 + $0x1d0] sm:$0xff]  ;;  %v729_v17 = vld [vmem:[#allocation6 + $0x1d8] sm:$0xff]  ;;  %v730_v19 = vld [vmem:[#allocation6 + $0x1e0] sm:$0xff] }
  0xa7   :  { %13122 = vmatprep.subr.bf16.mxu0 %v13121_v5  ;;  %v13137_v18 = vpack.c.bf16 %v729_v17, %v728_v16  ;;  %v731_v20 = vld [vmem:[#allocation6 + $0x1e8] sm:$0xff]  ;;  %v732_v22 = vld [vmem:[#allocation6 + $0x1f0] sm:$0xff]  ;;  %v733_v23 = vld [vmem:[#allocation6 + $0x1f8] sm:$0xff]  ;;  %p15340_p5 = por %p15339_p4, %p15338_p3 }
  0xa8   :  { %v13141_v21 = vpack.c.bf16 %v731_v20, %v730_v19  ;;  %v13145_v24 = vpack.c.bf16 %v733_v23, %v732_v22  ;;  %v913_v25 = vld [vmem:[#allocation6 + $0x200] sm:$0xff]  ;;  %v914_v26 = vld [vmem:[#allocation6 + $0x208] sm:$0xff]  ;;  %v915_v28 = vld [vmem:[#allocation6 + $0x210] sm:$0xff] }
  0xa9   :  { %v13149_v27 = vpack.c.bf16 %v914_v26, %v913_v25  ;;  %v916_v29 = vld [vmem:[#allocation6 + $0x218] sm:$0xff]  ;;  %v702_v30 = vld [vmem:[#allocation3 + $0xa1] sm:$0xff]  ;;  %v919_v38 = vld [vmem:[#allocation6 + $0x230] sm:$0xff]  ;;  %p15341_p6 = pnand %p15340_p5, %p15334_p2 }
  0xaa   :  { %13124 = vmatpush3.bf16.msra.mxu0 %v13121_v5  ;;  %v703_v31 = vld [vmem:[#allocation3 + $0xb1] sm:$0xff]  ;;  %v13153_v32 = vpack.c.bf16 %v916_v29, %v915_v28  ;;  %v917_v33 = vld [vmem:[#allocation6 + $0x220] sm:$0xff]  ;;  %v918_v34 = vld [vmem:[#allocation6 + $0x228] sm:$0xff] }
  0xab   :  { %13126 = vmatprep.subr.bf16.mxu0 %v13125_v8  ;;  %v704_v35 = vld [vmem:[#allocation3 + $0xc1] sm:$0xff]  ;;  %v705_v36 = vld [vmem:[#allocation3 + $0xd1] sm:$0xff]  ;;  %v13157_v37 = vpack.c.bf16 %v918_v34, %v917_v33 }
  0xac   :  { %v920_v39 = vld [vmem:[#allocation6 + $0x238] sm:$0xff]  ;;  %v706_v40 = vld [vmem:[#allocation3 + $0xe1] sm:$0xff]  ;;  %v923_v48 = vld [vmem:[#allocation6 + $0x250] sm:$0xff] }
  0xad   :  { %v707_v41 = vld [vmem:[#allocation3 + $0xf1] sm:$0xff]  ;;  %v13161_v42 = vpack.c.bf16 %v920_v39, %v919_v38  ;;  %v921_v43 = vld [vmem:[#allocation6 + $0x240] sm:$0xff]  ;;  %v922_v44 = vld [vmem:[#allocation6 + $0x248] sm:$0xff] }
  0xae   :  { %13128 = vmatpush3.bf16.msra.mxu0 %v13125_v8  ;;  %v708_v45 = vld [vmem:[#allocation3 + $0x101] sm:$0xff]  ;;  %v709_v46 = vld [vmem:[#allocation3 + $0x2d1] sm:$0xff]  ;;  %v13165_v47 = vpack.c.bf16 %v922_v44, %v921_v43 }
  0xaf   :  { %13130 = vmatprep.subr.bf16.mxu0 %v13129_v12  ;;  %v924_v49 = vld [vmem:[#allocation6 + $0x258] sm:$0xff]  ;;  %v710_v50 = vld [vmem:[#allocation3 + $0x2e1] sm:$0xff]  ;;  %v927_v58 = vld [vmem:[#allocation6 + $0x270] sm:$0xff] }
  0xb0   :  { %v711_v51 = vld [vmem:[#allocation3 + $0x2f1] sm:$0xff]  ;;  %v13169_v52 = vpack.c.bf16 %v924_v49, %v923_v48  ;;  %v925_v53 = vld [vmem:[#allocation6 + $0x260] sm:$0xff]  ;;  %v926_v54 = vld [vmem:[#allocation6 + $0x268] sm:$0xff] }
  0xb1   :  { %v712_v55 = vld [vmem:[#allocation3 + $0x301] sm:$0xff]  ;;  %v713_v56 = vld [vmem:[#allocation3 + $0x311] sm:$0xff]  ;;  %v13173_v57 = vpack.c.bf16 %v926_v54, %v925_v53 }
  0xb2   :  { %13132 = vmatpush3.bf16.msra.mxu0 %v13129_v12  ;;  %v928_v59 = vld [vmem:[#allocation6 + $0x278] sm:$0xff]  ;;  %v714_v60 = vld [vmem:[#allocation3 + $0x321] sm:$0xff]  ;;  %v1110_v4 = vld [vmem:[#allocation6 + $0x290] sm:$0xff] }
  0xb3   :  { %13134 = vmatprep.subr.bf16.mxu0 %v13133_v15  ;;  %v715_v61 = vld [vmem:[#allocation3 + $0x331] sm:$0xff]  ;;  %v13177_v62 = vpack.c.bf16 %v928_v59, %v927_v58  ;;  %v1108_v63 = vld [vmem:[#allocation6 + $0x280] sm:$0xff]  ;;  %v1109_v0 = vld [vmem:[#allocation6 + $0x288] sm:$0xff] }
  0xb4   :  { %v716_v1 = vld [vmem:[#allocation3 + $0x341] sm:$0xff]  ;;  %v13181_v3 = vpack.c.bf16 %v1109_v0, %v1108_v63  ;;  %v1111_v5 = vld [vmem:[#allocation6 + $0x298] sm:$0xff]  ;;  %v897_v6 = vld [vmem:[#allocation3 + $0x130] sm:$0xff] }
  0xb5   :  { %v896_v2 = vld [vmem:[#allocation3 + $0x120] sm:$0xff]  ;;  %v13185_v8 = vpack.c.bf16 %v1111_v5, %v1110_v4  ;;  %v1113_v10 = vld [vmem:[#allocation6 + $0x2a8] sm:$0xff]  ;;  %v899_v11 = vld [vmem:[#allocation3 + $0x150] sm:$0xff] }
  0xb6   :  { %13136 = vmatpush3.bf16.msra.mxu0 %v13133_v15  ;;  %v898_v7 = vld [vmem:[#allocation3 + $0x140] sm:$0xff]  ;;  %v1114_v14 = vld [vmem:[#allocation6 + $0x2b0] sm:$0xff]  ;;  %v1115_v15 = vld [vmem:[#allocation6 + $0x2b8] sm:$0xff] }
  0xb7   :  { %13138 = vmatprep.subr.bf16.mxu0 %v13137_v18  ;;  %v1112_v9 = vld [vmem:[#allocation6 + $0x2a0] sm:$0xff]  ;;  %v901_v16 = vld [vmem:[#allocation3 + $0x170] sm:$0xff]  ;;  %v1117_v20 = vld [vmem:[#allocation6 + $0x2c8] sm:$0xff] }
  0xb8   :  { %v900_v12 = vld [vmem:[#allocation3 + $0x160] sm:$0xff]  ;;  %v13189_v13 = vpack.c.bf16 %v1113_v10, %v1112_v9  ;;  %v1119_v25 = vld [vmem:[#allocation6 + $0x2d8] sm:$0xff]  ;;  %v905_v26 = vld [vmem:[#allocation3 + $0x370] sm:$0xff] }
  0xb9   :  { %v902_v17 = vld [vmem:[#allocation3 + $0x180] sm:$0xff]  ;;  %v1122_v34 = vld [vmem:[#allocation6 + $0x2f0] sm:$0xff] }
  0xba   :  { %13140 = vmatpush3.bf16.msra.mxu0 %v13137_v18  ;;  %v13193_v18 = vpack.c.bf16 %v1115_v15, %v1114_v14  ;;  %v1116_v19 = vld [vmem:[#allocation6 + $0x2c0] sm:$0xff]  ;;  %v1304_v44 = vld [vmem:[#allocation6 + $0x310] sm:$0xff] }
  0xbb   :  { %13142 = vmatprep.subr.bf16.mxu0 %v13141_v21  ;;  %v904_v22 = vld [vmem:[#allocation3 + $0x360] sm:$0xff]  ;;  %v13197_v23 = vpack.c.bf16 %v1117_v20, %v1116_v19  ;;  %v1308_v54 = vld [vmem:[#allocation6 + $0x330] sm:$0xff] }
  0xbc   :  { %v1120_v29 = vld [vmem:[#allocation6 + $0x2e0] sm:$0xff]  ;;  %v1312_v0 = vld [vmem:[#allocation6 + $0x350] sm:$0xff] }
  0xbd   :  { %v1302_v39 = vld [vmem:[#allocation6 + $0x300] sm:$0xff]  ;;  %v1316_v10 = vld [vmem:[#allocation6 + $0x370] sm:$0xff] }
  0xbe   :  { %13144 = vmatpush3.bf16.msra.mxu0 %v13141_v21  ;;  %v903_v21 = vld [vmem:[#allocation3 + $0x190] sm:$0xff]  ;;  %v1306_v49 = vld [vmem:[#allocation6 + $0x320] sm:$0xff] }
  0xbf   :  { %13146 = vmatprep.subr.bf16.mxu0 %v13145_v24  ;;  %v1310_v59 = vld [vmem:[#allocation6 + $0x340] sm:$0xff]  ;;  %v1498_v20 = vld [vmem:[#allocation6 + $0x390] sm:$0xff] }
  0xc0   :  { %v1314_v5 = vld [vmem:[#allocation6 + $0x360] sm:$0xff] }
  0xc1   :  { %v1496_v15 = vld [vmem:[#allocation6 + $0x380] sm:$0xff] }
  0xc2   :  { %13148 = vmatpush3.bf16.msra.mxu0 %v13145_v24  ;;  %v1118_v24 = vld [vmem:[#allocation6 + $0x2d0] sm:$0xff] }
  0xc3   :  { %13150 = vmatprep.subr.bf16.mxu0 %v13149_v27  ;;  %v13201_v28 = vpack.c.bf16 %v1119_v25, %v1118_v24  ;;  %v1286_v24 = vld [vmem:[#allocation3 + $0x131] sm:$0xff] }
  0xc5   :  { %10702 = vmatmul.mubr.f32.vlgmr.msra.gmra.mrb[0].mxu0 %v702_v30  ;;  %v1121_v30 = vld [vmem:[#allocation6 + $0x2e8] sm:$0xff] }
  0xc6   :  { %13152 = vmatpush3.bf16.msra.mxu0 %v13149_v27  ;;  %10704 = vmatprep.mubr.f32.mxu0 %v703_v31  ;;  %v906_v27 = vld [vmem:[#allocation3 + $0x380] sm:$0xff]  ;;  %v907_v31 = vld [vmem:[#allocation3 + $0x390] sm:$0xff]  ;;  %v13205_v33 = vpack.c.bf16 %v1121_v30, %v1120_v29  ;;  %v1501_v29 = vld [vmem:[#allocation6 + $0x3a8] sm:$0xff] }
  0xc7   :  { %13154 = vmatprep.subr.bf16.mxu0 %v13153_v32  ;;  %v203_v30 = vld [vmem:[#allocation6 + $0x90] sm:$0xff] }
  0xc9   :  { %10705 = vmatmul.mubr.f32.gmra.mrb[2].mxu0 %v704_v35  ;;  %v1123_v35 = vld [vmem:[#allocation6 + $0x2f8] sm:$0xff] }
  0xca   :  { %13156 = vmatpush3.bf16.msra.mxu0 %v13153_v32  ;;  %10707 = vmatprep.mubr.f32.mxu0 %v705_v36  ;;  %v908_v32 = vld [vmem:[#allocation3 + $0x3a0] sm:$0xff]  ;;  %v909_v36 = vld [vmem:[#allocation3 + $0x3b0] sm:$0xff]  ;;  %v13209_v38 = vpack.c.bf16 %v1123_v35, %v1122_v34 }
  0xcb   :  { %13158 = vmatprep.subr.bf16.mxu0 %v13157_v37  ;;  %v1289_v34 = vld [vmem:[#allocation3 + $0x161] sm:$0xff] }
  0xcd   :  { %10708 = vmatmul.mubr.f32.gmra.mrb[4].mxu0 %v706_v40  ;;  %v1303_v40 = vld [vmem:[#allocation6 + $0x308] sm:$0xff] }
  0xce   :  { %13160 = vmatpush3.bf16.msra.mxu0 %v13157_v37  ;;  %10710 = vmatprep.mubr.f32.mxu0 %v707_v41  ;;  %v910_v37 = vld [vmem:[#allocation3 + $0x3c0] sm:$0xff]  ;;  %v911_v41 = vld [vmem:[#allocation3 + $0x3d0] sm:$0xff]  ;;  %v13213_v43 = vpack.c.bf16 %v1303_v40, %v1302_v39  ;;  %v206_v39 = vld [vmem:[#allocation6 + $0xa8] sm:$0xff] }
  0xcf   :  { %13162 = vmatprep.subr.bf16.mxu0 %v13161_v42  ;;  %v1290_v40 = vld [vmem:[#allocation3 + $0x171] sm:$0xff] }
  0xd1   :  { %10711 = vmatmul.mubr.f32.gmra.mrb[6].mxu0 %v708_v45  ;;  %v1305_v45 = vld [vmem:[#allocation6 + $0x318] sm:$0xff] }
  0xd2   :  { %13164 = vmatpush3.bf16.msra.mxu0 %v13161_v42  ;;  %10713 = vmatprep.mubr.f32.mxu0 %v709_v46  ;;  %v1091_v42 = vld [vmem:[#allocation3 + $0x1b0] sm:$0xff]  ;;  %v1092_v46 = vld [vmem:[#allocation3 + $0x1c0] sm:$0xff]  ;;  %v13217_v48 = vpack.c.bf16 %v1305_v45, %v1304_v44  ;;  %v1505_v45 = vld [vmem:[#allocation6 + $0x3c8] sm:$0xff] }
  0xd3   :  { %13166 = vmatprep.subr.bf16.mxu0 %v13165_v47  ;;  %v1504_v44 = vld [vmem:[#allocation6 + $0x3c0] sm:$0xff] }
  0xd5   :  { %10714 = vmatmul.mubr.f32.gmra.mrb[8].mxu0 %v710_v50  ;;  %v1307_v50 = vld [vmem:[#allocation6 + $0x328] sm:$0xff] }
  0xd6   :  { %13168 = vmatpush3.bf16.msra.mxu0 %v13165_v47  ;;  %10716 = vmatprep.mubr.f32.mxu0 %v711_v51  ;;  %v1093_v47 = vld [vmem:[#allocation3 + $0x1d0] sm:$0xff]  ;;  %v1094_v51 = vld [vmem:[#allocation3 + $0x1e0] sm:$0xff]  ;;  %v13221_v53 = vpack.c.bf16 %v1307_v50, %v1306_v49 }
  0xd7   :  { %13170 = vmatprep.subr.bf16.mxu0 %v13169_v52  ;;  %v1293_v50 = vld [vmem:[#allocation3 + $0x361] sm:$0xff] }
  0xd9   :  { %10717 = vmatmul.mubr.f32.gmra.mrb[10].mxu0 %v712_v55  ;;  %v1309_v55 = vld [vmem:[#allocation6 + $0x338] sm:$0xff] }
  0xda   :  { %13172 = vmatpush3.bf16.msra.mxu0 %v13169_v52  ;;  %10719 = vmatprep.mubr.f32.mxu0 %v713_v56  ;;  %v1095_v52 = vld [vmem:[#allocation3 + $0x1f0] sm:$0xff]  ;;  %v1096_v56 = vld [vmem:[#allocation3 + $0x200] sm:$0xff]  ;;  %v13225_v58 = vpack.c.bf16 %v1309_v55, %v1308_v54  ;;  %v210_v55 = vld [vmem:[#allocation6 + $0xc8] sm:$0xff] }
  0xdb   :  { %13174 = vmatprep.subr.bf16.mxu0 %v13173_v57  ;;  %v209_v54 = vld [vmem:[#allocation6 + $0xc0] sm:$0xff] }
  0xdd   :  { %10720 = vmatmul.mubr.f32.gmra.mrb[12].mxu0 %v714_v60  ;;  %v1311_v60 = vld [vmem:[#allocation6 + $0x348] sm:$0xff] }
  0xde   :  { %13176 = vmatpush3.bf16.msra.mxu0 %v13173_v57  ;;  %10722 = vmatprep.mubr.f32.mxu0 %v715_v61  ;;  %v1097_v57 = vld [vmem:[#allocation3 + $0x210] sm:$0xff]  ;;  %v1098_v61 = vld [vmem:[#allocation3 + $0x220] sm:$0xff]  ;;  %v13229_v63 = vpack.c.bf16 %v1311_v60, %v1310_v59 }
  0xdf   :  { %13178 = vmatprep.subr.bf16.mxu0 %v13177_v62  ;;  %v1508_v60 = vld [vmem:[#allocation6 + $0x3e0] sm:$0xff] }
  0xe1   :  { %10723 = vmatmul.mubr.f32.gmra.mrb[14].mxu0 %v716_v1  ;;  %v1313_v1 = vld [vmem:[#allocation6 + $0x358] sm:$0xff] }
  0xe2   :  { %13180 = vmatpush3.bf16.msra.mxu0 %v13177_v62  ;;  %10757 = vmatprep.mubr.f32.mxu0 %v896_v2  ;;  %v1099_v62 = vld [vmem:[#allocation3 + $0x3f0] sm:$0xff]  ;;  %v1100_v2 = vld [vmem:[#allocation3 + $0x400] sm:$0xff]  ;;  %v13233_v4 = vpack.c.bf16 %v1313_v1, %v1312_v0 }
  0xe3   :  { %13182 = vmatprep.subr.bf16.mxu0 %v13181_v3  ;;  %v1296_v0 = vld [vmem:[#allocation3 + $0x391] sm:$0xff] }
  0xe5   :  { %10758 = vmatmul.mubr.f32.vlgmr.msra.gmra.mrb[0].mxu0 %v897_v6  ;;  %v1315_v6 = vld [vmem:[#allocation6 + $0x368] sm:$0xff] }
  0xe6   :  { %13184 = vmatpush3.bf16.msra.mxu0 %v13181_v3  ;;  %10760 = vmatprep.mubr.f32.mxu0 %v898_v7  ;;  %v1101_v3 = vld [vmem:[#allocation3 + $0x410] sm:$0xff]  ;;  %v1102_v7 = vld [vmem:[#allocation3 + $0x420] sm:$0xff]  ;;  %v13237_v9 = vpack.c.bf16 %v1315_v6, %v1314_v5  ;;  %v1511_v5 = vld [vmem:[#allocation6 + $0x3f8] sm:$0xff] }
  0xe7   :  { %13186 = vmatprep.subr.bf16.mxu0 %v13185_v8  ;;  %v213_v6 = vld [vmem:[#allocation6 + $0xe0] sm:$0xff] }
  0xe9   :  { %10761 = vmatmul.mubr.f32.gmra.mrb[2].mxu0 %v899_v11  ;;  %v1317_v11 = vld [vmem:[#allocation6 + $0x378] sm:$0xff] }
  0xea   :  { %13188 = vmatpush3.bf16.msra.mxu0 %v13185_v8  ;;  %10763 = vmatprep.mubr.f32.mxu0 %v900_v12  ;;  %v1103_v8 = vld [vmem:[#allocation3 + $0x430] sm:$0xff]  ;;  %v1104_v12 = vld [vmem:[#allocation3 + $0x440] sm:$0xff]  ;;  %v13241_v14 = vpack.c.bf16 %v1317_v11, %v1316_v10 }
  0xeb   :  { %13190 = vmatprep.subr.bf16.mxu0 %v13189_v13  ;;  %v1299_v10 = vld [vmem:[#allocation3 + $0x3c1] sm:$0xff] }
  0xed   :  { %10764 = vmatmul.mubr.f32.gmra.mrb[4].mxu0 %v901_v16  ;;  %v1497_v16 = vld [vmem:[#allocation6 + $0x388] sm:$0xff] }
  0xee   :  { %13192 = vmatpush3.bf16.msra.mxu0 %v13189_v13  ;;  %10766 = vmatprep.mubr.f32.mxu0 %v902_v17  ;;  %v1105_v13 = vld [vmem:[#allocation3 + $0x450] sm:$0xff]  ;;  %v1106_v17 = vld [vmem:[#allocation3 + $0x460] sm:$0xff]  ;;  %v13245_v19 = vpack.c.bf16 %v1497_v16, %v1496_v15  ;;  %v216_v15 = vld [vmem:[#allocation6 + $0xf8] sm:$0xff] }
  0xef   :  { %13194 = vmatprep.subr.bf16.mxu0 %v13193_v18  ;;  %v1300_v16 = vld [vmem:[#allocation3 + $0x3d1] sm:$0xff] }
  0xf1   :  { %10767 = vmatmul.mubr.f32.gmra.mrb[6].mxu0 %v903_v21  ;;  %v1499_v21 = vld [vmem:[#allocation6 + $0x398] sm:$0xff] }
  0xf2   :  { %13196 = vmatpush3.bf16.msra.mxu0 %v13193_v18  ;;  %10769 = vmatprep.mubr.f32.mxu0 %v904_v22  ;;  %v1285_v18 = vld [vmem:[#allocation3 + $0x121] sm:$0xff] }
  0xf3   :  { %13198 = vmatprep.subr.bf16.mxu0 %v13197_v23  ;;  %v201_v22 = vld [vmem:[#allocation6 + $0x80] sm:$0xff] }
  0xf5   :  { %10770 = vmatmul.mubr.f32.gmra.mrb[8].mxu0 %v905_v26  ;;  %v1287_v26 = vld [vmem:[#allocation3 + $0x141] sm:$0xff] }
  0xf6   :  { %13200 = vmatpush3.bf16.msra.mxu0 %v13197_v23  ;;  %10772 = vmatprep.mubr.f32.mxu0 %v906_v27  ;;  %v202_v23 = vld [vmem:[#allocation6 + $0x88] sm:$0xff]  ;;  %v13249_v27 = vpack.c.bf16 %v1499_v21, %v1498_v20  ;;  %v1693_v20 = vld [vmem:[#allocation6 + $0x410] sm:$0xff]  ;;  %v1694_v21 = vld [vmem:[#allocation6 + $0x418] sm:$0xff] }
  0xf7   :  { %13202 = vmatprep.subr.bf16.mxu0 %v13201_v28  ;;  %v13021_v25 = vpack.c.bf16 %v202_v23, %v201_v22  ;;  %v167_v22 = vld [vmem:[#allocation6] sm:$0xff]  ;;  %v168_v23 = vld [vmem:[#allocation6 + $0x8] sm:$0xff] }
  0xf9   :  { %10773 = vmatmul.mubr.f32.gmra.mrb[10].mxu0 %v907_v31  ;;  %13022 = vmatprep.subr.bf16.mxu1 %v13021_v25  ;;  %v204_v31 = vld [vmem:[#allocation6 + $0x98] sm:$0xff] }
  0xfa   :  { %13204 = vmatpush3.bf16.msra.mxu0 %v13201_v28  ;;  %10775 = vmatprep.mubr.f32.mxu0 %v908_v32  ;;  %v1500_v28 = vld [vmem:[#allocation6 + $0x3a0] sm:$0xff]  ;;  %v1288_v32 = vld [vmem:[#allocation3 + $0x151] sm:$0xff] }
  0xfb   :  { %13206 = vmatprep.subr.bf16.mxu0 %v13205_v33  ;;  %13024 = vmatpush3.bf16.msra.mxu1 %v13021_v25  ;;  %v13253_v35 = vpack.c.bf16 %v1501_v29, %v1500_v28  ;;  %v184_v25 = vld [vmem:[#allocation3 + $0x90] sm:$0xff]  ;;  %v13281_v28 = vpack.c.bf16 %v1694_v21, %v1693_v20  ;;  %v15576_v29 = vld [vmem:[#allocation3 + $0xa0] sm:$0xff] }
  0xfc   :  { %10533 = vmatprep.mubr.f32.mxu1 %v184_v25  ;;  %v1492_v20 = vld [vmem:[#allocation3 + $0x441] sm:$0xff]  ;;  %v15606_v21 = vld [vmem:[#allocation3 + $0x310] sm:$0xff] }
  0xfd   :  { %10776 = vmatmul.mubr.f32.gmra.mrb[12].mxu0 %v909_v36  ;;  %v1502_v36 = vld [vmem:[#allocation6 + $0x3b0] sm:$0xff]  ;;  %v15608_v25 = vld [vmem:[#allocation3 + $0x320] sm:$0xff] }
  0xfe   :  { %13208 = vmatpush3.bf16.msra.mxu0 %v13205_v33  ;;  %10778 = vmatprep.mubr.f32.mxu0 %v910_v37  ;;  %v13025_v33 = vpack.c.bf16 %v204_v31, %v203_v30  ;;  %v1503_v37 = vld [vmem:[#allocation6 + $0x3b8] sm:$0xff]  ;;  %v1695_v30 = vld [vmem:[#allocation6 + $0x420] sm:$0xff]  ;;  %v1696_v31 = vld [vmem:[#allocation6 + $0x428] sm:$0xff] }
  0xff   :  { %13210 = vmatprep.subr.bf16.mxu0 %v13209_v38 }
 0x100   :  { %13026 = vmatprep.subr.bf16.mxu1 %v13025_v33 }
 0x101   :  { %10779 = vmatmul.mubr.f32.gmra.mrb[14].mxu0 %v911_v41  ;;  %13028 = vmatpush3.bf16.msra.mxu1 %v13025_v33  ;;  %v170_v33 = vld [vmem:[#allocation6 + $0x18] sm:$0xff] }
 0x102   :  { %13212 = vmatpush3.bf16.msra.mxu0 %v13209_v38  ;;  %10813 = vmatprep.mubr.f32.mxu0 %v1091_v42  ;;  %v205_v38 = vld [vmem:[#allocation6 + $0xa0] sm:$0xff] }
 0x103   :  { %13214 = vmatprep.subr.bf16.mxu0 %v13213_v43  ;;  %v13029_v41 = vpack.c.bf16 %v206_v39, %v205_v38  ;;  %v1291_v42 = vld [vmem:[#allocation3 + $0x181] sm:$0xff]  ;;  %v13285_v38 = vpack.c.bf16 %v1696_v31, %v1695_v30  ;;  %v182_v30 = vld [vmem:[#allocation6 + $0x78] sm:$0xff] }
 0x104   :  { %v15581_v39 = vld [vmem:[#allocation3 + $0xc0] sm:$0xff] }
 0x105   :  { %10814 = vmatmul.mubr.f32.vlgmr.msra.gmra.mrb[0].mxu0 %v1092_v46  ;;  %13030 = vmatprep.subr.bf16.mxu1 %v13029_v41  ;;  %v207_v46 = vld [vmem:[#allocation6 + $0xb0] sm:$0xff]  ;;  %v1494_v31 = vld [vmem:[#allocation3 + $0x461] sm:$0xff] }
 0x106   :  { %13216 = vmatpush3.bf16.msra.mxu0 %v13213_v43  ;;  %10816 = vmatprep.mubr.f32.mxu0 %v1093_v47  ;;  %v13257_v43 = vpack.c.bf16 %v1503_v37, %v1502_v36  ;;  %v208_v47 = vld [vmem:[#allocation6 + $0xb8] sm:$0xff] }
 0x107   :  { %13218 = vmatprep.subr.bf16.mxu0 %v13217_v48  ;;  %13032 = vmatpush3.bf16.msra.mxu1 %v13029_v41  ;;  %v13033_v49 = vpack.c.bf16 %v208_v47, %v207_v46  ;;  %v1483_v37 = vld [vmem:[#allocation3 + $0x1f1] sm:$0xff] }
 0x108   :  { %v1698_v41 = vld [vmem:[#allocation6 + $0x438] sm:$0xff] }
 0x109   :  { %10817 = vmatmul.mubr.f32.gmra.mrb[2].mxu0 %v1094_v51  ;;  %v13261_v51 = vpack.c.bf16 %v1505_v45, %v1504_v44  ;;  %13034 = vmatprep.subr.bf16.mxu1 %v13033_v49  ;;  %v1484_v44 = vld [vmem:[#allocation3 + $0x201] sm:$0xff]  ;;  %v15585_v45 = vld [vmem:[#allocation3 + $0xd0] sm:$0xff] }
 0x10a   :  { %13220 = vmatpush3.bf16.msra.mxu0 %v13217_v48  ;;  %10819 = vmatprep.mubr.f32.mxu0 %v1095_v52  ;;  %v1292_v48 = vld [vmem:[#allocation3 + $0x191] sm:$0xff] }
 0x10b   :  { %13222 = vmatprep.subr.bf16.mxu0 %v13221_v53  ;;  %v1506_v52 = vld [vmem:[#allocation6 + $0x3d0] sm:$0xff]  ;;  %13036 = vmatpush3.bf16.msra.mxu1 %v13033_v49  ;;  %v15587_v49 = vld [vmem:[#allocation3 + $0xe0] sm:$0xff] }
 0x10c   :  { %v1485_v47 = vld [vmem:[#allocation3 + $0x211] sm:$0xff] }
 0x10d   :  { %10820 = vmatmul.mubr.f32.gmra.mrb[4].mxu0 %v1096_v56  ;;  %v1294_v56 = vld [vmem:[#allocation3 + $0x371] sm:$0xff] }
 0x10e   :  { %13224 = vmatpush3.bf16.msra.mxu0 %v13221_v53  ;;  %10822 = vmatprep.mubr.f32.mxu0 %v1097_v57  ;;  %v1507_v53 = vld [vmem:[#allocation6 + $0x3d8] sm:$0xff]  ;;  %v13037_v57 = vpack.c.bf16 %v210_v55, %v209_v54  ;;  %v1486_v54 = vld [vmem:[#allocation3 + $0x221] sm:$0xff]  ;;  %v15591_v55 = vld [vmem:[#allocation3 + $0xf0] sm:$0xff] }
 0x10f   :  { %13226 = vmatprep.subr.bf16.mxu0 %v13225_v58  ;;  %v13265_v59 = vpack.c.bf16 %v1507_v53, %v1506_v52  ;;  %v173_v52 = vld [vmem:[#allocation6 + $0x30] sm:$0xff]  ;;  %v174_v53 = vld [vmem:[#allocation6 + $0x38] sm:$0xff] }
 0x110   :  { %13038 = vmatprep.subr.bf16.mxu1 %v13037_v57 }
 0x111   :  { %10823 = vmatmul.mubr.f32.gmra.mrb[6].mxu0 %v1098_v61  ;;  %v1509_v61 = vld [vmem:[#allocation6 + $0x3e8] sm:$0xff]  ;;  %13040 = vmatpush3.bf16.msra.mxu1 %v13037_v57  ;;  %v1487_v57 = vld [vmem:[#allocation3 + $0x3f1] sm:$0xff] }
 0x112   :  { %13228 = vmatpush3.bf16.msra.mxu0 %v13225_v58  ;;  %10825 = vmatprep.mubr.f32.mxu0 %v1099_v62  ;;  %v1295_v58 = vld [vmem:[#allocation3 + $0x381] sm:$0xff]  ;;  %v211_v62 = vld [vmem:[#allocation6 + $0xd0] sm:$0xff] }
 0x113   :  { %13230 = vmatprep.subr.bf16.mxu0 %v13229_v63 }
 0x115   :  { %10826 = vmatmul.mubr.f32.gmra.mrb[8].mxu0 %v1100_v2  ;;  %v1297_v2 = vld [vmem:[#allocation3 + $0x3a1] sm:$0xff] }
 0x116   :  { %13232 = vmatpush3.bf16.msra.mxu0 %v13229_v63  ;;  %10828 = vmatprep.mubr.f32.mxu0 %v1101_v3  ;;  %v212_v63 = vld [vmem:[#allocation6 + $0xd8] sm:$0xff]  ;;  %v13269_v3 = vpack.c.bf16 %v1509_v61, %v1508_v60  ;;  %v1701_v60 = vld [vmem:[#allocation6 + $0x450] sm:$0xff] }
 0x117   :  { %13234 = vmatprep.subr.bf16.mxu0 %v13233_v4  ;;  %v13041_v1 = vpack.c.bf16 %v212_v63, %v211_v62  ;;  %v1702_v61 = vld [vmem:[#allocation6 + $0x458] sm:$0xff]  ;;  %v175_v62 = vld [vmem:[#allocation6 + $0x40] sm:$0xff]  ;;  %v176_v63 = vld [vmem:[#allocation6 + $0x48] sm:$0xff] }
 0x119   :  { %10829 = vmatmul.mubr.f32.gmra.mrb[10].mxu0 %v1102_v7  ;;  %13042 = vmatprep.subr.bf16.mxu1 %v13041_v1  ;;  %v214_v7 = vld [vmem:[#allocation6 + $0xe8] sm:$0xff] }
 0x11a   :  { %13236 = vmatpush3.bf16.msra.mxu0 %v13233_v4  ;;  %10831 = vmatprep.mubr.f32.mxu0 %v1103_v8  ;;  %v1510_v4 = vld [vmem:[#allocation6 + $0x3f0] sm:$0xff] }
 0x11b   :  { %13238 = vmatprep.subr.bf16.mxu0 %v13237_v9  ;;  %13044 = vmatpush3.bf16.msra.mxu1 %v13041_v1  ;;  %v1298_v8 = vld [vmem:[#allocation3 + $0x3b1] sm:$0xff]  ;;  %v13273_v11 = vpack.c.bf16 %v1511_v5, %v1510_v4  ;;  %v13297_v4 = vpack.c.bf16 %v1702_v61, %v1701_v60  ;;  %v15597_v5 = vld [vmem:[#allocation3 + $0x2e0] sm:$0xff] }
 0x11c   :  { %v192_v1 = vld [vmem:[#allocation3 + $0x2d0] sm:$0xff]  ;;  %v1893_v61 = vld [vmem:[#allocation6 + $0x4b8] sm:$0xff] }
 0x11d   :  { %10832 = vmatmul.mubr.f32.gmra.mrb[12].mxu0 %v1104_v12  ;;  %v1691_v12 = vld [vmem:[#allocation6 + $0x400] sm:$0xff]  ;;  %v1892_v60 = vld [vmem:[#allocation6 + $0x4b0] sm:$0xff] }
 0x11e   :  { %13240 = vmatpush3.bf16.msra.mxu0 %v13237_v9  ;;  %10834 = vmatprep.mubr.f32.mxu0 %v1105_v13  ;;  %v13045_v9 = vpack.c.bf16 %v214_v7, %v213_v6  ;;  %v1692_v13 = vld [vmem:[#allocation6 + $0x408] sm:$0xff]  ;;  %v1703_v6 = vld [vmem:[#allocation6 + $0x460] sm:$0xff] }
 0x11f   :  { %13242 = vmatprep.subr.bf16.mxu0 %v13241_v14  ;;  %v1704_v7 = vld [vmem:[#allocation6 + $0x468] sm:$0xff] }
 0x120   :  { %13046 = vmatprep.subr.bf16.mxu1 %v13045_v9 }
 0x121   :  { %10835 = vmatmul.mubr.f32.gmra.mrb[14].mxu0 %v1106_v17  ;;  %13048 = vmatpush3.bf16.msra.mxu1 %v13045_v9  ;;  %v178_v9 = vld [vmem:[#allocation6 + $0x58] sm:$0xff] }
 0x122   :  { %13244 = vmatpush3.bf16.msra.mxu0 %v13241_v14  ;;  %10869 = vmatprep.mubr.f32.mxu0 %v1285_v18  ;;  %v215_v14 = vld [vmem:[#allocation6 + $0xf0] sm:$0xff] }
 0x123   :  { %13246 = vmatprep.subr.bf16.mxu0 %v13245_v19  ;;  %v13049_v17 = vpack.c.bf16 %v216_v15, %v215_v14  ;;  %v1479_v18 = vld [vmem:[#allocation3 + $0x1b1] sm:$0xff]  ;;  %v13301_v14 = vpack.c.bf16 %v1704_v7, %v1703_v6  ;;  %v15602_v15 = vld [vmem:[#allocation3 + $0x300] sm:$0xff]  ;;  %v1895_v6 = vld [vmem:[#allocation6 + $0x4c8] sm:$0xff] }
 0x124   :  { %v530_v7 = vld [vmem:[#allocation6 + $0x130] sm:$0xff] }
 0x125   :  { %10870 = vmatmul.mubr.f32.vlgmr.msra.gmra.mrb[0].mxu0 %v1286_v24  ;;  %13050 = vmatprep.subr.bf16.mxu1 %v13049_v17  ;;  %v1480_v24 = vld [vmem:[#allocation3 + $0x1c1] sm:$0xff] }
 0x126   :  { %13248 = vmatpush3.bf16.msra.mxu0 %v13245_v19  ;;  %10872 = vmatprep.mubr.f32.mxu0 %v1287_v26  ;;  %v13277_v19 = vpack.c.bf16 %v1692_v13, %v1691_v12  ;;  %v13053_v26 = vpack.c.bf16 %v168_v23, %v167_v22  ;;  %v1491_v13 = vld [vmem:[#allocation3 + $0x431] sm:$0xff] }
 0x127   :  { %13250 = vmatprep.subr.bf16.mxu0 %v13249_v27  ;;  %13052 = vmatpush3.bf16.msra.mxu1 %v13049_v17  ;;  %v1706_v17 = vld [vmem:[#allocation6 + $0x478] sm:$0xff] }
 0x128   :  { %13054 = vmatprep.subr.bf16.mxu1 %v13053_v26  ;;  %v1493_v23 = vld [vmem:[#allocation3 + $0x451] sm:$0xff] }
 0x129   :  { %10873 = vmatmul.mubr.f32.gmra.mrb[2].mxu0 %v1288_v32  ;;  %v169_v32 = vld [vmem:[#allocation6 + $0x10] sm:$0xff] }
 0x12a   :  { %13252 = vmatpush3.bf16.msra.mxu0 %v13249_v27  ;;  %10875 = vmatprep.mubr.f32.mxu0 %v1289_v34  ;;  %v1481_v27 = vld [vmem:[#allocation3 + $0x1d1] sm:$0xff]  ;;  %v1482_v34 = vld [vmem:[#allocation3 + $0x1e1] sm:$0xff]  ;;  %v13057_v36 = vpack.c.bf16 %v170_v33, %v169_v32 }
 0x12b   :  { %13254 = vmatprep.subr.bf16.mxu0 %v13253_v35  ;;  %10534 = vmatmul.mubr.f32.vlgmr.msra.gmra.mrb[0].mxu1 %v15576_v29  ;;  %v15612_v32 = vld [vmem:[#allocation3 + $0x330] sm:$0xff] }
 0x12c   :  { %13056 = vmatpush3.bf16.msra.mxu1 %v13053_v26  ;;  %v1886_v26 = vld [vmem:[#allocation6 + $0x480] sm:$0xff] }
 0x12d   :  { %10876 = vmatmul.mubr.f32.gmra.mrb[4].mxu0 %v1290_v40  ;;  %v1697_v40 = vld [vmem:[#allocation6 + $0x430] sm:$0xff]  ;;  %13058 = vmatprep.subr.bf16.mxu1 %v13057_v36 }
 0x12e   :  { %13256 = vmatpush3.bf16.msra.mxu0 %v13253_v35  ;;  %10878 = vmatprep.mubr.f32.mxu0 %v1291_v42  ;;  %v15579_v35 = vld [vmem:[#allocation3 + $0xb0] sm:$0xff]  ;;  %v171_v42 = vld [vmem:[#allocation6 + $0x20] sm:$0xff] }
 0x12f   :  { %13258 = vmatprep.subr.bf16.mxu0 %v13257_v43  ;;  %10536 = vmatprep.mubr.f32.mxu1 %v15579_v35 }
 0x130   :  { %10537 = vmatmul.mubr.f32.gmra.mrb[2].mxu1 %v15581_v39 }
 0x131   :  { %10879 = vmatmul.mubr.f32.gmra.mrb[6].mxu0 %v1292_v48  ;;  %13060 = vmatpush3.bf16.msra.mxu1 %v13057_v36  ;;  %v13289_v48 = vpack.c.bf16 %v1698_v41, %v1697_v40  ;;  %v1889_v40 = vld [vmem:[#allocation6 + $0x498] sm:$0xff]  ;;  %v524_v41 = vld [vmem:[#allocation6 + $0x100] sm:$0xff] }
 0x132   :  { %13260 = vmatpush3.bf16.msra.mxu0 %v13257_v43  ;;  %10881 = vmatprep.mubr.f32.mxu0 %v1293_v50  ;;  %v172_v43 = vld [vmem:[#allocation6 + $0x28] sm:$0xff]  ;;  %v1699_v50 = vld [vmem:[#allocation6 + $0x440] sm:$0xff] }
 0x133   :  { %13262 = vmatprep.subr.bf16.mxu0 %v13261_v51  ;;  %v13061_v46 = vpack.c.bf16 %v172_v43, %v171_v42  ;;  %10539 = vmatprep.mubr.f32.mxu1 %v15585_v45  ;;  %v525_v42 = vld [vmem:[#allocation6 + $0x108] sm:$0xff]  ;;  %v1675_v43 = vld [vmem:[#allocation3 + $0x20] sm:$0xff] }
 0x134   :  { %10540 = vmatmul.mubr.f32.gmra.mrb[4].mxu1 %v15587_v49 }
 0x135   :  { %10882 = vmatmul.mubr.f32.gmra.mrb[8].mxu0 %v1294_v56  ;;  %13062 = vmatprep.subr.bf16.mxu1 %v13061_v46  ;;  %v13065_v56 = vpack.c.bf16 %v174_v53, %v173_v52  ;;  %v526_v52 = vld [vmem:[#allocation6 + $0x110] sm:$0xff]  ;;  %v527_v53 = vld [vmem:[#allocation6 + $0x118] sm:$0xff] }
 0x136   :  { %13264 = vmatpush3.bf16.msra.mxu0 %v13261_v51  ;;  %10884 = vmatprep.mubr.f32.mxu0 %v1295_v58  ;;  %v1700_v51 = vld [vmem:[#allocation6 + $0x448] sm:$0xff] }
 0x137   :  { %13266 = vmatprep.subr.bf16.mxu0 %v13265_v59  ;;  %13064 = vmatpush3.bf16.msra.mxu1 %v13061_v46  ;;  %v13293_v58 = vpack.c.bf16 %v1700_v51, %v1699_v50  ;;  %v13085_v46 = vpack.c.bf16 %v525_v42, %v524_v41  ;;  %v1890_v50 = vld [vmem:[#allocation6 + $0x4a0] sm:$0xff]  ;;  %v1891_v51 = vld [vmem:[#allocation6 + $0x4a8] sm:$0xff] }
 0x138   :  { %10542 = vmatprep.mubr.f32.mxu1 %v15591_v55  ;;  %13066 = vmatprep.subr.bf16.mxu1 %v13065_v56  ;;  %v536_v41 = vld [vmem:[#allocation6 + $0x160] sm:$0xff]  ;;  %v537_v42 = vld [vmem:[#allocation6 + $0x168] sm:$0xff] }
 0x139   :  { %10885 = vmatmul.mubr.f32.gmra.mrb[10].mxu0 %v1296_v0  ;;  %v1488_v0 = vld [vmem:[#allocation3 + $0x401] sm:$0xff] }
 0x13a   :  { %13268 = vmatpush3.bf16.msra.mxu0 %v13265_v59  ;;  %10887 = vmatprep.mubr.f32.mxu0 %v1297_v2  ;;  %v15593_v59 = vld [vmem:[#allocation3 + $0x100] sm:$0xff]  ;;  %v13069_v2 = vpack.c.bf16 %v176_v63, %v175_v62  ;;  %v529_v63 = vld [vmem:[#allocation6 + $0x128] sm:$0xff] }
 0x13b   :  { %13270 = vmatprep.subr.bf16.mxu0 %v13269_v3  ;;  %10543 = vmatmul.mubr.f32.gmra.mrb[6].mxu1 %v15593_v59  ;;  %v528_v62 = vld [vmem:[#allocation6 + $0x120] sm:$0xff] }
 0x13c   :  { %13068 = vmatpush3.bf16.msra.mxu1 %v13065_v56  ;;  %10545 = vmatprep.mubr.f32.mxu1 %v192_v1  ;;  %v13089_v56 = vpack.c.bf16 %v527_v53, %v526_v52  ;;  %v13093_v1 = vpack.c.bf16 %v529_v63, %v528_v62  ;;  %v539_v52 = vld [vmem:[#allocation6 + $0x178] sm:$0xff]  ;;  %v1689_v53 = vld [vmem:[#allocation3 + $0x2c0] sm:$0xff] }
 0x13d   :  { %10888 = vmatmul.mubr.f32.gmra.mrb[12].mxu0 %v1298_v8  ;;  %13070 = vmatprep.subr.bf16.mxu1 %v13069_v2  ;;  %v177_v8 = vld [vmem:[#allocation6 + $0x50] sm:$0xff]  ;;  %v2084_v63 = vld [vmem:[#allocation6 + $0x520] sm:$0xff] }
 0x13e   :  { %13272 = vmatpush3.bf16.msra.mxu0 %v13269_v3  ;;  %10890 = vmatprep.mubr.f32.mxu0 %v1299_v10  ;;  %v1489_v3 = vld [vmem:[#allocation3 + $0x411] sm:$0xff]  ;;  %v1490_v10 = vld [vmem:[#allocation3 + $0x421] sm:$0xff]  ;;  %v13073_v12 = vpack.c.bf16 %v178_v9, %v177_v8 }
 0x13f   :  { %13274 = vmatprep.subr.bf16.mxu0 %v13273_v11  ;;  %10546 = vmatmul.mubr.f32.gmra.mrb[8].mxu1 %v15597_v5  ;;  %v531_v8 = vld [vmem:[#allocation6 + $0x138] sm:$0xff]  ;;  %v1681_v9 = vld [vmem:[#allocation3 + $0x80] sm:$0xff] }
 0x140   :  { %13072 = vmatpush3.bf16.msra.mxu1 %v13069_v2  ;;  %v1680_v2 = vld [vmem:[#allocation3 + $0x70] sm:$0xff] }
 0x141   :  { %10891 = vmatmul.mubr.f32.gmra.mrb[14].mxu0 %v1300_v16  ;;  %v1705_v16 = vld [vmem:[#allocation6 + $0x470] sm:$0xff]  ;;  %13074 = vmatprep.subr.bf16.mxu1 %v13073_v12 }
 0x142   :  { %13276 = vmatpush3.bf16.msra.mxu0 %v13273_v11  ;;  %10925 = vmatprep.mubr.f32.mxu0 %v1479_v18  ;;  %v15600_v11 = vld [vmem:[#allocation3 + $0x2f0] sm:$0xff]  ;;  %v179_v18 = vld [vmem:[#allocation6 + $0x60] sm:$0xff] }
 0x143   :  { %13278 = vmatprep.subr.bf16.mxu0 %v13277_v19  ;;  %10548 = vmatprep.mubr.f32.mxu1 %v15600_v11  ;;  %v15619_v62 = vld [vmem:[#allocation3 + $0x11] sm:$0xff] }
 0x144   :  { %10549 = vmatmul.mubr.f32.gmra.mrb[10].mxu1 %v15602_v15 }
 0x145   :  { %10926 = vmatmul.mubr.f32.vlgmr.msra.gmra.mrb[0].mxu0 %v1480_v24  ;;  %13076 = vmatpush3.bf16.msra.mxu1 %v13073_v12  ;;  %v13305_v24 = vpack.c.bf16 %v1706_v17, %v1705_v16  ;;  %v1682_v12 = vld [vmem:[#allocation3 + $0x250] sm:$0xff]  ;;  %v1897_v16 = vld [vmem:[#allocation6 + $0x4d8] sm:$0xff]  ;;  %v532_v17 = vld [vmem:[#allocation6 + $0x140] sm:$0xff] }
 0x146   :  { %13280 = vmatpush3.bf16.msra.mxu0 %v13277_v19  ;;  %10928 = vmatprep.mubr.f32.mxu0 %v1481_v27  ;;  %v180_v19 = vld [vmem:[#allocation6 + $0x68] sm:$0xff] }
 0x147   :  { %13282 = vmatprep.subr.bf16.mxu0 %v13281_v28  ;;  %v13077_v22 = vpack.c.bf16 %v180_v19, %v179_v18  ;;  %10551 = vmatprep.mubr.f32.mxu1 %v15606_v21  ;;  %v1887_v27 = vld [vmem:[#allocation6 + $0x488] sm:$0xff]  ;;  %v1683_v19 = vld [vmem:[#allocation3 + $0x260] sm:$0xff] }
 0x148   :  { %10552 = vmatmul.mubr.f32.gmra.mrb[12].mxu1 %v15608_v25  ;;  %v13309_v36 = vpack.c.bf16 %v1887_v27, %v1886_v26  ;;  %v533_v18 = vld [vmem:[#allocation6 + $0x148] sm:$0xff]  ;;  %v1898_v26 = vld [vmem:[#allocation6 + $0x4e0] sm:$0xff] }
 0x149   :  { %10929 = vmatmul.mubr.f32.gmra.mrb[2].mxu0 %v1482_v34  ;;  %13078 = vmatprep.subr.bf16.mxu1 %v13077_v22  ;;  %v1674_v34 = vld [vmem:[#allocation3 + $0x10] sm:$0xff]  ;;  %v1899_v27 = vld [vmem:[#allocation6 + $0x4e8] sm:$0xff] }
 0x14a   :  { %13284 = vmatpush3.bf16.msra.mxu0 %v13281_v28  ;;  %10931 = vmatprep.mubr.f32.mxu0 %v1483_v37  ;;  %v181_v28 = vld [vmem:[#allocation6 + $0x70] sm:$0xff]  ;;  %v15614_v37 = vld [vmem:[#allocation3 + $0x340] sm:$0xff] }
 0x14b   :  { %13286 = vmatprep.subr.bf16.mxu0 %v13285_v38  ;;  %13080 = vmatpush3.bf16.msra.mxu1 %v13077_v22  ;;  %v13081_v33 = vpack.c.bf16 %v182_v30, %v181_v28  ;;  %v13101_v22 = vpack.c.bf16 %v533_v18, %v532_v17  ;;  %v534_v28 = vld [vmem:[#allocation6 + $0x150] sm:$0xff]  ;;  %v535_v30 = vld [vmem:[#allocation6 + $0x158] sm:$0xff]  ;;  %v2093_v17 = vld [vmem:[#allocation6 + $0x568] sm:$0xff] }
 0x14c   :  { %10554 = vmatprep.mubr.f32.mxu1 %v15612_v32  ;;  %v15649_v18 = vld [vmem:[#allocation3 + $0x261] sm:$0xff] }
 0x14d   :  { %10932 = vmatmul.mubr.f32.gmra.mrb[4].mxu0 %v1484_v44  ;;  %10555 = vmatmul.mubr.f32.gmra.mrb[14].mxu1 %v15614_v37  ;;  %v151_v44 = vld [vmem:[#allocation3] sm:$0xff] }
 0x14e   :  { %13288 = vmatpush3.bf16.msra.mxu0 %v13285_v38  ;;  %10934 = vmatprep.mubr.f32.mxu0 %v1485_v47  ;;  %v1888_v38 = vld [vmem:[#allocation6 + $0x490] sm:$0xff] }
 0x14f   :  { %13290 = vmatprep.subr.bf16.mxu0 %v13289_v48  ;;  %13082 = vmatprep.subr.bf16.mxu1 %v13081_v33  ;;  %v1676_v47 = vld [vmem:[#allocation3 + $0x30] sm:$0xff] }
 0x150   :  { %13084 = vmatpush3.bf16.msra.mxu1 %v13081_v33  ;;  %10589 = vmatprep.mubr.f32.mxu1 %v151_v44  ;;  %v13105_v33 = vpack.c.bf16 %v535_v30, %v534_v28  ;;  %v13109_v44 = vpack.c.bf16 %v537_v42, %v536_v41  ;;  %v1884_v28 = vld [vmem:[#allocation3 + $0x350] sm:$0xff]  ;;  %v2282_v41 = vld [vmem:[#allocation6 + $0x5c0] sm:$0xff]  ;;  %v2283_v42 = vld [vmem:[#allocation6 + $0x5c8] sm:$0xff] }
 0x151   :  { %10935 = vmatmul.mubr.f32.gmra.mrb[6].mxu0 %v1486_v54  ;;  %13086 = vmatprep.subr.bf16.mxu1 %v13085_v46  ;;  %v1677_v54 = vld [vmem:[#allocation3 + $0x40] sm:$0xff]  ;;  %v2077_v30 = vld [vmem:[#allocation3 + $0x2b1] sm:$0xff] }
 0x152   :  { %13292 = vmatpush3.bf16.msra.mxu0 %v13289_v48  ;;  %10937 = vmatprep.mubr.f32.mxu0 %v1487_v57  ;;  %v13313_v48 = vpack.c.bf16 %v1889_v40, %v1888_v38  ;;  %v1678_v57 = vld [vmem:[#allocation3 + $0x50] sm:$0xff]  ;;  %v1901_v40 = vld [vmem:[#allocation6 + $0x4f8] sm:$0xff] }
 0x153   :  { %13294 = vmatprep.subr.bf16.mxu0 %v13293_v58  ;;  %10590 = vmatmul.mubr.f32.vlgmr.msra.gmra.mrb[0].mxu1 %v1674_v34  ;;  %v1900_v38 = vld [vmem:[#allocation6 + $0x4f0] sm:$0xff] }
 0x154   :  { %13088 = vmatpush3.bf16.msra.mxu1 %v13085_v46  ;;  %10592 = vmatprep.mubr.f32.mxu1 %v1675_v43  ;;  %v1688_v46 = vld [vmem:[#allocation3 + $0x2b0] sm:$0xff] }
 0x155   :  { %10938 = vmatmul.mubr.f32.gmra.mrb[8].mxu0 %v1488_v0  ;;  %13090 = vmatprep.subr.bf16.mxu1 %v13089_v56  ;;  %v1679_v0 = vld [vmem:[#allocation3 + $0x60] sm:$0xff] }
 0x156   :  { %13296 = vmatpush3.bf16.msra.mxu0 %v13293_v58  ;;  %10940 = vmatprep.mubr.f32.mxu0 %v1489_v3  ;;  %v13317_v58 = vpack.c.bf16 %v1891_v51, %v1890_v50  ;;  %v13321_v3 = vpack.c.bf16 %v1893_v61, %v1892_v60  ;;  %v2081_v50 = vld [vmem:[#allocation6 + $0x508] sm:$0xff]  ;;  %v538_v51 = vld [vmem:[#allocation6 + $0x170] sm:$0xff] }
 0x157   :  { %13298 = vmatprep.subr.bf16.mxu0 %v13297_v4  ;;  %10593 = vmatmul.mubr.f32.gmra.mrb[2].mxu1 %v1676_v47  ;;  %v507_v60 = vld [vmem:[#allocation3 + $0x1] sm:$0xff] }
 0x158   :  { %13092 = vmatpush3.bf16.msra.mxu1 %v13089_v56  ;;  %10595 = vmatprep.mubr.f32.mxu1 %v1677_v54 }
 0x159   :  { %10941 = vmatmul.mubr.f32.gmra.mrb[10].mxu0 %v1490_v10  ;;  %13094 = vmatprep.subr.bf16.mxu1 %v13093_v1  ;;  %v13097_v10 = vpack.c.bf16 %v531_v8, %v530_v7  ;;  %v2088_v7 = vld [vmem:[#allocation6 + $0x540] sm:$0xff]  ;;  %v2089_v8 = vld [vmem:[#allocation6 + $0x548] sm:$0xff] }
 0x15a   :  { %13300 = vmatpush3.bf16.msra.mxu0 %v13297_v4  ;;  %10943 = vmatprep.mubr.f32.mxu0 %v1491_v13  ;;  %v1894_v4 = vld [vmem:[#allocation6 + $0x4c0] sm:$0xff] }
 0x15b   :  { %13302 = vmatprep.subr.bf16.mxu0 %v13301_v14  ;;  %10596 = vmatmul.mubr.f32.gmra.mrb[4].mxu1 %v1678_v57  ;;  %v13325_v13 = vpack.c.bf16 %v1895_v6, %v1894_v4  ;;  %v2087_v4 = vld [vmem:[#allocation6 + $0x538] sm:$0xff]  ;;  %v15629_v6 = vld [vmem:[#allocation3 + $0x41] sm:$0xff] }
 0x15c   :  { %13096 = vmatpush3.bf16.msra.mxu1 %v13093_v1  ;;  %10598 = vmatprep.mubr.f32.mxu1 %v1679_v0  ;;  %v15621_v1 = vld [vmem:[#allocation3 + $0x21] sm:$0xff] }
 0x15d   :  { %10944 = vmatmul.mubr.f32.gmra.mrb[12].mxu0 %v1492_v20  ;;  %13098 = vmatprep.subr.bf16.mxu1 %v13097_v10  ;;  %v159_v20 = vld [vmem:[#allocation3 + $0x240] sm:$0xff] }
 0x15e   :  { %13304 = vmatpush3.bf16.msra.mxu0 %v13301_v14  ;;  %10946 = vmatprep.mubr.f32.mxu0 %v1493_v23  ;;  %v1896_v14 = vld [vmem:[#allocation6 + $0x4d0] sm:$0xff] }
 0x15f   :  { %13306 = vmatprep.subr.bf16.mxu0 %v13305_v24  ;;  %10599 = vmatmul.mubr.f32.gmra.mrb[6].mxu1 %v1680_v2  ;;  %v1684_v23 = vld [vmem:[#allocation3 + $0x270] sm:$0xff] }
 0x160   :  { %13100 = vmatpush3.bf16.msra.mxu1 %v13097_v10  ;;  %10601 = vmatprep.mubr.f32.mxu1 %v159_v20  ;;  %v15643_v10 = vld [vmem:[#allocation3 + $0x71] sm:$0xff] }
 0x161   :  { %10947 = vmatmul.mubr.f32.gmra.mrb[14].mxu0 %v1494_v31  ;;  %13102 = vmatprep.subr.bf16.mxu1 %v13101_v22  ;;  %v1685_v31 = vld [vmem:[#allocation3 + $0x280] sm:$0xff]  ;;  %v2094_v20 = vld [vmem:[#allocation6 + $0x570] sm:$0xff] }
 0x162   :  { %13308 = vmatpush3.bf16.msra.mxu0 %v13305_v24  ;;  %10981 = vmatprep.mubr.f32.mxu0 %v1674_v34  ;;  %v13329_v24 = vpack.c.bf16 %v1897_v16, %v1896_v14  ;;  %v1686_v34 = vld [vmem:[#allocation3 + $0x290] sm:$0xff]  ;;  %v515_v14 = vld [vmem:[#allocation3 + $0x241] sm:$0xff] }
 0x163   :  { %13310 = vmatprep.subr.bf16.mxu0 %v13309_v36  ;;  %10602 = vmatmul.mubr.f32.gmra.mrb[8].mxu1 %v1682_v12  ;;  %v15647_v16 = vld [vmem:[#allocation3 + $0x251] sm:$0xff] }
 0x164   :  { %13104 = vmatpush3.bf16.msra.mxu1 %v13101_v22  ;;  %10604 = vmatprep.mubr.f32.mxu1 %v1683_v19  ;;  %v2095_v22 = vld [vmem:[#allocation6 + $0x578] sm:$0xff] }
 0x165   :  { %10982 = vmatmul.mubr.f32.vlgmr.msra.gmra.mrb[0].mxu0 %v1675_v43  ;;  %13106 = vmatprep.subr.bf16.mxu1 %v13105_v33  ;;  %v1687_v43 = vld [vmem:[#allocation3 + $0x2a0] sm:$0xff] }
 0x166   :  { %13312 = vmatpush3.bf16.msra.mxu0 %v13309_v36  ;;  %10984 = vmatprep.mubr.f32.mxu0 %v1676_v47  ;;  %v13333_v36 = vpack.c.bf16 %v1899_v27, %v1898_v26  ;;  %v13337_v47 = vpack.c.bf16 %v1901_v40, %v1900_v38  ;;  %v2275_v26 = vld [vmem:[#allocation6 + $0x588] sm:$0xff]  ;;  %v2281_v38 = vld [vmem:[#allocation6 + $0x5b8] sm:$0xff] }
 0x167   :  { %13314 = vmatprep.subr.bf16.mxu0 %v13313_v48  ;;  %10605 = vmatmul.mubr.f32.gmra.mrb[10].mxu1 %v1684_v23  ;;  %v2076_v27 = vld [vmem:[#allocation3 + $0x2a1] sm:$0xff] }
 0x168   :  { %13108 = vmatpush3.bf16.msra.mxu1 %v13105_v33  ;;  %10607 = vmatprep.mubr.f32.mxu1 %v1685_v31  ;;  %v2277_v33 = vld [vmem:[#allocation6 + $0x598] sm:$0xff] }
 0x169   :  { %10985 = vmatmul.mubr.f32.gmra.mrb[2].mxu0 %v1677_v54  ;;  %13110 = vmatprep.subr.bf16.mxu1 %v13109_v44  ;;  %v13113_v54 = vpack.c.bf16 %v539_v52, %v538_v51  ;;  %v2287_v51 = vld [vmem:[#allocation6 + $0x5e8] sm:$0xff] }
 0x16a   :  { %13316 = vmatpush3.bf16.msra.mxu0 %v13313_v48  ;;  %10987 = vmatprep.mubr.f32.mxu0 %v1678_v57  ;;  %v2080_v48 = vld [vmem:[#allocation6 + $0x500] sm:$0xff]  ;;  %v2082_v57 = vld [vmem:[#allocation6 + $0x510] sm:$0xff] }
 0x16b   :  { %13318 = vmatprep.subr.bf16.mxu0 %v13317_v58  ;;  %10608 = vmatmul.mubr.f32.gmra.mrb[12].mxu1 %v1686_v34  ;;  %v13341_v56 = vpack.c.bf16 %v2081_v50, %v2080_v48  ;;  %v2286_v50 = vld [vmem:[#allocation6 + $0x5e0] sm:$0xff] }
 0x16c   :  { %13112 = vmatpush3.bf16.msra.mxu1 %v13109_v44  ;;  %10610 = vmatprep.mubr.f32.mxu1 %v1687_v43  ;;  %v13389_v44 = vpack.c.bf16 %v2283_v42, %v2282_v41  ;;  %v13397_v52 = vpack.c.bf16 %v2287_v51, %v2286_v50  ;;  %v2669_v41 = vld [vmem:[#allocation6 + $0x6a8] sm:$0xff]  ;;  %v2455_v42 = vld [vmem:[#allocation3 + $0x160] sm:$0xff]  ;;  %v2458_v50 = vld [vmem:[#allocation3 + $0x190] sm:$0xff] }
 0x16d   :  { %10988 = vmatmul.mubr.f32.gmra.mrb[4].mxu0 %v1679_v0  ;;  %13114 = vmatprep.subr.bf16.mxu1 %v13113_v54  ;;  %v2085_v0 = vld [vmem:[#allocation6 + $0x528] sm:$0xff] }
 0x16e   :  { %13320 = vmatpush3.bf16.msra.mxu0 %v13317_v58  ;;  %10990 = vmatprep.mubr.f32.mxu0 %v1680_v2  ;;  %v2083_v58 = vld [vmem:[#allocation6 + $0x518] sm:$0xff] }
 0x16f   :  { %13322 = vmatprep.subr.bf16.mxu0 %v13321_v3  ;;  %10611 = vmatmul.mubr.f32.gmra.mrb[14].mxu1 %v1688_v46  ;;  %v13345_v61 = vpack.c.bf16 %v2083_v58, %v2082_v57  ;;  %v15627_v2 = vld [vmem:[#allocation3 + $0x31] sm:$0xff]  ;;  %v2469_v57 = vld [vmem:[#allocation6 + $0x600] sm:$0xff]  ;;  %v2470_v58 = vld [vmem:[#allocation6 + $0x608] sm:$0xff] }
 0x170   :  { %13116 = vmatpush3.bf16.msra.mxu1 %v13113_v54  ;;  %10645 = vmatprep.mubr.f32.mxu1 %v507_v60  ;;  %v2289_v54 = vld [vmem:[#allocation6 + $0x5f8] sm:$0xff]  ;;  %v2078_v60 = vld [vmem:[#allocation3 + $0x2c1] sm:$0xff] }
 0x171   :  { %10991 = vmatmul.mubr.f32.gmra.mrb[6].mxu0 %v1681_v9  ;;  %v15637_v9 = vld [vmem:[#allocation3 + $0x61] sm:$0xff] }
 0x172   :  { %13324 = vmatpush3.bf16.msra.mxu0 %v13321_v3  ;;  %10993 = vmatprep.mubr.f32.mxu0 %v1682_v12  ;;  %v2086_v3 = vld [vmem:[#allocation6 + $0x530] sm:$0xff] }
 0x173   :  { %13326 = vmatprep.subr.bf16.mxu0 %v13325_v13  ;;  %10646 = vmatmul.mubr.f32.vlgmr.msra.gmra.mrb[0].mxu1 %v15619_v62  ;;  %v2090_v12 = vld [vmem:[#allocation6 + $0x550] sm:$0xff] }
 0x174   :  { %10648 = vmatprep.mubr.f32.mxu1 %v15621_v1 }
 0x175   :  { %10994 = vmatmul.mubr.f32.gmra.mrb[8].mxu0 %v1683_v19  ;;  %v15655_v19 = vld [vmem:[#allocation3 + $0x271] sm:$0xff] }
 0x176   :  { %13328 = vmatpush3.bf16.msra.mxu0 %v13325_v13  ;;  %10996 = vmatprep.mubr.f32.mxu0 %v1684_v23  ;;  %v2091_v13 = vld [vmem:[#allocation6 + $0x558] sm:$0xff]  ;;  %v15657_v23 = vld [vmem:[#allocation3 + $0x281] sm:$0xff] }
 0x177   :  { %13330 = vmatprep.subr.bf16.mxu0 %v13329_v24  ;;  %10649 = vmatmul.mubr.f32.gmra.mrb[2].mxu1 %v15627_v2 }
 0x178   :  { %10651 = vmatprep.mubr.f32.mxu1 %v15629_v6 }
 0x179   :  { %10997 = vmatmul.mubr.f32.gmra.mrb[10].mxu0 %v1685_v31  ;;  %v2276_v31 = vld [vmem:[#allocation6 + $0x590] sm:$0xff] }
 0x17a   :  { %13332 = vmatpush3.bf16.msra.mxu0 %v13329_v24  ;;  %10999 = vmatprep.mubr.f32.mxu0 %v1686_v34  ;;  %v2274_v24 = vld [vmem:[#allocation6 + $0x580] sm:$0xff] }
 0x17b   :  { %13334 = vmatprep.subr.bf16.mxu0 %v13333_v36  ;;  %v2278_v34 = vld [vmem:[#allocation6 + $0x5a0] sm:$0xff] }
 0x17d   :  { %11000 = vmatmul.mubr.f32.gmra.mrb[12].mxu0 %v1687_v43  ;;  %v2070_v43 = vld [vmem:[#allocation3 + $0x81] sm:$0xff] }
 0x17e   :  { %13336 = vmatpush3.bf16.msra.mxu0 %v13333_v36  ;;  %11002 = vmatprep.mubr.f32.mxu0 %v1688_v46  ;;  %v2279_v36 = vld [vmem:[#allocation6 + $0x5a8] sm:$0xff]  ;;  %v2284_v46 = vld [vmem:[#allocation6 + $0x5d0] sm:$0xff] }
 0x17f   :  { %13338 = vmatprep.subr.bf16.mxu0 %v13337_v47 }
 0x181   :  { %11003 = vmatmul.mubr.f32.gmra.mrb[14].mxu0 %v1689_v53  ;;  %v2288_v53 = vld [vmem:[#allocation6 + $0x5f0] sm:$0xff] }
 0x182   :  { %13340 = vmatpush3.bf16.msra.mxu0 %v13337_v47  ;;  %11037 = vmatprep.mubr.f32.mxu0 %v15576_v29  ;;  %v13349_v29 = vpack.c.bf16 %v2085_v0, %v2084_v63  ;;  %v2285_v47 = vld [vmem:[#allocation6 + $0x5d8] sm:$0xff]  ;;  %v2471_v63 = vld [vmem:[#allocation6 + $0x610] sm:$0xff] }
 0x183   :  { %13342 = vmatprep.subr.bf16.mxu0 %v13341_v56  ;;  %v13393_v48 = vpack.c.bf16 %v2285_v47, %v2284_v46  ;;  %v2472_v0 = vld [vmem:[#allocation6 + $0x618] sm:$0xff]  ;;  %v2670_v46 = vld [vmem:[#allocation6 + $0x6b0] sm:$0xff] }
 0x184   :  { %v2671_v47 = vld [vmem:[#allocation6 + $0x6b8] sm:$0xff] }
 0x185   :  { %11038 = vmatmul.mubr.f32.vlgmr.msra.gmra.mrb[0].mxu0 %v15579_v35  ;;  %v13353_v35 = vpack.c.bf16 %v2087_v4, %v2086_v3  ;;  %v2473_v3 = vld [vmem:[#allocation6 + $0x620] sm:$0xff]  ;;  %v2474_v4 = vld [vmem:[#allocation6 + $0x628] sm:$0xff]  ;;  %v13449_v51 = vpack.c.bf16 %v2671_v47, %v2670_v46  ;;  %v2656_v46 = vld [vmem:[#allocation3 + $0x410] sm:$0xff] }
 0x186   :  { %13344 = vmatpush3.bf16.msra.mxu0 %v13341_v56  ;;  %11040 = vmatprep.mubr.f32.mxu0 %v15581_v39  ;;  %v15635_v39 = vld [vmem:[#allocation3 + $0x51] sm:$0xff]  ;;  %v13401_v56 = vpack.c.bf16 %v2289_v54, %v2288_v53  ;;  %v2673_v53 = vld [vmem:[#allocation6 + $0x6c8] sm:$0xff]  ;;  %v2459_v54 = vld [vmem:[#allocation3 + $0x1a0] sm:$0xff] }
 0x187   :  { %13346 = vmatprep.subr.bf16.mxu0 %v13345_v61  ;;  %10652 = vmatmul.mubr.f32.gmra.mrb[4].mxu1 %v15635_v39  ;;  %v2657_v47 = vld [vmem:[#allocation3 + $0x420] sm:$0xff] }
 0x188   :  { %10654 = vmatprep.mubr.f32.mxu1 %v15637_v9 }
 0x189   :  { %11041 = vmatmul.mubr.f32.gmra.mrb[2].mxu0 %v15585_v45  ;;  %v1876_v45 = vld [vmem:[#allocation3 + $0x110] sm:$0xff] }
 0x18a   :  { %13348 = vmatpush3.bf16.msra.mxu0 %v13345_v61  ;;  %11043 = vmatprep.mubr.f32.mxu0 %v15587_v49  ;;  %v13357_v49 = vpack.c.bf16 %v2089_v8, %v2088_v7  ;;  %v2257_v61 = vld [vmem:[#allocation3 + $0xa1] sm:$0xff]  ;;  %v2475_v7 = vld [vmem:[#allocation6 + $0x630] sm:$0xff]  ;;  %v2476_v8 = vld [vmem:[#allocation6 + $0x638] sm:$0xff] }
 0x18b   :  { %13350 = vmatprep.subr.bf16.mxu0 %v13349_v29  ;;  %10655 = vmatmul.mubr.f32.gmra.mrb[6].mxu1 %v15643_v10 }
 0x18c   :  { %10657 = vmatprep.mubr.f32.mxu1 %v515_v14  ;;  %v2265_v14 = vld [vmem:[#allocation3 + $0x2e1] sm:$0xff] }
 0x18d   :  { %11044 = vmatmul.mubr.f32.gmra.mrb[4].mxu0 %v15591_v55  ;;  %v13361_v55 = vpack.c.bf16 %v2091_v13, %v2090_v12  ;;  %v2478_v12 = vld [vmem:[#allocation6 + $0x648] sm:$0xff]  ;;  %v2264_v13 = vld [vmem:[#allocation3 + $0x111] sm:$0xff] }
 0x18e   :  { %13352 = vmatpush3.bf16.msra.mxu0 %v13349_v29  ;;  %11046 = vmatprep.mubr.f32.mxu0 %v15593_v59  ;;  %v2092_v59 = vld [vmem:[#allocation6 + $0x560] sm:$0xff] }
 0x18f   :  { %13354 = vmatprep.subr.bf16.mxu0 %v13353_v35  ;;  %10658 = vmatmul.mubr.f32.gmra.mrb[8].mxu1 %v15647_v16  ;;  %v2259_v29 = vld [vmem:[#allocation3 + $0xc1] sm:$0xff] }
 0x190   :  { %10660 = vmatprep.mubr.f32.mxu1 %v15649_v18 }
 0x191   :  { %11047 = vmatmul.mubr.f32.gmra.mrb[6].mxu0 %v1876_v45  ;;  %v2263_v45 = vld [vmem:[#allocation3 + $0x101] sm:$0xff] }
 0x192   :  { %13356 = vmatpush3.bf16.msra.mxu0 %v13353_v35  ;;  %11049 = vmatprep.mubr.f32.mxu0 %v15597_v5  ;;  %v13365_v5 = vpack.c.bf16 %v2093_v17, %v2092_v59  ;;  %v2261_v35 = vld [vmem:[#allocation3 + $0xe1] sm:$0xff]  ;;  %v2480_v59 = vld [vmem:[#allocation6 + $0x658] sm:$0xff] }
 0x193   :  { %13358 = vmatprep.subr.bf16.mxu0 %v13357_v49  ;;  %10661 = vmatmul.mubr.f32.gmra.mrb[10].mxu1 %v15655_v19  ;;  %v2266_v17 = vld [vmem:[#allocation3 + $0x2f1] sm:$0xff] }
 0x194   :  { %10663 = vmatprep.mubr.f32.mxu1 %v15657_v23 }
 0x195   :  { %11050 = vmatmul.mubr.f32.gmra.mrb[8].mxu0 %v15600_v11  ;;  %v13369_v11 = vpack.c.bf16 %v2095_v22, %v2094_v20  ;;  %v2482_v20 = vld [vmem:[#allocation6 + $0x668] sm:$0xff]  ;;  %v2268_v22 = vld [vmem:[#allocation3 + $0x311] sm:$0xff] }
 0x196   :  { %13360 = vmatpush3.bf16.msra.mxu0 %v13357_v49  ;;  %11052 = vmatprep.mubr.f32.mxu0 %v15602_v15  ;;  %v2075_v15 = vld [vmem:[#allocation3 + $0x291] sm:$0xff]  ;;  %v13417_v49 = vpack.c.bf16 %v2476_v8, %v2475_v7  ;;  %v3378_v7 = vld [vmem:[#allocation9 + $0xa0] sm:$0xff] }
 0x197   :  { %13362 = vmatprep.subr.bf16.mxu0 %v13361_v55  ;;  %10664 = vmatmul.mubr.f32.gmra.mrb[12].mxu1 %v2075_v15  ;;  %v3379_v8 = vld [vmem:[#allocation9 + $0xa8] sm:$0xff] }
 0x198   :  { %10666 = vmatprep.mubr.f32.mxu1 %v2076_v27 }
 0x199   :  { %11053 = vmatmul.mubr.f32.gmra.mrb[10].mxu0 %v15606_v21  ;;  %v13373_v21 = vpack.c.bf16 %v2275_v26, %v2274_v24  ;;  %v2484_v24 = vld [vmem:[#allocation6 + $0x678] sm:$0xff] }
 0x19a   :  { %13364 = vmatpush3.bf16.msra.mxu0 %v13361_v55  ;;  %11055 = vmatprep.mubr.f32.mxu0 %v15608_v25  ;;  %v13377_v25 = vpack.c.bf16 %v2277_v33, %v2276_v31  ;;  %v2270_v26 = vld [vmem:[#allocation3 + $0x331] sm:$0xff] }
 0x19b   :  { %13366 = vmatprep.subr.bf16.mxu0 %v13365_v5  ;;  %10667 = vmatmul.mubr.f32.gmra.mrb[14].mxu1 %v2077_v30  ;;  %v2272_v31 = vld [vmem:[#allocation3 + $0x351] sm:$0xff] }
 0x19c   :  { %v2452_v33 = vld [vmem:[#allocation3 + $0x130] sm:$0xff] }
 0x19d   :  { %11056 = vmatmul.mubr.f32.gmra.mrb[12].mxu0 %v15612_v32  ;;  %v13381_v32 = vpack.c.bf16 %v2279_v36, %v2278_v34  ;;  %v2666_v34 = vld [vmem:[#allocation6 + $0x690] sm:$0xff]  ;;  %v2667_v36 = vld [vmem:[#allocation6 + $0x698] sm:$0xff] }
 0x19e   :  { %13368 = vmatpush3.bf16.msra.mxu0 %v13365_v5  ;;  %11058 = vmatprep.mubr.f32.mxu0 %v15614_v37  ;;  %v2280_v37 = vld [vmem:[#allocation6 + $0x5b0] sm:$0xff] }
 0x19f   :  { %13370 = vmatprep.subr.bf16.mxu0 %v13369_v11  ;;  %v13385_v40 = vpack.c.bf16 %v2281_v38, %v2280_v37  ;;  %v2454_v37 = vld [vmem:[#allocation3 + $0x150] sm:$0xff]  ;;  %v13441_v38 = vpack.c.bf16 %v2667_v36, %v2666_v34  ;;  %v2653_v36 = vld [vmem:[#allocation3 + $0x220] sm:$0xff] }
 0x1a0   :  { %v2652_v34 = vld [vmem:[#allocation3 + $0x210] sm:$0xff] }
 0x1a1   :  { %11059 = vmatmul.mubr.f32.gmra.mrb[14].mxu0 %v1884_v28 }
 0x1a2   :  { %13372 = vmatpush3.bf16.msra.mxu0 %v13369_v11  ;;  %11093 = vmatprep.mubr.f32.mxu0 %v15619_v62  ;;  %v13405_v62 = vpack.c.bf16 %v2470_v58, %v2469_v57  ;;  %v2674_v58 = vld [vmem:[#allocation6 + $0x6d0] sm:$0xff] }
 0x1a3   :  { %13374 = vmatprep.subr.bf16.mxu0 %v13373_v21 }
 0x1a5   :  { %11094 = vmatmul.mubr.f32.vlgmr.msra.gmra.mrb[0].mxu0 %v15621_v1  ;;  %v2258_v1 = vld [vmem:[#allocation3 + $0xb1] sm:$0xff] }
 0x1a6   :  { %13376 = vmatpush3.bf16.msra.mxu0 %v13373_v21  ;;  %11096 = vmatprep.mubr.f32.mxu0 %v15627_v2  ;;  %v13409_v2 = vpack.c.bf16 %v2472_v0, %v2471_v63  ;;  %v2664_v21 = vld [vmem:[#allocation6 + $0x680] sm:$0xff] }
 0x1a7   :  { %13378 = vmatprep.subr.bf16.mxu0 %v13377_v25  ;;  %v2676_v0 = vld [vmem:[#allocation6 + $0x6e0] sm:$0xff] }
 0x1a9   :  { %11097 = vmatmul.mubr.f32.gmra.mrb[2].mxu0 %v15629_v6  ;;  %v2260_v6 = vld [vmem:[#allocation3 + $0xd1] sm:$0xff] }
 0x1aa   :  { %13380 = vmatpush3.bf16.msra.mxu0 %v13377_v25  ;;  %11099 = vmatprep.mubr.f32.mxu0 %v15635_v39  ;;  %v13413_v39 = vpack.c.bf16 %v2474_v4, %v2473_v3  ;;  %v3376_v3 = vld [vmem:[#allocation9 + $0x90] sm:$0xff] }
 0x1ab   :  { %13382 = vmatprep.subr.bf16.mxu0 %v13381_v32 }
 0x1ad   :  { %11100 = vmatmul.mubr.f32.gmra.mrb[4].mxu0 %v15637_v9  ;;  %v2262_v9 = vld [vmem:[#allocation3 + $0xf1] sm:$0xff] }
 0x1ae   :  { %13384 = vmatpush3.bf16.msra.mxu0 %v13381_v32  ;;  %11102 = vmatprep.mubr.f32.mxu0 %v15643_v10  ;;  %v2477_v10 = vld [vmem:[#allocation6 + $0x640] sm:$0xff] }
 0x1af   :  { %13386 = vmatprep.subr.bf16.mxu0 %v13385_v40  ;;  %v13421_v55 = vpack.c.bf16 %v2478_v12, %v2477_v10  ;;  %v2453_v32 = vld [vmem:[#allocation3 + $0x140] sm:$0xff]  ;;  %v2679_v10 = vld [vmem:[#allocation6 + $0x6f8] sm:$0xff]  ;;  %v13541_v12 = vpack.c.bf16 %v3379_v8, %v3378_v7  ;;  %v3057_v7 = vld [vmem:[#allocation6 + $0x7a8] sm:$0xff] }
 0x1b0   :  { %v2844_v8 = vld [vmem:[#allocation3 + $0x161] sm:$0xff] }
 0x1b1   :  { %11103 = vmatmul.mubr.f32.gmra.mrb[6].mxu0 %v2070_v43  ;;  %v2456_v43 = vld [vmem:[#allocation3 + $0x170] sm:$0xff] }
 0x1b2   :  { %13388 = vmatpush3.bf16.msra.mxu0 %v13385_v40  ;;  %11105 = vmatprep.mubr.f32.mxu0 %v15647_v16  ;;  %v2479_v16 = vld [vmem:[#allocation6 + $0x650] sm:$0xff]  ;;  %v2668_v40 = vld [vmem:[#allocation6 + $0x6a0] sm:$0xff] }
 0x1b3   :  { %13390 = vmatprep.subr.bf16.mxu0 %v13389_v44  ;;  %v13425_v5 = vpack.c.bf16 %v2480_v59, %v2479_v16  ;;  %v2466_v16 = vld [vmem:[#allocation3 + $0x3d0] sm:$0xff] }
 0x1b5   :  { %11106 = vmatmul.mubr.f32.gmra.mrb[8].mxu0 %v15649_v18  ;;  %v2267_v18 = vld [vmem:[#allocation3 + $0x301] sm:$0xff] }
 0x1b6   :  { %13392 = vmatpush3.bf16.msra.mxu0 %v13389_v44  ;;  %11108 = vmatprep.mubr.f32.mxu0 %v15655_v19  ;;  %v2481_v19 = vld [vmem:[#allocation6 + $0x660] sm:$0xff]  ;;  %v13445_v44 = vpack.c.bf16 %v2669_v41, %v2668_v40  ;;  %v2654_v40 = vld [vmem:[#allocation3 + $0x230] sm:$0xff] }
 0x1b7   :  { %13394 = vmatprep.subr.bf16.mxu0 %v13393_v48  ;;  %v13429_v11 = vpack.c.bf16 %v2482_v20, %v2481_v19  ;;  %v2467_v19 = vld [vmem:[#allocation3 + $0x3e0] sm:$0xff] }
 0x1b8   :  { %v2647_v20 = vld [vmem:[#allocation3 + $0x1c0] sm:$0xff] }
 0x1b9   :  { %11109 = vmatmul.mubr.f32.gmra.mrb[10].mxu0 %v15657_v23  ;;  %v2269_v23 = vld [vmem:[#allocation3 + $0x321] sm:$0xff] }
 0x1ba   :  { %13396 = vmatpush3.bf16.msra.mxu0 %v13393_v48  ;;  %11111 = vmatprep.mubr.f32.mxu0 %v2075_v15  ;;  %v2483_v15 = vld [vmem:[#allocation6 + $0x670] sm:$0xff]  ;;  %v2457_v48 = vld [vmem:[#allocation3 + $0x180] sm:$0xff] }
 0x1bb   :  { %13398 = vmatprep.subr.bf16.mxu0 %v13397_v52  ;;  %v13433_v28 = vpack.c.bf16 %v2484_v24, %v2483_v15  ;;  %v2648_v15 = vld [vmem:[#allocation3 + $0x1d0] sm:$0xff]  ;;  %v2649_v24 = vld [vmem:[#allocation3 + $0x1e0] sm:$0xff] }
 0x1bc   :  { %v2655_v41 = vld [vmem:[#allocation3 + $0x400] sm:$0xff] }
 0x1bd   :  { %11112 = vmatmul.mubr.f32.gmra.mrb[12].mxu0 %v2076_v27  ;;  %v2271_v27 = vld [vmem:[#allocation3 + $0x341] sm:$0xff] }
 0x1be   :  { %13400 = vmatpush3.bf16.msra.mxu0 %v13397_v52  ;;  %11114 = vmatprep.mubr.f32.mxu0 %v2077_v30  ;;  %v2665_v30 = vld [vmem:[#allocation6 + $0x688] sm:$0xff]  ;;  %v2672_v52 = vld [vmem:[#allocation6 + $0x6c0] sm:$0xff] }
 0x1bf   :  { %13402 = vmatprep.subr.bf16.mxu0 %v13401_v56  ;;  %v13437_v25 = vpack.c.bf16 %v2665_v30, %v2664_v21  ;;  %v13453_v57 = vpack.c.bf16 %v2673_v53, %v2672_v52  ;;  %v2650_v21 = vld [vmem:[#allocation3 + $0x1f0] sm:$0xff]  ;;  %v2651_v30 = vld [vmem:[#allocation3 + $0x200] sm:$0xff] }
 0x1c0   :  { %v2658_v52 = vld [vmem:[#allocation3 + $0x430] sm:$0xff]  ;;  %v2659_v53 = vld [vmem:[#allocation3 + $0x440] sm:$0xff] }
 0x1c1   :  { %11115 = vmatmul.mubr.f32.gmra.mrb[14].mxu0 %v2078_v60  ;;  %v2675_v60 = vld [vmem:[#allocation6 + $0x6d8] sm:$0xff] }
 0x1c2   :  { %13404 = vmatpush3.bf16.msra.mxu0 %v13401_v56  ;;  %11149 = vmatprep.mubr.f32.mxu0 %v2257_v61  ;;  %v2460_v56 = vld [vmem:[#allocation3 + $0x370] sm:$0xff]  ;;  %v2461_v61 = vld [vmem:[#allocation3 + $0x380] sm:$0xff]  ;;  %v13457_v63 = vpack.c.bf16 %v2675_v60, %v2674_v58 }
 0x1c3   :  { %13406 = vmatprep.subr.bf16.mxu0 %v13405_v62  ;;  %v2660_v58 = vld [vmem:[#allocation3 + $0x450] sm:$0xff]  ;;  %v2661_v60 = vld [vmem:[#allocation3 + $0x460] sm:$0xff] }
 0x1c5   :  { %11150 = vmatmul.mubr.f32.vlgmr.msra.gmra.mrb[0].mxu0 %v2258_v1  ;;  %v2677_v1 = vld [vmem:[#allocation6 + $0x6e8] sm:$0xff] }
 0x1c6   :  { %13408 = vmatpush3.bf16.msra.mxu0 %v13405_v62  ;;  %11152 = vmatprep.mubr.f32.mxu0 %v2259_v29  ;;  %v2462_v62 = vld [vmem:[#allocation3 + $0x390] sm:$0xff]  ;;  %v3374_v29 = vld [vmem:[#allocation9 + $0x80] sm:$0xff] }
 0x1c7   :  { %13410 = vmatprep.subr.bf16.mxu0 %v13409_v2 }
 0x1c9   :  { %11153 = vmatmul.mubr.f32.gmra.mrb[2].mxu0 %v2260_v6  ;;  %v3377_v6 = vld [vmem:[#allocation9 + $0x98] sm:$0xff] }
 0x1ca   :  { %13412 = vmatpush3.bf16.msra.mxu0 %v13409_v2  ;;  %11155 = vmatprep.mubr.f32.mxu0 %v2261_v35  ;;  %v3375_v2 = vld [vmem:[#allocation9 + $0x88] sm:$0xff]  ;;  %v2463_v35 = vld [vmem:[#allocation3 + $0x3a0] sm:$0xff] }
 0x1cb   :  { %13414 = vmatprep.subr.bf16.mxu0 %v13413_v39  ;;  %v13533_v4 = vpack.c.bf16 %v3375_v2, %v3374_v29  ;;  %v3054_v2 = vld [vmem:[#allocation6 + $0x790] sm:$0xff] }
 0x1cd   :  { %11156 = vmatmul.mubr.f32.gmra.mrb[4].mxu0 %v2262_v9  ;;  %v2464_v9 = vld [vmem:[#allocation3 + $0x3b0] sm:$0xff]  ;;  %13534 = vmatprep.subr.bf16.mxu1 %v13533_v4 }
 0x1ce   :  { %13416 = vmatpush3.bf16.msra.mxu0 %v13413_v39  ;;  %11158 = vmatprep.mubr.f32.mxu0 %v2263_v45  ;;  %v13537_v39 = vpack.c.bf16 %v3377_v6, %v3376_v3  ;;  %v13461_v45 = vpack.c.bf16 %v2677_v1, %v2676_v0  ;;  %v2662_v0 = vld [vmem:[#allocation3 + $0x470] sm:$0xff]  ;;  %v3055_v3 = vld [vmem:[#allocation6 + $0x798] sm:$0xff] }
 0x1cf   :  { %13418 = vmatprep.subr.bf16.mxu0 %v13417_v49  ;;  %13536 = vmatpush3.bf16.msra.mxu1 %v13533_v4  ;;  %v2841_v1 = vld [vmem:[#allocation3 + $0x131] sm:$0xff]  ;;  %v2842_v4 = vld [vmem:[#allocation3 + $0x141] sm:$0xff] }
 0x1d0   :  { %13538 = vmatprep.subr.bf16.mxu1 %v13537_v39  ;;  %v2843_v6 = vld [vmem:[#allocation3 + $0x151] sm:$0xff] }
 0x1d1   :  { %11159 = vmatmul.mubr.f32.gmra.mrb[6].mxu0 %v2264_v13  ;;  %v2465_v13 = vld [vmem:[#allocation3 + $0x3c0] sm:$0xff] }
 0x1d2   :  { %13420 = vmatpush3.bf16.msra.mxu0 %v13417_v49  ;;  %11161 = vmatprep.mubr.f32.mxu0 %v2265_v14  ;;  %v2678_v49 = vld [vmem:[#allocation6 + $0x6f0] sm:$0xff] }
 0x1d3   :  { %13422 = vmatprep.subr.bf16.mxu0 %v13421_v55  ;;  %v3380_v14 = vld [vmem:[#allocation9 + $0xb0] sm:$0xff]  ;;  %v13465_v59 = vpack.c.bf16 %v2679_v10, %v2678_v49  ;;  %13540 = vmatpush3.bf16.msra.mxu1 %v13537_v39  ;;  %v3056_v39 = vld [vmem:[#allocation6 + $0x7a0] sm:$0xff] }
 0x1d4   :  { %13542 = vmatprep.subr.bf16.mxu1 %v13541_v12  ;;  %v3058_v49 = vld [vmem:[#allocation6 + $0x7b0] sm:$0xff]  ;;  %v3059_v10 = vld [vmem:[#allocation6 + $0x7b8] sm:$0xff] }
 0x1d5   :  { %11162 = vmatmul.mubr.f32.gmra.mrb[8].mxu0 %v2266_v17  ;;  %v2858_v17 = vld [vmem:[#allocation6 + $0x700] sm:$0xff] }
 0x1d6   :  { %13424 = vmatpush3.bf16.msra.mxu0 %v13421_v55  ;;  %11164 = vmatprep.mubr.f32.mxu0 %v2267_v18  ;;  %v3381_v55 = vld [vmem:[#allocation9 + $0xb8] sm:$0xff]  ;;  %v2859_v18 = vld [vmem:[#allocation6 + $0x708] sm:$0xff] }
 0x1d7   :  { %13426 = vmatprep.subr.bf16.mxu0 %v13425_v5  ;;  %13544 = vmatpush3.bf16.msra.mxu1 %v13541_v12  ;;  %v2846_v12 = vld [vmem:[#allocation3 + $0x181] sm:$0xff] }
 0x1d9   :  { %11165 = vmatmul.mubr.f32.gmra.mrb[10].mxu0 %v2268_v22  ;;  %v13469_v22 = vpack.c.bf16 %v2859_v18, %v2858_v17  ;;  %v2849_v17 = vld [vmem:[#allocation3 + $0x371] sm:$0xff] }
 0x1da   :  { %13428 = vmatpush3.bf16.msra.mxu0 %v13425_v5  ;;  %11167 = vmatprep.mubr.f32.mxu0 %v2269_v23  ;;  %v13545_v5 = vpack.c.bf16 %v3381_v55, %v3380_v14  ;;  %v2860_v23 = vld [vmem:[#allocation6 + $0x710] sm:$0xff]  ;;  %v13513_v14 = vpack.c.bf16 %v3059_v10, %v3058_v49  ;;  %v3060_v55 = vld [vmem:[#allocation6 + $0x7c0] sm:$0xff] }
 0x1db   :  { %13430 = vmatprep.subr.bf16.mxu0 %v13429_v11  ;;  %v3386_v49 = vld [vmem:[#allocation9 + $0xe0] sm:$0xff]  ;;  %v3387_v10 = vld [vmem:[#allocation9 + $0xe8] sm:$0xff] }
 0x1dc   :  { %13546 = vmatprep.subr.bf16.mxu1 %v13545_v5 }
 0x1dd   :  { %11168 = vmatmul.mubr.f32.gmra.mrb[12].mxu0 %v2270_v26  ;;  %13548 = vmatpush3.bf16.msra.mxu1 %v13545_v5  ;;  %v3062_v5 = vld [vmem:[#allocation6 + $0x7d0] sm:$0xff] }
 0x1de   :  { %13432 = vmatpush3.bf16.msra.mxu0 %v13429_v11  ;;  %11170 = vmatprep.mubr.f32.mxu0 %v2271_v27  ;;  %v2861_v11 = vld [vmem:[#allocation6 + $0x718] sm:$0xff]  ;;  %v2862_v27 = vld [vmem:[#allocation6 + $0x720] sm:$0xff] }
 0x1df   :  { %13434 = vmatprep.subr.bf16.mxu0 %v13433_v28  ;;  %v13473_v26 = vpack.c.bf16 %v2861_v11, %v2860_v23  ;;  %v3064_v11 = vld [vmem:[#allocation6 + $0x7e0] sm:$0xff] }
 0x1e1   :  { %11171 = vmatmul.mubr.f32.gmra.mrb[14].mxu0 %v2272_v31 }
 0x1e2   :  { %13436 = vmatpush3.bf16.msra.mxu0 %v13433_v28  ;;  %11205 = vmatprep.mubr.f32.mxu0 %v2452_v33  ;;  %v2863_v28 = vld [vmem:[#allocation6 + $0x728] sm:$0xff]  ;;  %v2864_v33 = vld [vmem:[#allocation6 + $0x730] sm:$0xff] }
 0x1e3   :  { %13438 = vmatprep.subr.bf16.mxu0 %v13437_v25  ;;  %v13477_v31 = vpack.c.bf16 %v2863_v28, %v2862_v27  ;;  %v3066_v28 = vld [vmem:[#allocation6 + $0x7f0] sm:$0xff] }
 0x1e5   :  { %11206 = vmatmul.mubr.f32.vlgmr.msra.gmra.mrb[0].mxu0 %v2453_v32 }
 0x1e6   :  { %13440 = vmatpush3.bf16.msra.mxu0 %v13437_v25  ;;  %11208 = vmatprep.mubr.f32.mxu0 %v2454_v37  ;;  %v2865_v25 = vld [vmem:[#allocation6 + $0x738] sm:$0xff]  ;;  %v2866_v37 = vld [vmem:[#allocation6 + $0x740] sm:$0xff] }
 0x1e7   :  { %13442 = vmatprep.subr.bf16.mxu0 %v13441_v38  ;;  %v13481_v32 = vpack.c.bf16 %v2865_v25, %v2864_v33  ;;  %v2856_v25 = vld [vmem:[#allocation3 + $0x3e1] sm:$0xff] }
 0x1e9   :  { %11209 = vmatmul.mubr.f32.gmra.mrb[2].mxu0 %v2455_v42 }
 0x1ea   :  { %13444 = vmatpush3.bf16.msra.mxu0 %v13441_v38  ;;  %11211 = vmatprep.mubr.f32.mxu0 %v2456_v43  ;;  %v2867_v38 = vld [vmem:[#allocation6 + $0x748] sm:$0xff]  ;;  %v2868_v43 = vld [vmem:[#allocation6 + $0x750] sm:$0xff] }
 0x1eb   :  { %13446 = vmatprep.subr.bf16.mxu0 %v13445_v44  ;;  %v13485_v42 = vpack.c.bf16 %v2867_v38, %v2866_v37  ;;  %v3038_v37 = vld [vmem:[#allocation3 + $0x1f1] sm:$0xff]  ;;  %v3039_v38 = vld [vmem:[#allocation3 + $0x201] sm:$0xff] }
 0x1ed   :  { %11212 = vmatmul.mubr.f32.gmra.mrb[4].mxu0 %v2457_v48 }
 0x1ee   :  { %13448 = vmatpush3.bf16.msra.mxu0 %v13445_v44  ;;  %11214 = vmatprep.mubr.f32.mxu0 %v2458_v50  ;;  %v2869_v44 = vld [vmem:[#allocation6 + $0x758] sm:$0xff]  ;;  %v2870_v50 = vld [vmem:[#allocation6 + $0x760] sm:$0xff] }
 0x1ef   :  { %13450 = vmatprep.subr.bf16.mxu0 %v13449_v51  ;;  %v13489_v48 = vpack.c.bf16 %v2869_v44, %v2868_v43  ;;  %v3043_v43 = vld [vmem:[#allocation3 + $0x401] sm:$0xff]  ;;  %v3044_v44 = vld [vmem:[#allocation3 + $0x411] sm:$0xff] }
 0x1f1   :  { %11215 = vmatmul.mubr.f32.gmra.mrb[6].mxu0 %v2459_v54 }
 0x1f2   :  { %13452 = vmatpush3.bf16.msra.mxu0 %v13449_v51  ;;  %11217 = vmatprep.mubr.f32.mxu0 %v2460_v56  ;;  %v2871_v51 = vld [vmem:[#allocation6 + $0x768] sm:$0xff]  ;;  %v2872_v56 = vld [vmem:[#allocation6 + $0x770] sm:$0xff] }
 0x1f3   :  { %13454 = vmatprep.subr.bf16.mxu0 %v13453_v57  ;;  %v13493_v54 = vpack.c.bf16 %v2871_v51, %v2870_v50 }
 0x1f5   :  { %11218 = vmatmul.mubr.f32.gmra.mrb[8].mxu0 %v2461_v61 }
 0x1f6   :  { %13456 = vmatpush3.bf16.msra.mxu0 %v13453_v57  ;;  %11220 = vmatprep.mubr.f32.mxu0 %v2462_v62  ;;  %v2873_v57 = vld [vmem:[#allocation6 + $0x778] sm:$0xff]  ;;  %v3052_v62 = vld [vmem:[#allocation6 + $0x780] sm:$0xff] }
 0x1f7   :  { %13458 = vmatprep.subr.bf16.mxu0 %v13457_v63  ;;  %v13497_v61 = vpack.c.bf16 %v2873_v57, %v2872_v56  ;;  %v3050_v57 = vld [vmem:[#allocation3 + $0x471] sm:$0xff] }
 0x1f9   :  { %11221 = vmatmul.mubr.f32.gmra.mrb[10].mxu0 %v2463_v35  ;;  %v13505_v35 = vpack.c.bf16 %v3055_v3, %v3054_v2 }
 0x1fa   :  { %13460 = vmatpush3.bf16.msra.mxu0 %v13457_v63  ;;  %11223 = vmatprep.mubr.f32.mxu0 %v2464_v9  ;;  %v3053_v63 = vld [vmem:[#allocation6 + $0x788] sm:$0xff]  ;;  %v2845_v9 = vld [vmem:[#allocation3 + $0x171] sm:$0xff] }
 0x1fb   :  { %13462 = vmatprep.subr.bf16.mxu0 %v13461_v45  ;;  %v13501_v29 = vpack.c.bf16 %v3053_v63, %v3052_v62 }
 0x1fd   :  { %11224 = vmatmul.mubr.f32.gmra.mrb[12].mxu0 %v2465_v13  ;;  %v2847_v13 = vld [vmem:[#allocation3 + $0x191] sm:$0xff] }
 0x1fe   :  { %13464 = vmatpush3.bf16.msra.mxu0 %v13461_v45  ;;  %11226 = vmatprep.mubr.f32.mxu0 %v2466_v16  ;;  %v13509_v45 = vpack.c.bf16 %v3057_v7, %v3056_v39  ;;  %v3061_v16 = vld [vmem:[#allocation6 + $0x7c8] sm:$0xff] }
 0x1ff   :  { %13466 = vmatprep.subr.bf16.mxu0 %v13465_v59  ;;  %v13517_v18 = vpack.c.bf16 %v3061_v16, %v3060_v55  ;;  %v3383_v39 = vld [vmem:[#allocation9 + $0xc8] sm:$0xff]  ;;  %v3389_v55 = vld [vmem:[#allocation9 + $0xf8] sm:$0xff] }
 0x201   :  { %11227 = vmatmul.mubr.f32.gmra.mrb[14].mxu0 %v2467_v19  ;;  %v3063_v19 = vld [vmem:[#allocation6 + $0x7d8] sm:$0xff] }
 0x202   :  { %13468 = vmatpush3.bf16.msra.mxu0 %v13465_v59  ;;  %11261 = vmatprep.mubr.f32.mxu0 %v2647_v20  ;;  %v2848_v59 = vld [vmem:[#allocation3 + $0x1a1] sm:$0xff]  ;;  %v13521_v23 = vpack.c.bf16 %v3063_v19, %v3062_v5 }
 0x203   :  { %13470 = vmatprep.subr.bf16.mxu0 %v13469_v22  ;;  %v2850_v20 = vld [vmem:[#allocation3 + $0x381] sm:$0xff] }
 0x205   :  { %11262 = vmatmul.mubr.f32.vlgmr.msra.gmra.mrb[0].mxu0 %v2648_v15  ;;  %v3065_v15 = vld [vmem:[#allocation6 + $0x7e8] sm:$0xff] }
 0x206   :  { %13472 = vmatpush3.bf16.msra.mxu0 %v13469_v22  ;;  %11264 = vmatprep.mubr.f32.mxu0 %v2649_v24  ;;  %v2851_v22 = vld [vmem:[#allocation3 + $0x391] sm:$0xff]  ;;  %v2852_v24 = vld [vmem:[#allocation3 + $0x3a1] sm:$0xff]  ;;  %v13525_v27 = vpack.c.bf16 %v3065_v15, %v3064_v11 }
 0x207   :  { %13474 = vmatprep.subr.bf16.mxu0 %v13473_v26 }
 0x209   :  { %11265 = vmatmul.mubr.f32.gmra.mrb[2].mxu0 %v2650_v21  ;;  %v3067_v21 = vld [vmem:[#allocation6 + $0x7f8] sm:$0xff] }
 0x20a   :  { %13476 = vmatpush3.bf16.msra.mxu0 %v13473_v26  ;;  %11267 = vmatprep.mubr.f32.mxu0 %v2651_v30  ;;  %v2853_v26 = vld [vmem:[#allocation3 + $0x3b1] sm:$0xff]  ;;  %v2854_v30 = vld [vmem:[#allocation3 + $0x3c1] sm:$0xff]  ;;  %v13529_v33 = vpack.c.bf16 %v3067_v21, %v3066_v28 }
 0x20b   :  { %13478 = vmatprep.subr.bf16.mxu0 %v13477_v31 }
 0x20d   :  { %11268 = vmatmul.mubr.f32.gmra.mrb[4].mxu0 %v2652_v34  ;;  %v3035_v34 = vld [vmem:[#allocation3 + $0x1c1] sm:$0xff] }
 0x20e   :  { %13480 = vmatpush3.bf16.msra.mxu0 %v13477_v31  ;;  %11270 = vmatprep.mubr.f32.mxu0 %v2653_v36  ;;  %v2855_v31 = vld [vmem:[#allocation3 + $0x3d1] sm:$0xff] }
 0x20f   :  { %13482 = vmatprep.subr.bf16.mxu0 %v13481_v32  ;;  %v3036_v36 = vld [vmem:[#allocation3 + $0x1d1] sm:$0xff] }
 0x211   :  { %11271 = vmatmul.mubr.f32.gmra.mrb[6].mxu0 %v2654_v40  ;;  %v3040_v40 = vld [vmem:[#allocation3 + $0x211] sm:$0xff] }
 0x212   :  { %13484 = vmatpush3.bf16.msra.mxu0 %v13481_v32  ;;  %11273 = vmatprep.mubr.f32.mxu0 %v2655_v41  ;;  %v3037_v32 = vld [vmem:[#allocation3 + $0x1e1] sm:$0xff] }
 0x213   :  { %13486 = vmatprep.subr.bf16.mxu0 %v13485_v42  ;;  %v3041_v41 = vld [vmem:[#allocation3 + $0x221] sm:$0xff] }
 0x215   :  { %11274 = vmatmul.mubr.f32.gmra.mrb[8].mxu0 %v2656_v46  ;;  %v3045_v46 = vld [vmem:[#allocation3 + $0x421] sm:$0xff] }
 0x216   :  { %13488 = vmatpush3.bf16.msra.mxu0 %v13485_v42  ;;  %11276 = vmatprep.mubr.f32.mxu0 %v2657_v47  ;;  %v3042_v42 = vld [vmem:[#allocation3 + $0x231] sm:$0xff] }
 0x217   :  { %13490 = vmatprep.subr.bf16.mxu0 %v13489_v48  ;;  %v3046_v47 = vld [vmem:[#allocation3 + $0x431] sm:$0xff] }
 0x219   :  { %11277 = vmatmul.mubr.f32.gmra.mrb[10].mxu0 %v2658_v52  ;;  %v3048_v52 = vld [vmem:[#allocation3 + $0x451] sm:$0xff] }
 0x21a   :  { %13492 = vmatpush3.bf16.msra.mxu0 %v13489_v48  ;;  %11279 = vmatprep.mubr.f32.mxu0 %v2659_v53  ;;  %v3047_v48 = vld [vmem:[#allocation3 + $0x441] sm:$0xff] }
 0x21b   :  { %13494 = vmatprep.subr.bf16.mxu0 %v13493_v54  ;;  %v3049_v53 = vld [vmem:[#allocation3 + $0x461] sm:$0xff] }
 0x21d   :  { %11280 = vmatmul.mubr.f32.gmra.mrb[12].mxu0 %v2660_v58 }
 0x21e   :  { %13496 = vmatpush3.bf16.msra.mxu0 %v13493_v54  ;;  %11282 = vmatprep.mubr.f32.mxu0 %v2661_v60 }
 0x21f   :  { %13498 = vmatprep.subr.bf16.mxu0 %v13497_v61 }
 0x221   :  { %11283 = vmatmul.mubr.f32.gmra.mrb[14].mxu0 %v2662_v0 }
 0x222   :  { %13500 = vmatpush3.bf16.msra.mxu0 %v13497_v61  ;;  %11317 = vmatprep.mubr.f32.mxu0 %v2841_v1 }
 0x223   :  { %13502 = vmatprep.subr.bf16.mxu0 %v13501_v29 }
 0x225   :  { %11318 = vmatmul.mubr.f32.vlgmr.msra.gmra.mrb[0].mxu0 %v2842_v4 }
 0x226   :  { %13504 = vmatpush3.bf16.msra.mxu0 %v13501_v29  ;;  %11320 = vmatprep.mubr.f32.mxu0 %v2843_v6 }
 0x227   :  { %13506 = vmatprep.subr.bf16.mxu0 %v13505_v35 }
 0x229   :  { %11321 = vmatmul.mubr.f32.gmra.mrb[2].mxu0 %v2844_v8  ;;  %v3384_v8 = vld [vmem:[#allocation9 + $0xd0] sm:$0xff] }
 0x22a   :  { %13508 = vmatpush3.bf16.msra.mxu0 %v13505_v35  ;;  %11323 = vmatprep.mubr.f32.mxu0 %v2845_v9  ;;  %v3382_v35 = vld [vmem:[#allocation9 + $0xc0] sm:$0xff]  ;;  %v3385_v9 = vld [vmem:[#allocation9 + $0xd8] sm:$0xff] }
 0x22b   :  { %13510 = vmatprep.subr.bf16.mxu0 %v13509_v45  ;;  %v13549_v7 = vpack.c.bf16 %v3383_v39, %v3382_v35 }
 0x22d   :  { %11324 = vmatmul.mubr.f32.gmra.mrb[4].mxu0 %v2846_v12  ;;  %13550 = vmatprep.subr.bf16.mxu1 %v13549_v7  ;;  %v13557_v12 = vpack.c.bf16 %v3387_v10, %v3386_v49 }
 0x22e   :  { %13512 = vmatpush3.bf16.msra.mxu0 %v13509_v45  ;;  %11326 = vmatprep.mubr.f32.mxu0 %v2847_v13  ;;  %v13553_v45 = vpack.c.bf16 %v3385_v9, %v3384_v8  ;;  %v15380_v13 = vmov 0.0   ;;  %v3350_v8 = vld [vmem:[#allocation9 + $0x48] sm:$0xff] }
 0x22f   :  { %13514 = vmatprep.subr.bf16.mxu0 %v13513_v14  ;;  %13552 = vmatpush3.bf16.msra.mxu1 %v13549_v7  ;;  %3272 = vst [vmem:[#allocation2 + $0x20] sm:$0xff] %v15380_v13  ;;  %3273 = vst [vmem:[#allocation2 + $0x28] sm:$0x3] %v15380_v13  ;;  %v3349_v7 = vld [vmem:[#allocation9 + $0x40] sm:$0xff] }
 0x230   :  { %13554 = vmatprep.subr.bf16.mxu1 %v13553_v45  ;;  %3268 = vst [vmem:[#allocation2] sm:$0xff] %v15380_v13  ;;  %3269 = vst [vmem:[#allocation2 + $0x8] sm:$0x3] %v15380_v13 }
 0x231   :  { %11327 = vmatmul.mubr.f32.gmra.mrb[6].mxu0 %v2848_v59  ;;  %3270 = vst [vmem:[#allocation2 + $0x10] sm:$0xff] %v15380_v13  ;;  %3271 = vst [vmem:[#allocation2 + $0x18] sm:$0x3] %v15380_v13  ;;  %v3341_v59 = vld [vmem:[#allocation9] sm:$0xff] }
 0x232   :  { %13516 = vmatpush3.bf16.msra.mxu0 %v13513_v14  ;;  %11329 = vmatprep.mubr.f32.mxu0 %v2849_v17  ;;  %3274 = vst [vmem:[#allocation2 + $0x30] sm:$0xff] %v15380_v13  ;;  %3275 = vst [vmem:[#allocation2 + $0x38] sm:$0x3] %v15380_v13  ;;  %v3388_v14 = vld [vmem:[#allocation9 + $0xf0] sm:$0xff]  ;;  %v3342_v17 = vld [vmem:[#allocation9 + $0x8] sm:$0xff] }
 0x233   :  { %13518 = vmatprep.subr.bf16.mxu0 %v13517_v18  ;;  %13556 = vmatpush3.bf16.msra.mxu1 %v13553_v45  ;;  %3276 = vst [vmem:[#allocation2 + $0x40] sm:$0xff] %v15380_v13  ;;  %3277 = vst [vmem:[#allocation2 + $0x48] sm:$0x3] %v15380_v13  ;;  %v13561_v16 = vpack.c.bf16 %v3389_v55, %v3388_v14  ;;  %v13565_v5 = vpack.c.bf16 %v3342_v17, %v3341_v59  ;;  %v3351_v59 = vld [vmem:[#allocation9 + $0x50] sm:$0xff]  ;;  %v3352_v17 = vld [vmem:[#allocation9 + $0x58] sm:$0xff] }
 0x234   :  { %3278 = vst [vmem:[#allocation2 + $0x50] sm:$0xff] %v15380_v13  ;;  %3279 = vst [vmem:[#allocation2 + $0x58] sm:$0x3] %v15380_v13  ;;  %13558 = vmatprep.subr.bf16.mxu1 %v13557_v12  ;;  %v13581_v55 = vpack.c.bf16 %v3350_v8, %v3349_v7  ;;  %v3702_v7 = vld [vmem:[#allocation9 + $0x128] sm:$0xff] }
 0x235   :  { %11330 = vmatmul.mubr.f32.gmra.mrb[8].mxu0 %v2850_v20  ;;  %3280 = vst [vmem:[#allocation2 + $0x60] sm:$0xff] %v15380_v13  ;;  %3281 = vst [vmem:[#allocation2 + $0x68] sm:$0x3] %v15380_v13  ;;  %v15748_v20 = vld [vmem:[#allocation8] ss:$0 sm:$0xff] }
 0x236   :  { %13520 = vmatpush3.bf16.msra.mxu0 %v13517_v18  ;;  %11332 = vmatprep.mubr.f32.mxu0 %v2851_v22  ;;  %3282 = vst [vmem:[#allocation2 + $0x70] sm:$0xff] %v15380_v13  ;;  %3283 = vst [vmem:[#allocation2 + $0x78] sm:$0x3] %v15380_v13 }
 0x237   :  { %13522 = vmatprep.subr.bf16.mxu0 %v13521_v23  ;;  %3284 = vst [vmem:[#allocation2 + $0x80] sm:$0xff] %v15380_v13  ;;  %3285 = vst [vmem:[#allocation2 + $0x88] sm:$0x3] %v15380_v13  ;;  %13560 = vmatpush3.bf16.msra.mxu1 %v13557_v12  ;;  %v3357_v18 = vld [vmem:[#allocation2 + $0x1] sm:$0xff] }
 0x238   :  { %3286 = vst [vmem:[#allocation2 + $0x90] sm:$0xff] %v15380_v13  ;;  %3287 = vst [vmem:[#allocation2 + $0x98] sm:$0x3] %v15380_v13  ;;  %13562 = vmatprep.subr.bf16.mxu1 %v13561_v16  ;;  %11429 = vmatprep.mubr.f32.mxu1 %v3357_v18 }
 0x239   :  { %11333 = vmatmul.mubr.f32.gmra.mrb[10].mxu0 %v2852_v24  ;;  %3288 = vst [vmem:[#allocation2 + $0xa0] sm:$0xff] %v15380_v13  ;;  %3289 = vst [vmem:[#allocation2 + $0xa8] sm:$0x3] %v15380_v13  ;;  %v3343_v24 = vld [vmem:[#allocation9 + $0x10] sm:$0xff] }
 0x23a   :  { %13524 = vmatpush3.bf16.msra.mxu0 %v13521_v23  ;;  %11335 = vmatprep.mubr.f32.mxu0 %v2853_v26  ;;  %3290 = vst [vmem:[#allocation2 + $0xb0] sm:$0xff] %v15380_v13  ;;  %3291 = vst [vmem:[#allocation2 + $0xb8] sm:$0x3] %v15380_v13  ;;  %v3344_v26 = vld [vmem:[#allocation9 + $0x18] sm:$0xff] }
 0x23b   :  { %13526 = vmatprep.subr.bf16.mxu0 %v13525_v27  ;;  %3292 = vst [vmem:[#allocation2 + $0xc0] sm:$0xff] %v15380_v13  ;;  %3293 = vst [vmem:[#allocation2 + $0xc8] sm:$0x3] %v15380_v13  ;;  %13564 = vmatpush3.bf16.msra.mxu1 %v13561_v16 }
 0x23c   :  { %3294 = vst [vmem:[#allocation2 + $0xd0] sm:$0xff] %v15380_v13  ;;  %3295 = vst [vmem:[#allocation2 + $0xd8] sm:$0x3] %v15380_v13  ;;  %13566 = vmatprep.subr.bf16.mxu1 %v13565_v5 }
 0x23d   :  { %11336 = vmatmul.mubr.f32.gmra.mrb[12].mxu0 %v2854_v30  ;;  %3296 = vst [vmem:[#allocation2 + $0xe0] sm:$0xff] %v15380_v13  ;;  %3297 = vst [vmem:[#allocation2 + $0xe8] sm:$0x3] %v15380_v13 }
 0x23e   :  { %13528 = vmatpush3.bf16.msra.mxu0 %v13525_v27  ;;  %11338 = vmatprep.mubr.f32.mxu0 %v2855_v31  ;;  %3298 = vst [vmem:[#allocation2 + $0xf0] sm:$0xff] %v15380_v13  ;;  %3299 = vst [vmem:[#allocation2 + $0xf8] sm:$0x3] %v15380_v13 }
 0x23f   :  { %13530 = vmatprep.subr.bf16.mxu0 %v13529_v33  ;;  %3300 = vst [vmem:[#allocation2 + $0x100] sm:$0xff] %v15380_v13  ;;  %3301 = vst [vmem:[#allocation2 + $0x108] sm:$0x3] %v15380_v13 }
 0x240   :  { %3302 = vst [vmem:[#allocation2 + $0x110] sm:$0xff] %v15380_v13  ;;  %3303 = vst [vmem:[#allocation2 + $0x118] sm:$0x3] %v15380_v13  ;;  %v3365_v14 = vld [vmem:[#allocation2 + $0xa1] sm:$0xff] }
 0x241   :  { %11339 = vmatmul.mubr.f32.gmra.mrb[14].mxu0 %v2856_v25  ;;  %3304 = vst [vmem:[#allocation2 + $0x120] sm:$0xff] %v15380_v13  ;;  %3305 = vst [vmem:[#allocation2 + $0x128] sm:$0x3] %v15380_v13 }
 0x242   :  { %13532 = vmatpush3.bf16.msra.mxu0 %v13529_v33  ;;  %11373 = vmatprep.mubr.f32.mxu0 %v3035_v34  ;;  %3306 = vst [vmem:[#allocation2 + $0x130] sm:$0xff] %v15380_v13  ;;  %3307 = vst [vmem:[#allocation2 + $0x138] sm:$0x3] %v15380_v13  ;;  %v13569_v34 = vpack.c.bf16 %v3344_v26, %v3343_v24  ;;  %v3353_v24 = vld [vmem:[#allocation9 + $0x60] sm:$0xff]  ;;  %v3354_v26 = vld [vmem:[#allocation9 + $0x68] sm:$0xff] }
 0x245   :  { %11374 = vmatmul.mubr.f32.vlgmr.msra.gmra.mrb[0].mxu0 %v3036_v36 }
 0x246   :  { %11376 = vmatprep.mubr.f32.mxu0 %v3037_v32  ;;  %v15676_v50 = vpop.f32.mrb[0].mxu1  ;;  %v3345_v32 = vld [vmem:[#allocation9 + $0x20] sm:$0xff] }
 0x247   :  { %v15678_v51 = vpop.f32.mrb[1].mxu1 }
 0x249   :  { %11377 = vmatmul.mubr.f32.gmra.mrb[2].mxu0 %v3038_v37  ;;  %v3346_v37 = vld [vmem:[#allocation9 + $0x28] sm:$0xff] }
 0x24a   :  { %11379 = vmatprep.mubr.f32.mxu0 %v3039_v38  ;;  %v15680_v54 = vpop.f32.mrb[2].mxu1 }
 0x24b   :  { %v15682_v56 = vpop.f32.mrb[3].mxu1 }
 0x24d   :  { %11380 = vmatmul.mubr.f32.gmra.mrb[4].mxu0 %v3040_v40 }
 0x24e   :  { %11382 = vmatprep.mubr.f32.mxu0 %v3041_v41 }
 0x251   :  { %11383 = vmatmul.mubr.f32.gmra.mrb[6].mxu0 %v3042_v42 }
 0x252   :  { %11385 = vmatprep.mubr.f32.mxu0 %v3043_v43 }
 0x255   :  { %11386 = vmatmul.mubr.f32.gmra.mrb[8].mxu0 %v3044_v44 }
 0x256   :  { %11388 = vmatprep.mubr.f32.mxu0 %v3045_v46 }
 0x259   :  { %11389 = vmatmul.mubr.f32.gmra.mrb[10].mxu0 %v3046_v47  ;;  %v13573_v47 = vpack.c.bf16 %v3346_v37, %v3345_v32  ;;  %v3355_v32 = vld [vmem:[#allocation9 + $0x70] sm:$0xff]  ;;  %v3356_v37 = vld [vmem:[#allocation9 + $0x78] sm:$0xff] }
 0x25a   :  { %11391 = vmatprep.mubr.f32.mxu0 %v3047_v48  ;;  %v15684_v58 = vpop.f32.mrb[4].mxu1 }
 0x25b   :  { %v15686_v60 = vpop.f32.mrb[5].mxu1 }
 0x25d   :  { %11392 = vmatmul.mubr.f32.gmra.mrb[12].mxu0 %v3048_v52 }
 0x25e   :  { %11394 = vmatprep.mubr.f32.mxu0 %v3049_v53  ;;  %v15688_v61 = vpop.f32.mrb[6].mxu1 }
 0x25f   :  { %v15690_v62 = vpop.f32.mrb[7].mxu1 }
 0x261   :  { %11395 = vmatmul.mubr.f32.gmra.mrb[14].mxu0 %v3050_v57 }
 0x262   :  { %v15692_v63 = vpop.f32.mrb[8].mxu1 }
 0x263   :  { %v15694_v0 = vpop.f32.mrb[9].mxu1 }
 0x266   :  { %v15696_v1 = vpop.f32.mrb[10].mxu1 }
 0x267   :  { %v15698_v29 = vpop.f32.mrb[11].mxu1 }
 0x26a   :  { %v15700_v2 = vpop.f32.mrb[12].mxu1 }
 0x26b   :  { %v15702_v3 = vpop.f32.mrb[13].mxu1 }
 0x26e   :  { %v15704_v4 = vpop.f32.mrb[14].mxu1 }
 0x26f   :  { %v15706_v6 = vpop.f32.mrb[15].mxu1 }
 0x318   :  { %v11375_v19 = vpop.f32.mrb[0].mxu0 }
 0x319   :  { %v14461_v22 = vadd.f32 %v11375_v19, %v15676_v50  ;;  %v3134_v23 = vpop.f32.mrb[1].mxu0  ;;  %v3347_v50 = vld [vmem:[#allocation9 + $0x30] sm:$0xff] }
 0x31a   :  { %v14462_v11 = vadd.f32 %v3134_v23, %v15678_v51  ;;  %v3348_v51 = vld [vmem:[#allocation9 + $0x38] sm:$0xff] }
 0x31b   :  { %v3237_v15 = vadd.f32 %v14461_v22, %v15748_v20  ;;  %v13577_v35 = vpack.c.bf16 %v3348_v51, %v3347_v50  ;;  %v3697_v50 = vld [vmem:[#allocation9 + $0x100] sm:$0xff]  ;;  %v3698_v51 = vld [vmem:[#allocation9 + $0x108] sm:$0xff] }
 0x31c   :  { %v3236_v27 = vadd.f32 %v14462_v11, %v15748_v20  ;;  %v11378_v28 = vpop.f32.mrb[2].mxu0  ;;  %v13585_v11 = vpack.c.bf16 %v3352_v17, %v3351_v59  ;;  %v3706_v59 = vld [vmem:[#allocation9 + $0x148] sm:$0xff] }
 0x31d   :  { %v15754_v21 = vmax.f32 %v3237_v15, 0.0  ;;  %v14463_v30 = vadd.f32 %v11378_v28, %v15680_v54  ;;  %v3144_v31 = vpop.f32.mrb[3].mxu0 }
 0x31e   :  { %v15757_v33 = vmax.f32 %v3236_v27, 0.0  ;;  %v14464_v25 = vadd.f32 %v3144_v31, %v15682_v56 }
 0x31f   :  { %3310 = vst [vmem:[#allocation2 + $0x21] sm:$0xff] %v15754_v21  ;;  %v3239_v36 = vadd.f32 %v14463_v30, %v15748_v20 }
 0x320   :  { %3309 = vst [vmem:[#allocation2 + $0x11] sm:$0xff] %v15757_v33  ;;  %v3238_v38 = vadd.f32 %v14464_v25, %v15748_v20  ;;  %v11381_v40 = vpop.f32.mrb[4].mxu0  ;;  %11430 = vmatmul.mubr.f32.vlgmr.msra.gmra.mrb[16].mxu1 %v15757_v33 }
 0x321   :  { %v15765_v41 = vmax.f32 %v3239_v36, 0.0  ;;  %v14465_v42 = vadd.f32 %v11381_v40, %v15684_v58  ;;  %v3154_v43 = vpop.f32.mrb[5].mxu0  ;;  %11432 = vmatprep.mubr.f32.mxu1 %v15754_v21  ;;  %13568 = vmatpush3.bf16.msra.mxu1 %v13565_v5 }
 0x322   :  { %v15769_v44 = vmax.f32 %v3238_v38, 0.0  ;;  %v14466_v46 = vadd.f32 %v3154_v43, %v15686_v60  ;;  %13570 = vmatprep.subr.bf16.mxu1 %v13569_v34 }
 0x323   :  { %3312 = vst [vmem:[#allocation2 + $0x41] sm:$0xff] %v15765_v41  ;;  %v3241_v48 = vadd.f32 %v14465_v42, %v15748_v20 }
 0x324   :  { %3311 = vst [vmem:[#allocation2 + $0x31] sm:$0xff] %v15769_v44  ;;  %v3240_v52 = vadd.f32 %v14466_v46, %v15748_v20  ;;  %v11384_v53 = vpop.f32.mrb[6].mxu0  ;;  %11433 = vmatmul.mubr.f32.gmra.mrb[18].mxu1 %v15769_v44 }
 0x325   :  { %v15777_v54 = vmax.f32 %v3241_v48, 0.0  ;;  %v14467_v56 = vadd.f32 %v11384_v53, %v15688_v61  ;;  %v3164_v57 = vpop.f32.mrb[7].mxu0  ;;  %11435 = vmatprep.mubr.f32.mxu1 %v15765_v41  ;;  %13572 = vmatpush3.bf16.msra.mxu1 %v13569_v34  ;;  %v13589_v34 = vpack.c.bf16 %v3354_v26, %v3353_v24  ;;  %v13597_v53 = vpack.c.bf16 %v3698_v51, %v3697_v50  ;;  %v3710_v24 = vld [vmem:[#allocation9 + $0x168] sm:$0xff]  ;;  %v3895_v51 = vld [vmem:[#allocation9 + $0x1a0] sm:$0xff] }
 0x326   :  { %v15781_v58 = vmax.f32 %v3240_v52, 0.0  ;;  %v14468_v60 = vadd.f32 %v3164_v57, %v15690_v62  ;;  %13574 = vmatprep.subr.bf16.mxu1 %v13573_v47  ;;  %v3700_v57 = vld [vmem:[#allocation9 + $0x118] sm:$0xff] }
 0x327   :  { %3314 = vst [vmem:[#allocation2 + $0x61] sm:$0xff] %v15777_v54  ;;  %v15786_v39 = vadd.f32 %v14467_v56, %v15748_v20  ;;  %v3699_v56 = vld [vmem:[#allocation9 + $0x110] sm:$0xff]  ;;  %v15852_v8 = vld [vmem:[#allocation2 + $0x20] sm:$0xff] }
 0x328   :  { %3313 = vst [vmem:[#allocation2 + $0x51] sm:$0xff] %v15781_v58  ;;  %v3242_v61 = vadd.f32 %v14468_v60, %v15748_v20  ;;  %v11387_v9 = vpop.f32.mrb[8].mxu0  ;;  %11436 = vmatmul.mubr.f32.gmra.mrb[20].mxu1 %v15781_v58  ;;  %v15849_v60 = vld [vmem:[#allocation2 + $0x10] sm:$0xff] }
 0x329   :  { %v3259_v45 = vmax.f32 %v15786_v39, 0.0  ;;  %v14469_v62 = vadd.f32 %v11387_v9, %v15692_v63  ;;  %v3174_v49 = vpop.f32.mrb[9].mxu0  ;;  %11438 = vmatprep.mubr.f32.mxu1 %v15777_v54  ;;  %13576 = vmatpush3.bf16.msra.mxu1 %v13573_v47  ;;  %v13593_v47 = vpack.c.bf16 %v3356_v37, %v3355_v32  ;;  %v3892_v32 = vld [vmem:[#allocation9 + $0x188] sm:$0xff]  ;;  %v15892_v50 = vld [vmem:[#allocation2 + $0x12] sm:$0xff] }
 0x32a   :  { %v15794_v10 = vmax.f32 %v3242_v61, 0.0  ;;  %v14470_v12 = vadd.f32 %v3174_v49, %v15694_v0  ;;  %13578 = vmatprep.subr.bf16.mxu1 %v13577_v35  ;;  %v3704_v49 = vld [vmem:[#allocation9 + $0x138] sm:$0xff] }
 0x32b   :  { %3316 = vst [vmem:[#allocation2 + $0x81] sm:$0xff] %v3259_v45  ;;  %v3245_v16 = vadd.f32 %v14469_v62, %v15748_v20  ;;  %v15855_v9 = vld [vmem:[#allocation2 + $0x30] sm:$0xff] }
 0x32c   :  { %3315 = vst [vmem:[#allocation2 + $0x71] sm:$0xff] %v15794_v10  ;;  %v3244_v63 = vadd.f32 %v14470_v12, %v15748_v20  ;;  %v11390_v18 = vpop.f32.mrb[10].mxu0  ;;  %11439 = vmatmul.mubr.f32.gmra.mrb[22].mxu1 %v15794_v10  ;;  %v3703_v62 = vld [vmem:[#allocation9 + $0x130] sm:$0xff]  ;;  %v15858_v12 = vld [vmem:[#allocation2 + $0x40] sm:$0xff] }
 0x32d   :  { %v15803_v5 = vmax.f32 %v3245_v16, 0.0  ;;  %v14471_v0 = vadd.f32 %v11390_v18, %v15696_v1  ;;  %v3184_v19 = vpop.f32.mrb[11].mxu0  ;;  %13580 = vmatpush3.bf16.msra.mxu1 %v13577_v35  ;;  %11441 = vmatprep.mubr.f32.mxu1 %v3365_v14  ;;  %v3701_v35 = vld [vmem:[#allocation9 + $0x120] sm:$0xff]  ;;  %v13609_v14 = vpack.c.bf16 %v3704_v49, %v3703_v62 }
 0x32e   :  { %v15806_v22 = vmax.f32 %v3244_v63, 0.0  ;;  %v14472_v23 = vadd.f32 %v3184_v19, %v15698_v29  ;;  %13582 = vmatprep.subr.bf16.mxu1 %v13581_v55  ;;  %v13605_v61 = vpack.c.bf16 %v3702_v7, %v3701_v35  ;;  %v3705_v16 = vld [vmem:[#allocation9 + $0x140] sm:$0xff]  ;;  %v3708_v19 = vld [vmem:[#allocation9 + $0x158] sm:$0xff] }
 0x32f   :  { %3318 = vst [vmem:[#allocation2 + $0xc1] sm:$0xff] %v15803_v5  ;;  %v3247_v15 = vadd.f32 %v14471_v0, %v15748_v20  ;;  %v15864_v17 = vld [vmem:[#allocation2 + $0x60] sm:$0xff]  ;;  %v13613_v63 = vpack.c.bf16 %v3706_v59, %v3705_v16  ;;  %v3707_v0 = vld [vmem:[#allocation9 + $0x150] sm:$0xff] }
 0x330   :  { %3317 = vst [vmem:[#allocation2 + $0xb1] sm:$0xff] %v15806_v22  ;;  %v3246_v27 = vadd.f32 %v14472_v23, %v15748_v20  ;;  %v11393_v1 = vpop.f32.mrb[12].mxu0  ;;  %11442 = vmatmul.mubr.f32.gmra.mrb[24].mxu1 %v15806_v22  ;;  %v13617_v23 = vpack.c.bf16 %v3708_v19, %v3707_v0  ;;  %v3898_v35 = vld [vmem:[#allocation9 + $0x1b8] sm:$0xff]  ;;  %v15901_v7 = vld [vmem:[#allocation2 + $0x42] sm:$0xff]  ;;  %v15904_v62 = vld [vmem:[#allocation2 + $0x52] sm:$0xff] }
 0x331   :  { %v15814_v28 = vmax.f32 %v3247_v15, 0.0  ;;  %v14473_v30 = vadd.f32 %v11393_v1, %v15700_v2  ;;  %v3194_v29 = vpop.f32.mrb[13].mxu0  ;;  %11444 = vmatprep.mubr.f32.mxu1 %v15803_v5  ;;  %13584 = vmatpush3.bf16.msra.mxu1 %v13581_v55  ;;  %v15861_v55 = vld [vmem:[#allocation2 + $0x50] sm:$0xff]  ;;  %v3709_v15 = vld [vmem:[#allocation9 + $0x160] sm:$0xff] }
 0x332   :  { %v15818_v31 = vmax.f32 %v3246_v27, 0.0  ;;  %v14474_v25 = vadd.f32 %v3194_v29, %v15702_v3  ;;  %13586 = vmatprep.subr.bf16.mxu1 %v13585_v11  ;;  %v13621_v27 = vpack.c.bf16 %v3710_v24, %v3709_v15  ;;  %v3712_v29 = vld [vmem:[#allocation9 + $0x178] sm:$0xff]  ;;  %v3899_v49 = vld [vmem:[#allocation9 + $0x1c0] sm:$0xff]  ;;  %v3901_v19 = vld [vmem:[#allocation9 + $0x1d0] sm:$0xff] }
 0x333   :  { %3320 = vst [vmem:[#allocation2 + $0xe1] sm:$0xff] %v15814_v28  ;;  %v3249_v36 = vadd.f32 %v14473_v30, %v15748_v20  ;;  %v15867_v18 = vld [vmem:[#allocation2 + $0x70] sm:$0xff]  ;;  %v15907_v16 = vld [vmem:[#allocation2 + $0x62] sm:$0xff] }
 0x334   :  { %3319 = vst [vmem:[#allocation2 + $0xd1] sm:$0xff] %v15818_v31  ;;  %v3248_v2 = vadd.f32 %v14474_v25, %v15748_v20  ;;  %v11396_v38 = vpop.f32.mrb[14].mxu0  ;;  %11445 = vmatmul.mubr.f32.gmra.mrb[26].mxu1 %v15818_v31  ;;  %v3711_v30 = vld [vmem:[#allocation9 + $0x170] sm:$0xff]  ;;  %v3688_v59 = vld [vmem:[#allocation2 + $0xa2] sm:$0xff] }
 0x335   :  { %v15826_v40 = vmax.f32 %v3249_v36, 0.0  ;;  %v14475_v42 = vadd.f32 %v11396_v38, %v15704_v4  ;;  %v3204_v3 = vpop.f32.mrb[15].mxu0  ;;  %11447 = vmatprep.mubr.f32.mxu1 %v15814_v28  ;;  %13588 = vmatpush3.bf16.msra.mxu1 %v13585_v11  ;;  %v13625_v25 = vpack.c.bf16 %v3712_v29, %v3711_v30  ;;  %v3891_v36 = vld [vmem:[#allocation9 + $0x180] sm:$0xff]  ;;  %v15910_v0 = vld [vmem:[#allocation2 + $0x72] sm:$0xff]  ;;  %v3904_v30 = vld [vmem:[#allocation9 + $0x1e8] sm:$0xff] }
 0x336   :  { %v15830_v43 = vmax.f32 %v3248_v2, 0.0  ;;  %v14476_v46 = vadd.f32 %v3204_v3, %v15706_v6  ;;  %13590 = vmatprep.subr.bf16.mxu1 %v13589_v34  ;;  %v15874_v26 = vld [vmem:[#allocation2 + $0xc0] sm:$0xff]  ;;  %v13629_v38 = vpack.c.bf16 %v3892_v32, %v3891_v36  ;;  %v3893_v3 = vld [vmem:[#allocation9 + $0x190] sm:$0xff] }
 0x337   :  { %3322 = vst [vmem:[#allocation2 + $0x101] sm:$0xff] %v15826_v40  ;;  %v15835_v48 = vadd.f32 %v14475_v42, %v15748_v20  ;;  %v15871_v11 = vld [vmem:[#allocation2 + $0xb0] sm:$0xff]  ;;  %v3680_v2 = vld [vmem:[#allocation2 + $0x2] sm:$0xff] }
 0x338   :  { %3321 = vst [vmem:[#allocation2 + $0xf1] sm:$0xff] %v15830_v43  ;;  %v3250_v4 = vadd.f32 %v14476_v46, %v15748_v20  ;;  %11448 = vmatmul.mubr.f32.gmra.mrb[28].mxu1 %v15830_v43  ;;  %v13601_v20 = vpack.c.bf16 %v3700_v57, %v3699_v56  ;;  %v3894_v46 = vld [vmem:[#allocation9 + $0x198] sm:$0xff]  ;;  %v15898_v57 = vld [vmem:[#allocation2 + $0x32] sm:$0xff]  ;;  %v15916_v29 = vld [vmem:[#allocation2 + $0xc2] sm:$0xff] }
 0x339   :  { %v3267_v52 = vmax.f32 %v15835_v48, 0.0  ;;  %11450 = vmatprep.mubr.f32.mxu1 %v15826_v40  ;;  %13592 = vmatpush3.bf16.msra.mxu1 %v13589_v34  ;;  %v15913_v24 = vld [vmem:[#allocation2 + $0xb2] sm:$0xff] }
 0x33a   :  { %v15842_v6 = vmax.f32 %v3250_v4, 0.0  ;;  %13594 = vmatprep.subr.bf16.mxu1 %v13593_v47  ;;  %v3896_v4 = vld [vmem:[#allocation9 + $0x1a8] sm:$0xff]  ;;  %v3905_v32 = vld [vmem:[#allocation9 + $0x1f0] sm:$0xff] }
 0x33b   :  { %3324 = vst [vmem:[#allocation2 + $0x121] sm:$0xff] %v3267_v52  ;;  %v15877_v1 = vld [vmem:[#allocation2 + $0xd0] sm:$0xff]  ;;  %v13637_v56 = vpack.c.bf16 %v3896_v4, %v3895_v51 }
 0x33c   :  { %3323 = vst [vmem:[#allocation2 + $0x111] sm:$0xff] %v15842_v6  ;;  %11451 = vmatmul.mubr.f32.gmra.mrb[30].mxu1 %v15842_v6  ;;  %v15919_v36 = vld [vmem:[#allocation2 + $0xd2] sm:$0xff]  ;;  %v4086_v51 = vld [vmem:[#allocation9 + $0x208] sm:$0xff] }
 0x33d   :  { %13596 = vmatpush3.bf16.msra.mxu1 %v13593_v47  ;;  %11485 = vmatprep.mubr.f32.mxu1 %v15380_v13  ;;  %v13633_v47 = vpack.c.bf16 %v3894_v46, %v3893_v3 }
 0x33e   :  { %13598 = vmatprep.subr.bf16.mxu1 %v13597_v53  ;;  %v15886_v37 = vld [vmem:[#allocation2 + $0x100] sm:$0xff] }
 0x33f   :  { %v15883_v34 = vld [vmem:[#allocation2 + $0xf0] sm:$0xff]  ;;  %v15928_v4 = vld [vmem:[#allocation2 + $0x102] sm:$0xff] }
 0x340   :  { %11486 = vmatmul.mubr.f32.vlgmr.msra.gmra.mrb[16].mxu1 %v15849_v60  ;;  %v15925_v46 = vld [vmem:[#allocation2 + $0xf2] sm:$0xff] }
 0x341   :  { %11488 = vmatprep.mubr.f32.mxu1 %v15852_v8  ;;  %13600 = vmatpush3.bf16.msra.mxu1 %v13597_v53  ;;  %v15895_v53 = vld [vmem:[#allocation2 + $0x22] sm:$0xff] }
 0x342   :  { %13602 = vmatprep.subr.bf16.mxu1 %v13601_v20 }
 0x343   :  { %v15889_v42 = vld [vmem:[#allocation2 + $0x110] sm:$0xff] }
 0x344   :  { %11489 = vmatmul.mubr.f32.gmra.mrb[18].mxu1 %v15855_v9 }
 0x345   :  { %11491 = vmatprep.mubr.f32.mxu1 %v15858_v12  ;;  %13604 = vmatpush3.bf16.msra.mxu1 %v13601_v20  ;;  %v3897_v20 = vld [vmem:[#allocation9 + $0x1b0] sm:$0xff] }
 0x346   :  { %13606 = vmatprep.subr.bf16.mxu1 %v13605_v61 }
 0x348   :  { %11492 = vmatmul.mubr.f32.gmra.mrb[20].mxu1 %v15861_v55 }
 0x349   :  { %11494 = vmatprep.mubr.f32.mxu1 %v15864_v17  ;;  %13608 = vmatpush3.bf16.msra.mxu1 %v13605_v61  ;;  %v13641_v61 = vpack.c.bf16 %v3898_v35, %v3897_v20  ;;  %v15931_v20 = vld [vmem:[#allocation2 + $0x112] sm:$0xff] }
 0x34a   :  { %13610 = vmatprep.subr.bf16.mxu1 %v13609_v14  ;;  %v4087_v35 = vld [vmem:[#allocation9 + $0x210] sm:$0xff] }
 0x34c   :  { %11495 = vmatmul.mubr.f32.gmra.mrb[22].mxu1 %v15867_v18 }
 0x34d   :  { %13612 = vmatpush3.bf16.msra.mxu1 %v13609_v14  ;;  %11497 = vmatprep.mubr.f32.mxu1 %v15380_v13  ;;  %v15880_v13 = vld [vmem:[#allocation2 + $0xe0] sm:$0xff]  ;;  %v3900_v14 = vld [vmem:[#allocation9 + $0x1c8] sm:$0xff] }
 0x34e   :  { %13614 = vmatprep.subr.bf16.mxu1 %v13613_v63 }
 0x350   :  { %11498 = vmatmul.mubr.f32.gmra.mrb[24].mxu1 %v15871_v11 }
 0x351   :  { %11500 = vmatprep.mubr.f32.mxu1 %v15874_v26  ;;  %13616 = vmatpush3.bf16.msra.mxu1 %v13613_v63  ;;  %v13645_v63 = vpack.c.bf16 %v3900_v14, %v3899_v49  ;;  %v4089_v14 = vld [vmem:[#allocation9 + $0x220] sm:$0xff] }
 0x352   :  { %13618 = vmatprep.subr.bf16.mxu1 %v13617_v23 }
 0x354   :  { %11501 = vmatmul.mubr.f32.gmra.mrb[26].mxu1 %v15877_v1 }
 0x355   :  { %11503 = vmatprep.mubr.f32.mxu1 %v15880_v13  ;;  %13620 = vmatpush3.bf16.msra.mxu1 %v13617_v23  ;;  %v3902_v23 = vld [vmem:[#allocation9 + $0x1d8] sm:$0xff] }
 0x356   :  { %13622 = vmatprep.subr.bf16.mxu1 %v13621_v27  ;;  %v13649_v15 = vpack.c.bf16 %v3902_v23, %v3901_v19  ;;  %v4091_v19 = vld [vmem:[#allocation9 + $0x230] sm:$0xff]  ;;  %v4092_v23 = vld [vmem:[#allocation9 + $0x238] sm:$0xff] }
 0x358   :  { %11504 = vmatmul.mubr.f32.gmra.mrb[28].mxu1 %v15883_v34 }
 0x359   :  { %11506 = vmatprep.mubr.f32.mxu1 %v15886_v37  ;;  %13624 = vmatpush3.bf16.msra.mxu1 %v13621_v27  ;;  %v3903_v27 = vld [vmem:[#allocation9 + $0x1e0] sm:$0xff] }
 0x35a   :  { %13626 = vmatprep.subr.bf16.mxu1 %v13625_v25 }
 0x35c   :  { %11507 = vmatmul.mubr.f32.gmra.mrb[30].mxu1 %v15889_v42 }
 0x35d   :  { %13628 = vmatpush3.bf16.msra.mxu1 %v13625_v25  ;;  %11541 = vmatprep.mubr.f32.mxu1 %v3680_v2  ;;  %v13653_v25 = vpack.c.bf16 %v3904_v30, %v3903_v27  ;;  %v3906_v2 = vld [vmem:[#allocation9 + $0x1f8] sm:$0xff]  ;;  %v4094_v27 = vld [vmem:[#allocation9 + $0x248] sm:$0xff] }
 0x35e   :  { %13630 = vmatprep.subr.bf16.mxu1 %v13629_v38  ;;  %v13657_v3 = vpack.c.bf16 %v3906_v2, %v3905_v32  ;;  %v4095_v32 = vld [vmem:[#allocation9 + $0x250] sm:$0xff]  ;;  %v4096_v2 = vld [vmem:[#allocation9 + $0x258] sm:$0xff] }
 0x360   :  { %11542 = vmatmul.mubr.f32.vlgmr.msra.gmra.mrb[16].mxu1 %v15892_v50 }
 0x361   :  { %11544 = vmatprep.mubr.f32.mxu1 %v15895_v53  ;;  %13632 = vmatpush3.bf16.msra.mxu1 %v13629_v38  ;;  %v15922_v38 = vld [vmem:[#allocation2 + $0xe2] sm:$0xff] }
 0x362   :  { %13634 = vmatprep.subr.bf16.mxu1 %v13633_v47 }
 0x364   :  { %11545 = vmatmul.mubr.f32.gmra.mrb[18].mxu1 %v15898_v57 }
 0x365   :  { %11547 = vmatprep.mubr.f32.mxu1 %v15901_v7  ;;  %13636 = vmatpush3.bf16.msra.mxu1 %v13633_v47  ;;  %v4085_v47 = vld [vmem:[#allocation9 + $0x200] sm:$0xff] }
 0x366   :  { %13638 = vmatprep.subr.bf16.mxu1 %v13637_v56 }
 0x368   :  { %11548 = vmatmul.mubr.f32.gmra.mrb[20].mxu1 %v15904_v62 }
 0x369   :  { %11550 = vmatprep.mubr.f32.mxu1 %v15907_v16  ;;  %13640 = vmatpush3.bf16.msra.mxu1 %v13637_v56  ;;  %v13661_v56 = vpack.c.bf16 %v4086_v51, %v4085_v47  ;;  %v4097_v47 = vld [vmem:[#allocation9 + $0x260] sm:$0xff]  ;;  %v4098_v51 = vld [vmem:[#allocation9 + $0x268] sm:$0xff] }
 0x36a   :  { %13642 = vmatprep.subr.bf16.mxu1 %v13641_v61 }
 0x36c   :  { %11551 = vmatmul.mubr.f32.gmra.mrb[22].mxu1 %v15910_v0 }
 0x36d   :  { %13644 = vmatpush3.bf16.msra.mxu1 %v13641_v61  ;;  %11553 = vmatprep.mubr.f32.mxu1 %v3688_v59  ;;  %v4088_v61 = vld [vmem:[#allocation9 + $0x218] sm:$0xff]  ;;  %v4090_v59 = vld [vmem:[#allocation9 + $0x228] sm:$0xff] }
 0x36e   :  { %13646 = vmatprep.subr.bf16.mxu1 %v13645_v63  ;;  %v13665_v49 = vpack.c.bf16 %v4088_v61, %v4087_v35  ;;  %v4099_v35 = vld [vmem:[#allocation9 + $0x270] sm:$0xff]  ;;  %v4100_v61 = vld [vmem:[#allocation9 + $0x278] sm:$0xff] }
 0x370   :  { %11554 = vmatmul.mubr.f32.gmra.mrb[24].mxu1 %v15913_v24 }
 0x371   :  { %11556 = vmatprep.mubr.f32.mxu1 %v15916_v29  ;;  %13648 = vmatpush3.bf16.msra.mxu1 %v13645_v63  ;;  %v13669_v63 = vpack.c.bf16 %v4090_v59, %v4089_v14  ;;  %v4280_v14 = vld [vmem:[#allocation9 + $0x288] sm:$0xff] }
 0x372   :  { %13650 = vmatprep.subr.bf16.mxu1 %v13649_v15 }
 0x374   :  { %11557 = vmatmul.mubr.f32.gmra.mrb[26].mxu1 %v15919_v36 }
 0x375   :  { %11559 = vmatprep.mubr.f32.mxu1 %v15922_v38  ;;  %13652 = vmatpush3.bf16.msra.mxu1 %v13649_v15  ;;  %v4093_v15 = vld [vmem:[#allocation9 + $0x240] sm:$0xff] }
 0x376   :  { %13654 = vmatprep.subr.bf16.mxu1 %v13653_v25  ;;  %v13677_v30 = vpack.c.bf16 %v4094_v27, %v4093_v15  ;;  %v4283_v15 = vld [vmem:[#allocation9 + $0x2a0] sm:$0xff]  ;;  %v4284_v27 = vld [vmem:[#allocation9 + $0x2a8] sm:$0xff] }
 0x378   :  { %11560 = vmatmul.mubr.f32.gmra.mrb[28].mxu1 %v15925_v46 }
 0x379   :  { %11562 = vmatprep.mubr.f32.mxu1 %v15928_v4  ;;  %13656 = vmatpush3.bf16.msra.mxu1 %v13653_v25  ;;  %v15941_v25 = vld [vmem:[#allocation2 + $0x80] sm:$0xff] }
 0x37a   :  { %13658 = vmatprep.subr.bf16.mxu1 %v13657_v3 }
 0x37c   :  { %11563 = vmatmul.mubr.f32.gmra.mrb[30].mxu1 %v15931_v20 }
 0x37d   :  { %13660 = vmatpush3.bf16.msra.mxu1 %v13657_v3  ;;  %11597 = vmatprep.mubr.f32.mxu1 %v15849_v60  ;;  %v13673_v60 = vpack.c.bf16 %v4092_v23, %v4091_v19  ;;  %v13681_v3 = vpack.c.bf16 %v4096_v2, %v4095_v32  ;;  %v4281_v19 = vld [vmem:[#allocation9 + $0x290] sm:$0xff]  ;;  %v4282_v23 = vld [vmem:[#allocation9 + $0x298] sm:$0xff] }
 0x37e   :  { %13662 = vmatprep.subr.bf16.mxu1 %v13661_v56  ;;  %v4285_v32 = vld [vmem:[#allocation9 + $0x2b0] sm:$0xff]  ;;  %v4286_v2 = vld [vmem:[#allocation9 + $0x2b8] sm:$0xff] }
 0x380   :  { %11598 = vmatmul.mubr.f32.vlgmr.msra.gmra.mrb[16].mxu1 %v15852_v8 }
 0x381   :  { %11600 = vmatprep.mubr.f32.mxu1 %v15855_v9  ;;  %13664 = vmatpush3.bf16.msra.mxu1 %v13661_v56  ;;  %v13685_v56 = vpack.c.bf16 %v4098_v51, %v4097_v47  ;;  %v4288_v47 = vld [vmem:[#allocation9 + $0x2c8] sm:$0xff]  ;;  %v4290_v51 = vld [vmem:[#allocation9 + $0x2d8] sm:$0xff] }
 0x382   :  { %13666 = vmatprep.subr.bf16.mxu1 %v13665_v49 }
 0x384   :  { %11601 = vmatmul.mubr.f32.gmra.mrb[18].mxu1 %v15858_v12 }
 0x385   :  { %11603 = vmatprep.mubr.f32.mxu1 %v15861_v55  ;;  %13668 = vmatpush3.bf16.msra.mxu1 %v13665_v49  ;;  %v4279_v49 = vld [vmem:[#allocation9 + $0x280] sm:$0xff] }
 0x386   :  { %13670 = vmatprep.subr.bf16.mxu1 %v13669_v63  ;;  %v13693_v59 = vpack.c.bf16 %v4280_v14, %v4279_v49  ;;  %v4481_v49 = vld [vmem:[#allocation9 + $0x338] sm:$0xff] }
 0x388   :  { %11604 = vmatmul.mubr.f32.gmra.mrb[20].mxu1 %v15864_v17 }
 0x389   :  { %11606 = vmatprep.mubr.f32.mxu1 %v15867_v18  ;;  %13672 = vmatpush3.bf16.msra.mxu1 %v13669_v63  ;;  %v15951_v63 = vld [vmem:[#allocation2 + $0x120] sm:$0xff] }
 0x38a   :  { %13674 = vmatprep.subr.bf16.mxu1 %v13673_v60 }
 0x38c   :  { %11607 = vmatmul.mubr.f32.gmra.mrb[22].mxu1 %v15941_v25 }
 0x38d   :  { %11609 = vmatprep.mubr.f32.mxu1 %v15871_v11  ;;  %13676 = vmatpush3.bf16.msra.mxu1 %v13673_v60  ;;  %v13689_v11 = vpack.c.bf16 %v4100_v61, %v4099_v35  ;;  %v13697_v60 = vpack.c.bf16 %v4282_v23, %v4281_v19  ;;  %v4294_v35 = vld [vmem:[#allocation9 + $0x2f8] sm:$0xff]  ;;  %v4484_v19 = vld [vmem:[#allocation9 + $0x350] sm:$0xff] }
 0x38e   :  { %13678 = vmatprep.subr.bf16.mxu1 %v13677_v30  ;;  %v4477_v61 = vld [vmem:[#allocation9 + $0x318] sm:$0xff] }
 0x38f   :  { %v4485_v23 = vld [vmem:[#allocation9 + $0x358] sm:$0xff] }
 0x390   :  { %11610 = vmatmul.mubr.f32.gmra.mrb[24].mxu1 %v15874_v26 }
 0x391   :  { %11612 = vmatprep.mubr.f32.mxu1 %v15877_v1  ;;  %13680 = vmatpush3.bf16.msra.mxu1 %v13677_v30  ;;  %v13701_v30 = vpack.c.bf16 %v4284_v27, %v4283_v15  ;;  %v4486_v15 = vld [vmem:[#allocation9 + $0x360] sm:$0xff]  ;;  %v4487_v27 = vld [vmem:[#allocation9 + $0x368] sm:$0xff] }
 0x392   :  { %13682 = vmatprep.subr.bf16.mxu1 %v13681_v3 }
 0x394   :  { %11613 = vmatmul.mubr.f32.gmra.mrb[26].mxu1 %v15880_v13 }
 0x395   :  { %11615 = vmatprep.mubr.f32.mxu1 %v15883_v34  ;;  %13684 = vmatpush3.bf16.msra.mxu1 %v13681_v3  ;;  %v4287_v3 = vld [vmem:[#allocation9 + $0x2c0] sm:$0xff] }
 0x396   :  { %13686 = vmatprep.subr.bf16.mxu1 %v13685_v56 }
 0x398   :  { %11616 = vmatmul.mubr.f32.gmra.mrb[28].mxu1 %v15886_v37 }
 0x399   :  { %11618 = vmatprep.mubr.f32.mxu1 %v15889_v42  ;;  %13688 = vmatpush3.bf16.msra.mxu1 %v13685_v56  ;;  %v4292_v56 = vld [vmem:[#allocation9 + $0x2e8] sm:$0xff] }
 0x39a   :  { %13690 = vmatprep.subr.bf16.mxu1 %v13689_v11 }
 0x39c   :  { %11619 = vmatmul.mubr.f32.gmra.mrb[30].mxu1 %v15951_v63 }
 0x39d   :  { %13692 = vmatpush3.bf16.msra.mxu1 %v13689_v11  ;;  %11653 = vmatprep.mubr.f32.mxu1 %v15757_v33  ;;  %v13705_v33 = vpack.c.bf16 %v4286_v2, %v4285_v32  ;;  %v4479_v11 = vld [vmem:[#allocation9 + $0x328] sm:$0xff]  ;;  %v4488_v32 = vld [vmem:[#allocation9 + $0x370] sm:$0xff]  ;;  %v4489_v2 = vld [vmem:[#allocation9 + $0x378] sm:$0xff] }
 0x39e   :  { %13694 = vmatprep.subr.bf16.mxu1 %v13693_v59 }
 0x3a0   :  { %11654 = vmatmul.mubr.f32.vlgmr.msra.gmra.mrb[16].mxu1 %v15754_v21  ;;  %v13709_v21 = vpack.c.bf16 %v4288_v47, %v4287_v3  ;;  %v4669_v3 = vld [vmem:[#allocation9 + $0x388] sm:$0xff] }
 0x3a1   :  { %11656 = vmatprep.mubr.f32.mxu1 %v15769_v44  ;;  %13696 = vmatpush3.bf16.msra.mxu1 %v13693_v59  ;;  %v4289_v44 = vld [vmem:[#allocation9 + $0x2d0] sm:$0xff]  ;;  %v15979_v59 = vld [vmem:[#allocation2 + $0x82] sm:$0xff] }
 0x3a2   :  { %13698 = vmatprep.subr.bf16.mxu1 %v13697_v60 }
 0x3a4   :  { %11657 = vmatmul.mubr.f32.gmra.mrb[18].mxu1 %v15765_v41  ;;  %v13713_v41 = vpack.c.bf16 %v4290_v51, %v4289_v44  ;;  %v4670_v44 = vld [vmem:[#allocation9 + $0x390] sm:$0xff]  ;;  %v4671_v51 = vld [vmem:[#allocation9 + $0x398] sm:$0xff] }
 0x3a5   :  { %11659 = vmatprep.mubr.f32.mxu1 %v15781_v58  ;;  %13700 = vmatpush3.bf16.msra.mxu1 %v13697_v60  ;;  %v4291_v58 = vld [vmem:[#allocation9 + $0x2e0] sm:$0xff]  ;;  %v13745_v60 = vpack.c.bf16 %v4485_v23, %v4484_v19  ;;  %v4656_v23 = vld [vmem:[#allocation2 + $0x71] sm:$0xff] }
 0x3a6   :  { %13702 = vmatprep.subr.bf16.mxu1 %v13701_v30 }
 0x3a8   :  { %11660 = vmatmul.mubr.f32.gmra.mrb[20].mxu1 %v15777_v54  ;;  %v13717_v54 = vpack.c.bf16 %v4292_v56, %v4291_v58  ;;  %v4672_v58 = vld [vmem:[#allocation9 + $0x3a0] sm:$0xff]  ;;  %v4673_v56 = vld [vmem:[#allocation9 + $0x3a8] sm:$0xff] }
 0x3a9   :  { %11662 = vmatprep.mubr.f32.mxu1 %v15794_v10  ;;  %13704 = vmatpush3.bf16.msra.mxu1 %v13701_v30  ;;  %v4293_v10 = vld [vmem:[#allocation9 + $0x2f0] sm:$0xff]  ;;  %v13749_v30 = vpack.c.bf16 %v4487_v27, %v4486_v15  ;;  %v4871_v15 = vld [vmem:[#allocation9 + $0x448] sm:$0xff]  ;;  %v4657_v27 = vld [vmem:[#allocation2 + $0x81] sm:$0xff] }
 0x3aa   :  { %13706 = vmatprep.subr.bf16.mxu1 %v13705_v33  ;;  %v13721_v39 = vpack.c.bf16 %v4294_v35, %v4293_v10  ;;  %v4674_v10 = vld [vmem:[#allocation9 + $0x3b0] sm:$0xff]  ;;  %v4675_v35 = vld [vmem:[#allocation9 + $0x3b8] sm:$0xff] }
 0x3ac   :  { %11663 = vmatmul.mubr.f32.gmra.mrb[22].mxu1 %v3259_v45  ;;  %v4474_v45 = vld [vmem:[#allocation9 + $0x300] sm:$0xff] }
 0x3ad   :  { %11665 = vmatprep.mubr.f32.mxu1 %v15806_v22  ;;  %13708 = vmatpush3.bf16.msra.mxu1 %v13705_v33  ;;  %v4475_v22 = vld [vmem:[#allocation9 + $0x308] sm:$0xff]  ;;  %v4668_v33 = vld [vmem:[#allocation9 + $0x380] sm:$0xff] }
 0x3ae   :  { %13710 = vmatprep.subr.bf16.mxu1 %v13709_v21  ;;  %v13757_v47 = vpack.c.bf16 %v4669_v3, %v4668_v33  ;;  %v4659_v33 = vld [vmem:[#allocation2 + $0xc1] sm:$0xff] }
 0x3b0   :  { %11666 = vmatmul.mubr.f32.gmra.mrb[24].mxu1 %v15803_v5  ;;  %v13725_v5 = vpack.c.bf16 %v4475_v22, %v4474_v45  ;;  %v4677_v45 = vld [vmem:[#allocation9 + $0x3c8] sm:$0xff]  ;;  %v4679_v22 = vld [vmem:[#allocation9 + $0x3d8] sm:$0xff] }
 0x3b1   :  { %11668 = vmatprep.mubr.f32.mxu1 %v15818_v31  ;;  %13712 = vmatpush3.bf16.msra.mxu1 %v13709_v21  ;;  %v4476_v31 = vld [vmem:[#allocation9 + $0x310] sm:$0xff]  ;;  %v15989_v21 = vld [vmem:[#allocation2 + $0x122] sm:$0xff] }
 0x3b2   :  { %13714 = vmatprep.subr.bf16.mxu1 %v13713_v41 }
 0x3b4   :  { %11669 = vmatmul.mubr.f32.gmra.mrb[26].mxu1 %v15814_v28  ;;  %v13729_v28 = vpack.c.bf16 %v4477_v61, %v4476_v31  ;;  %v4681_v31 = vld [vmem:[#allocation9 + $0x3e8] sm:$0xff]  ;;  %v4683_v61 = vld [vmem:[#allocation9 + $0x3f8] sm:$0xff] }
 0x3b5   :  { %11671 = vmatprep.mubr.f32.mxu1 %v15830_v43  ;;  %13716 = vmatpush3.bf16.msra.mxu1 %v13713_v41  ;;  %v4478_v43 = vld [vmem:[#allocation9 + $0x320] sm:$0xff]  ;;  %v13761_v41 = vpack.c.bf16 %v4671_v51, %v4670_v44  ;;  %v4875_v51 = vld [vmem:[#allocation9 + $0x468] sm:$0xff] }
 0x3b6   :  { %13718 = vmatprep.subr.bf16.mxu1 %v13717_v54  ;;  %v4874_v44 = vld [vmem:[#allocation9 + $0x460] sm:$0xff] }
 0x3b8   :  { %11672 = vmatmul.mubr.f32.gmra.mrb[28].mxu1 %v15826_v40  ;;  %v13733_v40 = vpack.c.bf16 %v4479_v11, %v4478_v43  ;;  %v4863_v43 = vld [vmem:[#allocation9 + $0x408] sm:$0xff]  ;;  %v4865_v11 = vld [vmem:[#allocation9 + $0x418] sm:$0xff] }
 0x3b9   :  { %11674 = vmatprep.mubr.f32.mxu1 %v15842_v6  ;;  %13720 = vmatpush3.bf16.msra.mxu1 %v13717_v54  ;;  %v4480_v6 = vld [vmem:[#allocation9 + $0x330] sm:$0xff]  ;;  %v13765_v54 = vpack.c.bf16 %v4673_v56, %v4672_v58  ;;  %v13813_v58 = vpack.c.bf16 %v4875_v51, %v4874_v44 }
 0x3ba   :  { %13722 = vmatprep.subr.bf16.mxu1 %v13721_v39  ;;  %v13737_v48 = vpack.c.bf16 %v4481_v49, %v4480_v6  ;;  %v4866_v6 = vld [vmem:[#allocation9 + $0x420] sm:$0xff]  ;;  %v4867_v49 = vld [vmem:[#allocation9 + $0x428] sm:$0xff]  ;;  %v5116_v51 = vld [vmem:[#allocation12 + $0x30] sm:$0xff] }
 0x3bb   :  { %v4662_v56 = vld [vmem:[#allocation2 + $0xf1] sm:$0xff] }
 0x3bc   :  { %11675 = vmatmul.mubr.f32.gmra.mrb[30].mxu1 %v3267_v52  ;;  %v4482_v52 = vld [vmem:[#allocation9 + $0x340] sm:$0xff] }
 0x3bd   :  { %13724 = vmatpush3.bf16.msra.mxu1 %v13721_v39  ;;  %11709 = vmatprep.mubr.f32.mxu1 %v15892_v50  ;;  %v4483_v50 = vld [vmem:[#allocation9 + $0x348] sm:$0xff]  ;;  %v4676_v39 = vld [vmem:[#allocation9 + $0x3c0] sm:$0xff] }
 0x3be   :  { %13726 = vmatprep.subr.bf16.mxu1 %v13725_v5  ;;  %v13741_v14 = vpack.c.bf16 %v4483_v50, %v4482_v52  ;;  %v4868_v52 = vld [vmem:[#allocation9 + $0x430] sm:$0xff]  ;;  %v4869_v50 = vld [vmem:[#allocation9 + $0x438] sm:$0xff] }
 0x3bf   :  { %v13801_v19 = vpack.c.bf16 %v4869_v50, %v4868_v52 }
 0x3c0   :  { %11710 = vmatmul.mubr.f32.vlgmr.msra.gmra.mrb[16].mxu1 %v15895_v53 }
 0x3c1   :  { %11712 = vmatprep.mubr.f32.mxu1 %v15898_v57  ;;  %13728 = vmatpush3.bf16.msra.mxu1 %v13725_v5  ;;  %v15999_v5 = vld [vmem:[#allocation2] sm:$0xff] }
 0x3c2   :  { %13730 = vmatprep.subr.bf16.mxu1 %v13729_v28 }
 0x3c4   :  { %11713 = vmatmul.mubr.f32.gmra.mrb[18].mxu1 %v15901_v7 }
 0x3c5   :  { %11715 = vmatprep.mubr.f32.mxu1 %v15904_v62  ;;  %13732 = vmatpush3.bf16.msra.mxu1 %v13729_v28  ;;  %v4862_v28 = vld [vmem:[#allocation9 + $0x400] sm:$0xff] }
 0x3c6   :  { %13734 = vmatprep.subr.bf16.mxu1 %v13733_v40 }
 0x3c8   :  { %11716 = vmatmul.mubr.f32.gmra.mrb[20].mxu1 %v15907_v16 }
 0x3c9   :  { %11718 = vmatprep.mubr.f32.mxu1 %v15910_v0  ;;  %13736 = vmatpush3.bf16.msra.mxu1 %v13733_v40  ;;  %v4651_v40 = vld [vmem:[#allocation2 + $0x21] sm:$0xff] }
 0x3ca   :  { %13738 = vmatprep.subr.bf16.mxu1 %v13737_v48 }
 0x3cc   :  { %11719 = vmatmul.mubr.f32.gmra.mrb[22].mxu1 %v15979_v59 }
 0x3cd   :  { %11721 = vmatprep.mubr.f32.mxu1 %v15913_v24  ;;  %13740 = vmatpush3.bf16.msra.mxu1 %v13737_v48  ;;  %v13753_v24 = vpack.c.bf16 %v4489_v2, %v4488_v32  ;;  %v4653_v48 = vld [vmem:[#allocation2 + $0x41] sm:$0xff]  ;;  %v4872_v2 = vld [vmem:[#allocation9 + $0x450] sm:$0xff] }
 0x3ce   :  { %13742 = vmatprep.subr.bf16.mxu1 %v13741_v14 }
 0x3d0   :  { %11722 = vmatmul.mubr.f32.gmra.mrb[24].mxu1 %v15916_v29 }
 0x3d1   :  { %11724 = vmatprep.mubr.f32.mxu1 %v15919_v36  ;;  %13744 = vmatpush3.bf16.msra.mxu1 %v13741_v14  ;;  %v4655_v14 = vld [vmem:[#allocation2 + $0x61] sm:$0xff] }
 0x3d2   :  { %13746 = vmatprep.subr.bf16.mxu1 %v13745_v60 }
 0x3d4   :  { %11725 = vmatmul.mubr.f32.gmra.mrb[26].mxu1 %v15922_v38 }
 0x3d5   :  { %11727 = vmatprep.mubr.f32.mxu1 %v15925_v46  ;;  %13748 = vmatpush3.bf16.msra.mxu1 %v13745_v60  ;;  %v4870_v60 = vld [vmem:[#allocation9 + $0x440] sm:$0xff] }
 0x3d6   :  { %13750 = vmatprep.subr.bf16.mxu1 %v13749_v30  ;;  %v13805_v32 = vpack.c.bf16 %v4871_v15, %v4870_v60 }
 0x3d8   :  { %11728 = vmatmul.mubr.f32.gmra.mrb[28].mxu1 %v15928_v4 }
 0x3d9   :  { %11730 = vmatprep.mubr.f32.mxu1 %v15931_v20  ;;  %13752 = vmatpush3.bf16.msra.mxu1 %v13749_v30  ;;  %v4658_v30 = vld [vmem:[#allocation2 + $0x91] sm:$0xff] }
 0x3da   :  { %13754 = vmatprep.subr.bf16.mxu1 %v13753_v24 }
 0x3dc   :  { %11731 = vmatmul.mubr.f32.gmra.mrb[30].mxu1 %v15989_v21 }
 0x3dd   :  { %13756 = vmatpush3.bf16.msra.mxu1 %v13753_v24  ;;  %11765 = vmatprep.mubr.f32.mxu1 %v15852_v8  ;;  %v13769_v8 = vpack.c.bf16 %v4675_v35, %v4674_v10  ;;  %v4873_v24 = vld [vmem:[#allocation9 + $0x458] sm:$0xff] }
 0x3de   :  { %13758 = vmatprep.subr.bf16.mxu1 %v13757_v47  ;;  %v13809_v3 = vpack.c.bf16 %v4873_v24, %v4872_v2  ;;  %v4877_v10 = vld [vmem:[#allocation9 + $0x478] sm:$0xff] }
 0x3df   :  { %v4663_v35 = vld [vmem:[#allocation2 + $0x101] sm:$0xff] }
 0x3e0   :  { %11766 = vmatmul.mubr.f32.vlgmr.msra.gmra.mrb[16].mxu1 %v15855_v9  ;;  %v13773_v9 = vpack.c.bf16 %v4677_v45, %v4676_v39  ;;  %v4664_v39 = vld [vmem:[#allocation2 + $0x111] sm:$0xff]  ;;  %v5143_v45 = vld [vmem:[#allocation12 + $0x80] sm:$0xff] }
 0x3e1   :  { %11768 = vmatprep.mubr.f32.mxu1 %v15858_v12  ;;  %13760 = vmatpush3.bf16.msra.mxu1 %v13757_v47  ;;  %v4678_v12 = vld [vmem:[#allocation9 + $0x3d0] sm:$0xff] }
 0x3e2   :  { %13762 = vmatprep.subr.bf16.mxu1 %v13761_v41  ;;  %v4660_v47 = vld [vmem:[#allocation2 + $0xd1] sm:$0xff] }
 0x3e4   :  { %11769 = vmatmul.mubr.f32.gmra.mrb[18].mxu1 %v15861_v55  ;;  %v13777_v55 = vpack.c.bf16 %v4679_v22, %v4678_v12  ;;  %v4665_v12 = vld [vmem:[#allocation2 + $0x121] sm:$0xff]  ;;  %v4666_v22 = vld [vmem:[#allocation2 + $0x131] sm:$0xff] }
 0x3e5   :  { %11771 = vmatprep.mubr.f32.mxu1 %v15864_v17  ;;  %13764 = vmatpush3.bf16.msra.mxu1 %v13761_v41  ;;  %v4680_v17 = vld [vmem:[#allocation9 + $0x3e0] sm:$0xff] }
 0x3e6   :  { %13766 = vmatprep.subr.bf16.mxu1 %v13765_v54  ;;  %v4661_v41 = vld [vmem:[#allocation2 + $0xe1] sm:$0xff] }
 0x3e8   :  { %11772 = vmatmul.mubr.f32.gmra.mrb[20].mxu1 %v15867_v18  ;;  %v13781_v18 = vpack.c.bf16 %v4681_v31, %v4680_v17  ;;  %v5145_v17 = vld [vmem:[#allocation12 + $0x90] sm:$0xff]  ;;  %v5146_v31 = vld [vmem:[#allocation12 + $0x98] sm:$0xff] }
 0x3e9   :  { %11774 = vmatprep.mubr.f32.mxu1 %v15941_v25  ;;  %13768 = vmatpush3.bf16.msra.mxu1 %v13765_v54  ;;  %v4682_v25 = vld [vmem:[#allocation9 + $0x3f0] sm:$0xff] }
 0x3ea   :  { %13770 = vmatprep.subr.bf16.mxu1 %v13769_v8  ;;  %v4876_v54 = vld [vmem:[#allocation9 + $0x470] sm:$0xff] }
 0x3ec   :  { %11775 = vmatmul.mubr.f32.gmra.mrb[22].mxu1 %v15999_v5 }
 0x3ed   :  { %11777 = vmatprep.mubr.f32.mxu1 %v15874_v26  ;;  %13772 = vmatpush3.bf16.msra.mxu1 %v13769_v8  ;;  %v13785_v26 = vpack.c.bf16 %v4683_v61, %v4682_v25  ;;  %v13817_v8 = vpack.c.bf16 %v4877_v10, %v4876_v54  ;;  %v5147_v25 = vld [vmem:[#allocation12 + $0xa0] sm:$0xff]  ;;  %v5148_v61 = vld [vmem:[#allocation12 + $0xa8] sm:$0xff] }
 0x3ee   :  { %13774 = vmatprep.subr.bf16.mxu1 %v13773_v9 }
 0x3f0   :  { %11778 = vmatmul.mubr.f32.gmra.mrb[24].mxu1 %v15877_v1  ;;  %v13789_v1 = vpack.c.bf16 %v4863_v43, %v4862_v28  ;;  %v5149_v28 = vld [vmem:[#allocation12 + $0xb0] sm:$0xff]  ;;  %v5150_v43 = vld [vmem:[#allocation12 + $0xb8] sm:$0xff] }
 0x3f1   :  { %11780 = vmatprep.mubr.f32.mxu1 %v15880_v13  ;;  %13776 = vmatpush3.bf16.msra.mxu1 %v13773_v9  ;;  %v4864_v13 = vld [vmem:[#allocation9 + $0x410] sm:$0xff] }
 0x3f2   :  { %13778 = vmatprep.subr.bf16.mxu1 %v13777_v55  ;;  %v5144_v9 = vld [vmem:[#allocation12 + $0x88] sm:$0xff] }
 0x3f4   :  { %11781 = vmatmul.mubr.f32.gmra.mrb[26].mxu1 %v15883_v34  ;;  %v13793_v34 = vpack.c.bf16 %v4865_v11, %v4864_v13  ;;  %v5152_v13 = vld [vmem:[#allocation12 + $0xc8] sm:$0xff] }
 0x3f5   :  { %11783 = vmatprep.mubr.f32.mxu1 %v15886_v37  ;;  %13780 = vmatpush3.bf16.msra.mxu1 %v13777_v55  ;;  %v4652_v37 = vld [vmem:[#allocation2 + $0x31] sm:$0xff]  ;;  %v13821_v55 = vpack.c.bf16 %v5144_v9, %v5143_v45  ;;  %v5118_v45 = vld [vmem:[#allocation12 + $0x40] sm:$0xff] }
 0x3f6   :  { %13782 = vmatprep.subr.bf16.mxu1 %v13781_v18  ;;  %v5119_v9 = vld [vmem:[#allocation12 + $0x48] sm:$0xff] }
 0x3f8   :  { %11784 = vmatmul.mubr.f32.gmra.mrb[28].mxu1 %v15889_v42  ;;  %v13797_v42 = vpack.c.bf16 %v4867_v49, %v4866_v6 }
 0x3f9   :  { %11786 = vmatprep.mubr.f32.mxu1 %v15951_v63  ;;  %13784 = vmatpush3.bf16.msra.mxu1 %v13781_v18  ;;  %v4654_v63 = vld [vmem:[#allocation2 + $0x51] sm:$0xff]  ;;  %v13825_v18 = vpack.c.bf16 %v5146_v31, %v5145_v17  ;;  %v5134_v31 = vld [vmem:[#allocation2 + $0xa1] sm:$0xff] }
 0x3fa   :  { %13786 = vmatprep.subr.bf16.mxu1 %v13785_v26 }
 0x3fc   :  { %11787 = vmatmul.mubr.f32.gmra.mrb[30].mxu1 %v15999_v5 }
 0x3fd   :  { %13788 = vmatpush3.bf16.msra.mxu1 %v13785_v26  ;;  %11821 = vmatprep.mubr.f32.mxu1 %v4651_v40  ;;  %v13829_v26 = vpack.c.bf16 %v5148_v61, %v5147_v25 }
 0x3fe   :  { %13790 = vmatprep.subr.bf16.mxu1 %v13789_v1 }
 0x400   :  { %11822 = vmatmul.mubr.f32.vlgmr.msra.gmra.mrb[16].mxu1 %v4652_v37  ;;  %v16024_v37 = vld [vmem:[#allocation11] ss:$0 sm:$0xff] }
 0x401   :  { %11824 = vmatprep.mubr.f32.mxu1 %v4653_v48  ;;  %13792 = vmatpush3.bf16.msra.mxu1 %v13789_v1  ;;  %v5151_v1 = vld [vmem:[#allocation12 + $0xc0] sm:$0xff] }
 0x402   :  { %13794 = vmatprep.subr.bf16.mxu1 %v13793_v34 }
 0x404   :  { %11825 = vmatmul.mubr.f32.gmra.mrb[18].mxu1 %v4654_v63  ;;  %v5113_v63 = vld [vmem:[#allocation12 + $0x18] sm:$0xff] }
 0x405   :  { %11827 = vmatprep.mubr.f32.mxu1 %v4655_v14  ;;  %13796 = vmatpush3.bf16.msra.mxu1 %v13793_v34 }
 0x406   :  { %13798 = vmatprep.subr.bf16.mxu1 %v13797_v42 }
 0x408   :  { %11828 = vmatmul.mubr.f32.gmra.mrb[20].mxu1 %v4656_v23 }
 0x409   :  { %11830 = vmatprep.mubr.f32.mxu1 %v4657_v27  ;;  %13800 = vmatpush3.bf16.msra.mxu1 %v13797_v42  ;;  %v5112_v42 = vld [vmem:[#allocation12 + $0x10] sm:$0xff]  ;;  %v5114_v27 = vld [vmem:[#allocation12 + $0x20] sm:$0xff] }
 0x40a   :  { %13802 = vmatprep.subr.bf16.mxu1 %v13801_v19  ;;  %v13857_v23 = vpack.c.bf16 %v5113_v63, %v5112_v42 }
 0x40c   :  { %11831 = vmatmul.mubr.f32.gmra.mrb[22].mxu1 %v4658_v30  ;;  %v5115_v30 = vld [vmem:[#allocation12 + $0x28] sm:$0xff] }
 0x40d   :  { %11833 = vmatprep.mubr.f32.mxu1 %v4659_v33  ;;  %13804 = vmatpush3.bf16.msra.mxu1 %v13801_v19 }
 0x40e   :  { %13806 = vmatprep.subr.bf16.mxu1 %v13805_v32 }
 0x410   :  { %11834 = vmatmul.mubr.f32.gmra.mrb[24].mxu1 %v4660_v47 }
 0x411   :  { %11836 = vmatprep.mubr.f32.mxu1 %v4661_v41  ;;  %13808 = vmatpush3.bf16.msra.mxu1 %v13805_v32  ;;  %v5117_v41 = vld [vmem:[#allocation12 + $0x38] sm:$0xff] }
 0x412   :  { %13810 = vmatprep.subr.bf16.mxu1 %v13809_v3 }
 0x414   :  { %11837 = vmatmul.mubr.f32.gmra.mrb[26].mxu1 %v4662_v56 }
 0x415   :  { %11839 = vmatprep.mubr.f32.mxu1 %v4663_v35  ;;  %13812 = vmatpush3.bf16.msra.mxu1 %v13809_v3  ;;  %v13861_v3 = vpack.c.bf16 %v5115_v30, %v5114_v27  ;;  %v13865_v35 = vpack.c.bf16 %v5117_v41, %v5116_v51  ;;  %v5468_v30 = vld [vmem:[#allocation12 + $0x110] sm:$0xff] }
 0x416   :  { %13814 = vmatprep.subr.bf16.mxu1 %v13813_v58 }
 0x418   :  { %11840 = vmatmul.mubr.f32.gmra.mrb[28].mxu1 %v4664_v39 }
 0x419   :  { %11842 = vmatprep.mubr.f32.mxu1 %v4665_v12  ;;  %13816 = vmatpush3.bf16.msra.mxu1 %v13813_v58 }
 0x41a   :  { %13818 = vmatprep.subr.bf16.mxu1 %v13817_v8 }
 0x41c   :  { %11843 = vmatmul.mubr.f32.gmra.mrb[30].mxu1 %v4666_v22 }
 0x41d   :  { %13820 = vmatpush3.bf16.msra.mxu1 %v13817_v8  ;;  %11877 = vmatprep.mubr.f32.mxu1 %v15895_v53  ;;  %v13833_v53 = vpack.c.bf16 %v5150_v43, %v5149_v28  ;;  %v5121_v28 = vld [vmem:[#allocation12 + $0x58] sm:$0xff] }
 0x41e   :  { %13822 = vmatprep.subr.bf16.mxu1 %v13821_v55 }
 0x420   :  { %11878 = vmatmul.mubr.f32.vlgmr.msra.gmra.mrb[16].mxu1 %v15898_v57  ;;  %v4852_v57 = vld [vmem:[#allocation2 + $0x92] sm:$0xff] }
 0x421   :  { %11880 = vmatprep.mubr.f32.mxu1 %v15901_v7  ;;  %13824 = vmatpush3.bf16.msra.mxu1 %v13821_v55  ;;  %v13837_v7 = vpack.c.bf16 %v5152_v13, %v5151_v1 }
 0x422   :  { %13826 = vmatprep.subr.bf16.mxu1 %v13825_v18 }
 0x424   :  { %11881 = vmatmul.mubr.f32.gmra.mrb[18].mxu1 %v15904_v62  ;;  %v4860_v62 = vld [vmem:[#allocation2 + $0x132] sm:$0xff] }
 0x425   :  { %11883 = vmatprep.mubr.f32.mxu1 %v15907_v16  ;;  %13828 = vmatpush3.bf16.msra.mxu1 %v13825_v18  ;;  %v5153_v16 = vld [vmem:[#allocation12 + $0xd0] sm:$0xff]  ;;  %v13869_v18 = vpack.c.bf16 %v5119_v9, %v5118_v45  ;;  %v5474_v9 = vld [vmem:[#allocation12 + $0x140] sm:$0xff] }
 0x426   :  { %13830 = vmatprep.subr.bf16.mxu1 %v13829_v26 }
 0x428   :  { %11884 = vmatmul.mubr.f32.gmra.mrb[20].mxu1 %v15910_v0  ;;  %v5154_v0 = vld [vmem:[#allocation12 + $0xd8] sm:$0xff] }
 0x429   :  { %11886 = vmatprep.mubr.f32.mxu1 %v15979_v59  ;;  %13832 = vmatpush3.bf16.msra.mxu1 %v13829_v26  ;;  %v5155_v59 = vld [vmem:[#allocation12 + $0xe0] sm:$0xff]  ;;  %v5120_v26 = vld [vmem:[#allocation12 + $0x50] sm:$0xff] }
 0x42a   :  { %13834 = vmatprep.subr.bf16.mxu1 %v13833_v53 }
 0x42c   :  { %11887 = vmatmul.mubr.f32.gmra.mrb[22].mxu1 %v4852_v57  ;;  %v13873_v57 = vpack.c.bf16 %v5121_v28, %v5120_v26 }
 0x42d   :  { %11889 = vmatprep.mubr.f32.mxu1 %v15916_v29  ;;  %13836 = vmatpush3.bf16.msra.mxu1 %v13833_v53  ;;  %v13841_v29 = vpack.c.bf16 %v5154_v0, %v5153_v16  ;;  %v5122_v16 = vld [vmem:[#allocation12 + $0x60] sm:$0xff]  ;;  %v5123_v0 = vld [vmem:[#allocation12 + $0x68] sm:$0xff] }
 0x42e   :  { %13838 = vmatprep.subr.bf16.mxu1 %v13837_v7 }
 0x430   :  { %11890 = vmatmul.mubr.f32.gmra.mrb[24].mxu1 %v15919_v36  ;;  %v5156_v36 = vld [vmem:[#allocation12 + $0xe8] sm:$0xff] }
 0x431   :  { %11892 = vmatprep.mubr.f32.mxu1 %v15922_v38  ;;  %13840 = vmatpush3.bf16.msra.mxu1 %v13837_v7  ;;  %v13845_v11 = vpack.c.bf16 %v5156_v36, %v5155_v59  ;;  %v5157_v38 = vld [vmem:[#allocation12 + $0xf0] sm:$0xff] }
 0x432   :  { %13842 = vmatprep.subr.bf16.mxu1 %v13841_v29 }
 0x434   :  { %11893 = vmatmul.mubr.f32.gmra.mrb[26].mxu1 %v15925_v46  ;;  %v5158_v46 = vld [vmem:[#allocation12 + $0xf8] sm:$0xff] }
 0x435   :  { %11895 = vmatprep.mubr.f32.mxu1 %v15928_v4  ;;  %13844 = vmatpush3.bf16.msra.mxu1 %v13841_v29  ;;  %v13849_v40 = vpack.c.bf16 %v5158_v46, %v5157_v38  ;;  %v5110_v4 = vld [vmem:[#allocation12] sm:$0xff]  ;;  %v13877_v38 = vpack.c.bf16 %v5123_v0, %v5122_v16  ;;  %v5480_v16 = vld [vmem:[#allocation12 + $0x170] sm:$0xff]  ;;  %v5481_v0 = vld [vmem:[#allocation12 + $0x178] sm:$0xff] }
 0x436   :  { %13846 = vmatprep.subr.bf16.mxu1 %v13845_v11 }
 0x438   :  { %11896 = vmatmul.mubr.f32.gmra.mrb[28].mxu1 %v15931_v20  ;;  %v5111_v20 = vld [vmem:[#allocation12 + $0x8] sm:$0xff] }
 0x439   :  { %11898 = vmatprep.mubr.f32.mxu1 %v15989_v21  ;;  %13848 = vmatpush3.bf16.msra.mxu1 %v13845_v11  ;;  %v5126_v21 = vld [vmem:[#allocation2 + $0x1] sm:$0xff]  ;;  %v13853_v34 = vpack.c.bf16 %v5111_v20, %v5110_v4  ;;  %v5124_v4 = vld [vmem:[#allocation12 + $0x70] sm:$0xff] }
 0x43a   :  { %13850 = vmatprep.subr.bf16.mxu1 %v13849_v40  ;;  %v5125_v20 = vld [vmem:[#allocation12 + $0x78] sm:$0xff] }
 0x43c   :  { %11899 = vmatmul.mubr.f32.gmra.mrb[30].mxu1 %v4860_v62 }
 0x43d   :  { %13852 = vmatpush3.bf16.msra.mxu1 %v13849_v40  ;;  %11933 = vmatprep.mubr.f32.mxu1 %v5126_v21 }
 0x43e   :  { %13854 = vmatprep.subr.bf16.mxu1 %v13853_v34 }
 0x4f3   :  { %v11879_v6 = vpop.f32.mrb[16].mxu1 }
 0x4f4   :  { %v5047_v49 = vadd.f32 %v11879_v6, %v16024_v37  ;;  %v4944_v48 = vpop.f32.mrb[17].mxu1 }
 0x4f5   :  { %v5046_v52 = vadd.f32 %v16024_v37, %v4944_v48  ;;  %v13881_v48 = vpack.c.bf16 %v5125_v20, %v5124_v4  ;;  %v5449_v4 = vld [vmem:[#allocation2 + $0x2] sm:$0xff] }
 0x4f6   :  { %v16028_v50 = vmax.f32 %v5047_v49, 0.0 }
 0x4f7   :  { %v16030_v14 = vmax.f32 %v5046_v52, 0.0  ;;  %v11882_v19 = vpop.f32.mrb[18].mxu1  ;;  %v5466_v52 = vld [vmem:[#allocation12 + $0x100] sm:$0xff] }
 0x4f8   :  { %5079 = vst [vmem:[#allocation2 + $0x21] sm:$0xff] %v16028_v50  ;;  %v5049_v60 = vadd.f32 %v11882_v19, %v16024_v37  ;;  %v4954_v15 = vpop.f32.mrb[19].mxu1  ;;  %v5467_v19 = vld [vmem:[#allocation12 + $0x108] sm:$0xff] }
 0x4f9   :  { %5078 = vst [vmem:[#allocation2 + $0x11] sm:$0xff] %v16030_v14  ;;  %v5048_v32 = vadd.f32 %v16024_v37, %v4954_v15  ;;  %11934 = vmatmul.mubr.f32.vlgmr.msra.gmra.mrb[32].mxu1 %v16030_v14  ;;  %v13885_v27 = vpack.c.bf16 %v5467_v19, %v5466_v52  ;;  %v5664_v19 = vld [vmem:[#allocation12 + $0x1a0] sm:$0xff] }
 0x4fa   :  { %v16037_v2 = vmax.f32 %v5049_v60, 0.0  ;;  %11936 = vmatprep.mubr.f32.mxu1 %v16028_v50  ;;  %13856 = vmatpush3.bf16.msra.mxu1 %v13853_v34 }
 0x4fb   :  { %v16040_v24 = vmax.f32 %v5048_v32, 0.0  ;;  %v11885_v33 = vpop.f32.mrb[20].mxu1  ;;  %13858 = vmatprep.subr.bf16.mxu1 %v13857_v23  ;;  %v5469_v32 = vld [vmem:[#allocation12 + $0x118] sm:$0xff] }
 0x4fc   :  { %5081 = vst [vmem:[#allocation2 + $0x41] sm:$0xff] %v16037_v2  ;;  %v5051_v47 = vadd.f32 %v11885_v33, %v16024_v37  ;;  %v4964_v44 = vpop.f32.mrb[21].mxu1 }
 0x4fd   :  { %5080 = vst [vmem:[#allocation2 + $0x31] sm:$0xff] %v16040_v24  ;;  %v5050_v58 = vadd.f32 %v16024_v37, %v4964_v44  ;;  %11937 = vmatmul.mubr.f32.gmra.mrb[34].mxu1 %v16040_v24 }
 0x4fe   :  { %v16047_v56 = vmax.f32 %v5051_v47, 0.0  ;;  %11939 = vmatprep.mubr.f32.mxu1 %v16037_v2  ;;  %13860 = vmatpush3.bf16.msra.mxu1 %v13857_v23  ;;  %v5471_v47 = vld [vmem:[#allocation12 + $0x128] sm:$0xff] }
 0x4ff   :  { %v16050_v54 = vmax.f32 %v5050_v58, 0.0  ;;  %v11888_v10 = vpop.f32.mrb[22].mxu1  ;;  %13862 = vmatprep.subr.bf16.mxu1 %v13861_v3  ;;  %v16112_v44 = vld [vmem:[#allocation2 + $0x20] sm:$0xff]  ;;  %v5472_v58 = vld [vmem:[#allocation12 + $0x130] sm:$0xff] }
 0x500   :  { %5083 = vst [vmem:[#allocation2 + $0x61] sm:$0xff] %v16047_v56  ;;  %v16054_v8 = vadd.f32 %v11888_v10, %v16024_v37  ;;  %v4974_v39 = vpop.f32.mrb[23].mxu1  ;;  %v16109_v33 = vld [vmem:[#allocation2 + $0x10] sm:$0xff]  ;;  %v5473_v10 = vld [vmem:[#allocation12 + $0x138] sm:$0xff] }
 0x501   :  { %5082 = vst [vmem:[#allocation2 + $0x51] sm:$0xff] %v16050_v54  ;;  %v5052_v12 = vadd.f32 %v16024_v37, %v4974_v39  ;;  %11940 = vmatmul.mubr.f32.gmra.mrb[36].mxu1 %v16050_v54  ;;  %v13897_v39 = vpack.c.bf16 %v5473_v10, %v5472_v58  ;;  %v16152_v52 = vld [vmem:[#allocation2 + $0x12] sm:$0xff]  ;;  %v5668_v10 = vld [vmem:[#allocation12 + $0x1c0] sm:$0xff] }
 0x502   :  { %v5069_v22 = vmax.f32 %v16054_v8, 0.0  ;;  %11942 = vmatprep.mubr.f32.mxu1 %v16047_v56  ;;  %13864 = vmatpush3.bf16.msra.mxu1 %v13861_v3  ;;  %v5470_v3 = vld [vmem:[#allocation12 + $0x120] sm:$0xff] }
 0x503   :  { %v16061_v55 = vmax.f32 %v5052_v12, 0.0  ;;  %v11891_v17 = vpop.f32.mrb[24].mxu1  ;;  %13866 = vmatprep.subr.bf16.mxu1 %v13865_v35  ;;  %v13893_v51 = vpack.c.bf16 %v5471_v47, %v5470_v3  ;;  %v5475_v12 = vld [vmem:[#allocation12 + $0x148] sm:$0xff]  ;;  %v5667_v3 = vld [vmem:[#allocation12 + $0x1b8] sm:$0xff] }
 0x504   :  { %5085 = vst [vmem:[#allocation2 + $0x81] sm:$0xff] %v5069_v22  ;;  %v5055_v25 = vadd.f32 %v11891_v17, %v16024_v37  ;;  %v4984_v61 = vpop.f32.mrb[25].mxu1  ;;  %v16115_v41 = vld [vmem:[#allocation2 + $0x30] sm:$0xff]  ;;  %v16161_v47 = vld [vmem:[#allocation2 + $0x42] sm:$0xff] }
 0x505   :  { %5084 = vst [vmem:[#allocation2 + $0x71] sm:$0xff] %v16061_v55  ;;  %v5054_v43 = vadd.f32 %v16024_v37, %v4984_v61  ;;  %11943 = vmatmul.mubr.f32.gmra.mrb[38].mxu1 %v16061_v55  ;;  %v5477_v61 = vld [vmem:[#allocation12 + $0x158] sm:$0xff] }
 0x506   :  { %v16069_v53 = vmax.f32 %v5055_v25, 0.0  ;;  %13868 = vmatpush3.bf16.msra.mxu1 %v13865_v35  ;;  %11945 = vmatprep.mubr.f32.mxu1 %v5134_v31  ;;  %v16118_v35 = vld [vmem:[#allocation2 + $0x40] sm:$0xff]  ;;  %v13901_v31 = vpack.c.bf16 %v5475_v12, %v5474_v9  ;;  %v5476_v25 = vld [vmem:[#allocation12 + $0x150] sm:$0xff] }
 0x507   :  { %v16071_v1 = vmax.f32 %v5054_v43, 0.0  ;;  %v11894_v13 = vpop.f32.mrb[26].mxu1  ;;  %13870 = vmatprep.subr.bf16.mxu1 %v13869_v18  ;;  %v16124_v17 = vld [vmem:[#allocation2 + $0x60] sm:$0xff]  ;;  %v13905_v26 = vpack.c.bf16 %v5477_v61, %v5476_v25  ;;  %v5670_v61 = vld [vmem:[#allocation12 + $0x1d0] sm:$0xff] }
 0x508   :  { %5087 = vst [vmem:[#allocation2 + $0xc1] sm:$0xff] %v16069_v53  ;;  %v5057_v7 = vadd.f32 %v11894_v13, %v16024_v37  ;;  %v4994_v62 = vpop.f32.mrb[27].mxu1  ;;  %v16121_v45 = vld [vmem:[#allocation2 + $0x50] sm:$0xff]  ;;  %v5478_v43 = vld [vmem:[#allocation12 + $0x160] sm:$0xff] }
 0x509   :  { %5086 = vst [vmem:[#allocation2 + $0xb1] sm:$0xff] %v16071_v1  ;;  %v5056_v29 = vadd.f32 %v16024_v37, %v4994_v62  ;;  %11946 = vmatmul.mubr.f32.gmra.mrb[40].mxu1 %v16071_v1  ;;  %v5479_v13 = vld [vmem:[#allocation12 + $0x168] sm:$0xff]  ;;  %v16167_v9 = vld [vmem:[#allocation2 + $0x62] sm:$0xff] }
 0x50a   :  { %v16078_v59 = vmax.f32 %v5057_v7, 0.0  ;;  %11948 = vmatprep.mubr.f32.mxu1 %v16069_v53  ;;  %13872 = vmatpush3.bf16.msra.mxu1 %v13869_v18  ;;  %v13909_v7 = vpack.c.bf16 %v5479_v13, %v5478_v43  ;;  %v16164_v58 = vld [vmem:[#allocation2 + $0x52] sm:$0xff]  ;;  %v5457_v12 = vld [vmem:[#allocation2 + $0xa2] sm:$0xff] }
 0x50b   :  { %v16081_v36 = vmax.f32 %v5056_v29, 0.0  ;;  %v11897_v11 = vpop.f32.mrb[28].mxu1  ;;  %13874 = vmatprep.subr.bf16.mxu1 %v13873_v57  ;;  %v13913_v29 = vpack.c.bf16 %v5481_v0, %v5480_v16  ;;  %v5673_v16 = vld [vmem:[#allocation12 + $0x1e8] sm:$0xff] }
 0x50c   :  { %5089 = vst [vmem:[#allocation2 + $0xe1] sm:$0xff] %v16078_v59  ;;  %v5059_v46 = vadd.f32 %v11897_v11, %v16024_v37  ;;  %v5004_v40 = vpop.f32.mrb[29].mxu1  ;;  %v16127_v18 = vld [vmem:[#allocation2 + $0x70] sm:$0xff] }
 0x50d   :  { %5088 = vst [vmem:[#allocation2 + $0xd1] sm:$0xff] %v16081_v36  ;;  %v5058_v21 = vadd.f32 %v16024_v37, %v5004_v40  ;;  %11949 = vmatmul.mubr.f32.gmra.mrb[42].mxu1 %v16081_v36  ;;  %v16170_v25 = vld [vmem:[#allocation2 + $0x72] sm:$0xff] }
 0x50e   :  { %v16088_v34 = vmax.f32 %v5059_v46, 0.0  ;;  %11951 = vmatprep.mubr.f32.mxu1 %v16078_v59  ;;  %13876 = vmatpush3.bf16.msra.mxu1 %v13873_v57  ;;  %v5661_v46 = vld [vmem:[#allocation12 + $0x188] sm:$0xff] }
 0x50f   :  { %v16091_v6 = vmax.f32 %v5058_v21, 0.0  ;;  %v11900_v49 = vpop.f32.mrb[30].mxu1  ;;  %13878 = vmatprep.subr.bf16.mxu1 %v13877_v38  ;;  %v16134_v57 = vld [vmem:[#allocation2 + $0xc0] sm:$0xff] }
 0x510   :  { %5091 = vst [vmem:[#allocation2 + $0x101] sm:$0xff] %v16088_v34  ;;  %v16095_v42 = vadd.f32 %v11900_v49, %v16024_v37  ;;  %v5014_v63 = vpop.f32.mrb[31].mxu1  ;;  %v16131_v28 = vld [vmem:[#allocation2 + $0xb0] sm:$0xff]  ;;  %v16176_v0 = vld [vmem:[#allocation2 + $0xc2] sm:$0xff] }
 0x511   :  { %5090 = vst [vmem:[#allocation2 + $0xf1] sm:$0xff] %v16091_v6  ;;  %v5060_v23 = vadd.f32 %v16024_v37, %v5014_v63  ;;  %11952 = vmatmul.mubr.f32.gmra.mrb[44].mxu1 %v16091_v6  ;;  %v13889_v37 = vpack.c.bf16 %v5469_v32, %v5468_v30  ;;  %v5662_v49 = vld [vmem:[#allocation12 + $0x190] sm:$0xff] }
 0x512   :  { %v5077_v60 = vmax.f32 %v16095_v42, 0.0  ;;  %11954 = vmatprep.mubr.f32.mxu1 %v16088_v34  ;;  %13880 = vmatpush3.bf16.msra.mxu1 %v13877_v38  ;;  %v5660_v38 = vld [vmem:[#allocation12 + $0x180] sm:$0xff]  ;;  %v16158_v32 = vld [vmem:[#allocation2 + $0x32] sm:$0xff] }
 0x513   :  { %v16102_v15 = vmax.f32 %v5060_v23, 0.0  ;;  %13882 = vmatprep.subr.bf16.mxu1 %v13881_v48  ;;  %v13917_v20 = vpack.c.bf16 %v5661_v46, %v5660_v38  ;;  %v5665_v23 = vld [vmem:[#allocation12 + $0x1a8] sm:$0xff]  ;;  %v5674_v46 = vld [vmem:[#allocation12 + $0x1f0] sm:$0xff] }
 0x514   :  { %5093 = vst [vmem:[#allocation2 + $0x121] sm:$0xff] %v5077_v60  ;;  %v16137_v62 = vld [vmem:[#allocation2 + $0xd0] sm:$0xff]  ;;  %v13925_v30 = vpack.c.bf16 %v5665_v23, %v5664_v19 }
 0x515   :  { %5092 = vst [vmem:[#allocation2 + $0x111] sm:$0xff] %v16102_v15  ;;  %11955 = vmatmul.mubr.f32.gmra.mrb[46].mxu1 %v16102_v15  ;;  %v16173_v13 = vld [vmem:[#allocation2 + $0xb2] sm:$0xff] }
 0x516   :  { %13884 = vmatpush3.bf16.msra.mxu1 %v13881_v48  ;;  %11989 = vmatprep.mubr.f32.mxu1 %v15999_v5  ;;  %v5663_v48 = vld [vmem:[#allocation12 + $0x198] sm:$0xff]  ;;  %v16179_v38 = vld [vmem:[#allocation2 + $0xd2] sm:$0xff] }
 0x517   :  { %13886 = vmatprep.subr.bf16.mxu1 %v13885_v27  ;;  %v16146_v40 = vld [vmem:[#allocation2 + $0x100] sm:$0xff]  ;;  %v13921_v63 = vpack.c.bf16 %v5663_v48, %v5662_v49  ;;  %v5855_v19 = vld [vmem:[#allocation12 + $0x208] sm:$0xff] }
 0x518   :  { %v16143_v11 = vld [vmem:[#allocation2 + $0xf0] sm:$0xff]  ;;  %v16188_v23 = vld [vmem:[#allocation2 + $0x102] sm:$0xff] }
 0x519   :  { %11990 = vmatmul.mubr.f32.vlgmr.msra.gmra.mrb[32].mxu1 %v16109_v33  ;;  %v16185_v48 = vld [vmem:[#allocation2 + $0xf2] sm:$0xff] }
 0x51a   :  { %11992 = vmatprep.mubr.f32.mxu1 %v16112_v44  ;;  %13888 = vmatpush3.bf16.msra.mxu1 %v13885_v27  ;;  %v16155_v27 = vld [vmem:[#allocation2 + $0x22] sm:$0xff] }
 0x51b   :  { %13890 = vmatprep.subr.bf16.mxu1 %v13889_v37 }
 0x51c   :  { %v16149_v21 = vld [vmem:[#allocation2 + $0x110] sm:$0xff] }
 0x51d   :  { %11993 = vmatmul.mubr.f32.gmra.mrb[34].mxu1 %v16115_v41 }
 0x51e   :  { %11995 = vmatprep.mubr.f32.mxu1 %v16118_v35  ;;  %13892 = vmatpush3.bf16.msra.mxu1 %v13889_v37  ;;  %v5666_v37 = vld [vmem:[#allocation12 + $0x1b0] sm:$0xff] }
 0x51f   :  { %13894 = vmatprep.subr.bf16.mxu1 %v13893_v51 }
 0x521   :  { %11996 = vmatmul.mubr.f32.gmra.mrb[36].mxu1 %v16121_v45 }
 0x522   :  { %11998 = vmatprep.mubr.f32.mxu1 %v16124_v17  ;;  %13896 = vmatpush3.bf16.msra.mxu1 %v13893_v51  ;;  %v13929_v51 = vpack.c.bf16 %v5667_v3, %v5666_v37  ;;  %v16191_v37 = vld [vmem:[#allocation2 + $0x112] sm:$0xff] }
 0x523   :  { %13898 = vmatprep.subr.bf16.mxu1 %v13897_v39  ;;  %v5856_v3 = vld [vmem:[#allocation12 + $0x210] sm:$0xff] }
 0x525   :  { %11999 = vmatmul.mubr.f32.gmra.mrb[38].mxu1 %v16127_v18 }
 0x526   :  { %13900 = vmatpush3.bf16.msra.mxu1 %v13897_v39  ;;  %12001 = vmatprep.mubr.f32.mxu1 %v15999_v5  ;;  %v16140_v5 = vld [vmem:[#allocation2 + $0xe0] sm:$0xff]  ;;  %v5669_v39 = vld [vmem:[#allocation12 + $0x1c8] sm:$0xff] }
 0x527   :  { %13902 = vmatprep.subr.bf16.mxu1 %v13901_v31 }
 0x529   :  { %12002 = vmatmul.mubr.f32.gmra.mrb[40].mxu1 %v16131_v28 }
 0x52a   :  { %12004 = vmatprep.mubr.f32.mxu1 %v16134_v57  ;;  %13904 = vmatpush3.bf16.msra.mxu1 %v13901_v31  ;;  %v13933_v31 = vpack.c.bf16 %v5669_v39, %v5668_v10  ;;  %v5858_v39 = vld [vmem:[#allocation12 + $0x220] sm:$0xff] }
 0x52b   :  { %13906 = vmatprep.subr.bf16.mxu1 %v13905_v26 }
 0x52d   :  { %12005 = vmatmul.mubr.f32.gmra.mrb[42].mxu1 %v16137_v62 }
 0x52e   :  { %12007 = vmatprep.mubr.f32.mxu1 %v16140_v5  ;;  %13908 = vmatpush3.bf16.msra.mxu1 %v13905_v26  ;;  %v5671_v26 = vld [vmem:[#allocation12 + $0x1d8] sm:$0xff] }
 0x52f   :  { %13910 = vmatprep.subr.bf16.mxu1 %v13909_v7  ;;  %v13937_v43 = vpack.c.bf16 %v5671_v26, %v5670_v61  ;;  %v5860_v61 = vld [vmem:[#allocation12 + $0x230] sm:$0xff]  ;;  %v5861_v26 = vld [vmem:[#allocation12 + $0x238] sm:$0xff] }
 0x531   :  { %12008 = vmatmul.mubr.f32.gmra.mrb[44].mxu1 %v16143_v11 }
 0x532   :  { %12010 = vmatprep.mubr.f32.mxu1 %v16146_v40  ;;  %13912 = vmatpush3.bf16.msra.mxu1 %v13909_v7  ;;  %v5672_v7 = vld [vmem:[#allocation12 + $0x1e0] sm:$0xff] }
 0x533   :  { %13914 = vmatprep.subr.bf16.mxu1 %v13913_v29 }
 0x535   :  { %12011 = vmatmul.mubr.f32.gmra.mrb[46].mxu1 %v16149_v21 }
 0x536   :  { %13916 = vmatpush3.bf16.msra.mxu1 %v13913_v29  ;;  %12045 = vmatprep.mubr.f32.mxu1 %v5449_v4  ;;  %v13941_v29 = vpack.c.bf16 %v5673_v16, %v5672_v7  ;;  %v5675_v4 = vld [vmem:[#allocation12 + $0x1f8] sm:$0xff]  ;;  %v5863_v7 = vld [vmem:[#allocation12 + $0x248] sm:$0xff] }
 0x537   :  { %13918 = vmatprep.subr.bf16.mxu1 %v13917_v20  ;;  %v13945_v49 = vpack.c.bf16 %v5675_v4, %v5674_v46  ;;  %v5864_v46 = vld [vmem:[#allocation12 + $0x250] sm:$0xff]  ;;  %v5865_v4 = vld [vmem:[#allocation12 + $0x258] sm:$0xff] }
 0x539   :  { %12046 = vmatmul.mubr.f32.vlgmr.msra.gmra.mrb[32].mxu1 %v16152_v52 }
 0x53a   :  { %12048 = vmatprep.mubr.f32.mxu1 %v16155_v27  ;;  %13920 = vmatpush3.bf16.msra.mxu1 %v13917_v20  ;;  %v16182_v20 = vld [vmem:[#allocation2 + $0xe2] sm:$0xff] }
 0x53b   :  { %13922 = vmatprep.subr.bf16.mxu1 %v13921_v63 }
 0x53d   :  { %12049 = vmatmul.mubr.f32.gmra.mrb[34].mxu1 %v16158_v32 }
 0x53e   :  { %12051 = vmatprep.mubr.f32.mxu1 %v16161_v47  ;;  %13924 = vmatpush3.bf16.msra.mxu1 %v13921_v63  ;;  %v5854_v63 = vld [vmem:[#allocation12 + $0x200] sm:$0xff] }
 0x53f   :  { %13926 = vmatprep.subr.bf16.mxu1 %v13925_v30 }
 0x541   :  { %12052 = vmatmul.mubr.f32.gmra.mrb[36].mxu1 %v16164_v58 }
 0x542   :  { %12054 = vmatprep.mubr.f32.mxu1 %v16167_v9  ;;  %13928 = vmatpush3.bf16.msra.mxu1 %v13925_v30  ;;  %v13949_v30 = vpack.c.bf16 %v5855_v19, %v5854_v63  ;;  %v5866_v63 = vld [vmem:[#allocation12 + $0x260] sm:$0xff]  ;;  %v5867_v19 = vld [vmem:[#allocation12 + $0x268] sm:$0xff] }
 0x543   :  { %13930 = vmatprep.subr.bf16.mxu1 %v13929_v51 }
 0x545   :  { %12055 = vmatmul.mubr.f32.gmra.mrb[38].mxu1 %v16170_v25 }
 0x546   :  { %13932 = vmatpush3.bf16.msra.mxu1 %v13929_v51  ;;  %12057 = vmatprep.mubr.f32.mxu1 %v5457_v12  ;;  %v5857_v51 = vld [vmem:[#allocation12 + $0x218] sm:$0xff]  ;;  %v5859_v12 = vld [vmem:[#allocation12 + $0x228] sm:$0xff] }
 0x547   :  { %13934 = vmatprep.subr.bf16.mxu1 %v13933_v31  ;;  %v13953_v10 = vpack.c.bf16 %v5857_v51, %v5856_v3  ;;  %v5868_v3 = vld [vmem:[#allocation12 + $0x270] sm:$0xff]  ;;  %v5869_v51 = vld [vmem:[#allocation12 + $0x278] sm:$0xff] }
 0x549   :  { %12058 = vmatmul.mubr.f32.gmra.mrb[40].mxu1 %v16173_v13 }
 0x54a   :  { %12060 = vmatprep.mubr.f32.mxu1 %v16176_v0  ;;  %13936 = vmatpush3.bf16.msra.mxu1 %v13933_v31  ;;  %v13957_v31 = vpack.c.bf16 %v5859_v12, %v5858_v39  ;;  %v6049_v39 = vld [vmem:[#allocation12 + $0x288] sm:$0xff] }
 0x54b   :  { %13938 = vmatprep.subr.bf16.mxu1 %v13937_v43 }
 0x54d   :  { %12061 = vmatmul.mubr.f32.gmra.mrb[42].mxu1 %v16179_v38 }
 0x54e   :  { %12063 = vmatprep.mubr.f32.mxu1 %v16182_v20  ;;  %13940 = vmatpush3.bf16.msra.mxu1 %v13937_v43  ;;  %v5862_v43 = vld [vmem:[#allocation12 + $0x240] sm:$0xff] }
 0x54f   :  { %13942 = vmatprep.subr.bf16.mxu1 %v13941_v29  ;;  %v13965_v16 = vpack.c.bf16 %v5863_v7, %v5862_v43  ;;  %v6052_v43 = vld [vmem:[#allocation12 + $0x2a0] sm:$0xff]  ;;  %v6053_v7 = vld [vmem:[#allocation12 + $0x2a8] sm:$0xff] }
 0x551   :  { %12064 = vmatmul.mubr.f32.gmra.mrb[44].mxu1 %v16185_v48 }
 0x552   :  { %12066 = vmatprep.mubr.f32.mxu1 %v16188_v23  ;;  %13944 = vmatpush3.bf16.msra.mxu1 %v13941_v29  ;;  %v16201_v29 = vld [vmem:[#allocation2 + $0x80] sm:$0xff] }
 0x553   :  { %13946 = vmatprep.subr.bf16.mxu1 %v13945_v49 }
 0x555   :  { %12067 = vmatmul.mubr.f32.gmra.mrb[46].mxu1 %v16191_v37 }
 0x556   :  { %13948 = vmatpush3.bf16.msra.mxu1 %v13945_v49  ;;  %12101 = vmatprep.mubr.f32.mxu1 %v16109_v33  ;;  %v13961_v33 = vpack.c.bf16 %v5861_v26, %v5860_v61  ;;  %v13969_v49 = vpack.c.bf16 %v5865_v4, %v5864_v46  ;;  %v6050_v61 = vld [vmem:[#allocation12 + $0x290] sm:$0xff]  ;;  %v6051_v26 = vld [vmem:[#allocation12 + $0x298] sm:$0xff] }
 0x557   :  { %13950 = vmatprep.subr.bf16.mxu1 %v13949_v30  ;;  %v6054_v46 = vld [vmem:[#allocation12 + $0x2b0] sm:$0xff]  ;;  %v6055_v4 = vld [vmem:[#allocation12 + $0x2b8] sm:$0xff] }
 0x559   :  { %12102 = vmatmul.mubr.f32.vlgmr.msra.gmra.mrb[32].mxu1 %v16112_v44 }
 0x55a   :  { %12104 = vmatprep.mubr.f32.mxu1 %v16115_v41  ;;  %13952 = vmatpush3.bf16.msra.mxu1 %v13949_v30  ;;  %v13973_v30 = vpack.c.bf16 %v5867_v19, %v5866_v63  ;;  %v6057_v63 = vld [vmem:[#allocation12 + $0x2c8] sm:$0xff]  ;;  %v6059_v19 = vld [vmem:[#allocation12 + $0x2d8] sm:$0xff] }
 0x55b   :  { %13954 = vmatprep.subr.bf16.mxu1 %v13953_v10 }
 0x55d   :  { %12105 = vmatmul.mubr.f32.gmra.mrb[34].mxu1 %v16118_v35 }
 0x55e   :  { %12107 = vmatprep.mubr.f32.mxu1 %v16121_v45  ;;  %13956 = vmatpush3.bf16.msra.mxu1 %v13953_v10  ;;  %v6048_v10 = vld [vmem:[#allocation12 + $0x280] sm:$0xff] }
 0x55f   :  { %13958 = vmatprep.subr.bf16.mxu1 %v13957_v31  ;;  %v13981_v12 = vpack.c.bf16 %v6049_v39, %v6048_v10  ;;  %v6849_v39 = vld [vmem:[#allocation15 + $0x18] sm:$0xff] }
 0x561   :  { %12108 = vmatmul.mubr.f32.gmra.mrb[36].mxu1 %v16124_v17 }
 0x562   :  { %12110 = vmatprep.mubr.f32.mxu1 %v16127_v18  ;;  %13960 = vmatpush3.bf16.msra.mxu1 %v13957_v31  ;;  %v16211_v31 = vld [vmem:[#allocation2 + $0x120] sm:$0xff] }
 0x563   :  { %13962 = vmatprep.subr.bf16.mxu1 %v13961_v33 }
 0x565   :  { %12111 = vmatmul.mubr.f32.gmra.mrb[38].mxu1 %v16201_v29 }
 0x566   :  { %12113 = vmatprep.mubr.f32.mxu1 %v16131_v28  ;;  %13964 = vmatpush3.bf16.msra.mxu1 %v13961_v33  ;;  %v13977_v28 = vpack.c.bf16 %v5869_v51, %v5868_v3  ;;  %v13985_v33 = vpack.c.bf16 %v6051_v26, %v6050_v61  ;;  %v6063_v3 = vld [vmem:[#allocation12 + $0x2f8] sm:$0xff]  ;;  %v6247_v61 = vld [vmem:[#allocation12 + $0x328] sm:$0xff] }
 0x567   :  { %13966 = vmatprep.subr.bf16.mxu1 %v13965_v16  ;;  %v6245_v51 = vld [vmem:[#allocation12 + $0x318] sm:$0xff]  ;;  %v6850_v26 = vld [vmem:[#allocation15 + $0x20] sm:$0xff] }
 0x569   :  { %12114 = vmatmul.mubr.f32.gmra.mrb[40].mxu1 %v16134_v57 }
 0x56a   :  { %12116 = vmatprep.mubr.f32.mxu1 %v16137_v62  ;;  %13968 = vmatpush3.bf16.msra.mxu1 %v13965_v16  ;;  %v13989_v16 = vpack.c.bf16 %v6053_v7, %v6052_v43  ;;  %v6249_v43 = vld [vmem:[#allocation12 + $0x338] sm:$0xff] }
 0x56b   :  { %13970 = vmatprep.subr.bf16.mxu1 %v13969_v49  ;;  %v6852_v7 = vld [vmem:[#allocation15 + $0x30] sm:$0xff] }
 0x56d   :  { %12117 = vmatmul.mubr.f32.gmra.mrb[42].mxu1 %v16140_v5 }
 0x56e   :  { %12119 = vmatprep.mubr.f32.mxu1 %v16143_v11  ;;  %13972 = vmatpush3.bf16.msra.mxu1 %v13969_v49  ;;  %v6056_v49 = vld [vmem:[#allocation12 + $0x2c0] sm:$0xff] }
 0x56f   :  { %13974 = vmatprep.subr.bf16.mxu1 %v13973_v30 }
 0x571   :  { %12120 = vmatmul.mubr.f32.gmra.mrb[44].mxu1 %v16146_v40 }
 0x572   :  { %12122 = vmatprep.mubr.f32.mxu1 %v16149_v21  ;;  %13976 = vmatpush3.bf16.msra.mxu1 %v13973_v30  ;;  %v6061_v30 = vld [vmem:[#allocation12 + $0x2e8] sm:$0xff] }
 0x573   :  { %13978 = vmatprep.subr.bf16.mxu1 %v13977_v28 }
 0x575   :  { %12123 = vmatmul.mubr.f32.gmra.mrb[46].mxu1 %v16211_v31 }
 0x576   :  { %13980 = vmatpush3.bf16.msra.mxu1 %v13977_v28  ;;  %12157 = vmatprep.mubr.f32.mxu1 %v16030_v14  ;;  %v13993_v14 = vpack.c.bf16 %v6055_v4, %v6054_v46  ;;  %v6847_v28 = vld [vmem:[#allocation15 + $0x8] sm:$0xff]  ;;  %v6250_v4 = vld [vmem:[#allocation12 + $0x340] sm:$0xff] }
 0x577   :  { %13982 = vmatprep.subr.bf16.mxu1 %v13981_v12 }
 0x579   :  { %12158 = vmatmul.mubr.f32.vlgmr.msra.gmra.mrb[32].mxu1 %v16028_v50  ;;  %v13997_v50 = vpack.c.bf16 %v6057_v63, %v6056_v49  ;;  %v6251_v49 = vld [vmem:[#allocation12 + $0x348] sm:$0xff] }
 0x57a   :  { %12160 = vmatprep.mubr.f32.mxu1 %v16040_v24  ;;  %13984 = vmatpush3.bf16.msra.mxu1 %v13981_v12  ;;  %v6058_v24 = vld [vmem:[#allocation12 + $0x2d0] sm:$0xff]  ;;  %v6246_v12 = vld [vmem:[#allocation12 + $0x320] sm:$0xff] }
 0x57b   :  { %13986 = vmatprep.subr.bf16.mxu1 %v13985_v33  ;;  %v14021_v42 = vpack.c.bf16 %v6247_v61, %v6246_v12  ;;  %v6854_v63 = vld [vmem:[#allocation15 + $0x40] sm:$0xff]  ;;  %v6439_v61 = vld [vmem:[#allocation12 + $0x398] sm:$0xff] }
 0x57c   :  { %v16249_v12 = vld [vmem:[#allocation2 + $0x122] sm:$0xff] }
 0x57d   :  { %12161 = vmatmul.mubr.f32.gmra.mrb[34].mxu1 %v16037_v2  ;;  %v14001_v2 = vpack.c.bf16 %v6059_v19, %v6058_v24  ;;  %v16239_v24 = vld [vmem:[#allocation2 + $0x82] sm:$0xff]  ;;  %v14029_v19 = vpack.c.bf16 %v6251_v49, %v6250_v4 }
 0x57e   :  { %12163 = vmatprep.mubr.f32.mxu1 %v16050_v54  ;;  %13988 = vmatpush3.bf16.msra.mxu1 %v13985_v33  ;;  %v6060_v54 = vld [vmem:[#allocation12 + $0x2e0] sm:$0xff]  ;;  %v6851_v33 = vld [vmem:[#allocation15 + $0x28] sm:$0xff]  ;;  %v6451_v49 = vld [vmem:[#allocation12 + $0x3f8] sm:$0xff] }
 0x57f   :  { %13990 = vmatprep.subr.bf16.mxu1 %v13989_v16  ;;  %v16259_v4 = vld [vmem:[#allocation2] sm:$0xff] }
 0x581   :  { %12164 = vmatmul.mubr.f32.gmra.mrb[36].mxu1 %v16047_v56  ;;  %v14005_v56 = vpack.c.bf16 %v6061_v30, %v6060_v54  ;;  %v6253_v30 = vld [vmem:[#allocation12 + $0x358] sm:$0xff] }
 0x582   :  { %12166 = vmatprep.mubr.f32.mxu1 %v16061_v55  ;;  %13992 = vmatpush3.bf16.msra.mxu1 %v13989_v16  ;;  %v6062_v55 = vld [vmem:[#allocation12 + $0x2f0] sm:$0xff]  ;;  %v6853_v16 = vld [vmem:[#allocation15 + $0x38] sm:$0xff] }
 0x583   :  { %13994 = vmatprep.subr.bf16.mxu1 %v13993_v14  ;;  %v14009_v8 = vpack.c.bf16 %v6063_v3, %v6062_v55  ;;  %v6857_v55 = vld [vmem:[#allocation15 + $0x58] sm:$0xff] }
 0x585   :  { %12167 = vmatmul.mubr.f32.gmra.mrb[38].mxu1 %v5069_v22  ;;  %v6242_v22 = vld [vmem:[#allocation12 + $0x300] sm:$0xff] }
 0x586   :  { %12169 = vmatprep.mubr.f32.mxu1 %v16071_v1  ;;  %13996 = vmatpush3.bf16.msra.mxu1 %v13993_v14  ;;  %v6243_v1 = vld [vmem:[#allocation12 + $0x308] sm:$0xff]  ;;  %v14121_v14 = vpack.c.bf16 %v6853_v16, %v6852_v7  ;;  %v6444_v7 = vld [vmem:[#allocation12 + $0x3c0] sm:$0xff] }
 0x587   :  { %13998 = vmatprep.subr.bf16.mxu1 %v13997_v50  ;;  %v6445_v16 = vld [vmem:[#allocation12 + $0x3c8] sm:$0xff] }
 0x589   :  { %12170 = vmatmul.mubr.f32.gmra.mrb[40].mxu1 %v16069_v53  ;;  %v14013_v53 = vpack.c.bf16 %v6243_v1, %v6242_v22  ;;  %v6255_v1 = vld [vmem:[#allocation12 + $0x368] sm:$0xff] }
 0x58a   :  { %12172 = vmatprep.mubr.f32.mxu1 %v16081_v36  ;;  %14000 = vmatpush3.bf16.msra.mxu1 %v13997_v50  ;;  %v6244_v36 = vld [vmem:[#allocation12 + $0x310] sm:$0xff] }
 0x58b   :  { %14002 = vmatprep.subr.bf16.mxu1 %v14001_v2  ;;  %v6855_v50 = vld [vmem:[#allocation15 + $0x48] sm:$0xff] }
 0x58c   :  { %v14125_v54 = vpack.c.bf16 %v6855_v50, %v6854_v63  ;;  %v6630_v63 = vld [vmem:[#allocation12 + $0x400] sm:$0xff]  ;;  %v6631_v50 = vld [vmem:[#allocation12 + $0x408] sm:$0xff] }
 0x58d   :  { %12173 = vmatmul.mubr.f32.gmra.mrb[42].mxu1 %v16078_v59  ;;  %v6846_v59 = vld [vmem:[#allocation15] sm:$0xff] }
 0x58e   :  { %12175 = vmatprep.mubr.f32.mxu1 %v16091_v6  ;;  %14004 = vmatpush3.bf16.msra.mxu1 %v14001_v2  ;;  %v6848_v6 = vld [vmem:[#allocation15 + $0x10] sm:$0xff]  ;;  %v14109_v10 = vpack.c.bf16 %v6847_v28, %v6846_v59 }
 0x58f   :  { %14006 = vmatprep.subr.bf16.mxu1 %v14005_v56  ;;  %v6252_v2 = vld [vmem:[#allocation12 + $0x350] sm:$0xff]  ;;  %v6257_v28 = vld [vmem:[#allocation12 + $0x378] sm:$0xff] }
 0x590   :  { %14110 = vmatprep.subr.bf16.mxu0 %v14109_v10  ;;  %v14033_v3 = vpack.c.bf16 %v6253_v30, %v6252_v2  ;;  %v6419_v2 = vld [vmem:[#allocation2 + $0x21] sm:$0xff]  ;;  %v6635_v30 = vld [vmem:[#allocation12 + $0x428] sm:$0xff] }
 0x591   :  { %12176 = vmatmul.mubr.f32.gmra.mrb[44].mxu1 %v16088_v34  ;;  %v14017_v34 = vpack.c.bf16 %v6245_v51, %v6244_v36  ;;  %14112 = vmatpush3.bf16.msra.mxu0 %v14109_v10  ;;  %v6859_v36 = vld [vmem:[#allocation15 + $0x68] sm:$0xff]  ;;  %v6436_v10 = vld [vmem:[#allocation12 + $0x380] sm:$0xff] }
 0x592   :  { %12178 = vmatprep.mubr.f32.mxu1 %v16102_v15  ;;  %14008 = vmatpush3.bf16.msra.mxu1 %v14005_v56  ;;  %v14113_v15 = vpack.c.bf16 %v6849_v39, %v6848_v6  ;;  %v6856_v56 = vld [vmem:[#allocation15 + $0x50] sm:$0xff]  ;;  %v6437_v39 = vld [vmem:[#allocation12 + $0x388] sm:$0xff] }
 0x593   :  { %14010 = vmatprep.subr.bf16.mxu1 %v14009_v8  ;;  %v14129_v22 = vpack.c.bf16 %v6857_v55, %v6856_v56  ;;  %v6421_v56 = vld [vmem:[#allocation2 + $0x41] sm:$0xff]  ;;  %v6636_v55 = vld [vmem:[#allocation12 + $0x430] sm:$0xff] }
 0x594   :  { %14114 = vmatprep.subr.bf16.mxu0 %v14113_v15 }
 0x595   :  { %12179 = vmatmul.mubr.f32.gmra.mrb[46].mxu1 %v5077_v60  ;;  %v6248_v60 = vld [vmem:[#allocation12 + $0x330] sm:$0xff]  ;;  %14116 = vmatpush3.bf16.msra.mxu0 %v14113_v15 }
 0x596   :  { %14012 = vmatpush3.bf16.msra.mxu1 %v14009_v8  ;;  %12213 = vmatprep.mubr.f32.mxu1 %v16152_v52  ;;  %v14117_v52 = vpack.c.bf16 %v6851_v33, %v6850_v26  ;;  %v14025_v46 = vpack.c.bf16 %v6249_v43, %v6248_v60  ;;  %v6254_v8 = vld [vmem:[#allocation12 + $0x360] sm:$0xff]  ;;  %v6438_v15 = vld [vmem:[#allocation12 + $0x390] sm:$0xff]  ;;  %v6443_v43 = vld [vmem:[#allocation12 + $0x3b8] sm:$0xff] }
 0x597   :  { %14014 = vmatprep.subr.bf16.mxu1 %v14013_v53  ;;  %v14037_v51 = vpack.c.bf16 %v6255_v1, %v6254_v8  ;;  %v14049_v26 = vpack.c.bf16 %v6439_v61, %v6438_v15  ;;  %v6440_v33 = vld [vmem:[#allocation12 + $0x3a0] sm:$0xff]  ;;  %v6424_v1 = vld [vmem:[#allocation2 + $0x71] sm:$0xff] }
 0x598   :  { %14118 = vmatprep.subr.bf16.mxu0 %v14117_v52  ;;  %v6423_v8 = vld [vmem:[#allocation2 + $0x61] sm:$0xff]  ;;  %v6643_v61 = vld [vmem:[#allocation12 + $0x468] sm:$0xff] }
 0x599   :  { %12214 = vmatmul.mubr.f32.vlgmr.msra.gmra.mrb[32].mxu1 %v16155_v27  ;;  %14120 = vmatpush3.bf16.msra.mxu0 %v14117_v52  ;;  %v6442_v52 = vld [vmem:[#allocation12 + $0x3b0] sm:$0xff]  ;;  %v6642_v15 = vld [vmem:[#allocation12 + $0x460] sm:$0xff] }
 0x59a   :  { %12216 = vmatprep.mubr.f32.mxu1 %v16158_v32  ;;  %14016 = vmatpush3.bf16.msra.mxu1 %v14013_v53  ;;  %v6858_v53 = vld [vmem:[#allocation15 + $0x60] sm:$0xff] }
 0x59b   :  { %14018 = vmatprep.subr.bf16.mxu1 %v14017_v34  ;;  %14122 = vmatprep.subr.bf16.mxu0 %v14121_v14  ;;  %v14133_v59 = vpack.c.bf16 %v6859_v36, %v6858_v53  ;;  %v6638_v53 = vld [vmem:[#allocation12 + $0x440] sm:$0xff]  ;;  %v6639_v36 = vld [vmem:[#allocation12 + $0x448] sm:$0xff] }
 0x59d   :  { %12217 = vmatmul.mubr.f32.gmra.mrb[34].mxu1 %v16161_v47  ;;  %14124 = vmatpush3.bf16.msra.mxu0 %v14121_v14  ;;  %v6449_v14 = vld [vmem:[#allocation12 + $0x3e8] sm:$0xff] }
 0x59e   :  { %12219 = vmatprep.mubr.f32.mxu1 %v16164_v58  ;;  %14020 = vmatpush3.bf16.msra.mxu1 %v14017_v34  ;;  %v14045_v34 = vpack.c.bf16 %v6437_v39, %v6436_v10  ;;  %v6427_v10 = vld [vmem:[#allocation2 + $0xc1] sm:$0xff] }
 0x59f   :  { %14022 = vmatprep.subr.bf16.mxu1 %v14021_v42  ;;  %14126 = vmatprep.subr.bf16.mxu0 %v14125_v54 }
 0x5a1   :  { %12220 = vmatmul.mubr.f32.gmra.mrb[36].mxu1 %v16167_v9  ;;  %14128 = vmatpush3.bf16.msra.mxu0 %v14125_v54  ;;  %v6634_v54 = vld [vmem:[#allocation12 + $0x420] sm:$0xff] }
 0x5a2   :  { %12222 = vmatprep.mubr.f32.mxu1 %v16170_v25  ;;  %14024 = vmatpush3.bf16.msra.mxu1 %v14021_v42  ;;  %v6441_v42 = vld [vmem:[#allocation12 + $0x3a8] sm:$0xff] }
 0x5a3   :  { %14026 = vmatprep.subr.bf16.mxu1 %v14025_v46  ;;  %14130 = vmatprep.subr.bf16.mxu0 %v14129_v22  ;;  %v14053_v60 = vpack.c.bf16 %v6441_v42, %v6440_v33  ;;  %v14101_v33 = vpack.c.bf16 %v6643_v61, %v6642_v15  ;;  %v6430_v42 = vld [vmem:[#allocation2 + $0xf1] sm:$0xff] }
 0x5a5   :  { %12223 = vmatmul.mubr.f32.gmra.mrb[38].mxu1 %v16239_v24  ;;  %14132 = vmatpush3.bf16.msra.mxu0 %v14129_v22 }
 0x5a6   :  { %12225 = vmatprep.mubr.f32.mxu1 %v16173_v13  ;;  %14028 = vmatpush3.bf16.msra.mxu1 %v14025_v46  ;;  %v6256_v13 = vld [vmem:[#allocation12 + $0x370] sm:$0xff]  ;;  %v6447_v46 = vld [vmem:[#allocation12 + $0x3d8] sm:$0xff] }
 0x5a7   :  { %14030 = vmatprep.subr.bf16.mxu1 %v14029_v19  ;;  %v14041_v6 = vpack.c.bf16 %v6257_v28, %v6256_v13  ;;  %14134 = vmatprep.subr.bf16.mxu0 %v14133_v59  ;;  %v14093_v13 = vpack.c.bf16 %v6639_v36, %v6638_v53  ;;  %v6640_v28 = vld [vmem:[#allocation12 + $0x450] sm:$0xff] }
 0x5a9   :  { %12226 = vmatmul.mubr.f32.gmra.mrb[40].mxu1 %v16176_v0  ;;  %14136 = vmatpush3.bf16.msra.mxu0 %v14133_v59  ;;  %v6426_v59 = vld [vmem:[#allocation2 + $0x91] sm:$0xff] }
 0x5aa   :  { %12228 = vmatprep.mubr.f32.mxu1 %v16179_v38  ;;  %14032 = vmatpush3.bf16.msra.mxu1 %v14029_v19  ;;  %v6633_v19 = vld [vmem:[#allocation12 + $0x418] sm:$0xff] }
 0x5ab   :  { %14034 = vmatprep.subr.bf16.mxu1 %v14033_v3 }
 0x5ad   :  { %12229 = vmatmul.mubr.f32.gmra.mrb[42].mxu1 %v16182_v20 }
 0x5ae   :  { %12231 = vmatprep.mubr.f32.mxu1 %v16185_v48  ;;  %14036 = vmatpush3.bf16.msra.mxu1 %v14033_v3  ;;  %v6637_v3 = vld [vmem:[#allocation12 + $0x438] sm:$0xff] }
 0x5af   :  { %14038 = vmatprep.subr.bf16.mxu1 %v14037_v51  ;;  %v14089_v22 = vpack.c.bf16 %v6637_v3, %v6636_v55 }
 0x5b1   :  { %12232 = vmatmul.mubr.f32.gmra.mrb[44].mxu1 %v16188_v23 }
 0x5b2   :  { %12234 = vmatprep.mubr.f32.mxu1 %v16191_v37  ;;  %14040 = vmatpush3.bf16.msra.mxu1 %v14037_v51  ;;  %v6425_v51 = vld [vmem:[#allocation2 + $0x81] sm:$0xff] }
 0x5b3   :  { %14042 = vmatprep.subr.bf16.mxu1 %v14041_v6 }
 0x5b5   :  { %12235 = vmatmul.mubr.f32.gmra.mrb[46].mxu1 %v16249_v12 }
 0x5b6   :  { %14044 = vmatpush3.bf16.msra.mxu1 %v14041_v6  ;;  %12269 = vmatprep.mubr.f32.mxu1 %v16112_v44  ;;  %v14057_v44 = vpack.c.bf16 %v6443_v43, %v6442_v52  ;;  %v6641_v6 = vld [vmem:[#allocation12 + $0x458] sm:$0xff] }
 0x5b7   :  { %14046 = vmatprep.subr.bf16.mxu1 %v14045_v34  ;;  %v14097_v39 = vpack.c.bf16 %v6641_v6, %v6640_v28  ;;  %v6645_v52 = vld [vmem:[#allocation12 + $0x478] sm:$0xff] }
 0x5b8   :  { %v6431_v43 = vld [vmem:[#allocation2 + $0x101] sm:$0xff] }
 0x5b9   :  { %12270 = vmatmul.mubr.f32.vlgmr.msra.gmra.mrb[32].mxu1 %v16115_v41  ;;  %v14061_v41 = vpack.c.bf16 %v6445_v16, %v6444_v7  ;;  %v6432_v7 = vld [vmem:[#allocation2 + $0x111] sm:$0xff]  ;;  %v6433_v16 = vld [vmem:[#allocation2 + $0x121] sm:$0xff] }
 0x5ba   :  { %12272 = vmatprep.mubr.f32.mxu1 %v16118_v35  ;;  %14048 = vmatpush3.bf16.msra.mxu1 %v14045_v34  ;;  %v6446_v35 = vld [vmem:[#allocation12 + $0x3d0] sm:$0xff] }
 0x5bb   :  { %14050 = vmatprep.subr.bf16.mxu1 %v14049_v26  ;;  %v6428_v34 = vld [vmem:[#allocation2 + $0xd1] sm:$0xff] }
 0x5bd   :  { %12273 = vmatmul.mubr.f32.gmra.mrb[34].mxu1 %v16121_v45  ;;  %v14065_v45 = vpack.c.bf16 %v6447_v46, %v6446_v35  ;;  %v6620_v35 = vld [vmem:[#allocation2 + $0x92] sm:$0xff] }
 0x5be   :  { %12275 = vmatprep.mubr.f32.mxu1 %v16124_v17  ;;  %14052 = vmatpush3.bf16.msra.mxu1 %v14049_v26  ;;  %v6448_v17 = vld [vmem:[#allocation12 + $0x3e0] sm:$0xff] }
 0x5bf   :  { %14054 = vmatprep.subr.bf16.mxu1 %v14053_v60  ;;  %v6429_v26 = vld [vmem:[#allocation2 + $0xe1] sm:$0xff] }
 0x5c1   :  { %12276 = vmatmul.mubr.f32.gmra.mrb[36].mxu1 %v16127_v18  ;;  %v14069_v18 = vpack.c.bf16 %v6449_v14, %v6448_v17 }
 0x5c2   :  { %12278 = vmatprep.mubr.f32.mxu1 %v16201_v29  ;;  %14056 = vmatpush3.bf16.msra.mxu1 %v14053_v60  ;;  %v6450_v29 = vld [vmem:[#allocation12 + $0x3f0] sm:$0xff] }
 0x5c3   :  { %14058 = vmatprep.subr.bf16.mxu1 %v14057_v44  ;;  %v6644_v60 = vld [vmem:[#allocation12 + $0x470] sm:$0xff] }
 0x5c5   :  { %12279 = vmatmul.mubr.f32.gmra.mrb[38].mxu1 %v16259_v4 }
 0x5c6   :  { %12281 = vmatprep.mubr.f32.mxu1 %v16134_v57  ;;  %14060 = vmatpush3.bf16.msra.mxu1 %v14057_v44  ;;  %v14073_v57 = vpack.c.bf16 %v6451_v49, %v6450_v29  ;;  %v14105_v44 = vpack.c.bf16 %v6645_v52, %v6644_v60 }
 0x5c7   :  { %14062 = vmatprep.subr.bf16.mxu1 %v14061_v41 }
 0x5c9   :  { %12282 = vmatmul.mubr.f32.gmra.mrb[40].mxu1 %v16137_v62  ;;  %v14077_v62 = vpack.c.bf16 %v6631_v50, %v6630_v63  ;;  %v7117_v63 = vld [vmem:[#allocation12 + $0x528] sm:$0xff] }
 0x5ca   :  { %12284 = vmatprep.mubr.f32.mxu1 %v16140_v5  ;;  %14064 = vmatpush3.bf16.msra.mxu1 %v14061_v41  ;;  %v6632_v5 = vld [vmem:[#allocation12 + $0x410] sm:$0xff] }
 0x5cb   :  { %14066 = vmatprep.subr.bf16.mxu1 %v14065_v45  ;;  %v6434_v41 = vld [vmem:[#allocation2 + $0x131] sm:$0xff] }
 0x5cd   :  { %12285 = vmatmul.mubr.f32.gmra.mrb[42].mxu1 %v16143_v11  ;;  %v14081_v11 = vpack.c.bf16 %v6633_v19, %v6632_v5 }
 0x5ce   :  { %12287 = vmatprep.mubr.f32.mxu1 %v16146_v40  ;;  %14068 = vmatpush3.bf16.msra.mxu1 %v14065_v45  ;;  %v6420_v40 = vld [vmem:[#allocation2 + $0x31] sm:$0xff] }
 0x5cf   :  { %14070 = vmatprep.subr.bf16.mxu1 %v14069_v18 }
 0x5d1   :  { %12288 = vmatmul.mubr.f32.gmra.mrb[44].mxu1 %v16149_v21  ;;  %v14085_v21 = vpack.c.bf16 %v6635_v30, %v6634_v54  ;;  %v7118_v54 = vld [vmem:[#allocation12 + $0x530] sm:$0xff]  ;;  %v7119_v30 = vld [vmem:[#allocation12 + $0x538] sm:$0xff] }
 0x5d2   :  { %12290 = vmatprep.mubr.f32.mxu1 %v16211_v31  ;;  %14072 = vmatpush3.bf16.msra.mxu1 %v14069_v18  ;;  %v6422_v31 = vld [vmem:[#allocation2 + $0x51] sm:$0xff] }
 0x5d3   :  { %14074 = vmatprep.subr.bf16.mxu1 %v14073_v57 }
 0x5d5   :  { %12291 = vmatmul.mubr.f32.gmra.mrb[46].mxu1 %v16259_v4 }
 0x5d6   :  { %14076 = vmatpush3.bf16.msra.mxu1 %v14073_v57  ;;  %12325 = vmatprep.mubr.f32.mxu1 %v6419_v2  ;;  %v7116_v57 = vld [vmem:[#allocation12 + $0x520] sm:$0xff] }
 0x5d7   :  { %14078 = vmatprep.subr.bf16.mxu1 %v14077_v62 }
 0x5d9   :  { %12326 = vmatmul.mubr.f32.vlgmr.msra.gmra.mrb[32].mxu1 %v6420_v40 }
 0x5da   :  { %12328 = vmatprep.mubr.f32.mxu1 %v6421_v56  ;;  %14080 = vmatpush3.bf16.msra.mxu1 %v14077_v62 }
 0x5db   :  { %14082 = vmatprep.subr.bf16.mxu1 %v14081_v11 }
 0x5dd   :  { %12329 = vmatmul.mubr.f32.gmra.mrb[34].mxu1 %v6422_v31 }
 0x5de   :  { %12331 = vmatprep.mubr.f32.mxu1 %v6423_v8  ;;  %14084 = vmatpush3.bf16.msra.mxu1 %v14081_v11  ;;  %v14149_v11 = vpack.c.bf16 %v7117_v63, %v7116_v57  ;;  %v14153_v8 = vpack.c.bf16 %v7119_v30, %v7118_v54 }
 0x5df   :  { %14086 = vmatprep.subr.bf16.mxu1 %v14085_v21 }
 0x5e1   :  { %12332 = vmatmul.mubr.f32.gmra.mrb[36].mxu1 %v6424_v1 }
 0x5e2   :  { %12334 = vmatprep.mubr.f32.mxu1 %v6425_v51  ;;  %14088 = vmatpush3.bf16.msra.mxu1 %v14085_v21 }
 0x5e3   :  { %14090 = vmatprep.subr.bf16.mxu1 %v14089_v22 }
 0x5e5   :  { %12335 = vmatmul.mubr.f32.gmra.mrb[38].mxu1 %v6426_v59 }
 0x5e6   :  { %12337 = vmatprep.mubr.f32.mxu1 %v6427_v10  ;;  %14092 = vmatpush3.bf16.msra.mxu1 %v14089_v22 }
 0x5e7   :  { %14094 = vmatprep.subr.bf16.mxu1 %v14093_v13 }
 0x5e9   :  { %12338 = vmatmul.mubr.f32.gmra.mrb[40].mxu1 %v6428_v34 }
 0x5ea   :  { %12340 = vmatprep.mubr.f32.mxu1 %v6429_v26  ;;  %14096 = vmatpush3.bf16.msra.mxu1 %v14093_v13 }
 0x5eb   :  { %14098 = vmatprep.subr.bf16.mxu1 %v14097_v39 }
 0x5ed   :  { %12341 = vmatmul.mubr.f32.gmra.mrb[42].mxu1 %v6430_v42 }
 0x5ee   :  { %12343 = vmatprep.mubr.f32.mxu1 %v6431_v43  ;;  %14100 = vmatpush3.bf16.msra.mxu1 %v14097_v39 }
 0x5ef   :  { %14102 = vmatprep.subr.bf16.mxu1 %v14101_v33 }
 0x5f1   :  { %12344 = vmatmul.mubr.f32.gmra.mrb[44].mxu1 %v6432_v7 }
 0x5f2   :  { %12346 = vmatprep.mubr.f32.mxu1 %v6433_v16  ;;  %14104 = vmatpush3.bf16.msra.mxu1 %v14101_v33 }
 0x5f3   :  { %14106 = vmatprep.subr.bf16.mxu1 %v14105_v44 }
 0x5f5   :  { %12347 = vmatmul.mubr.f32.gmra.mrb[46].mxu1 %v6434_v41 }
 0x5f6   :  { %14108 = vmatpush3.bf16.msra.mxu1 %v14105_v44  ;;  %12381 = vmatprep.mubr.f32.mxu1 %v16155_v27  ;;  %v6628_v27 = vld [vmem:[#allocation2 + $0x132] sm:$0xff] }
 0x5f9   :  { %12382 = vmatmul.mubr.f32.vlgmr.msra.gmra.mrb[32].mxu1 %v16158_v32  ;;  %v6860_v32 = vld [vmem:[#allocation15 + $0x70] sm:$0xff] }
 0x5fa   :  { %12384 = vmatprep.mubr.f32.mxu1 %v16161_v47  ;;  %v6861_v47 = vld [vmem:[#allocation15 + $0x78] sm:$0xff] }
 0x5fd   :  { %12385 = vmatmul.mubr.f32.gmra.mrb[34].mxu1 %v16164_v58  ;;  %v14137_v58 = vpack.c.bf16 %v6861_v47, %v6860_v32  ;;  %v7120_v47 = vld [vmem:[#allocation12 + $0x540] sm:$0xff] }
 0x5fe   :  { %12387 = vmatprep.mubr.f32.mxu1 %v16167_v9  ;;  %v7112_v9 = vld [vmem:[#allocation12 + $0x500] sm:$0xff] }
 0x5ff   :  { %14138 = vmatprep.subr.bf16.mxu0 %v14137_v58 }
 0x600   :  { %14140 = vmatpush3.bf16.msra.mxu0 %v14137_v58  ;;  %v7121_v58 = vld [vmem:[#allocation12 + $0x548] sm:$0xff] }
 0x601   :  { %12388 = vmatmul.mubr.f32.gmra.mrb[36].mxu1 %v16170_v25  ;;  %v7113_v25 = vld [vmem:[#allocation12 + $0x508] sm:$0xff] }
 0x602   :  { %12390 = vmatprep.mubr.f32.mxu1 %v16239_v24  ;;  %v7114_v24 = vld [vmem:[#allocation12 + $0x510] sm:$0xff] }
 0x605   :  { %12391 = vmatmul.mubr.f32.gmra.mrb[38].mxu1 %v6620_v35 }
 0x606   :  { %12393 = vmatprep.mubr.f32.mxu1 %v16176_v0  ;;  %v14141_v0 = vpack.c.bf16 %v7113_v25, %v7112_v9  ;;  %v14157_v9 = vpack.c.bf16 %v7121_v58, %v7120_v47  ;;  %v7122_v25 = vld [vmem:[#allocation12 + $0x550] sm:$0xff]  ;;  %v7088_v47 = vld [vmem:[#allocation12 + $0x4c8] sm:$0xff] }
 0x607   :  { %v15109_v58 = vld [vmem:[#allocation2 + $0x71] sm:$0xff] }
 0x608   :  { %14142 = vmatprep.subr.bf16.mxu0 %v14141_v0 }
 0x609   :  { %12394 = vmatmul.mubr.f32.gmra.mrb[40].mxu1 %v16179_v38  ;;  %v16284_v38 = vld [vmem:[#allocation14] ss:$0 sm:$0xff] }
 0x60a   :  { %12396 = vmatprep.mubr.f32.mxu1 %v16182_v20 }
 0x60d   :  { %12397 = vmatmul.mubr.f32.gmra.mrb[42].mxu1 %v16185_v48 }
 0x60e   :  { %12399 = vmatprep.mubr.f32.mxu1 %v16188_v23 }
 0x611   :  { %12400 = vmatmul.mubr.f32.gmra.mrb[44].mxu1 %v16191_v37 }
 0x612   :  { %12402 = vmatprep.mubr.f32.mxu1 %v16249_v12  ;;  %v7115_v12 = vld [vmem:[#allocation12 + $0x518] sm:$0xff] }
 0x613   :  { %v14145_v29 = vpack.c.bf16 %v7115_v12, %v7114_v24  ;;  %v7127_v24 = vld [vmem:[#allocation12 + $0x578] sm:$0xff] }
 0x615   :  { %12403 = vmatmul.mubr.f32.gmra.mrb[46].mxu1 %v6628_v27 }
 0x6cc   :  { %v12383_v20 = vpop.f32.mrb[32].mxu1 }
 0x6cd   :  { %v6815_v48 = vadd.f32 %v12383_v20, %v16284_v38  ;;  %v6712_v23 = vpop.f32.mrb[33].mxu1 }
 0x6ce   :  { %v6814_v37 = vadd.f32 %v16284_v38, %v6712_v23  ;;  %v7125_v23 = vld [vmem:[#allocation12 + $0x568] sm:$0xff] }
 0x6cf   :  { %v6831_v17 = vmax.f32 %v6815_v48, 0.0  ;;  %v7124_v48 = vld [vmem:[#allocation12 + $0x560] sm:$0xff] }
 0x6d0   :  { %v6830_v46 = vmax.f32 %v6814_v37, 0.0  ;;  %v12386_v45 = vpop.f32.mrb[34].mxu1  ;;  %v14165_v37 = vpack.c.bf16 %v7125_v23, %v7124_v48 }
 0x6d1   :  { %v6817_v14 = vadd.f32 %v12386_v45, %v16284_v38  ;;  %v6722_v18 = vpop.f32.mrb[35].mxu1  ;;  %v7080_v45 = vld [vmem:[#allocation12 + $0x488] sm:$0xff] }
 0x6d2   :  { %v6816_v49 = vadd.f32 %v16284_v38, %v6722_v18  ;;  %12437 = vmatprep.mubr.f32.mxu0 %v6830_v46  ;;  %v7079_v46 = vld [vmem:[#allocation12 + $0x480] sm:$0xff] }
 0x6d3   :  { %12438 = vmatmul.mubr.f32.vlgmr.msra.gmra.mrb[16].mxu0 %v6831_v17  ;;  %v6833_v5 = vmax.f32 %v6817_v14, 0.0  ;;  %v7095_v17 = vld [vmem:[#allocation2 + $0x1] sm:$0xff]  ;;  %v14173_v14 = vpack.c.bf16 %v7080_v45, %v7079_v46  ;;  %v7089_v45 = vld [vmem:[#allocation12 + $0x4d0] sm:$0xff] }
 0x6d4   :  { %v6832_v50 = vmax.f32 %v6816_v49, 0.0  ;;  %v12389_v62 = vpop.f32.mrb[36].mxu1  ;;  %14144 = vmatpush3.bf16.msra.mxu0 %v14141_v0  ;;  %v7123_v0 = vld [vmem:[#allocation12 + $0x558] sm:$0xff]  ;;  %v16302_v18 = vld [vmem:[#allocation17] ss:$0 sm:$0xff] }
 0x6d5   :  { %v6819_v19 = vadd.f32 %v12389_v62, %v16284_v38  ;;  %v6732_v2 = vpop.f32.mrb[37].mxu1  ;;  %14146 = vmatprep.subr.bf16.mxu0 %v14145_v29  ;;  %v14161_v20 = vpack.c.bf16 %v7123_v0, %v7122_v25 }
 0x6d6   :  { %v6818_v40 = vadd.f32 %v16284_v38, %v6732_v2  ;;  %12440 = vmatprep.mubr.f32.mxu0 %v6832_v50  ;;  %v15102_v50 = vld [vmem:[#allocation2 + $0x21] sm:$0xff]  ;;  %v15103_v2 = vld [vmem:[#allocation2 + $0x11] sm:$0xff] }
 0x6d7   :  { %12441 = vmatmul.mubr.f32.gmra.mrb[18].mxu0 %v6833_v5  ;;  %v6835_v31 = vmax.f32 %v6819_v19, 0.0  ;;  %v7081_v5 = vld [vmem:[#allocation12 + $0x490] sm:$0xff]  ;;  %v7082_v19 = vld [vmem:[#allocation12 + $0x498] sm:$0xff] }
 0x6d8   :  { %v6834_v56 = vmax.f32 %v6818_v40, 0.0  ;;  %v12392_v21 = vpop.f32.mrb[38].mxu1  ;;  %14148 = vmatpush3.bf16.msra.mxu0 %v14145_v29 }
 0x6d9   :  { %v6821_v55 = vadd.f32 %v12392_v21, %v16284_v38  ;;  %v6742_v3 = vpop.f32.mrb[39].mxu1  ;;  %14150 = vmatprep.subr.bf16.mxu0 %v14149_v11 }
 0x6da   :  { %v6820_v22 = vadd.f32 %v16284_v38, %v6742_v3  ;;  %12443 = vmatprep.mubr.f32.mxu0 %v6834_v56  ;;  %v15104_v3 = vld [vmem:[#allocation2 + $0x41] sm:$0xff] }
 0x6db   :  { %12444 = vmatmul.mubr.f32.gmra.mrb[20].mxu0 %v6835_v31  ;;  %v6837_v36 = vmax.f32 %v6821_v55, 0.0  ;;  %v14177_v55 = vpack.c.bf16 %v7082_v19, %v7081_v5 }
 0x6dc   :  { %v6836_v1 = vmax.f32 %v6820_v22, 0.0  ;;  %v12395_v53 = vpop.f32.mrb[40].mxu1  ;;  %14152 = vmatpush3.bf16.msra.mxu0 %v14149_v11  ;;  %v7083_v22 = vld [vmem:[#allocation12 + $0x4a0] sm:$0xff] }
 0x6dd   :  { %v6823_v51 = vadd.f32 %v12395_v53, %v16284_v38  ;;  %v6752_v59 = vpop.f32.mrb[41].mxu1  ;;  %14154 = vmatprep.subr.bf16.mxu0 %v14153_v8  ;;  %v15105_v53 = vld [vmem:[#allocation2 + $0x31] sm:$0xff] }
 0x6de   :  { %v6822_v13 = vadd.f32 %v16284_v38, %v6752_v59  ;;  %12446 = vmatprep.mubr.f32.mxu0 %v6836_v1  ;;  %v7084_v1 = vld [vmem:[#allocation12 + $0x4a8] sm:$0xff] }
 0x6df   :  { %12447 = vmatmul.mubr.f32.gmra.mrb[22].mxu0 %v6837_v36  ;;  %v6839_v10 = vmax.f32 %v6823_v51, 0.0 }
 0x6e0   :  { %v6838_v28 = vmax.f32 %v6822_v13, 0.0  ;;  %v12398_v6 = vpop.f32.mrb[42].mxu1  ;;  %14156 = vmatpush3.bf16.msra.mxu0 %v14153_v8 }
 0x6e1   :  { %v6825_v39 = vadd.f32 %v12398_v6, %v16284_v38  ;;  %v6762_v34 = vpop.f32.mrb[43].mxu1  ;;  %14158 = vmatprep.subr.bf16.mxu0 %v14157_v9 }
 0x6e2   :  { %v6824_v15 = vadd.f32 %v16284_v38, %v6762_v34  ;;  %12449 = vmatprep.mubr.f32.mxu0 %v6838_v28  ;;  %v15106_v34 = vld [vmem:[#allocation2 + $0x61] sm:$0xff] }
 0x6e3   :  { %12450 = vmatmul.mubr.f32.gmra.mrb[24].mxu0 %v6839_v10  ;;  %v6841_v33 = vmax.f32 %v6825_v39, 0.0  ;;  %v14181_v39 = vpack.c.bf16 %v7084_v1, %v7083_v22 }
 0x6e4   :  { %v6840_v61 = vmax.f32 %v6824_v15, 0.0  ;;  %v12401_v26 = vpop.f32.mrb[44].mxu1  ;;  %14160 = vmatpush3.bf16.msra.mxu0 %v14157_v9 }
 0x6e5   :  { %v6827_v42 = vadd.f32 %v12401_v26, %v16284_v38  ;;  %v6772_v60 = vpop.f32.mrb[45].mxu1  ;;  %14162 = vmatprep.subr.bf16.mxu0 %v14161_v20  ;;  %v7086_v26 = vld [vmem:[#allocation12 + $0x4b8] sm:$0xff] }
 0x6e6   :  { %v6826_v52 = vadd.f32 %v16284_v38, %v6772_v60  ;;  %12452 = vmatprep.mubr.f32.mxu0 %v6840_v61  ;;  %v7085_v61 = vld [vmem:[#allocation12 + $0x4b0] sm:$0xff] }
 0x6e7   :  { %12453 = vmatmul.mubr.f32.gmra.mrb[26].mxu0 %v6841_v33  ;;  %v6843_v7 = vmax.f32 %v6827_v42, 0.0  ;;  %v15107_v33 = vld [vmem:[#allocation2 + $0x51] sm:$0xff] }
 0x6e8   :  { %v6842_v43 = vmax.f32 %v6826_v52, 0.0  ;;  %v12404_v44 = vpop.f32.mrb[46].mxu1  ;;  %14164 = vmatpush3.bf16.msra.mxu0 %v14161_v20 }
 0x6e9   :  { %v6829_v16 = vadd.f32 %v12404_v44, %v16284_v38  ;;  %v6782_v41 = vpop.f32.mrb[47].mxu1  ;;  %14166 = vmatprep.subr.bf16.mxu0 %v14165_v37 }
 0x6ea   :  { %v6828_v35 = vadd.f32 %v16284_v38, %v6782_v41  ;;  %12455 = vmatprep.mubr.f32.mxu0 %v6842_v43  ;;  %v7126_v38 = vld [vmem:[#allocation12 + $0x570] sm:$0xff]  ;;  %v14185_v41 = vpack.c.bf16 %v7086_v26, %v7085_v61 }
 0x6eb   :  { %12456 = vmatmul.mubr.f32.gmra.mrb[28].mxu0 %v6843_v7  ;;  %v6845_v32 = vmax.f32 %v6829_v16, 0.0  ;;  %v14169_v12 = vpack.c.bf16 %v7127_v24, %v7126_v38  ;;  %v7103_v38 = vld [vmem:[#allocation2 + $0xa1] sm:$0xff] }
 0x6ec   :  { %v6844_v27 = vmax.f32 %v6828_v35, 0.0  ;;  %14168 = vmatpush3.bf16.msra.mxu0 %v14165_v37  ;;  %v15108_v35 = vld [vmem:[#allocation2 + $0x81] sm:$0xff] }
 0x6ed   :  { %14170 = vmatprep.subr.bf16.mxu0 %v14169_v12 }
 0x6ee   :  { %12458 = vmatprep.mubr.f32.mxu0 %v6844_v27 }
 0x6ef   :  { %12459 = vmatmul.mubr.f32.gmra.mrb[30].mxu0 %v6845_v32  ;;  %v7087_v32 = vld [vmem:[#allocation12 + $0x4c0] sm:$0xff] }
 0x6f0   :  { %14172 = vmatpush3.bf16.msra.mxu0 %v14169_v12  ;;  %12493 = vmatprep.mubr.f32.mxu0 %v7095_v17  ;;  %v14189_v24 = vpack.c.bf16 %v7088_v47, %v7087_v32  ;;  %v15110_v12 = vld [vmem:[#allocation2 + $0xc1] sm:$0xff]  ;;  %v15117_v32 = vld [vmem:[#allocation2 + $0x111] sm:$0xff] }
 0x6f1   :  { %14174 = vmatprep.subr.bf16.mxu0 %v14173_v14  ;;  %v7090_v17 = vld [vmem:[#allocation12 + $0x4d8] sm:$0xff] }
 0x6f2   :  { %v14193_v19 = vpack.c.bf16 %v7090_v17, %v7089_v45  ;;  %v7441_v17 = vld [vmem:[#allocation12 + $0x5b0] sm:$0xff] }
 0x7a6   :  { %v12439_v29 = vpop.f32.mrb[16].mxu0 }
 0x7a7   :  { %v6941_v49 = vadd.f32 %v12439_v29, %v16302_v18  ;;  %v6935_v57 = vpop.f32.mrb[17].mxu0 }
 0x7a8   :  { %v6936_v63 = vadd.f32 %v16302_v18, %v6935_v57 }
 0x7a9   :  { %v7015_v62 = vadd.f32 %v15102_v50, %v6941_v49 }
 0x7aa   :  { %v7014_v11 = vadd.f32 %v15103_v2, %v6936_v63  ;;  %v12442_v40 = vpop.f32.mrb[18].mxu0  ;;  %v15112_v2 = vld [vmem:[#allocation2 + $0xe1] sm:$0xff] }
 0x7ab   :  { %v16306_v54 = vmax.f32 %v7015_v62, 0.0  ;;  %v6951_v30 = vadd.f32 %v12442_v40, %v16302_v18  ;;  %v6945_v56 = vpop.f32.mrb[19].mxu0  ;;  %v7091_v40 = vld [vmem:[#allocation12 + $0x4e0] sm:$0xff] }
 0x7ac   :  { %v16309_v21 = vmax.f32 %v7014_v11, 0.0  ;;  %v6946_v31 = vadd.f32 %v16302_v18, %v6945_v56  ;;  %v15113_v56 = vld [vmem:[#allocation2 + $0xd1] sm:$0xff] }
 0x7ad   :  { %7047 = vst [vmem:[#allocation2 + $0x21] sm:$0xff] %v16306_v54  ;;  %v7017_v8 = vadd.f32 %v15104_v3, %v6951_v30  ;;  %v7092_v30 = vld [vmem:[#allocation12 + $0x4e8] sm:$0xff] }
 0x7ae   :  { %7046 = vst [vmem:[#allocation2 + $0x11] sm:$0xff] %v16309_v21  ;;  %v7016_v36 = vadd.f32 %v15105_v53, %v6946_v31  ;;  %v12445_v51 = vpop.f32.mrb[20].mxu0  ;;  %12494 = vmatmul.mubr.f32.vlgmr.msra.gmra.mrb[32].mxu0 %v16309_v21 }
 0x7af   :  { %v16315_v59 = vmax.f32 %v7017_v8, 0.0  ;;  %v6961_v13 = vadd.f32 %v12445_v51, %v16302_v18  ;;  %v6955_v28 = vpop.f32.mrb[21].mxu0  ;;  %12496 = vmatprep.mubr.f32.mxu0 %v16306_v54  ;;  %14176 = vmatpush3.bf16.msra.mxu0 %v14173_v14  ;;  %v15111_v14 = vld [vmem:[#allocation2 + $0xb1] sm:$0xff]  ;;  %v15114_v51 = vld [vmem:[#allocation2 + $0x101] sm:$0xff] }
 0x7b0   :  { %v16319_v6 = vmax.f32 %v7016_v36, 0.0  ;;  %v6956_v10 = vadd.f32 %v16302_v18, %v6955_v28  ;;  %14178 = vmatprep.subr.bf16.mxu0 %v14177_v55  ;;  %v14197_v36 = vpack.c.bf16 %v7092_v30, %v7091_v40  ;;  %v7093_v28 = vld [vmem:[#allocation12 + $0x4f0] sm:$0xff]  ;;  %v7446_v30 = vld [vmem:[#allocation12 + $0x5d8] sm:$0xff] }
 0x7b1   :  { %7049 = vst [vmem:[#allocation2 + $0x41] sm:$0xff] %v16315_v59  ;;  %v7019_v15 = vadd.f32 %v15106_v34, %v6961_v13  ;;  %v7445_v40 = vld [vmem:[#allocation12 + $0x5d0] sm:$0xff] }
 0x7b2   :  { %7048 = vst [vmem:[#allocation2 + $0x31] sm:$0xff] %v16319_v6  ;;  %v7018_v42 = vadd.f32 %v15107_v33, %v6956_v10  ;;  %v12448_v60 = vpop.f32.mrb[22].mxu0  ;;  %12497 = vmatmul.mubr.f32.gmra.mrb[34].mxu0 %v16319_v6  ;;  %v7094_v10 = vld [vmem:[#allocation12 + $0x4f8] sm:$0xff] }
 0x7b3   :  { %v16325_v52 = vmax.f32 %v7019_v15, 0.0  ;;  %v6971_v43 = vadd.f32 %v12448_v60, %v16302_v18  ;;  %v6965_v44 = vpop.f32.mrb[23].mxu0  ;;  %12499 = vmatprep.mubr.f32.mxu0 %v16315_v59  ;;  %14180 = vmatpush3.bf16.msra.mxu0 %v14177_v55 }
 0x7b4   :  { %v16329_v7 = vmax.f32 %v7018_v42, 0.0  ;;  %v6966_v16 = vadd.f32 %v16302_v18, %v6965_v44  ;;  %14182 = vmatprep.subr.bf16.mxu0 %v14181_v39  ;;  %v15116_v44 = vld [vmem:[#allocation2 + $0x121] sm:$0xff] }
 0x7b5   :  { %7051 = vst [vmem:[#allocation2 + $0x61] sm:$0xff] %v16325_v52  ;;  %v16333_v27 = vadd.f32 %v15108_v35, %v6971_v43  ;;  %v14201_v43 = vpack.c.bf16 %v7094_v10, %v7093_v28  ;;  %v7436_v35 = vld [vmem:[#allocation12 + $0x588] sm:$0xff] }
 0x7b6   :  { %7050 = vst [vmem:[#allocation2 + $0x51] sm:$0xff] %v16329_v7  ;;  %v7020_v9 = vadd.f32 %v15109_v58, %v6966_v16  ;;  %v12451_v25 = vpop.f32.mrb[24].mxu0  ;;  %12500 = vmatmul.mubr.f32.gmra.mrb[36].mxu0 %v16329_v7 }
 0x7b7   :  { %v7037_v0 = vmax.f32 %v16333_v27, 0.0  ;;  %v6981_v20 = vadd.f32 %v12451_v25, %v16302_v18  ;;  %v6975_v48 = vpop.f32.mrb[25].mxu0  ;;  %12502 = vmatprep.mubr.f32.mxu0 %v16325_v52  ;;  %14184 = vmatpush3.bf16.msra.mxu0 %v14181_v39  ;;  %v15115_v39 = vld [vmem:[#allocation2 + $0xf1] sm:$0xff] }
 0x7b8   :  { %v16340_v23 = vmax.f32 %v7020_v9, 0.0  ;;  %v6976_v37 = vadd.f32 %v16302_v18, %v6975_v48  ;;  %14186 = vmatprep.subr.bf16.mxu0 %v14185_v41  ;;  %v7437_v25 = vld [vmem:[#allocation12 + $0x590] sm:$0xff] }
 0x7b9   :  { %7053 = vst [vmem:[#allocation2 + $0x81] sm:$0xff] %v7037_v0  ;;  %v7023_v46 = vadd.f32 %v15110_v12, %v6981_v20  ;;  %v7438_v20 = vld [vmem:[#allocation12 + $0x598] sm:$0xff]  ;;  %v16393_v45 = vld [vmem:[#allocation2 + $0x30] sm:$0xff] }
 0x7ba   :  { %7052 = vst [vmem:[#allocation2 + $0x71] sm:$0xff] %v16340_v23  ;;  %v7022_v29 = vadd.f32 %v15111_v14, %v6976_v37  ;;  %v12454_v49 = vpop.f32.mrb[26].mxu0  ;;  %12503 = vmatmul.mubr.f32.gmra.mrb[38].mxu0 %v16340_v23  ;;  %v14209_v48 = vpack.c.bf16 %v7438_v20, %v7437_v25  ;;  %v16387_v37 = vld [vmem:[#allocation2 + $0x10] sm:$0xff]  ;;  %v16390_v12 = vld [vmem:[#allocation2 + $0x20] sm:$0xff] }
 0x7bb   :  { %v16347_v57 = vmax.f32 %v7023_v46, 0.0  ;;  %v6991_v63 = vadd.f32 %v12454_v49, %v16302_v18  ;;  %v6985_v50 = vpop.f32.mrb[27].mxu0  ;;  %14188 = vmatpush3.bf16.msra.mxu0 %v14185_v41  ;;  %12505 = vmatprep.mubr.f32.mxu0 %v7103_v38  ;;  %v7435_v41 = vld [vmem:[#allocation12 + $0x580] sm:$0xff]  ;;  %v7442_v14 = vld [vmem:[#allocation12 + $0x5b8] sm:$0xff]  ;;  %v16436_v20 = vld [vmem:[#allocation2 + $0x32] sm:$0xff] }
 0x7bc   :  { %v16350_v62 = vmax.f32 %v7022_v29, 0.0  ;;  %v6986_v5 = vadd.f32 %v16302_v18, %v6985_v50  ;;  %14190 = vmatprep.subr.bf16.mxu0 %v14189_v24  ;;  %v14205_v9 = vpack.c.bf16 %v7436_v35, %v7435_v41  ;;  %v7439_v38 = vld [vmem:[#allocation12 + $0x5a0] sm:$0xff]  ;;  %v14217_v49 = vpack.c.bf16 %v7442_v14, %v7441_v17  ;;  %v16430_v35 = vld [vmem:[#allocation2 + $0x12] sm:$0xff] }
 0x7bd   :  { %7055 = vst [vmem:[#allocation2 + $0xc1] sm:$0xff] %v16347_v57  ;;  %v7025_v11 = vadd.f32 %v15112_v2, %v6991_v63  ;;  %v16396_v29 = vld [vmem:[#allocation2 + $0x40] sm:$0xff]  ;;  %v16399_v63 = vld [vmem:[#allocation2 + $0x50] sm:$0xff] }
 0x7be   :  { %7054 = vst [vmem:[#allocation2 + $0xb1] sm:$0xff] %v16350_v62  ;;  %v7024_v31 = vadd.f32 %v15113_v56, %v6986_v5  ;;  %v12457_v55 = vpop.f32.mrb[28].mxu0  ;;  %12506 = vmatmul.mubr.f32.gmra.mrb[40].mxu0 %v16350_v62  ;;  %v7443_v50 = vld [vmem:[#allocation12 + $0x5c0] sm:$0xff]  ;;  %v7444_v5 = vld [vmem:[#allocation12 + $0x5c8] sm:$0xff]  ;;  %v14225_v56 = vpack.c.bf16 %v7446_v30, %v7445_v40  ;;  %v7639_v30 = vld [vmem:[#allocation12 + $0x650] sm:$0xff] }
 0x7bf   :  { %v16356_v3 = vmax.f32 %v7025_v11, 0.0  ;;  %v7001_v8 = vadd.f32 %v12457_v55, %v16302_v18  ;;  %v6995_v22 = vpop.f32.mrb[29].mxu0  ;;  %12508 = vmatprep.mubr.f32.mxu0 %v16347_v57  ;;  %14192 = vmatpush3.bf16.msra.mxu0 %v14189_v24  ;;  %v7440_v24 = vld [vmem:[#allocation12 + $0x5a8] sm:$0xff]  ;;  %v14221_v2 = vpack.c.bf16 %v7444_v5, %v7443_v50  ;;  %v7447_v55 = vld [vmem:[#allocation12 + $0x5e0] sm:$0xff] }
 0x7c0   :  { %v16360_v1 = vmax.f32 %v7024_v31, 0.0  ;;  %v6996_v53 = vadd.f32 %v16302_v18, %v6995_v22  ;;  %14194 = vmatprep.subr.bf16.mxu0 %v14193_v19  ;;  %v14213_v46 = vpack.c.bf16 %v7440_v24, %v7439_v38  ;;  %v7636_v38 = vld [vmem:[#allocation12 + $0x638] sm:$0xff]  ;;  %v16442_v17 = vld [vmem:[#allocation2 + $0x52] sm:$0xff]  ;;  %v7637_v14 = vld [vmem:[#allocation12 + $0x640] sm:$0xff] }
 0x7c1   :  { %7057 = vst [vmem:[#allocation2 + $0xe1] sm:$0xff] %v16356_v3  ;;  %v7027_v13 = vadd.f32 %v15114_v51, %v7001_v8  ;;  %v16405_v11 = vld [vmem:[#allocation2 + $0x70] sm:$0xff]  ;;  %v16439_v24 = vld [vmem:[#allocation2 + $0x42] sm:$0xff] }
 0x7c2   :  { %7056 = vst [vmem:[#allocation2 + $0xd1] sm:$0xff] %v16360_v1  ;;  %v7026_v34 = vadd.f32 %v15115_v39, %v6996_v53  ;;  %v12460_v15 = vpop.f32.mrb[30].mxu0  ;;  %12509 = vmatmul.mubr.f32.gmra.mrb[42].mxu0 %v16360_v1  ;;  %v7448_v8 = vld [vmem:[#allocation12 + $0x5e8] sm:$0xff]  ;;  %v7449_v51 = vld [vmem:[#allocation12 + $0x5f0] sm:$0xff]  ;;  %v7629_v39 = vld [vmem:[#allocation12 + $0x600] sm:$0xff] }
 0x7c3   :  { %v16366_v61 = vmax.f32 %v7027_v13, 0.0  ;;  %v7011_v26 = vadd.f32 %v12460_v15, %v16302_v18  ;;  %v7005_v33 = vpop.f32.mrb[31].mxu0  ;;  %12511 = vmatprep.mubr.f32.mxu0 %v16356_v3  ;;  %14196 = vmatpush3.bf16.msra.mxu0 %v14193_v19  ;;  %v16402_v19 = vld [vmem:[#allocation2 + $0x60] sm:$0xff]  ;;  %v14229_v53 = vpack.c.bf16 %v7448_v8, %v7447_v55  ;;  %v16448_v40 = vld [vmem:[#allocation2 + $0x72] sm:$0xff] }
 0x7c4   :  { %v16370_v42 = vmax.f32 %v7026_v34, 0.0  ;;  %v7006_v60 = vadd.f32 %v16302_v18, %v7005_v33  ;;  %14198 = vmatprep.subr.bf16.mxu0 %v14197_v36  ;;  %v16412_v22 = vld [vmem:[#allocation2 + $0xc0] sm:$0xff]  ;;  %v7630_v34 = vld [vmem:[#allocation12 + $0x608] sm:$0xff] }
 0x7c5   :  { %7059 = vst [vmem:[#allocation2 + $0x101] sm:$0xff] %v16366_v61  ;;  %v16374_v16 = vadd.f32 %v15116_v44, %v7011_v26  ;;  %v16409_v31 = vld [vmem:[#allocation2 + $0xb0] sm:$0xff]  ;;  %v7450_v13 = vld [vmem:[#allocation12 + $0x5f8] sm:$0xff]  ;;  %v14237_v33 = vpack.c.bf16 %v7630_v34, %v7629_v39 }
 0x7c6   :  { %7058 = vst [vmem:[#allocation2 + $0xf1] sm:$0xff] %v16370_v42  ;;  %v7028_v47 = vadd.f32 %v15117_v32, %v7006_v60  ;;  %12512 = vmatmul.mubr.f32.gmra.mrb[44].mxu0 %v16370_v42  ;;  %v14233_v28 = vpack.c.bf16 %v7450_v13, %v7449_v51  ;;  %v7418_v26 = vld [vmem:[#allocation2 + $0x2] sm:$0xff]  ;;  %v16451_v8 = vld [vmem:[#allocation2 + $0xb2] sm:$0xff] }
 0x7c7   :  { %v7045_v58 = vmax.f32 %v16374_v16, 0.0  ;;  %12514 = vmatprep.mubr.f32.mxu0 %v16366_v61  ;;  %14200 = vmatpush3.bf16.msra.mxu0 %v14197_v36  ;;  %v7632_v44 = vld [vmem:[#allocation12 + $0x618] sm:$0xff]  ;;  %v7633_v32 = vld [vmem:[#allocation12 + $0x620] sm:$0xff]  ;;  %v7642_v51 = vld [vmem:[#allocation12 + $0x668] sm:$0xff] }
 0x7c8   :  { %v16380_v18 = vmax.f32 %v7028_v47, 0.0  ;;  %14202 = vmatprep.subr.bf16.mxu0 %v14201_v43  ;;  %v7634_v47 = vld [vmem:[#allocation12 + $0x628] sm:$0xff]  ;;  %v16445_v50 = vld [vmem:[#allocation2 + $0x62] sm:$0xff]  ;;  %v7643_v34 = vld [vmem:[#allocation12 + $0x670] sm:$0xff] }
 0x7c9   :  { %7061 = vst [vmem:[#allocation2 + $0x121] sm:$0xff] %v7045_v58  ;;  %v16415_v36 = vld [vmem:[#allocation2 + $0xd0] sm:$0xff]  ;;  %v14245_v25 = vpack.c.bf16 %v7634_v47, %v7633_v32  ;;  %v7426_v5 = vld [vmem:[#allocation2 + $0xa2] sm:$0xff] }
 0x7ca   :  { %7060 = vst [vmem:[#allocation2 + $0x111] sm:$0xff] %v16380_v18  ;;  %12515 = vmatmul.mubr.f32.gmra.mrb[46].mxu0 %v16380_v18  ;;  %v16454_v13 = vld [vmem:[#allocation2 + $0xc2] sm:$0xff]  ;;  %v16457_v39 = vld [vmem:[#allocation2 + $0xd2] sm:$0xff] }
 0x7cb   :  { %14204 = vmatpush3.bf16.msra.mxu0 %v14201_v43  ;;  %12549 = vmatprep.mubr.f32.mxu0 %v16259_v4  ;;  %v7631_v43 = vld [vmem:[#allocation12 + $0x610] sm:$0xff]  ;;  %v7824_v32 = vld [vmem:[#allocation12 + $0x688] sm:$0xff] }
 0x7cc   :  { %14206 = vmatprep.subr.bf16.mxu0 %v14205_v9  ;;  %v16424_v15 = vld [vmem:[#allocation2 + $0x100] sm:$0xff]  ;;  %v14241_v41 = vpack.c.bf16 %v7632_v44, %v7631_v43 }
 0x7cd   :  { %v16421_v10 = vld [vmem:[#allocation2 + $0xf0] sm:$0xff]  ;;  %v16466_v47 = vld [vmem:[#allocation2 + $0x102] sm:$0xff] }
 0x7ce   :  { %12550 = vmatmul.mubr.f32.vlgmr.msra.gmra.mrb[32].mxu0 %v16387_v37  ;;  %v16463_v44 = vld [vmem:[#allocation2 + $0xf2] sm:$0xff] }
 0x7cf   :  { %12552 = vmatprep.mubr.f32.mxu0 %v16390_v12  ;;  %14208 = vmatpush3.bf16.msra.mxu0 %v14205_v9  ;;  %v16433_v9 = vld [vmem:[#allocation2 + $0x22] sm:$0xff] }
 0x7d0   :  { %14210 = vmatprep.subr.bf16.mxu0 %v14209_v48 }
 0x7d1   :  { %v16427_v60 = vld [vmem:[#allocation2 + $0x110] sm:$0xff] }
 0x7d2   :  { %12553 = vmatmul.mubr.f32.gmra.mrb[34].mxu0 %v16393_v45 }
 0x7d3   :  { %12555 = vmatprep.mubr.f32.mxu0 %v16396_v29  ;;  %14212 = vmatpush3.bf16.msra.mxu0 %v14209_v48  ;;  %v7635_v48 = vld [vmem:[#allocation12 + $0x630] sm:$0xff] }
 0x7d4   :  { %14214 = vmatprep.subr.bf16.mxu0 %v14213_v46 }
 0x7d6   :  { %12556 = vmatmul.mubr.f32.gmra.mrb[36].mxu0 %v16399_v63 }
 0x7d7   :  { %12558 = vmatprep.mubr.f32.mxu0 %v16402_v19  ;;  %14216 = vmatpush3.bf16.msra.mxu0 %v14213_v46  ;;  %v14249_v46 = vpack.c.bf16 %v7636_v38, %v7635_v48  ;;  %v16469_v48 = vld [vmem:[#allocation2 + $0x112] sm:$0xff] }
 0x7d8   :  { %14218 = vmatprep.subr.bf16.mxu0 %v14217_v49  ;;  %v7825_v38 = vld [vmem:[#allocation12 + $0x690] sm:$0xff] }
 0x7da   :  { %12559 = vmatmul.mubr.f32.gmra.mrb[38].mxu0 %v16405_v11 }
 0x7db   :  { %14220 = vmatpush3.bf16.msra.mxu0 %v14217_v49  ;;  %12561 = vmatprep.mubr.f32.mxu0 %v16259_v4  ;;  %v16418_v4 = vld [vmem:[#allocation2 + $0xe0] sm:$0xff]  ;;  %v7638_v49 = vld [vmem:[#allocation12 + $0x648] sm:$0xff] }
 0x7dc   :  { %14222 = vmatprep.subr.bf16.mxu0 %v14221_v2 }
 0x7de   :  { %12562 = vmatmul.mubr.f32.gmra.mrb[40].mxu0 %v16409_v31 }
 0x7df   :  { %12564 = vmatprep.mubr.f32.mxu0 %v16412_v22  ;;  %14224 = vmatpush3.bf16.msra.mxu0 %v14221_v2  ;;  %v14253_v2 = vpack.c.bf16 %v7638_v49, %v7637_v14  ;;  %v7827_v49 = vld [vmem:[#allocation12 + $0x6a0] sm:$0xff] }
 0x7e0   :  { %14226 = vmatprep.subr.bf16.mxu0 %v14225_v56 }
 0x7e2   :  { %12565 = vmatmul.mubr.f32.gmra.mrb[42].mxu0 %v16415_v36 }
 0x7e3   :  { %12567 = vmatprep.mubr.f32.mxu0 %v16418_v4  ;;  %14228 = vmatpush3.bf16.msra.mxu0 %v14225_v56  ;;  %v7640_v56 = vld [vmem:[#allocation12 + $0x658] sm:$0xff] }
 0x7e4   :  { %14230 = vmatprep.subr.bf16.mxu0 %v14229_v53  ;;  %v14257_v55 = vpack.c.bf16 %v7640_v56, %v7639_v30  ;;  %v7829_v30 = vld [vmem:[#allocation12 + $0x6b0] sm:$0xff]  ;;  %v7830_v56 = vld [vmem:[#allocation12 + $0x6b8] sm:$0xff] }
 0x7e6   :  { %12568 = vmatmul.mubr.f32.gmra.mrb[44].mxu0 %v16421_v10 }
 0x7e7   :  { %12570 = vmatprep.mubr.f32.mxu0 %v16424_v15  ;;  %14232 = vmatpush3.bf16.msra.mxu0 %v14229_v53  ;;  %v7641_v53 = vld [vmem:[#allocation12 + $0x660] sm:$0xff] }
 0x7e8   :  { %14234 = vmatprep.subr.bf16.mxu0 %v14233_v28 }
 0x7ea   :  { %12571 = vmatmul.mubr.f32.gmra.mrb[46].mxu0 %v16427_v60 }
 0x7eb   :  { %14236 = vmatpush3.bf16.msra.mxu0 %v14233_v28  ;;  %12605 = vmatprep.mubr.f32.mxu0 %v7418_v26  ;;  %v14261_v28 = vpack.c.bf16 %v7642_v51, %v7641_v53  ;;  %v7644_v26 = vld [vmem:[#allocation12 + $0x678] sm:$0xff]  ;;  %v7832_v53 = vld [vmem:[#allocation12 + $0x6c8] sm:$0xff] }
 0x7ec   :  { %14238 = vmatprep.subr.bf16.mxu0 %v14237_v33  ;;  %v14265_v43 = vpack.c.bf16 %v7644_v26, %v7643_v34  ;;  %v7833_v34 = vld [vmem:[#allocation12 + $0x6d0] sm:$0xff]  ;;  %v7834_v26 = vld [vmem:[#allocation12 + $0x6d8] sm:$0xff] }
 0x7ee   :  { %12606 = vmatmul.mubr.f32.vlgmr.msra.gmra.mrb[32].mxu0 %v16430_v35 }
 0x7ef   :  { %12608 = vmatprep.mubr.f32.mxu0 %v16433_v9  ;;  %14240 = vmatpush3.bf16.msra.mxu0 %v14237_v33  ;;  %v16460_v33 = vld [vmem:[#allocation2 + $0xe2] sm:$0xff] }
 0x7f0   :  { %14242 = vmatprep.subr.bf16.mxu0 %v14241_v41 }
 0x7f2   :  { %12609 = vmatmul.mubr.f32.gmra.mrb[34].mxu0 %v16436_v20 }
 0x7f3   :  { %12611 = vmatprep.mubr.f32.mxu0 %v16439_v24  ;;  %14244 = vmatpush3.bf16.msra.mxu0 %v14241_v41  ;;  %v7823_v41 = vld [vmem:[#allocation12 + $0x680] sm:$0xff] }
 0x7f4   :  { %14246 = vmatprep.subr.bf16.mxu0 %v14245_v25 }
 0x7f6   :  { %12612 = vmatmul.mubr.f32.gmra.mrb[36].mxu0 %v16442_v17 }
 0x7f7   :  { %12614 = vmatprep.mubr.f32.mxu0 %v16445_v50  ;;  %14248 = vmatpush3.bf16.msra.mxu0 %v14245_v25  ;;  %v14269_v25 = vpack.c.bf16 %v7824_v32, %v7823_v41  ;;  %v7835_v41 = vld [vmem:[#allocation12 + $0x6e0] sm:$0xff]  ;;  %v7836_v32 = vld [vmem:[#allocation12 + $0x6e8] sm:$0xff] }
 0x7f8   :  { %14250 = vmatprep.subr.bf16.mxu0 %v14249_v46 }
 0x7fa   :  { %12615 = vmatmul.mubr.f32.gmra.mrb[38].mxu0 %v16448_v40 }
 0x7fb   :  { %14252 = vmatpush3.bf16.msra.mxu0 %v14249_v46  ;;  %12617 = vmatprep.mubr.f32.mxu0 %v7426_v5  ;;  %v7826_v46 = vld [vmem:[#allocation12 + $0x698] sm:$0xff]  ;;  %v7828_v5 = vld [vmem:[#allocation12 + $0x6a8] sm:$0xff] }
 0x7fc   :  { %14254 = vmatprep.subr.bf16.mxu0 %v14253_v2  ;;  %v14273_v14 = vpack.c.bf16 %v7826_v46, %v7825_v38  ;;  %v7837_v38 = vld [vmem:[#allocation12 + $0x6f0] sm:$0xff]  ;;  %v7838_v46 = vld [vmem:[#allocation12 + $0x6f8] sm:$0xff] }
 0x7fe   :  { %12618 = vmatmul.mubr.f32.gmra.mrb[40].mxu0 %v16451_v8 }
 0x7ff   :  { %12620 = vmatprep.mubr.f32.mxu0 %v16454_v13  ;;  %14256 = vmatpush3.bf16.msra.mxu0 %v14253_v2  ;;  %v14277_v2 = vpack.c.bf16 %v7828_v5, %v7827_v49  ;;  %v8018_v49 = vld [vmem:[#allocation12 + $0x708] sm:$0xff] }
 0x800   :  { %14258 = vmatprep.subr.bf16.mxu0 %v14257_v55 }
 0x802   :  { %12621 = vmatmul.mubr.f32.gmra.mrb[42].mxu0 %v16457_v39 }
 0x803   :  { %12623 = vmatprep.mubr.f32.mxu0 %v16460_v33  ;;  %14260 = vmatpush3.bf16.msra.mxu0 %v14257_v55  ;;  %v7831_v55 = vld [vmem:[#allocation12 + $0x6c0] sm:$0xff] }
 0x804   :  { %14262 = vmatprep.subr.bf16.mxu0 %v14261_v28  ;;  %v14285_v51 = vpack.c.bf16 %v7832_v53, %v7831_v55  ;;  %v8021_v55 = vld [vmem:[#allocation12 + $0x720] sm:$0xff]  ;;  %v8022_v53 = vld [vmem:[#allocation12 + $0x728] sm:$0xff] }
 0x806   :  { %12624 = vmatmul.mubr.f32.gmra.mrb[44].mxu0 %v16463_v44 }
 0x807   :  { %12626 = vmatprep.mubr.f32.mxu0 %v16466_v47  ;;  %14264 = vmatpush3.bf16.msra.mxu0 %v14261_v28  ;;  %v16479_v28 = vld [vmem:[#allocation2 + $0x80] sm:$0xff] }
 0x808   :  { %14266 = vmatprep.subr.bf16.mxu0 %v14265_v43 }
 0x80a   :  { %12627 = vmatmul.mubr.f32.gmra.mrb[46].mxu0 %v16469_v48 }
 0x80b   :  { %14268 = vmatpush3.bf16.msra.mxu0 %v14265_v43  ;;  %12661 = vmatprep.mubr.f32.mxu0 %v16387_v37  ;;  %v14281_v37 = vpack.c.bf16 %v7830_v56, %v7829_v30  ;;  %v14289_v43 = vpack.c.bf16 %v7834_v26, %v7833_v34  ;;  %v8019_v30 = vld [vmem:[#allocation12 + $0x710] sm:$0xff]  ;;  %v8020_v56 = vld [vmem:[#allocation12 + $0x718] sm:$0xff] }
 0x80c   :  { %14270 = vmatprep.subr.bf16.mxu0 %v14269_v25  ;;  %v8023_v34 = vld [vmem:[#allocation12 + $0x730] sm:$0xff]  ;;  %v8024_v26 = vld [vmem:[#allocation12 + $0x738] sm:$0xff] }
 0x80e   :  { %12662 = vmatmul.mubr.f32.vlgmr.msra.gmra.mrb[32].mxu0 %v16390_v12 }
 0x80f   :  { %12664 = vmatprep.mubr.f32.mxu0 %v16393_v45  ;;  %14272 = vmatpush3.bf16.msra.mxu0 %v14269_v25  ;;  %v14293_v25 = vpack.c.bf16 %v7836_v32, %v7835_v41  ;;  %v8026_v41 = vld [vmem:[#allocation12 + $0x748] sm:$0xff]  ;;  %v8028_v32 = vld [vmem:[#allocation12 + $0x758] sm:$0xff] }
 0x810   :  { %14274 = vmatprep.subr.bf16.mxu0 %v14273_v14 }
 0x812   :  { %12665 = vmatmul.mubr.f32.gmra.mrb[34].mxu0 %v16396_v29 }
 0x813   :  { %12667 = vmatprep.mubr.f32.mxu0 %v16399_v63  ;;  %14276 = vmatpush3.bf16.msra.mxu0 %v14273_v14  ;;  %v8017_v14 = vld [vmem:[#allocation12 + $0x700] sm:$0xff] }
 0x814   :  { %14278 = vmatprep.subr.bf16.mxu0 %v14277_v2  ;;  %v14301_v5 = vpack.c.bf16 %v8018_v49, %v8017_v14  ;;  %v8820_v49 = vld [vmem:[#allocation15 + $0x98] sm:$0xff] }
 0x816   :  { %12668 = vmatmul.mubr.f32.gmra.mrb[36].mxu0 %v16402_v19 }
 0x817   :  { %12670 = vmatprep.mubr.f32.mxu0 %v16405_v11  ;;  %14280 = vmatpush3.bf16.msra.mxu0 %v14277_v2  ;;  %v16489_v2 = vld [vmem:[#allocation2 + $0x120] sm:$0xff] }
 0x818   :  { %14282 = vmatprep.subr.bf16.mxu0 %v14281_v37 }
 0x81a   :  { %12671 = vmatmul.mubr.f32.gmra.mrb[38].mxu0 %v16479_v28 }
 0x81b   :  { %12673 = vmatprep.mubr.f32.mxu0 %v16409_v31  ;;  %14284 = vmatpush3.bf16.msra.mxu0 %v14281_v37  ;;  %v14297_v31 = vpack.c.bf16 %v7838_v46, %v7837_v38  ;;  %v14305_v37 = vpack.c.bf16 %v8020_v56, %v8019_v30  ;;  %v8032_v38 = vld [vmem:[#allocation12 + $0x778] sm:$0xff]  ;;  %v8216_v30 = vld [vmem:[#allocation12 + $0x7a8] sm:$0xff] }
 0x81c   :  { %14286 = vmatprep.subr.bf16.mxu0 %v14285_v51  ;;  %v8214_v46 = vld [vmem:[#allocation12 + $0x798] sm:$0xff]  ;;  %v8821_v56 = vld [vmem:[#allocation15 + $0xa0] sm:$0xff] }
 0x81e   :  { %12674 = vmatmul.mubr.f32.gmra.mrb[40].mxu0 %v16412_v22 }
 0x81f   :  { %12676 = vmatprep.mubr.f32.mxu0 %v16415_v36  ;;  %14288 = vmatpush3.bf16.msra.mxu0 %v14285_v51  ;;  %v14309_v51 = vpack.c.bf16 %v8022_v53, %v8021_v55  ;;  %v8218_v55 = vld [vmem:[#allocation12 + $0x7b8] sm:$0xff] }
 0x820   :  { %14290 = vmatprep.subr.bf16.mxu0 %v14289_v43  ;;  %v8823_v53 = vld [vmem:[#allocation15 + $0xb0] sm:$0xff] }
 0x822   :  { %12677 = vmatmul.mubr.f32.gmra.mrb[42].mxu0 %v16418_v4 }
 0x823   :  { %12679 = vmatprep.mubr.f32.mxu0 %v16421_v10  ;;  %14292 = vmatpush3.bf16.msra.mxu0 %v14289_v43  ;;  %v8025_v43 = vld [vmem:[#allocation12 + $0x740] sm:$0xff] }
 0x824   :  { %14294 = vmatprep.subr.bf16.mxu0 %v14293_v25 }
 0x826   :  { %12680 = vmatmul.mubr.f32.gmra.mrb[44].mxu0 %v16424_v15 }
 0x827   :  { %12682 = vmatprep.mubr.f32.mxu0 %v16427_v60  ;;  %14296 = vmatpush3.bf16.msra.mxu0 %v14293_v25  ;;  %v8030_v25 = vld [vmem:[#allocation12 + $0x768] sm:$0xff] }
 0x828   :  { %14298 = vmatprep.subr.bf16.mxu0 %v14297_v31 }
 0x82a   :  { %12683 = vmatmul.mubr.f32.gmra.mrb[46].mxu0 %v16489_v2 }
 0x82b   :  { %14300 = vmatpush3.bf16.msra.mxu0 %v14297_v31  ;;  %12717 = vmatprep.mubr.f32.mxu0 %v16309_v21  ;;  %v14313_v21 = vpack.c.bf16 %v8024_v26, %v8023_v34  ;;  %v8818_v31 = vld [vmem:[#allocation15 + $0x88] sm:$0xff]  ;;  %v8219_v26 = vld [vmem:[#allocation12 + $0x7c0] sm:$0xff] }
 0x82c   :  { %14302 = vmatprep.subr.bf16.mxu0 %v14301_v5 }
 0x82e   :  { %12718 = vmatmul.mubr.f32.vlgmr.msra.gmra.mrb[32].mxu0 %v16306_v54  ;;  %v14317_v54 = vpack.c.bf16 %v8026_v41, %v8025_v43  ;;  %v8220_v43 = vld [vmem:[#allocation12 + $0x7c8] sm:$0xff] }
 0x82f   :  { %12720 = vmatprep.mubr.f32.mxu0 %v16319_v6  ;;  %14304 = vmatpush3.bf16.msra.mxu0 %v14301_v5  ;;  %v8027_v6 = vld [vmem:[#allocation12 + $0x750] sm:$0xff]  ;;  %v8215_v5 = vld [vmem:[#allocation12 + $0x7a0] sm:$0xff] }
 0x830   :  { %14306 = vmatprep.subr.bf16.mxu0 %v14305_v37  ;;  %v14341_v16 = vpack.c.bf16 %v8216_v30, %v8215_v5  ;;  %v8825_v41 = vld [vmem:[#allocation15 + $0xc0] sm:$0xff]  ;;  %v8408_v30 = vld [vmem:[#allocation12 + $0x818] sm:$0xff] }
 0x831   :  { %v16527_v5 = vld [vmem:[#allocation2 + $0x122] sm:$0xff] }
 0x832   :  { %12721 = vmatmul.mubr.f32.gmra.mrb[34].mxu0 %v16315_v59  ;;  %v14321_v59 = vpack.c.bf16 %v8028_v32, %v8027_v6  ;;  %v16517_v6 = vld [vmem:[#allocation2 + $0x82] sm:$0xff]  ;;  %v14349_v32 = vpack.c.bf16 %v8220_v43, %v8219_v26 }
 0x833   :  { %12723 = vmatprep.mubr.f32.mxu0 %v16329_v7  ;;  %14308 = vmatpush3.bf16.msra.mxu0 %v14305_v37  ;;  %v8029_v7 = vld [vmem:[#allocation12 + $0x760] sm:$0xff]  ;;  %v8822_v37 = vld [vmem:[#allocation15 + $0xa8] sm:$0xff]  ;;  %v8420_v43 = vld [vmem:[#allocation12 + $0x878] sm:$0xff] }
 0x834   :  { %14310 = vmatprep.subr.bf16.mxu0 %v14309_v51  ;;  %v15118_v26 = vld [vmem:[#allocation2] sm:$0xff] }
 0x836   :  { %12724 = vmatmul.mubr.f32.gmra.mrb[36].mxu0 %v16325_v52  ;;  %v14325_v52 = vpack.c.bf16 %v8030_v25, %v8029_v7  ;;  %v8222_v25 = vld [vmem:[#allocation12 + $0x7d8] sm:$0xff] }
 0x837   :  { %12726 = vmatprep.mubr.f32.mxu0 %v16340_v23  ;;  %14312 = vmatpush3.bf16.msra.mxu0 %v14309_v51  ;;  %v8031_v23 = vld [vmem:[#allocation12 + $0x770] sm:$0xff]  ;;  %v8824_v51 = vld [vmem:[#allocation15 + $0xb8] sm:$0xff] }
 0x838   :  { %14314 = vmatprep.subr.bf16.mxu0 %v14313_v21  ;;  %v14329_v27 = vpack.c.bf16 %v8032_v38, %v8031_v23  ;;  %v8828_v23 = vld [vmem:[#allocation15 + $0xd8] sm:$0xff] }
 0x83a   :  { %12727 = vmatmul.mubr.f32.gmra.mrb[38].mxu0 %v7037_v0  ;;  %v8211_v0 = vld [vmem:[#allocation12 + $0x780] sm:$0xff] }
 0x83b   :  { %12729 = vmatprep.mubr.f32.mxu0 %v16350_v62  ;;  %14316 = vmatpush3.bf16.msra.mxu0 %v14313_v21  ;;  %v8212_v62 = vld [vmem:[#allocation12 + $0x788] sm:$0xff]  ;;  %v14441_v21 = vpack.c.bf16 %v8824_v51, %v8823_v53  ;;  %v8413_v53 = vld [vmem:[#allocation12 + $0x840] sm:$0xff] }
 0x83c   :  { %14318 = vmatprep.subr.bf16.mxu0 %v14317_v54  ;;  %v8414_v51 = vld [vmem:[#allocation12 + $0x848] sm:$0xff] }
 0x83e   :  { %12730 = vmatmul.mubr.f32.gmra.mrb[40].mxu0 %v16347_v57  ;;  %v14333_v57 = vpack.c.bf16 %v8212_v62, %v8211_v0  ;;  %v8224_v62 = vld [vmem:[#allocation12 + $0x7e8] sm:$0xff] }
 0x83f   :  { %12732 = vmatprep.mubr.f32.mxu0 %v16360_v1  ;;  %14320 = vmatpush3.bf16.msra.mxu0 %v14317_v54  ;;  %v8213_v1 = vld [vmem:[#allocation12 + $0x790] sm:$0xff] }
 0x840   :  { %14322 = vmatprep.subr.bf16.mxu0 %v14321_v59  ;;  %v8826_v54 = vld [vmem:[#allocation15 + $0xc8] sm:$0xff] }
 0x841   :  { %v14445_v7 = vpack.c.bf16 %v8826_v54, %v8825_v41  ;;  %v8599_v41 = vld [vmem:[#allocation12 + $0x880] sm:$0xff]  ;;  %v8600_v54 = vld [vmem:[#allocation12 + $0x888] sm:$0xff] }
 0x842   :  { %12733 = vmatmul.mubr.f32.gmra.mrb[42].mxu0 %v16356_v3  ;;  %v8817_v3 = vld [vmem:[#allocation15 + $0x80] sm:$0xff] }
 0x843   :  { %12735 = vmatprep.mubr.f32.mxu0 %v16370_v42  ;;  %14324 = vmatpush3.bf16.msra.mxu0 %v14321_v59  ;;  %v8819_v42 = vld [vmem:[#allocation15 + $0x90] sm:$0xff]  ;;  %v14429_v14 = vpack.c.bf16 %v8818_v31, %v8817_v3 }
 0x844   :  { %14326 = vmatprep.subr.bf16.mxu0 %v14325_v52  ;;  %v8221_v59 = vld [vmem:[#allocation12 + $0x7d0] sm:$0xff]  ;;  %v8226_v31 = vld [vmem:[#allocation12 + $0x7f8] sm:$0xff] }
 0x845   :  { %14430 = vmatprep.subr.bf16.mxu1 %v14429_v14  ;;  %v14353_v38 = vpack.c.bf16 %v8222_v25, %v8221_v59  ;;  %v8388_v59 = vld [vmem:[#allocation2 + $0x21] sm:$0xff]  ;;  %v8604_v25 = vld [vmem:[#allocation12 + $0x8a8] sm:$0xff] }
 0x846   :  { %12736 = vmatmul.mubr.f32.gmra.mrb[44].mxu0 %v16366_v61  ;;  %v14337_v61 = vpack.c.bf16 %v8214_v46, %v8213_v1  ;;  %14432 = vmatpush3.bf16.msra.mxu1 %v14429_v14  ;;  %v8830_v1 = vld [vmem:[#allocation15 + $0xe8] sm:$0xff]  ;;  %v8405_v14 = vld [vmem:[#allocation12 + $0x800] sm:$0xff] }
 0x847   :  { %12738 = vmatprep.mubr.f32.mxu0 %v16380_v18  ;;  %14328 = vmatpush3.bf16.msra.mxu0 %v14325_v52  ;;  %v14433_v18 = vpack.c.bf16 %v8820_v49, %v8819_v42  ;;  %v8827_v52 = vld [vmem:[#allocation15 + $0xd0] sm:$0xff]  ;;  %v8406_v49 = vld [vmem:[#allocation12 + $0x808] sm:$0xff] }
 0x848   :  { %14330 = vmatprep.subr.bf16.mxu0 %v14329_v27  ;;  %v14449_v0 = vpack.c.bf16 %v8828_v23, %v8827_v52  ;;  %v8390_v52 = vld [vmem:[#allocation2 + $0x41] sm:$0xff]  ;;  %v8605_v23 = vld [vmem:[#allocation12 + $0x8b0] sm:$0xff] }
 0x849   :  { %14434 = vmatprep.subr.bf16.mxu1 %v14433_v18 }
 0x84a   :  { %12739 = vmatmul.mubr.f32.gmra.mrb[46].mxu0 %v7045_v58  ;;  %v8217_v58 = vld [vmem:[#allocation12 + $0x7b0] sm:$0xff]  ;;  %14436 = vmatpush3.bf16.msra.mxu1 %v14433_v18 }
 0x84b   :  { %14332 = vmatpush3.bf16.msra.mxu0 %v14329_v27  ;;  %12773 = vmatprep.mubr.f32.mxu0 %v16430_v35  ;;  %v14437_v35 = vpack.c.bf16 %v8822_v37, %v8821_v56  ;;  %v14345_v34 = vpack.c.bf16 %v8218_v55, %v8217_v58  ;;  %v8223_v27 = vld [vmem:[#allocation12 + $0x7e0] sm:$0xff]  ;;  %v8407_v18 = vld [vmem:[#allocation12 + $0x810] sm:$0xff]  ;;  %v8412_v55 = vld [vmem:[#allocation12 + $0x838] sm:$0xff] }
 0x84c   :  { %14334 = vmatprep.subr.bf16.mxu0 %v14333_v57  ;;  %v14357_v46 = vpack.c.bf16 %v8224_v62, %v8223_v27  ;;  %v14369_v56 = vpack.c.bf16 %v8408_v30, %v8407_v18  ;;  %v8409_v37 = vld [vmem:[#allocation12 + $0x820] sm:$0xff]  ;;  %v8393_v62 = vld [vmem:[#allocation2 + $0x71] sm:$0xff] }
 0x84d   :  { %14438 = vmatprep.subr.bf16.mxu1 %v14437_v35  ;;  %v8392_v27 = vld [vmem:[#allocation2 + $0x61] sm:$0xff]  ;;  %v8612_v30 = vld [vmem:[#allocation12 + $0x8e8] sm:$0xff] }
 0x84e   :  { %12774 = vmatmul.mubr.f32.vlgmr.msra.gmra.mrb[32].mxu0 %v16433_v9  ;;  %14440 = vmatpush3.bf16.msra.mxu1 %v14437_v35  ;;  %v8411_v35 = vld [vmem:[#allocation12 + $0x830] sm:$0xff]  ;;  %v8611_v18 = vld [vmem:[#allocation12 + $0x8e0] sm:$0xff] }
 0x84f   :  { %12776 = vmatprep.mubr.f32.mxu0 %v16436_v20  ;;  %14336 = vmatpush3.bf16.msra.mxu0 %v14333_v57  ;;  %v8829_v57 = vld [vmem:[#allocation15 + $0xe0] sm:$0xff] }
 0x850   :  { %14338 = vmatprep.subr.bf16.mxu0 %v14337_v61  ;;  %14442 = vmatprep.subr.bf16.mxu1 %v14441_v21  ;;  %v14453_v3 = vpack.c.bf16 %v8830_v1, %v8829_v57  ;;  %v8607_v57 = vld [vmem:[#allocation12 + $0x8c0] sm:$0xff]  ;;  %v8608_v1 = vld [vmem:[#allocation12 + $0x8c8] sm:$0xff] }
 0x852   :  { %12777 = vmatmul.mubr.f32.gmra.mrb[34].mxu0 %v16439_v24  ;;  %14444 = vmatpush3.bf16.msra.mxu1 %v14441_v21  ;;  %v8418_v21 = vld [vmem:[#allocation12 + $0x868] sm:$0xff] }
 0x853   :  { %12779 = vmatprep.mubr.f32.mxu0 %v16442_v17  ;;  %14340 = vmatpush3.bf16.msra.mxu0 %v14337_v61  ;;  %v14365_v61 = vpack.c.bf16 %v8406_v49, %v8405_v14  ;;  %v8396_v14 = vld [vmem:[#allocation2 + $0xc1] sm:$0xff] }
 0x854   :  { %14342 = vmatprep.subr.bf16.mxu0 %v14341_v16  ;;  %14446 = vmatprep.subr.bf16.mxu1 %v14445_v7 }
 0x856   :  { %12780 = vmatmul.mubr.f32.gmra.mrb[36].mxu0 %v16445_v50  ;;  %14448 = vmatpush3.bf16.msra.mxu1 %v14445_v7  ;;  %v8603_v7 = vld [vmem:[#allocation12 + $0x8a0] sm:$0xff] }
 0x857   :  { %12782 = vmatprep.mubr.f32.mxu0 %v16448_v40  ;;  %14344 = vmatpush3.bf16.msra.mxu0 %v14341_v16  ;;  %v8410_v16 = vld [vmem:[#allocation12 + $0x828] sm:$0xff] }
 0x858   :  { %14346 = vmatprep.subr.bf16.mxu0 %v14345_v34  ;;  %14450 = vmatprep.subr.bf16.mxu1 %v14449_v0  ;;  %v14373_v58 = vpack.c.bf16 %v8410_v16, %v8409_v37  ;;  %v14421_v37 = vpack.c.bf16 %v8612_v30, %v8611_v18  ;;  %v8399_v16 = vld [vmem:[#allocation2 + $0xf1] sm:$0xff] }
 0x85a   :  { %12783 = vmatmul.mubr.f32.gmra.mrb[38].mxu0 %v16517_v6  ;;  %14452 = vmatpush3.bf16.msra.mxu1 %v14449_v0 }
 0x85b   :  { %12785 = vmatprep.mubr.f32.mxu0 %v16451_v8  ;;  %14348 = vmatpush3.bf16.msra.mxu0 %v14345_v34  ;;  %v8225_v8 = vld [vmem:[#allocation12 + $0x7f0] sm:$0xff]  ;;  %v8416_v34 = vld [vmem:[#allocation12 + $0x858] sm:$0xff] }
 0x85c   :  { %14350 = vmatprep.subr.bf16.mxu0 %v14349_v32  ;;  %v14361_v42 = vpack.c.bf16 %v8226_v31, %v8225_v8  ;;  %14454 = vmatprep.subr.bf16.mxu1 %v14453_v3  ;;  %v14413_v8 = vpack.c.bf16 %v8608_v1, %v8607_v57  ;;  %v8609_v31 = vld [vmem:[#allocation12 + $0x8d0] sm:$0xff] }
 0x85e   :  { %12786 = vmatmul.mubr.f32.gmra.mrb[40].mxu0 %v16454_v13  ;;  %14456 = vmatpush3.bf16.msra.mxu1 %v14453_v3  ;;  %v8395_v3 = vld [vmem:[#allocation2 + $0x91] sm:$0xff] }
 0x85f   :  { %12788 = vmatprep.mubr.f32.mxu0 %v16457_v39  ;;  %14352 = vmatpush3.bf16.msra.mxu0 %v14349_v32  ;;  %v8602_v32 = vld [vmem:[#allocation12 + $0x898] sm:$0xff] }
 0x860   :  { %14354 = vmatprep.subr.bf16.mxu0 %v14353_v38 }
 0x862   :  { %12789 = vmatmul.mubr.f32.gmra.mrb[42].mxu0 %v16460_v33 }
 0x863   :  { %12791 = vmatprep.mubr.f32.mxu0 %v16463_v44  ;;  %14356 = vmatpush3.bf16.msra.mxu0 %v14353_v38  ;;  %v8606_v38 = vld [vmem:[#allocation12 + $0x8b8] sm:$0xff] }
 0x864   :  { %14358 = vmatprep.subr.bf16.mxu0 %v14357_v46  ;;  %v14409_v0 = vpack.c.bf16 %v8606_v38, %v8605_v23 }
 0x866   :  { %12792 = vmatmul.mubr.f32.gmra.mrb[44].mxu0 %v16466_v47 }
 0x867   :  { %12794 = vmatprep.mubr.f32.mxu0 %v16469_v48  ;;  %14360 = vmatpush3.bf16.msra.mxu0 %v14357_v46  ;;  %v8394_v46 = vld [vmem:[#allocation2 + $0x81] sm:$0xff] }
 0x868   :  { %14362 = vmatprep.subr.bf16.mxu0 %v14361_v42 }
 0x86a   :  { %12795 = vmatmul.mubr.f32.gmra.mrb[46].mxu0 %v16527_v5 }
 0x86b   :  { %14364 = vmatpush3.bf16.msra.mxu0 %v14361_v42  ;;  %12829 = vmatprep.mubr.f32.mxu0 %v16390_v12  ;;  %v14377_v12 = vpack.c.bf16 %v8412_v55, %v8411_v35  ;;  %v8610_v42 = vld [vmem:[#allocation12 + $0x8d8] sm:$0xff] }
 0x86c   :  { %14366 = vmatprep.subr.bf16.mxu0 %v14365_v61  ;;  %v14417_v49 = vpack.c.bf16 %v8610_v42, %v8609_v31  ;;  %v8614_v35 = vld [vmem:[#allocation12 + $0x8f8] sm:$0xff] }
 0x86d   :  { %v8400_v55 = vld [vmem:[#allocation2 + $0x101] sm:$0xff] }
 0x86e   :  { %12830 = vmatmul.mubr.f32.vlgmr.msra.gmra.mrb[32].mxu0 %v16393_v45  ;;  %v14381_v45 = vpack.c.bf16 %v8414_v51, %v8413_v53  ;;  %v8401_v53 = vld [vmem:[#allocation2 + $0x111] sm:$0xff]  ;;  %v8402_v51 = vld [vmem:[#allocation2 + $0x121] sm:$0xff] }
 0x86f   :  { %12832 = vmatprep.mubr.f32.mxu0 %v16396_v29  ;;  %14368 = vmatpush3.bf16.msra.mxu0 %v14365_v61  ;;  %v8415_v29 = vld [vmem:[#allocation12 + $0x850] sm:$0xff] }
 0x870   :  { %14370 = vmatprep.subr.bf16.mxu0 %v14369_v56  ;;  %v8397_v61 = vld [vmem:[#allocation2 + $0xd1] sm:$0xff] }
 0x872   :  { %12833 = vmatmul.mubr.f32.gmra.mrb[34].mxu0 %v16399_v63  ;;  %v14385_v63 = vpack.c.bf16 %v8416_v34, %v8415_v29  ;;  %v8589_v29 = vld [vmem:[#allocation2 + $0x92] sm:$0xff] }
 0x873   :  { %12835 = vmatprep.mubr.f32.mxu0 %v16402_v19  ;;  %14372 = vmatpush3.bf16.msra.mxu0 %v14369_v56  ;;  %v8417_v19 = vld [vmem:[#allocation12 + $0x860] sm:$0xff] }
 0x874   :  { %14374 = vmatprep.subr.bf16.mxu0 %v14373_v58  ;;  %v8398_v56 = vld [vmem:[#allocation2 + $0xe1] sm:$0xff] }
 0x876   :  { %12836 = vmatmul.mubr.f32.gmra.mrb[36].mxu0 %v16405_v11  ;;  %v14389_v11 = vpack.c.bf16 %v8418_v21, %v8417_v19 }
 0x877   :  { %12838 = vmatprep.mubr.f32.mxu0 %v16479_v28  ;;  %14376 = vmatpush3.bf16.msra.mxu0 %v14373_v58  ;;  %v8419_v28 = vld [vmem:[#allocation12 + $0x870] sm:$0xff] }
 0x878   :  { %14378 = vmatprep.subr.bf16.mxu0 %v14377_v12  ;;  %v8613_v58 = vld [vmem:[#allocation12 + $0x8f0] sm:$0xff] }
 0x87a   :  { %12839 = vmatmul.mubr.f32.gmra.mrb[38].mxu0 %v15118_v26 }
 0x87b   :  { %12841 = vmatprep.mubr.f32.mxu0 %v16412_v22  ;;  %14380 = vmatpush3.bf16.msra.mxu0 %v14377_v12  ;;  %v14393_v22 = vpack.c.bf16 %v8420_v43, %v8419_v28  ;;  %v14425_v12 = vpack.c.bf16 %v8614_v35, %v8613_v58 }
 0x87c   :  { %14382 = vmatprep.subr.bf16.mxu0 %v14381_v45 }
 0x87e   :  { %12842 = vmatmul.mubr.f32.gmra.mrb[40].mxu0 %v16415_v36  ;;  %v14397_v36 = vpack.c.bf16 %v8600_v54, %v8599_v41 }
 0x87f   :  { %12844 = vmatprep.mubr.f32.mxu0 %v16418_v4  ;;  %14384 = vmatpush3.bf16.msra.mxu0 %v14381_v45  ;;  %v8601_v4 = vld [vmem:[#allocation12 + $0x890] sm:$0xff] }
 0x880   :  { %14386 = vmatprep.subr.bf16.mxu0 %v14385_v63  ;;  %v8403_v45 = vld [vmem:[#allocation2 + $0x131] sm:$0xff] }
 0x882   :  { %12845 = vmatmul.mubr.f32.gmra.mrb[42].mxu0 %v16421_v10  ;;  %v14401_v10 = vpack.c.bf16 %v8602_v32, %v8601_v4 }
 0x883   :  { %12847 = vmatprep.mubr.f32.mxu0 %v16424_v15  ;;  %14388 = vmatpush3.bf16.msra.mxu0 %v14385_v63  ;;  %v8389_v15 = vld [vmem:[#allocation2 + $0x31] sm:$0xff] }
 0x884   :  { %14390 = vmatprep.subr.bf16.mxu0 %v14389_v11 }
 0x886   :  { %12848 = vmatmul.mubr.f32.gmra.mrb[44].mxu0 %v16427_v60  ;;  %v14405_v60 = vpack.c.bf16 %v8604_v25, %v8603_v7 }
 0x887   :  { %12850 = vmatprep.mubr.f32.mxu0 %v16489_v2  ;;  %14392 = vmatpush3.bf16.msra.mxu0 %v14389_v11  ;;  %v8391_v2 = vld [vmem:[#allocation2 + $0x51] sm:$0xff] }
 0x888   :  { %14394 = vmatprep.subr.bf16.mxu0 %v14393_v22 }
 0x88a   :  { %12851 = vmatmul.mubr.f32.gmra.mrb[46].mxu0 %v15118_v26 }
 0x88b   :  { %14396 = vmatpush3.bf16.msra.mxu0 %v14393_v22  ;;  %12885 = vmatprep.mubr.f32.mxu0 %v8388_v59 }
 0x88c   :  { %14398 = vmatprep.subr.bf16.mxu0 %v14397_v36 }
 0x88e   :  { %12886 = vmatmul.mubr.f32.vlgmr.msra.gmra.mrb[32].mxu0 %v8389_v15 }
 0x88f   :  { %12888 = vmatprep.mubr.f32.mxu0 %v8390_v52  ;;  %14400 = vmatpush3.bf16.msra.mxu0 %v14397_v36 }
 0x890   :  { %14402 = vmatprep.subr.bf16.mxu0 %v14401_v10 }
 0x892   :  { %12889 = vmatmul.mubr.f32.gmra.mrb[34].mxu0 %v8391_v2 }
 0x893   :  { %12891 = vmatprep.mubr.f32.mxu0 %v8392_v27  ;;  %14404 = vmatpush3.bf16.msra.mxu0 %v14401_v10 }
 0x894   :  { %14406 = vmatprep.subr.bf16.mxu0 %v14405_v60 }
 0x896   :  { %12892 = vmatmul.mubr.f32.gmra.mrb[36].mxu0 %v8393_v62 }
 0x897   :  { %12894 = vmatprep.mubr.f32.mxu0 %v8394_v46  ;;  %14408 = vmatpush3.bf16.msra.mxu0 %v14405_v60 }
 0x898   :  { %14410 = vmatprep.subr.bf16.mxu0 %v14409_v0 }
 0x89a   :  { %12895 = vmatmul.mubr.f32.gmra.mrb[38].mxu0 %v8395_v3 }
 0x89b   :  { %12897 = vmatprep.mubr.f32.mxu0 %v8396_v14  ;;  %14412 = vmatpush3.bf16.msra.mxu0 %v14409_v0 }
 0x89c   :  { %14414 = vmatprep.subr.bf16.mxu0 %v14413_v8 }
 0x89e   :  { %12898 = vmatmul.mubr.f32.gmra.mrb[40].mxu0 %v8397_v61 }
 0x89f   :  { %12900 = vmatprep.mubr.f32.mxu0 %v8398_v56  ;;  %14416 = vmatpush3.bf16.msra.mxu0 %v14413_v8  ;;  %v16558_v56 = vld [vmem:[#allocation17 + $0x1] ss:$0 sm:$0xff] }
 0x8a0   :  { %14418 = vmatprep.subr.bf16.mxu0 %v14417_v49 }
 0x8a2   :  { %12901 = vmatmul.mubr.f32.gmra.mrb[42].mxu0 %v8399_v16 }
 0x8a3   :  { %12903 = vmatprep.mubr.f32.mxu0 %v8400_v55  ;;  %14420 = vmatpush3.bf16.msra.mxu0 %v14417_v49  ;;  %v15119_v55 = vld [vmem:[#allocation2 + $0x21] sm:$0xff] }
 0x8a4   :  { %14422 = vmatprep.subr.bf16.mxu0 %v14421_v37 }
 0x8a6   :  { %12904 = vmatmul.mubr.f32.gmra.mrb[44].mxu0 %v8401_v53  ;;  %v15120_v53 = vld [vmem:[#allocation2 + $0x11] sm:$0xff] }
 0x8a7   :  { %12906 = vmatprep.mubr.f32.mxu0 %v8402_v51  ;;  %14424 = vmatpush3.bf16.msra.mxu0 %v14421_v37 }
 0x8a8   :  { %14426 = vmatprep.subr.bf16.mxu0 %v14425_v12 }
 0x8aa   :  { %12907 = vmatmul.mubr.f32.gmra.mrb[46].mxu0 %v8403_v45 }
 0x8ab   :  { %14428 = vmatpush3.bf16.msra.mxu0 %v14425_v12  ;;  %12941 = vmatprep.mubr.f32.mxu0 %v16433_v9  ;;  %v8597_v9 = vld [vmem:[#allocation2 + $0x132] sm:$0xff] }
 0x8ae   :  { %12942 = vmatmul.mubr.f32.vlgmr.msra.gmra.mrb[32].mxu0 %v16436_v20  ;;  %v8831_v20 = vld [vmem:[#allocation15 + $0xf0] sm:$0xff] }
 0x8af   :  { %12944 = vmatprep.mubr.f32.mxu0 %v16439_v24  ;;  %v8832_v24 = vld [vmem:[#allocation15 + $0xf8] sm:$0xff] }
 0x8b2   :  { %12945 = vmatmul.mubr.f32.gmra.mrb[34].mxu0 %v16442_v17  ;;  %v14457_v17 = vpack.c.bf16 %v8832_v24, %v8831_v20 }
 0x8b3   :  { %12947 = vmatprep.mubr.f32.mxu0 %v16445_v50  ;;  %v9059_v50 = vld [vmem:[#allocation14 + $0x1] ss:$0 sm:$0xff] }
 0x8b4   :  { %14458 = vmatprep.subr.bf16.mxu1 %v14457_v17 }
 0x8b5   :  { %14460 = vmatpush3.bf16.msra.mxu1 %v14457_v17 }
 0x8b6   :  { %12948 = vmatmul.mubr.f32.gmra.mrb[36].mxu0 %v16448_v40 }
 0x8b7   :  { %12950 = vmatprep.mubr.f32.mxu0 %v16517_v6 }
 0x8ba   :  { %12951 = vmatmul.mubr.f32.gmra.mrb[38].mxu0 %v8589_v29 }
 0x8bb   :  { %12953 = vmatprep.mubr.f32.mxu0 %v16454_v13 }
 0x8be   :  { %12954 = vmatmul.mubr.f32.gmra.mrb[40].mxu0 %v16457_v39 }
 0x8bf   :  { %12956 = vmatprep.mubr.f32.mxu0 %v16460_v33 }
 0x8c2   :  { %12957 = vmatmul.mubr.f32.gmra.mrb[42].mxu0 %v16463_v44 }
 0x8c3   :  { %12959 = vmatprep.mubr.f32.mxu0 %v16466_v47 }
 0x8c6   :  { %12960 = vmatmul.mubr.f32.gmra.mrb[44].mxu0 %v16469_v48 }
 0x8c7   :  { %12962 = vmatprep.mubr.f32.mxu0 %v16527_v5 }
 0x8ca   :  { %12963 = vmatmul.mubr.f32.gmra.mrb[46].mxu0 %v8597_v9 }
 0x981   :  { %v12943_v40 = vpop.f32.mrb[32].mxu0 }
 0x982   :  { %v8785_v13 = vadd.f32 %v12943_v40, %v9059_v50  ;;  %v8681_v39 = vpop.f32.mrb[33].mxu0 }
 0x983   :  { %v8784_v33 = vadd.f32 %v9059_v50, %v8681_v39 }
 0x984   :  { %v8801_v34 = vmax.f32 %v8785_v13, 0.0  ;;  %v15122_v13 = vld [vmem:[#allocation2 + $0x31] sm:$0xff] }
 0x985   :  { %v8800_v6 = vmax.f32 %v8784_v33, 0.0  ;;  %v12946_v44 = vpop.f32.mrb[34].mxu0 }
 0x986   :  { %v8787_v47 = vadd.f32 %v12946_v44, %v9059_v50  ;;  %v8691_v26 = vpop.f32.mrb[35].mxu0 }
 0x987   :  { %v8786_v48 = vadd.f32 %v9059_v50, %v8691_v26  ;;  %12997 = vmatprep.mubr.f32.mxu1 %v8800_v6 }
 0x988   :  { %12998 = vmatmul.mubr.f32.vlgmr.msra.gmra.mrb[48].mxu1 %v8801_v34  ;;  %v8803_v19 = vmax.f32 %v8787_v47, 0.0 }
 0x989   :  { %v8802_v5 = vmax.f32 %v8786_v48, 0.0  ;;  %v12949_v63 = vpop.f32.mrb[36].mxu0  ;;  %v15123_v48 = vld [vmem:[#allocation2 + $0x61] sm:$0xff] }
 0x98a   :  { %v8789_v21 = vadd.f32 %v12949_v63, %v9059_v50  ;;  %v8701_v11 = vpop.f32.mrb[37].mxu0  ;;  %v15124_v63 = vld [vmem:[#allocation2 + $0x51] sm:$0xff] }
 0x98b   :  { %v8788_v28 = vadd.f32 %v9059_v50, %v8701_v11  ;;  %13000 = vmatprep.mubr.f32.mxu1 %v8802_v5 }
 0x98c   :  { %13001 = vmatmul.mubr.f32.gmra.mrb[50].mxu1 %v8803_v19  ;;  %v8805_v41 = vmax.f32 %v8789_v21, 0.0 }
 0x98d   :  { %v8804_v43 = vmax.f32 %v8788_v28, 0.0  ;;  %v12952_v22 = vpop.f32.mrb[38].mxu0 }
 0x98e   :  { %v8791_v54 = vadd.f32 %v12952_v22, %v9059_v50  ;;  %v8711_v36 = vpop.f32.mrb[39].mxu0 }
 0x98f   :  { %v8790_v4 = vadd.f32 %v9059_v50, %v8711_v36  ;;  %13003 = vmatprep.mubr.f32.mxu1 %v8804_v43 }
 0x990   :  { %13004 = vmatmul.mubr.f32.gmra.mrb[52].mxu1 %v8805_v41  ;;  %v8807_v10 = vmax.f32 %v8791_v54, 0.0  ;;  %v15125_v54 = vld [vmem:[#allocation2 + $0x81] sm:$0xff] }
 0x991   :  { %v8806_v32 = vmax.f32 %v8790_v4, 0.0  ;;  %v12955_v59 = vpop.f32.mrb[40].mxu0  ;;  %v15126_v4 = vld [vmem:[#allocation2 + $0x71] sm:$0xff] }
 0x992   :  { %v8793_v15 = vadd.f32 %v12955_v59, %v9059_v50  ;;  %v8721_v7 = vpop.f32.mrb[41].mxu0 }
 0x993   :  { %v8792_v25 = vadd.f32 %v9059_v50, %v8721_v7  ;;  %13006 = vmatprep.mubr.f32.mxu1 %v8806_v32 }
 0x994   :  { %13007 = vmatmul.mubr.f32.gmra.mrb[54].mxu1 %v8807_v10  ;;  %v8809_v2 = vmax.f32 %v8793_v15, 0.0 }
 0x995   :  { %v8808_v52 = vmax.f32 %v8792_v25, 0.0  ;;  %v12958_v60 = vpop.f32.mrb[42].mxu0 }
 0x996   :  { %v8795_v23 = vadd.f32 %v12958_v60, %v9059_v50  ;;  %v8731_v38 = vpop.f32.mrb[43].mxu0  ;;  %v15127_v60 = vld [vmem:[#allocation2 + $0xc1] sm:$0xff] }
 0x997   :  { %v8794_v27 = vadd.f32 %v9059_v50, %v8731_v38  ;;  %13009 = vmatprep.mubr.f32.mxu1 %v8808_v52 }
 0x998   :  { %13010 = vmatmul.mubr.f32.gmra.mrb[56].mxu1 %v8809_v2  ;;  %v8811_v57 = vmax.f32 %v8795_v23, 0.0  ;;  %v15128_v23 = vld [vmem:[#allocation2 + $0xb1] sm:$0xff] }
 0x999   :  { %v8810_v0 = vmax.f32 %v8794_v27, 0.0  ;;  %v12961_v62 = vpop.f32.mrb[44].mxu0 }
 0x99a   :  { %v8797_v1 = vadd.f32 %v12961_v62, %v9059_v50  ;;  %v8741_v46 = vpop.f32.mrb[45].mxu0 }
 0x99b   :  { %v8796_v3 = vadd.f32 %v9059_v50, %v8741_v46  ;;  %13012 = vmatprep.mubr.f32.mxu1 %v8810_v0 }
 0x99c   :  { %13013 = vmatmul.mubr.f32.gmra.mrb[58].mxu1 %v8811_v57  ;;  %v8813_v42 = vmax.f32 %v8797_v1, 0.0 }
 0x99d   :  { %v8812_v8 = vmax.f32 %v8796_v3, 0.0  ;;  %v12964_v31 = vpop.f32.mrb[46].mxu0  ;;  %v15129_v3 = vld [vmem:[#allocation2 + $0xe1] sm:$0xff] }
 0x99e   :  { %v8799_v14 = vadd.f32 %v12964_v31, %v9059_v50  ;;  %v8751_v49 = vpop.f32.mrb[47].mxu0  ;;  %v15130_v31 = vld [vmem:[#allocation2 + $0xd1] sm:$0xff] }
 0x99f   :  { %v8798_v61 = vadd.f32 %v9059_v50, %v8751_v49  ;;  %13015 = vmatprep.mubr.f32.mxu1 %v8812_v8  ;;  %v15121_v50 = vld [vmem:[#allocation2 + $0x41] sm:$0xff] }
 0x9a0   :  { %13016 = vmatmul.mubr.f32.gmra.mrb[60].mxu1 %v8813_v42  ;;  %v8815_v30 = vmax.f32 %v8799_v14, 0.0 }
 0x9a1   :  { %v8814_v18 = vmax.f32 %v8798_v61, 0.0 }
 0x9a3   :  { %13018 = vmatprep.mubr.f32.mxu1 %v8814_v18 }
 0x9a4   :  { %13019 = vmatmul.mubr.f32.gmra.mrb[62].mxu1 %v8815_v30 }
 0xa5b   :  { %v12999_v37 = vpop.f32.mrb[48].mxu1 }
 0xa5c   :  { %v8913_v16 = vadd.f32 %v12999_v37, %v16558_v56  ;;  %v8907_v58 = vpop.f32.mrb[49].mxu1 }
 0xa5d   :  { %v8908_v35 = vadd.f32 %v16558_v56, %v8907_v58 }
 0xa5e   :  { %v8987_v12 = vadd.f32 %v15119_v55, %v8913_v16  ;;  %v15131_v16 = vld [vmem:[#allocation2 + $0x101] sm:$0xff] }
 0xa5f   :  { %v8986_v51 = vadd.f32 %v15120_v53, %v8908_v35  ;;  %v13002_v45 = vpop.f32.mrb[50].mxu1  ;;  %v15132_v35 = vld [vmem:[#allocation2 + $0xf1] sm:$0xff] }
 0xa60   :  { %v9003_v29 = vmax.f32 %v8987_v12, 0.0  ;;  %v8923_v9 = vadd.f32 %v13002_v45, %v16558_v56  ;;  %v8917_v20 = vpop.f32.mrb[51].mxu1 }
 0xa61   :  { %v9002_v24 = vmax.f32 %v8986_v51, 0.0  ;;  %v8918_v17 = vadd.f32 %v16558_v56, %v8917_v20  ;;  %v15133_v20 = vld [vmem:[#allocation2 + $0x121] sm:$0xff] }
 0xa62   :  { %9019 = vst [vmem:[#allocation18 + $0x8] sm:$0xff] %v9003_v29  ;;  %v8989_v40 = vadd.f32 %v15121_v50, %v8923_v9 }
 0xa63   :  { %9018 = vst [vmem:[#allocation18] sm:$0xff] %v9002_v24  ;;  %v8988_v39 = vadd.f32 %v15122_v13, %v8918_v17  ;;  %v13005_v33 = vpop.f32.mrb[52].mxu1  ;;  %v15134_v17 = vld [vmem:[#allocation2 + $0x111] sm:$0xff] }
 0xa64   :  { %v9005_v6 = vmax.f32 %v8989_v40, 0.0  ;;  %v8933_v44 = vadd.f32 %v13005_v33, %v16558_v56  ;;  %v8927_v34 = vpop.f32.mrb[53].mxu1 }
 0xa65   :  { %v9004_v47 = vmax.f32 %v8988_v39, 0.0  ;;  %v8928_v26 = vadd.f32 %v16558_v56, %v8927_v34 }
 0xa66   :  { %9021 = vst [vmem:[#allocation18 + $0x18] sm:$0xff] %v9005_v6  ;;  %v8991_v5 = vadd.f32 %v15123_v48, %v8933_v44 }
 0xa67   :  { %9020 = vst [vmem:[#allocation18 + $0x10] sm:$0xff] %v9004_v47  ;;  %v8990_v19 = vadd.f32 %v15124_v63, %v8928_v26  ;;  %v13008_v21 = vpop.f32.mrb[54].mxu1 }
 0xa68   :  { %v9007_v11 = vmax.f32 %v8991_v5, 0.0  ;;  %v8943_v28 = vadd.f32 %v13008_v21, %v16558_v56  ;;  %v8937_v43 = vpop.f32.mrb[55].mxu1 }
 0xa69   :  { %v9006_v22 = vmax.f32 %v8990_v19, 0.0  ;;  %v8938_v41 = vadd.f32 %v16558_v56, %v8937_v43 }
 0xa6a   :  { %9023 = vst [vmem:[#allocation18 + $0x28] sm:$0xff] %v9007_v11  ;;  %v8993_v36 = vadd.f32 %v15125_v54, %v8943_v28 }
 0xa6b   :  { %9022 = vst [vmem:[#allocation18 + $0x20] sm:$0xff] %v9006_v22  ;;  %v8992_v32 = vadd.f32 %v15126_v4, %v8938_v41  ;;  %v13011_v59 = vpop.f32.mrb[56].mxu1 }
 0xa6c   :  { %v9009_v10 = vmax.f32 %v8993_v36, 0.0  ;;  %v8953_v15 = vadd.f32 %v13011_v59, %v16558_v56  ;;  %v8947_v7 = vpop.f32.mrb[57].mxu1 }
 0xa6d   :  { %v9008_v25 = vmax.f32 %v8992_v32, 0.0  ;;  %v8948_v52 = vadd.f32 %v16558_v56, %v8947_v7 }
 0xa6e   :  { %9025 = vst [vmem:[#allocation18 + $0x38] sm:$0xff] %v9009_v10  ;;  %v8995_v2 = vadd.f32 %v15127_v60, %v8953_v15 }
 0xa6f   :  { %9024 = vst [vmem:[#allocation18 + $0x30] sm:$0xff] %v9008_v25  ;;  %v8994_v38 = vadd.f32 %v15128_v23, %v8948_v52  ;;  %v13014_v27 = vpop.f32.mrb[58].mxu1 }
 0xa70   :  { %v9011_v0 = vmax.f32 %v8995_v2, 0.0  ;;  %v8963_v62 = vadd.f32 %v13014_v27, %v16558_v56  ;;  %v8957_v57 = vpop.f32.mrb[59].mxu1 }
 0xa71   :  { %v9010_v1 = vmax.f32 %v8994_v38, 0.0  ;;  %v8958_v46 = vadd.f32 %v16558_v56, %v8957_v57 }
 0xa72   :  { %9027 = vst [vmem:[#allocation18 + $0x48] sm:$0xff] %v9011_v0  ;;  %v8997_v8 = vadd.f32 %v15129_v3, %v8963_v62 }
 0xa73   :  { %9026 = vst [vmem:[#allocation18 + $0x40] sm:$0xff] %v9010_v1  ;;  %v8996_v42 = vadd.f32 %v15130_v31, %v8958_v46  ;;  %v13017_v14 = vpop.f32.mrb[60].mxu1 }
 0xa74   :  { %v9013_v49 = vmax.f32 %v8997_v8, 0.0  ;;  %v8973_v61 = vadd.f32 %v13017_v14, %v16558_v56  ;;  %v8967_v18 = vpop.f32.mrb[61].mxu1 }
 0xa75   :  { %v9012_v30 = vmax.f32 %v8996_v42, 0.0  ;;  %v8968_v37 = vadd.f32 %v16558_v56, %v8967_v18 }
 0xa76   :  { %9029 = vst [vmem:[#allocation18 + $0x58] sm:$0xff] %v9013_v49  ;;  %v8999_v58 = vadd.f32 %v15131_v16, %v8973_v61 }
 0xa77   :  { %9028 = vst [vmem:[#allocation18 + $0x50] sm:$0xff] %v9012_v30  ;;  %v8998_v55 = vadd.f32 %v15132_v35, %v8968_v37  ;;  %v13020_v12 = vpop.f32.mrb[62].mxu1 }
 0xa78   :  { %v9015_v53 = vmax.f32 %v8999_v58, 0.0  ;;  %v8983_v51 = vadd.f32 %v13020_v12, %v16558_v56  ;;  %v8977_v45 = vpop.f32.mrb[63].mxu1 }
 0xa79   :  { %v9014_v29 = vmax.f32 %v8998_v55, 0.0  ;;  %v8978_v9 = vadd.f32 %v16558_v56, %v8977_v45 }
 0xa7a   :  { %9031 = vst [vmem:[#allocation18 + $0x68] sm:$0xff] %v9015_v53  ;;  %v9001_v24 = vadd.f32 %v15133_v20, %v8983_v51 }
 0xa7b   :  { %9030 = vst [vmem:[#allocation18 + $0x60] sm:$0xff] %v9014_v29  ;;  %v9000_v50 = vadd.f32 %v15134_v17, %v8978_v9 }
 0xa7c   :  { %v9017_v40 = vmax.f32 %v9001_v24, 0.0 }
 0xa7d   :  { %v9016_v13 = vmax.f32 %v9000_v50, 0.0 }
 0xa7e   :  { %9033 = vst [vmem:[#allocation18 + $0x78] sm:$0xff] %v9017_v40 }
 0xa7f   :  { %9032 = vst [vmem:[#allocation18 + $0x70] sm:$0xff] %v9016_v13 }
 0xa80   :  { %15344 = shalt.err (!%p15341_p6)
}
 0xa81   :  { %s15345_s11 = scalar_lea.hbm %s16600_s9, 2048 }
 0xa82   :  { %p15346_p7 = scmp.ne.s32.totalorder %s16600_s9, %s15345_s11  ;;  %p15349_p8 = scmp.lt.u32.totalorder %s15345_s11, %s16600_s9 }
 0xa84   :  { %p15351_p9 = pnand %p15349_p8, %p15346_p7 }
 0xa86   :  { %15354 = shalt.err (!%p15351_p9)
}
 0xa87   :  { %9045 = dma.vmem_to_hbm [thread:$0]  %s9040_s20, 2048, %s16600_s9, [#allocation5], %s15369_s21, %s15369_s21, %s15370_s22  }
 0xa88   :  { %15365 = dma.done.wait [#allocation5], 2048  }
 0xa89   :  { %15366 = vsyncadd [#allocation5], 4294965248 }
 0xa8a   :  { %9049 = vsyncpa [#allocation4], 1 }
 0xa8b   :  { %9050 = vsyncpa [#allocation7], 1 }
 0xa8c   :  { %9051 = vsyncpa [#allocation10], 1 }
 0xa8d   :  { %9052 = vsyncpa [#allocation13], 1 }
 0xa8e   :  { %9053 = vsyncpa [#allocation16], 1 }
 0xa8f   :  { %9054 = vsyncpa [#allocation5], 1 }

</bundles_post_ra>
